<compile_context>
chip_gen: v7x
topology: tpu7x:2x2x1
jax: 0.10.0
libtpu: 0.0.40
codegen_flags: <defaults>
</compile_context>

<pallas_src>
import functools

import jax
import jax.numpy as jnp
from jax import lax
from jax.experimental import pallas as pl
from jax.experimental.pallas import tpu as pltpu


def _round_up(v, m):
    return (v + m - 1) // m * m


# ---------------------------------------------------------------------------
# Kernel
# ---------------------------------------------------------------------------
def _make_encoder_kernel(num_layers, k, hidden_pad, time_chunk, use_h0):
    L, Hp, tc = num_layers, hidden_pad, time_chunk
    n_w = 2 + 4 * (L - 1)  # layer 0: [Wh_ur, Wh_c]; l>=1: [Wx_all, b_all, Wh_ur, Wh_c]

    def kernel(*refs):
        i = 0
        px_ref = refs[i]; i += 1                    # (tc, bb, N, 3Hp) bf16 layer-0 x-proj
        if use_h0:
            h0_ref = refs[i]; i += 1                # (L, bb, N, Hp) f32
        aq_ref = refs[i]; i += 1                    # (N, N) bf16, resident
        ah_ref = refs[i]; i += 1                    # (N, N) bf16, resident
        wrefs = refs[i:i + n_w]; i += n_w           # resident packed weights
        out_ref = refs[i]; i += 1                   # (L, bb, N, Hp)
        h_scr = refs[i]                             # VMEM (L, bb, N, Hp) f32

        # Hidden-state carry lives in VMEM scratch across the *innermost*
        # time-chunk grid axis; batch blocks are outer ("parallel").  Do not
        # reorder the grid axes.
        tchunk = pl.program_id(1)

        @pl.when(tchunk == 0)
        def _init():
            if use_h0:
                h_scr[...] = h0_ref[...].astype(jnp.float32)
            else:
                h_scr[...] = jnp.zeros_like(h_scr)

        a_q = aq_ref[...]                           # bf16
        a_h = ah_ref[...]

        def cheb_cat(x):
            # x: (bb, N, C) f32.  Chebyshev diffusion terms (T0, A_q chain,
            # A_h chain) stacked along the contraction axis, returned in bf16
            # (the Theta consumer is bf16).  MXU operands are explicitly bf16
            # (pinned precision, f32 accumulation); the 2*A@t - t_prev
            # recurrence carry stays in f32.
            xb = x.astype(jnp.bfloat16)
            terms = [xb]
            for a in (a_q, a_h):
                t_prev = x
                t_cur = jnp.einsum('nm,bmc->bnc', a, xb,
                                   preferred_element_type=jnp.float32)
                t_cur_b = t_cur.astype(jnp.bfloat16)
                terms.append(t_cur_b)
                for _ in range(2, k + 1):
                    t_next = 2.0 * jnp.einsum('nm,bmc->bnc', a, t_cur_b,
                                              preferred_element_type=jnp.float32) - t_prev
                    t_next_b = t_next.astype(jnp.bfloat16)
                    terms.append(t_next_b)
                    t_prev, t_cur, t_cur_b = t_cur, t_next, t_next_b
            return jnp.concatenate(terms, axis=-1)  # (bb, N, M*C) bf16

        def theta(tcat, w_ref):
            # Stacked contraction (bb, N, M*C) @ (M*C, cols): bf16 MXU, f32 acc.
            return jnp.einsum('bnk,kh->bnh', tcat, w_ref[...],
                              preferred_element_type=jnp.float32)

        def layer_weights(l):
            if l == 0:
                return None, None, wrefs[0], wrefs[1]
            base = 2 + 4 * (l - 1)
            return wrefs[base], wrefs[base + 1], wrefs[base + 2], wrefs[base + 3]

        def cell(l, inp, h):
            # inp: l == 0 -> precomputed x projection (bb, N, 3Hp) f32 (bias folded)
            #      l >= 1 -> previous layer's new hidden (bb, N, Hp) f32
            wx_all, b_all, wh_ur, wh_c = layer_weights(l)
            if l == 0:
                pxl = inp
            else:
                pxl = theta(cheb_cat(inp), wx_all) + b_all[...]
            th = cheb_cat(h)
            # Fused update/reset gates: shared diffusion, one Theta matmul,
            # 128-lane-aligned slices.
            ur = jax.nn.sigmoid(pxl[..., :2 * Hp] + theta(th, wh_ur))
            u = ur[..., :Hp]
            r = ur[..., Hp:]
            c = jnp.tanh(pxl[..., 2 * Hp:] + theta(cheb_cat(r * h), wh_c))
            return u * h + (1.0 - u) * c            # f32 VPU math (padded cols stay 0)

        def tstep(tt, hs):
            px = px_ref[tt].astype(jnp.float32)     # (bb, N, 3Hp)
            inp = px
            new_hs = []
            for l in range(L):
                h_new = cell(l, inp, hs[l])
                new_hs.append(h_new)
                inp = h_new
            return tuple(new_hs)

        hs = lax.fori_loop(0, tc, tstep, tuple(h_scr[l] for l in range(L)))
        for l in range(L):
            h_scr[l] = hs[l]

        @pl.when(tchunk == pl.num_programs(1) - 1)
        def _finalize():
            out_ref[...] = h_scr[...].astype(out_ref.dtype)

    return kernel


# ---------------------------------------------------------------------------
# Weight packing (wrapper-side, traced once)
# ---------------------------------------------------------------------------
def _pack_params(params, input_size, hidden_size, k):
    """Split Theta into x-/h-parts, fuse [u|r|c] columns, zero-pad to 128 lanes."""
    M = 2 * k + 1
    H = hidden_size
    Hp = _round_up(H, 128)

    def x_part(w, fin, cp):
        wx = jnp.pad(w[:, :fin, :], ((0, 0), (0, cp - fin), (0, Hp - H)))
        return wx.reshape(M * cp, Hp)               # K index = m*cp + c

    def h_part(w, fin):
        wh = jnp.pad(w[:, fin:, :], ((0, 0), (0, Hp - H), (0, Hp - H)))
        return wh.reshape(M * Hp, Hp)               # K index = m*Hp + c

    def bias(b):
        return jnp.pad(jnp.reshape(b, (-1,)), (0, Hp - H))

    p0 = params[0]
    # Layer-0 x-path weight / bias, consumed wrapper-side (hoisted projection).
    wx0 = jnp.concatenate([x_part(p0['Wu'], input_size, input_size),
                           x_part(p0['Wr'], input_size, input_size),
                           x_part(p0['Wc'], input_size, input_size)],
                          axis=-1).astype(jnp.bfloat16)            # (M*Fin, 3Hp)
    b0 = jnp.concatenate([bias(p0['bu']), bias(p0['br']),
                          bias(p0['bc'])]).astype(jnp.float32)     # (3Hp,)

    kw = [
        jnp.concatenate([h_part(p0['Wu'], input_size),
                         h_part(p0['Wr'], input_size)], -1).astype(jnp.bfloat16),
        h_part(p0['Wc'], input_size).astype(jnp.bfloat16),
    ]
    for p in params[1:]:
        kw += [
            jnp.concatenate([x_part(p['Wu'], H, Hp), x_part(p['Wr'], H, Hp),
                             x_part(p['Wc'], H, Hp)], -1).astype(jnp.bfloat16),
            jnp.concatenate([bias(p['bu']), bias(p['br']), bias(p['bc'])]
                            ).reshape(1, 3 * Hp).astype(jnp.float32),
            jnp.concatenate([h_part(p['Wu'], H), h_part(p['Wr'], H)],
                            -1).astype(jnp.bfloat16),
            h_part(p['Wc'], H).astype(jnp.bfloat16),
        ]
    return wx0, b0, kw, Hp


# ---------------------------------------------------------------------------
# Forward wrapper (mirrors Encoder.forward)
# ---------------------------------------------------------------------------
def encoder_forward(x, a_q, a_h, params, hidden_size, num_layers, k,
                    h0=None, batch_block=None, time_chunk=None):
    B, T, N, Fin = x.shape
    H, L, M = hidden_size, num_layers, 2 * k + 1

    # Batch block: default = whole batch (one big MXU block, nb = 1).
    # On v7x choose batch_block = B // 2 so nb = 2 matches the two TensorCores.
    bb = B if batch_block is None else batch_block
    assert B % bb == 0
    nb = B // bb

    wx0, b0, kw, Hp = _pack_params(params, Fin, H, k)

    # --- Layer-0 x projection hoisted out of the serial recurrence ----------
    # It has no dependence on the hidden state, so compute it for all (B, T)
    # at once (full-MXU XLA matmul, biases folded) and stream the bf16 result.
    def cheb_cat_x(xx):
        terms = [xx.astype(jnp.bfloat16)]
        for a in (a_q, a_h):
            t_prev = xx
            t_cur = jnp.einsum('nm,btmc->btnc', a, xx)
            terms.append(t_cur.astype(jnp.bfloat16))
            for _ in range(2, k + 1):
                t_next = 2.0 * jnp.einsum('nm,btmc->btnc', a, t_cur) - t_prev
                terms.append(t_next.astype(jnp.bfloat16))
                t_prev, t_cur = t_cur, t_next
        return jnp.concatenate(terms, axis=-1)       # (B, T, N, M*Fin) bf16

    px0 = jnp.einsum('btnk,kh->btnh', cheb_cat_x(x.astype(jnp.float32)), wx0,
                     preferred_element_type=jnp.float32) + b0
    px0 = jnp.transpose(px0, (1, 0, 2, 3)).astype(jnp.bfloat16)  # (T, B, N, 3Hp)

    # --- time chunking: amortize per-grid-step overhead with bounded VMEM ---
    step_bytes = bb * N * 3 * Hp * 2                 # one timestep of px0 (bf16)
    if time_chunk is None:
        tc = 1
        for c in range(1, T + 1):
            if T % c == 0 and 2 * c * step_bytes <= (4 << 20):
                tc = c
    else:
        tc = time_chunk
    assert T % tc == 0
    nt = T // tc

    a_q_b = a_q.astype(jnp.bfloat16)                 # bf16 residents (half VMEM)
    a_h_b = a_h.astype(jnp.bfloat16)

    use_h0 = h0 is not None
    inputs = [px0]
    in_specs = [pl.BlockSpec((tc, bb, N, 3 * Hp), lambda b, t: (t, b, 0, 0))]
    if use_h0:
        h0p = jnp.pad(h0.astype(jnp.float32), ((0, 0),) * 3 + ((0, Hp - H),))
        inputs.append(h0p)
        in_specs.append(pl.BlockSpec((L, bb, N, Hp), lambda b, t: (0, b, 0, 0)))
    inputs += [a_q_b, a_h_b] + kw

    def _const(nd):
        zeros = (0,) * nd
        return lambda b, t: zeros

    in_specs += [pl.BlockSpec((N, N), _const(2)), pl.BlockSpec((N, N), _const(2))]
    in_specs += [pl.BlockSpec(w.shape, _const(w.ndim)) for w in kw]
    # TODO(synk): on v7x (64 MiB VMEM) add pipeline_mode=pl.Buffered(1) to the
    # constant-index resident specs above to drop their second buffer at large N.

    out_spec = pl.BlockSpec((L, bb, N, Hp), lambda b, t: (0, b, 0, 0))

    kernel = _make_encoder_kernel(L, k, Hp, tc, use_h0)

    grid_spec = pltpu.PrefetchScalarGridSpec(
        num_scalar_prefetch=0,
        grid=(nb, nt),                               # time chunk MUST stay innermost
        in_specs=in_specs,
        out_specs=out_spec,
        scratch_shapes=[pltpu.VMEM((L, bb, N, Hp), jnp.float32)])

    # Explicit VMEM limit sized from the actual footprint (double-buffered
    # streams + residents + scratch), important on v7x / v5e defaults.
    def nbytes(a):
        return int(a.size) * a.dtype.itemsize

    footprint = (2 * tc * step_bytes
                 + 2 * sum(nbytes(w) for w in kw)
                 + 2 * (nbytes(a_q_b) + nbytes(a_h_b))
                 + 2 * L * bb * N * Hp * x.dtype.itemsize
                 + L * bb * N * Hp * 4)
    if use_h0:
        footprint += 2 * L * bb * N * Hp * 4
    vmem_limit = int(min(100 << 20, max(32 << 20, 2 * footprint)))

    # Advisory cost estimate for the whole fused call.
    flops = 0
    for l in range(L):
        n_cheb = 2 if l == 0 else 3
        flops += n_cheb * (2 * k) * (2 * N * N * Hp)          # Chebyshev A-matmuls
        flops += 2 * N * (M * Hp) * ((3 * Hp) if l == 0 else (6 * Hp))  # Theta
        flops += 12 * N * Hp                                   # gate elementwise
    cost = pl.CostEstimate(
        flops=int(flops) * B * T,
        transcendentals=int(T * L * B * N * 3 * Hp),
        bytes_accessed=int(nbytes(px0) + L * B * N * Hp * x.dtype.itemsize
                           + nb * (sum(nbytes(w) for w in kw)
                                   + nbytes(a_q_b) + nbytes(a_h_b))))

    out_padded = pl.pallas_call(
        kernel,
        out_shape=jax.ShapeDtypeStruct((L, B, N, Hp), x.dtype),
        grid_spec=grid_spec,
        compiler_params=pltpu.CompilerParams(
            dimension_semantics=("parallel", "arbitrary"),
            vmem_limit_bytes=vmem_limit),
        cost_estimate=cost,
    )(*inputs)
    return out_padded[..., :H]


# ---------------------------------------------------------------------------
# Parameter init (shapes match the module: Theta (M, C_in, H), bias (1,1,H))
# ---------------------------------------------------------------------------
def init_encoder_params(key, input_size, hidden_size, num_layers, k):
    M = 2 * k + 1
    params = []
    for layer in range(num_layers):
        c_in = (input_size if layer == 0 else hidden_size) + hidden_size
        layer_p = {}
        for gate in ('u', 'r', 'c'):
            key, kw_, kb = jax.random.split(key, 3)
            scale = 1.0 / jnp.sqrt(jnp.float32(c_in * M))
            layer_p['W' + gate] = (
                jax.random.normal(kw_, (M, c_in, hidden_size), jnp.float32) * scale)
            layer_p['b' + gate] = (
                jax.random.normal(kb, (1, 1, hidden_size), jnp.float32) * 0.01)
        params.append(layer_p)
    return params


# ---------------------------------------------------------------------------
# Pure-JAX reference (mirrors the PyTorch Encoder + DCRNN diffusion-GRU cell)
# ---------------------------------------------------------------------------
def _reference_encoder(x, a_q, a_h, params, hidden_size, num_layers, k):
    B, T, N, _ = x.shape
    H = hidden_size

    def cheb_terms(X):
        terms = [X]
        for A in (a_q, a_h):
            t0, t1 = X, jnp.einsum('nm,bmc->bnc', A, X)
            terms.append(t1)
            for _ in range(2, k + 1):
                t2 = 2.0 * jnp.einsum('nm,bmc->bnc', A, t1) - t0
                terms.append(t2)
                t0, t1 = t1, t2
        return terms

    def dconv(X, W, b):
        out = sum(jnp.einsum('bnc,ch->bnh', tm, W[m])
                  for m, tm in enumerate(cheb_terms(X)))
        return out + b

    hidden = [jnp.zeros((B, N, H), jnp.float32) for _ in range(num_layers)]
    for t in range(T):
        inp = x[:, t]
        for l in range(num_layers):
            p, h = params[l], hidden[l]
            comb = jnp.concatenate([inp, h], axis=-1)
            u = jax.nn.sigmoid(dconv(comb, p['Wu'], p['bu']))
            r = jax.nn.sigmoid(dconv(comb, p['Wr'], p['br']))
            c = jnp.tanh(dconv(jnp.concatenate([inp, r * h], -1), p['Wc'], p['bc']))
            hn = u * h + (1.0 - u) * c
            hidden[l] = hn
            inp = hn
    return jnp.stack(hidden, axis=0)


if __name__ == "__main__":
    # Small deterministic example shapes.
    B, T, N = 2, 8, 16                 # batch, seq_len, num_nodes
    input_size, hidden_size = 4, 32
    num_layers, k = 2, 2

    key = jax.random.PRNGKey(0)
    kx, kaq, kah, kp = jax.random.split(key, 4)

    x = jax.random.normal(kx, (B, T, N, input_size), jnp.float32)

    # Random row-normalized transition matrices (forward / backward diffusion).
    a_q = jax.random.uniform(kaq, (N, N), jnp.float32)
    a_q = a_q / jnp.sum(a_q, axis=1, keepdims=True)
    a_h = jax.random.uniform(kah, (N, N), jnp.float32)
    a_h = a_h / jnp.sum(a_h, axis=1, keepdims=True)

    params = init_encoder_params(kp, input_size, hidden_size, num_layers, k)

    # batch_block default = B (one big block, nb = 1); on v7x pass B // 2.
    fwd = jax.jit(functools.partial(
        encoder_forward, hidden_size=hidden_size, num_layers=num_layers, k=k))
    out = jax.block_until_ready(fwd(x, a_q, a_h, params))

    assert out.shape == (num_layers, B, N, hidden_size)
    assert bool(jnp.all(jnp.isfinite(out)))

    # Correctness vs. pure-JAX reference (loose tol: bf16 MXU operands for
    # both the Chebyshev diffusion and the Theta contractions, bf16 stream).
    ref = _reference_encoder(x, a_q, a_h, params, hidden_size, num_layers, k)
    err = float(jnp.max(jnp.abs(out - ref)))
    assert err < 1e-1, f"max abs error {err}"

    print("KERNEL_OK")
</pallas_src>

<mosaic_0001>
module attributes {stable_mosaic.version = 11 : i64} {
  func.func @kernel(%arg0: i32, %arg1: i32, %arg2: memref<8x2x16x384xbf16, #tpu.memory_space<vmem>>, %arg3: memref<16x16xbf16, #tpu.memory_space<vmem>>, %arg4: memref<16x16xbf16, #tpu.memory_space<vmem>>, %arg5: memref<640x256xbf16, #tpu.memory_space<vmem>>, %arg6: memref<640x128xbf16, #tpu.memory_space<vmem>>, %arg7: memref<640x384xbf16, #tpu.memory_space<vmem>>, %arg8: memref<1x384xf32, #tpu.memory_space<vmem>>, %arg9: memref<640x256xbf16, #tpu.memory_space<vmem>>, %arg10: memref<640x128xbf16, #tpu.memory_space<vmem>>, %arg11: memref<2x2x16x128xf32, #tpu.memory_space<vmem>>, %arg12: memref<2x2x16x128xf32, #tpu.memory_space<vmem>>) attributes {dimension_semantics = [#tpu.dimension_semantics<parallel>, #tpu.dimension_semantics<arbitrary>], iteration_bounds = array<i64: 1, 1>, scalar_prefetch = 0 : i64, scratch_operands = 1 : i64, tpu.core_type = #tpu.core_type<tc>, window_params = [{transform_indices = @transform_0, window_bounds = array<i64: 8, 2, 16, 384>}, {pipeline_mode = #tpu.pipeline_mode<synchronous>, transform_indices = @transform_1, window_bounds = array<i64: 16, 16>}, {pipeline_mode = #tpu.pipeline_mode<synchronous>, transform_indices = @transform_2, window_bounds = array<i64: 16, 16>}, {pipeline_mode = #tpu.pipeline_mode<synchronous>, transform_indices = @transform_3, window_bounds = array<i64: 640, 256>}, {pipeline_mode = #tpu.pipeline_mode<synchronous>, transform_indices = @transform_4, window_bounds = array<i64: 640, 128>}, {pipeline_mode = #tpu.pipeline_mode<synchronous>, transform_indices = @transform_5, window_bounds = array<i64: 640, 384>}, {pipeline_mode = #tpu.pipeline_mode<synchronous>, transform_indices = @transform_6, window_bounds = array<i64: 1, 384>}, {pipeline_mode = #tpu.pipeline_mode<synchronous>, transform_indices = @transform_7, window_bounds = array<i64: 640, 256>}, {pipeline_mode = #tpu.pipeline_mode<synchronous>, transform_indices = @transform_8, window_bounds = array<i64: 640, 128>}, {transform_indices = @transform_9, window_bounds = array<i64: 2, 2, 16, 128>}]} {
    %c0_i32 = arith.constant 0 : i32
    %0 = arith.cmpi eq, %arg1, %c0_i32 : i32
    %1 = arith.extui %0 : i1 to i32
    %c0_i32_0 = arith.constant 0 : i32
    %2 = arith.cmpi ne, %1, %c0_i32_0 : i32
    scf.if %2 {
      %cst = arith.constant 0.000000e+00 : f32
      %20 = vector.broadcast %cst : f32 to vector<2x2x16x128xf32>
      %c0_23 = arith.constant 0 : index
      %c0_24 = arith.constant 0 : index
      %c0_25 = arith.constant 0 : index
      %c0_26 = arith.constant 0 : index
      %21 = vector.load %arg12[%c0_23, %c0_24, %c0_25, %c0_26] : memref<2x2x16x128xf32, #tpu.memory_space<vmem>>, vector<2x2x16x128xf32>
      tpu.vector_store %arg12[%c0_23, %c0_24, %c0_25, %c0_26], %20 {strides = array<i32>} : memref<2x2x16x128xf32, #tpu.memory_space<vmem>>, vector<2x2x16x128xf32>,
    } else {
    }
    %c0 = arith.constant 0 : index
    %c0_1 = arith.constant 0 : index
    %3 = vector.load %arg3[%c0, %c0_1] : memref<16x16xbf16, #tpu.memory_space<vmem>>, vector<16x16xbf16>
    %c0_2 = arith.constant 0 : index
    %c0_3 = arith.constant 0 : index
    %4 = vector.load %arg4[%c0_2, %c0_3] : memref<16x16xbf16, #tpu.memory_space<vmem>>, vector<16x16xbf16>
    %c0_4 = arith.constant 0 : index
    %c0_5 = arith.constant 0 : index
    %c0_6 = arith.constant 0 : index
    %c0_7 = arith.constant 0 : index
    %5 = vector.load %arg12[%c0_4, %c0_5, %c0_6, %c0_7] : memref<2x2x16x128xf32, #tpu.memory_space<vmem>>, vector<1x2x16x128xf32>
    %6 = vector.shape_cast %5 : vector<1x2x16x128xf32> to vector<2x16x128xf32>
    %c1 = arith.constant 1 : index
    %c0_8 = arith.constant 0 : index
    %c0_9 = arith.constant 0 : index
    %c0_10 = arith.constant 0 : index
    %7 = vector.load %arg12[%c1, %c0_8, %c0_9, %c0_10] : memref<2x2x16x128xf32, #tpu.memory_space<vmem>>, vector<1x2x16x128xf32>
    %8 = vector.shape_cast %7 : vector<1x2x16x128xf32> to vector<2x16x128xf32>
    %c0_i32_11 = arith.constant 0 : i32
    %c8_i32 = arith.constant 8 : i32
    %9 = arith.addi %c0_i32_11, %c8_i32 : i32
    %c1_i32 = arith.constant 1 : i32
    %10:2 = scf.for %arg13 = %c0_i32_11 to %9 step %c1_i32 iter_args(%arg14 = %6, %arg15 = %8) -> (vector<2x16x128xf32>, vector<2x16x128xf32>)  : i32 {
      %20 = arith.index_cast %arg13 : i32 to index
      %c0_23 = arith.constant 0 : index
      %c0_24 = arith.constant 0 : index
      %c0_25 = arith.constant 0 : index
      %21 = vector.load %arg2[%20, %c0_23, %c0_24, %c0_25] : memref<8x2x16x384xbf16, #tpu.memory_space<vmem>>, vector<1x2x16x384xbf16>
      %22 = vector.shape_cast %21 : vector<1x2x16x384xbf16> to vector<2x16x384xbf16>
      %23 = arith.extf %22 : vector<2x16x384xbf16> to vector<2x16x384xf32>
      %24 = arith.truncf %arg14 : vector<2x16x128xf32> to vector<2x16x128xbf16>
      "tpu.trace_start"() <{level = 10 : i32, message = "nm,bmc->bnc"}> : () -> ()
      %cst = arith.constant dense<0.000000e+00> : vector<2x128x16xf32>
      %25 = tpu.matmul %24, %3, %cst {dimension_numbers = #tpu.dot_dimension_numbers<[1], [1], [0, 2], [0], [0, 0, 0, 2, 1, 0], [], []>} : vector<2x16x128xbf16>, vector<16x16xbf16>, vector<2x128x16xf32> -> vector<2x128x16xf32>
      %26 = tpu.transpose %25, [0, 2, 1] : vector<2x128x16xf32> -> vector<2x16x128xf32>
      "tpu.trace_stop"() : () -> ()
      %27 = arith.truncf %26 : vector<2x16x128xf32> to vector<2x16x128xbf16>
      "tpu.trace_start"() <{level = 10 : i32, message = "nm,bmc->bnc"}> : () -> ()
      %cst_26 = arith.constant dense<0.000000e+00> : vector<2x128x16xf32>
      %28 = tpu.matmul %27, %3, %cst_26 {dimension_numbers = #tpu.dot_dimension_numbers<[1], [1], [0, 2], [0], [0, 0, 0, 2, 1, 0], [], []>} : vector<2x16x128xbf16>, vector<16x16xbf16>, vector<2x128x16xf32> -> vector<2x128x16xf32>
      %29 = tpu.transpose %28, [0, 2, 1] : vector<2x128x16xf32> -> vector<2x16x128xf32>
      "tpu.trace_stop"() : () -> ()
      %cst_27 = arith.constant 2.000000e+00 : f32
      %30 = vector.broadcast %cst_27 : f32 to vector<2x16x128xf32>
      %31 = arith.mulf %30, %29 : vector<2x16x128xf32>
      %32 = arith.subf %31, %arg14 : vector<2x16x128xf32>
      %33 = arith.truncf %32 : vector<2x16x128xf32> to vector<2x16x128xbf16>
      "tpu.trace_start"() <{level = 10 : i32, message = "nm,bmc->bnc"}> : () -> ()
      %cst_28 = arith.constant dense<0.000000e+00> : vector<2x128x16xf32>
      %34 = tpu.matmul %24, %4, %cst_28 {dimension_numbers = #tpu.dot_dimension_numbers<[1], [1], [0, 2], [0], [0, 0, 0, 2, 1, 0], [], []>} : vector<2x16x128xbf16>, vector<16x16xbf16>, vector<2x128x16xf32> -> vector<2x128x16xf32>
      %35 = tpu.transpose %34, [0, 2, 1] : vector<2x128x16xf32> -> vector<2x16x128xf32>
      "tpu.trace_stop"() : () -> ()
      %36 = arith.truncf %35 : vector<2x16x128xf32> to vector<2x16x128xbf16>
      "tpu.trace_start"() <{level = 10 : i32, message = "nm,bmc->bnc"}> : () -> ()
      %cst_29 = arith.constant dense<0.000000e+00> : vector<2x128x16xf32>
      %37 = tpu.matmul %36, %4, %cst_29 {dimension_numbers = #tpu.dot_dimension_numbers<[1], [1], [0, 2], [0], [0, 0, 0, 2, 1, 0], [], []>} : vector<2x16x128xbf16>, vector<16x16xbf16>, vector<2x128x16xf32> -> vector<2x128x16xf32>
      %38 = tpu.transpose %37, [0, 2, 1] : vector<2x128x16xf32> -> vector<2x16x128xf32>
      "tpu.trace_stop"() : () -> ()
      %cst_30 = arith.constant 2.000000e+00 : f32
      %39 = vector.broadcast %cst_30 : f32 to vector<2x16x128xf32>
      %40 = arith.mulf %39, %38 : vector<2x16x128xf32>
      %41 = arith.subf %40, %arg14 : vector<2x16x128xf32>
      %42 = arith.truncf %41 : vector<2x16x128xf32> to vector<2x16x128xbf16>
      %43 = tpu.concatenate %24, %27, %33, %36, %42 in 2 : vector<2x16x128xbf16>, vector<2x16x128xbf16>, vector<2x16x128xbf16>, vector<2x16x128xbf16>, vector<2x16x128xbf16> -> vector<2x16x640xbf16>
      %44 = vector.extract_strided_slice %23 {offsets = [0, 0, 0], sizes = [2, 16, 256], strides = [1, 1, 1]} : vector<2x16x384xf32> to vector<2x16x256xf32>
      %c0_31 = arith.constant 0 : index
      %c0_32 = arith.constant 0 : index
      %45 = vector.load %arg5[%c0_31, %c0_32] : memref<640x256xbf16, #tpu.memory_space<vmem>>, vector<640x256xbf16>
      "tpu.trace_start"() <{level = 10 : i32, message = "bnk,kh->bnh"}> : () -> ()
      %cst_33 = arith.constant dense<0.000000e+00> : vector<2x16x256xf32>
      %46 = tpu.matmul %43, %45, %cst_33 {dimension_numbers = #tpu.dot_dimension_numbers<[2], [0], [0, 1], [1], [0, 0, 0, 1, 1, 1], [], []>} : vector<2x16x640xbf16>, vector<640x256xbf16>, vector<2x16x256xf32> -> vector<2x16x256xf32>
      "tpu.trace_stop"() : () -> ()
      %47 = arith.addf %44, %46 : vector<2x16x256xf32>
      %48 = arith.negf %47 : vector<2x16x256xf32>
      %49 = math.exp %48 : vector<2x16x256xf32>
      %cst_34 = arith.constant 1.000000e+00 : f32
      %50 = vector.broadcast %cst_34 : f32 to vector<2x16x256xf32>
      %51 = arith.addf %50, %49 : vector<2x16x256xf32>
      %52 = arith.divf %50, %51 : vector<2x16x256xf32>
      %53 = vector.extract_strided_slice %52 {offsets = [0, 0, 0], sizes = [2, 16, 128], strides = [1, 1, 1]} : vector<2x16x256xf32> to vector<2x16x128xf32>
      %54 = vector.extract_strided_slice %52 {offsets = [0, 0, 128], sizes = [2, 16, 128], strides = [1, 1, 1]} : vector<2x16x256xf32> to vector<2x16x128xf32>
      %55 = vector.extract_strided_slice %23 {offsets = [0, 0, 256], sizes = [2, 16, 128], strides = [1, 1, 1]} : vector<2x16x384xf32> to vector<2x16x128xf32>
      %56 = arith.mulf %54, %arg14 : vector<2x16x128xf32>
      %57 = arith.truncf %56 : vector<2x16x128xf32> to vector<2x16x128xbf16>
      "tpu.trace_start"() <{level = 10 : i32, message = "nm,bmc->bnc"}> : () -> ()
      %cst_35 = arith.constant dense<0.000000e+00> : vector<2x128x16xf32>
      %58 = tpu.matmul %57, %3, %cst_35 {dimension_numbers = #tpu.dot_dimension_numbers<[1], [1], [0, 2], [0], [0, 0, 0, 2, 1, 0], [], []>} : vector<2x16x128xbf16>, vector<16x16xbf16>, vector<2x128x16xf32> -> vector<2x128x16xf32>
      %59 = tpu.transpose %58, [0, 2, 1] : vector<2x128x16xf32> -> vector<2x16x128xf32>
      "tpu.trace_stop"() : () -> ()
      %60 = arith.truncf %59 : vector<2x16x128xf32> to vector<2x16x128xbf16>
      "tpu.trace_start"() <{level = 10 : i32, message = "nm,bmc->bnc"}> : () -> ()
      %cst_36 = arith.constant dense<0.000000e+00> : vector<2x128x16xf32>
      %61 = tpu.matmul %60, %3, %cst_36 {dimension_numbers = #tpu.dot_dimension_numbers<[1], [1], [0, 2], [0], [0, 0, 0, 2, 1, 0], [], []>} : vector<2x16x128xbf16>, vector<16x16xbf16>, vector<2x128x16xf32> -> vector<2x128x16xf32>
      %62 = tpu.transpose %61, [0, 2, 1] : vector<2x128x16xf32> -> vector<2x16x128xf32>
      "tpu.trace_stop"() : () -> ()
      %cst_37 = arith.constant 2.000000e+00 : f32
      %63 = vector.broadcast %cst_37 : f32 to vector<2x16x128xf32>
      %64 = arith.mulf %63, %62 : vector<2x16x128xf32>
      %65 = arith.subf %64, %56 : vector<2x16x128xf32>
      %66 = arith.truncf %65 : vector<2x16x128xf32> to vector<2x16x128xbf16>
      "tpu.trace_start"() <{level = 10 : i32, message = "nm,bmc->bnc"}> : () -> ()
      %cst_38 = arith.constant dense<0.000000e+00> : vector<2x128x16xf32>
      %67 = tpu.matmul %57, %4, %cst_38 {dimension_numbers = #tpu.dot_dimension_numbers<[1], [1], [0, 2], [0], [0, 0, 0, 2, 1, 0], [], []>} : vector<2x16x128xbf16>, vector<16x16xbf16>, vector<2x128x16xf32> -> vector<2x128x16xf32>
      %68 = tpu.transpose %67, [0, 2, 1] : vector<2x128x16xf32> -> vector<2x16x128xf32>
      "tpu.trace_stop"() : () -> ()
      %69 = arith.truncf %68 : vector<2x16x128xf32> to vector<2x16x128xbf16>
      "tpu.trace_start"() <{level = 10 : i32, message = "nm,bmc->bnc"}> : () -> ()
      %cst_39 = arith.constant dense<0.000000e+00> : vector<2x128x16xf32>
      %70 = tpu.matmul %69, %4, %cst_39 {dimension_numbers = #tpu.dot_dimension_numbers<[1], [1], [0, 2], [0], [0, 0, 0, 2, 1, 0], [], []>} : vector<2x16x128xbf16>, vector<16x16xbf16>, vector<2x128x16xf32> -> vector<2x128x16xf32>
      %71 = tpu.transpose %70, [0, 2, 1] : vector<2x128x16xf32> -> vector<2x16x128xf32>
      "tpu.trace_stop"() : () -> ()
      %cst_40 = arith.constant 2.000000e+00 : f32
      %72 = vector.broadcast %cst_40 : f32 to vector<2x16x128xf32>
      %73 = arith.mulf %72, %71 : vector<2x16x128xf32>
      %74 = arith.subf %73, %56 : vector<2x16x128xf32>
      %75 = arith.truncf %74 : vector<2x16x128xf32> to vector<2x16x128xbf16>
      %76 = tpu.concatenate %57, %60, %66, %69, %75 in 2 : vector<2x16x128xbf16>, vector<2x16x128xbf16>, vector<2x16x128xbf16>, vector<2x16x128xbf16>, vector<2x16x128xbf16> -> vector<2x16x640xbf16>
      %c0_41 = arith.constant 0 : index
      %c0_42 = arith.constant 0 : index
      %77 = vector.load %arg6[%c0_41, %c0_42] : memref<640x128xbf16, #tpu.memory_space<vmem>>, vector<640x128xbf16>
      "tpu.trace_start"() <{level = 10 : i32, message = "bnk,kh->bnh"}> : () -> ()
      %cst_43 = arith.constant dense<0.000000e+00> : vector<2x16x128xf32>
      %78 = tpu.matmul %76, %77, %cst_43 {dimension_numbers = #tpu.dot_dimension_numbers<[2], [0], [0, 1], [1], [0, 0, 0, 1, 1, 1], [], []>} : vector<2x16x640xbf16>, vector<640x128xbf16>, vector<2x16x128xf32> -> vector<2x16x128xf32>
      "tpu.trace_stop"() : () -> ()
      %79 = arith.addf %55, %78 : vector<2x16x128xf32>
      %80 = math.tanh %79 : vector<2x16x128xf32>
      %81 = arith.mulf %53, %arg14 : vector<2x16x128xf32>
      %cst_44 = arith.constant 1.000000e+00 : f32
      %82 = vector.broadcast %cst_44 : f32 to vector<2x16x128xf32>
      %83 = arith.subf %82, %53 : vector<2x16x128xf32>
      %84 = arith.mulf %83, %80 : vector<2x16x128xf32>
      %85 = arith.addf %81, %84 : vector<2x16x128xf32>
      %86 = arith.truncf %85 : vector<2x16x128xf32> to vector<2x16x128xbf16>
      "tpu.trace_start"() <{level = 10 : i32, message = "nm,bmc->bnc"}> : () -> ()
      %cst_45 = arith.constant dense<0.000000e+00> : vector<2x128x16xf32>
      %87 = tpu.matmul %86, %3, %cst_45 {dimension_numbers = #tpu.dot_dimension_numbers<[1], [1], [0, 2], [0], [0, 0, 0, 2, 1, 0], [], []>} : vector<2x16x128xbf16>, vector<16x16xbf16>, vector<2x128x16xf32> -> vector<2x128x16xf32>
      %88 = tpu.transpose %87, [0, 2, 1] : vector<2x128x16xf32> -> vector<2x16x128xf32>
      "tpu.trace_stop"() : () -> ()
      %89 = arith.truncf %88 : vector<2x16x128xf32> to vector<2x16x128xbf16>
      "tpu.trace_start"() <{level = 10 : i32, message = "nm,bmc->bnc"}> : () -> ()
      %cst_46 = arith.constant dense<0.000000e+00> : vector<2x128x16xf32>
      %90 = tpu.matmul %89, %3, %cst_46 {dimension_numbers = #tpu.dot_dimension_numbers<[1], [1], [0, 2], [0], [0, 0, 0, 2, 1, 0], [], []>} : vector<2x16x128xbf16>, vector<16x16xbf16>, vector<2x128x16xf32> -> vector<2x128x16xf32>
      %91 = tpu.transpose %90, [0, 2, 1] : vector<2x128x16xf32> -> vector<2x16x128xf32>
      "tpu.trace_stop"() : () -> ()
      %cst_47 = arith.constant 2.000000e+00 : f32
      %92 = vector.broadcast %cst_47 : f32 to vector<2x16x128xf32>
      %93 = arith.mulf %92, %91 : vector<2x16x128xf32>
      %94 = arith.subf %93, %85 : vector<2x16x128xf32>
      %95 = arith.truncf %94 : vector<2x16x128xf32> to vector<2x16x128xbf16>
      "tpu.trace_start"() <{level = 10 : i32, message = "nm,bmc->bnc"}> : () -> ()
      %cst_48 = arith.constant dense<0.000000e+00> : vector<2x128x16xf32>
      %96 = tpu.matmul %86, %4, %cst_48 {dimension_numbers = #tpu.dot_dimension_numbers<[1], [1], [0, 2], [0], [0, 0, 0, 2, 1, 0], [], []>} : vector<2x16x128xbf16>, vector<16x16xbf16>, vector<2x128x16xf32> -> vector<2x128x16xf32>
      %97 = tpu.transpose %96, [0, 2, 1] : vector<2x128x16xf32> -> vector<2x16x128xf32>
      "tpu.trace_stop"() : () -> ()
      %98 = arith.truncf %97 : vector<2x16x128xf32> to vector<2x16x128xbf16>
      "tpu.trace_start"() <{level = 10 : i32, message = "nm,bmc->bnc"}> : () -> ()
      %cst_49 = arith.constant dense<0.000000e+00> : vector<2x128x16xf32>
      %99 = tpu.matmul %98, %4, %cst_49 {dimension_numbers = #tpu.dot_dimension_numbers<[1], [1], [0, 2], [0], [0, 0, 0, 2, 1, 0], [], []>} : vector<2x16x128xbf16>, vector<16x16xbf16>, vector<2x128x16xf32> -> vector<2x128x16xf32>
      %100 = tpu.transpose %99, [0, 2, 1] : vector<2x128x16xf32> -> vector<2x16x128xf32>
      "tpu.trace_stop"() : () -> ()
      %cst_50 = arith.constant 2.000000e+00 : f32
      %101 = vector.broadcast %cst_50 : f32 to vector<2x16x128xf32>
      %102 = arith.mulf %101, %100 : vector<2x16x128xf32>
      %103 = arith.subf %102, %85 : vector<2x16x128xf32>
      %104 = arith.truncf %103 : vector<2x16x128xf32> to vector<2x16x128xbf16>
      %105 = tpu.concatenate %86, %89, %95, %98, %104 in 2 : vector<2x16x128xbf16>, vector<2x16x128xbf16>, vector<2x16x128xbf16>, vector<2x16x128xbf16>, vector<2x16x128xbf16> -> vector<2x16x640xbf16>
      %c0_51 = arith.constant 0 : index
      %c0_52 = arith.constant 0 : index
      %106 = vector.load %arg7[%c0_51, %c0_52] : memref<640x384xbf16, #tpu.memory_space<vmem>>, vector<640x384xbf16>
      "tpu.trace_start"() <{level = 10 : i32, message = "bnk,kh->bnh"}> : () -> ()
      %cst_53 = arith.constant dense<0.000000e+00> : vector<2x16x384xf32>
      %107 = tpu.matmul %105, %106, %cst_53 {dimension_numbers = #tpu.dot_dimension_numbers<[2], [0], [0, 1], [1], [0, 0, 0, 1, 1, 1], [], []>} : vector<2x16x640xbf16>, vector<640x384xbf16>, vector<2x16x384xf32> -> vector<2x16x384xf32>
      "tpu.trace_stop"() : () -> ()
      %c0_54 = arith.constant 0 : index
      %c0_55 = arith.constant 0 : index
      %108 = vector.load %arg8[%c0_54, %c0_55] : memref<1x384xf32, #tpu.memory_space<vmem>>, vector<1x384xf32>
      %109 = vector.shape_cast %108 : vector<1x384xf32> to vector<1x1x384xf32>
      %110 = vector.broadcast %109 : vector<1x1x384xf32> to vector<2x16x384xf32>
      %111 = arith.addf %107, %110 : vector<2x16x384xf32>
      %112 = arith.truncf %arg15 : vector<2x16x128xf32> to vector<2x16x128xbf16>
      "tpu.trace_start"() <{level = 10 : i32, message = "nm,bmc->bnc"}> : () -> ()
      %cst_56 = arith.constant dense<0.000000e+00> : vector<2x128x16xf32>
      %113 = tpu.matmul %112, %3, %cst_56 {dimension_numbers = #tpu.dot_dimension_numbers<[1], [1], [0, 2], [0], [0, 0, 0, 2, 1, 0], [], []>} : vector<2x16x128xbf16>, vector<16x16xbf16>, vector<2x128x16xf32> -> vector<2x128x16xf32>
      %114 = tpu.transpose %113, [0, 2, 1] : vector<2x128x16xf32> -> vector<2x16x128xf32>
      "tpu.trace_stop"() : () -> ()
      %115 = arith.truncf %114 : vector<2x16x128xf32> to vector<2x16x128xbf16>
      "tpu.trace_start"() <{level = 10 : i32, message = "nm,bmc->bnc"}> : () -> ()
      %cst_57 = arith.constant dense<0.000000e+00> : vector<2x128x16xf32>
      %116 = tpu.matmul %115, %3, %cst_57 {dimension_numbers = #tpu.dot_dimension_numbers<[1], [1], [0, 2], [0], [0, 0, 0, 2, 1, 0], [], []>} : vector<2x16x128xbf16>, vector<16x16xbf16>, vector<2x128x16xf32> -> vector<2x128x16xf32>
      %117 = tpu.transpose %116, [0, 2, 1] : vector<2x128x16xf32> -> vector<2x16x128xf32>
      "tpu.trace_stop"() : () -> ()
      %cst_58 = arith.constant 2.000000e+00 : f32
      %118 = vector.broadcast %cst_58 : f32 to vector<2x16x128xf32>
      %119 = arith.mulf %118, %117 : vector<2x16x128xf32>
      %120 = arith.subf %119, %arg15 : vector<2x16x128xf32>
      %121 = arith.truncf %120 : vector<2x16x128xf32> to vector<2x16x128xbf16>
      "tpu.trace_start"() <{level = 10 : i32, message = "nm,bmc->bnc"}> : () -> ()
      %cst_59 = arith.constant dense<0.000000e+00> : vector<2x128x16xf32>
      %122 = tpu.matmul %112, %4, %cst_59 {dimension_numbers = #tpu.dot_dimension_numbers<[1], [1], [0, 2], [0], [0, 0, 0, 2, 1, 0], [], []>} : vector<2x16x128xbf16>, vector<16x16xbf16>, vector<2x128x16xf32> -> vector<2x128x16xf32>
      %123 = tpu.transpose %122, [0, 2, 1] : vector<2x128x16xf32> -> vector<2x16x128xf32>
      "tpu.trace_stop"() : () -> ()
      %124 = arith.truncf %123 : vector<2x16x128xf32> to vector<2x16x128xbf16>
      "tpu.trace_start"() <{level = 10 : i32, message = "nm,bmc->bnc"}> : () -> ()
      %cst_60 = arith.constant dense<0.000000e+00> : vector<2x128x16xf32>
      %125 = tpu.matmul %124, %4, %cst_60 {dimension_numbers = #tpu.dot_dimension_numbers<[1], [1], [0, 2], [0], [0, 0, 0, 2, 1, 0], [], []>} : vector<2x16x128xbf16>, vector<16x16xbf16>, vector<2x128x16xf32> -> vector<2x128x16xf32>
      %126 = tpu.transpose %125, [0, 2, 1] : vector<2x128x16xf32> -> vector<2x16x128xf32>
      "tpu.trace_stop"() : () -> ()
      %cst_61 = arith.constant 2.000000e+00 : f32
      %127 = vector.broadcast %cst_61 : f32 to vector<2x16x128xf32>
      %128 = arith.mulf %127, %126 : vector<2x16x128xf32>
      %129 = arith.subf %128, %arg15 : vector<2x16x128xf32>
      %130 = arith.truncf %129 : vector<2x16x128xf32> to vector<2x16x128xbf16>
      %131 = tpu.concatenate %112, %115, %121, %124, %130 in 2 : vector<2x16x128xbf16>, vector<2x16x128xbf16>, vector<2x16x128xbf16>, vector<2x16x128xbf16>, vector<2x16x128xbf16> -> vector<2x16x640xbf16>
      %132 = vector.extract_strided_slice %111 {offsets = [0, 0, 0], sizes = [2, 16, 256], strides = [1, 1, 1]} : vector<2x16x384xf32> to vector<2x16x256xf32>
      %c0_62 = arith.constant 0 : index
      %c0_63 = arith.constant 0 : index
      %133 = vector.load %arg9[%c0_62, %c0_63] : memref<640x256xbf16, #tpu.memory_space<vmem>>, vector<640x256xbf16>
      "tpu.trace_start"() <{level = 10 : i32, message = "bnk,kh->bnh"}> : () -> ()
      %cst_64 = arith.constant dense<0.000000e+00> : vector<2x16x256xf32>
      %134 = tpu.matmul %131, %133, %cst_64 {dimension_numbers = #tpu.dot_dimension_numbers<[2], [0], [0, 1], [1], [0, 0, 0, 1, 1, 1], [], []>} : vector<2x16x640xbf16>, vector<640x256xbf16>, vector<2x16x256xf32> -> vector<2x16x256xf32>
      "tpu.trace_stop"() : () -> ()
      %135 = arith.addf %132, %134 : vector<2x16x256xf32>
      %136 = arith.negf %135 : vector<2x16x256xf32>
      %137 = math.exp %136 : vector<2x16x256xf32>
      %cst_65 = arith.constant 1.000000e+00 : f32
      %138 = vector.broadcast %cst_65 : f32 to vector<2x16x256xf32>
      %139 = arith.addf %138, %137 : vector<2x16x256xf32>
      %140 = arith.divf %138, %139 : vector<2x16x256xf32>
      %141 = vector.extract_strided_slice %140 {offsets = [0, 0, 0], sizes = [2, 16, 128], strides = [1, 1, 1]} : vector<2x16x256xf32> to vector<2x16x128xf32>
      %142 = vector.extract_strided_slice %140 {offsets = [0, 0, 128], sizes = [2, 16, 128], strides = [1, 1, 1]} : vector<2x16x256xf32> to vector<2x16x128xf32>
      %143 = vector.extract_strided_slice %111 {offsets = [0, 0, 256], sizes = [2, 16, 128], strides = [1, 1, 1]} : vector<2x16x384xf32> to vector<2x16x128xf32>
      %144 = arith.mulf %142, %arg15 : vector<2x16x128xf32>
      %145 = arith.truncf %144 : vector<2x16x128xf32> to vector<2x16x128xbf16>
      "tpu.trace_start"() <{level = 10 : i32, message = "nm,bmc->bnc"}> : () -> ()
      %cst_66 = arith.constant dense<0.000000e+00> : vector<2x128x16xf32>
      %146 = tpu.matmul %145, %3, %cst_66 {dimension_numbers = #tpu.dot_dimension_numbers<[1], [1], [0, 2], [0], [0, 0, 0, 2, 1, 0], [], []>} : vector<2x16x128xbf16>, vector<16x16xbf16>, vector<2x128x16xf32> -> vector<2x128x16xf32>
      %147 = tpu.transpose %146, [0, 2, 1] : vector<2x128x16xf32> -> vector<2x16x128xf32>
      "tpu.trace_stop"() : () -> ()
      %148 = arith.truncf %147 : vector<2x16x128xf32> to vector<2x16x128xbf16>
      "tpu.trace_start"() <{level = 10 : i32, message = "nm,bmc->bnc"}> : () -> ()
      %cst_67 = arith.constant dense<0.000000e+00> : vector<2x128x16xf32>
      %149 = tpu.matmul %148, %3, %cst_67 {dimension_numbers = #tpu.dot_dimension_numbers<[1], [1], [0, 2], [0], [0, 0, 0, 2, 1, 0], [], []>} : vector<2x16x128xbf16>, vector<16x16xbf16>, vector<2x128x16xf32> -> vector<2x128x16xf32>
      %150 = tpu.transpose %149, [0, 2, 1] : vector<2x128x16xf32> -> vector<2x16x128xf32>
      "tpu.trace_stop"() : () -> ()
      %cst_68 = arith.constant 2.000000e+00 : f32
      %151 = vector.broadcast %cst_68 : f32 to vector<2x16x128xf32>
      %152 = arith.mulf %151, %150 : vector<2x16x128xf32>
      %153 = arith.subf %152, %144 : vector<2x16x128xf32>
      %154 = arith.truncf %153 : vector<2x16x128xf32> to vector<2x16x128xbf16>
      "tpu.trace_start"() <{level = 10 : i32, message = "nm,bmc->bnc"}> : () -> ()
      %cst_69 = arith.constant dense<0.000000e+00> : vector<2x128x16xf32>
      %155 = tpu.matmul %145, %4, %cst_69 {dimension_numbers = #tpu.dot_dimension_numbers<[1], [1], [0, 2], [0], [0, 0, 0, 2, 1, 0], [], []>} : vector<2x16x128xbf16>, vector<16x16xbf16>, vector<2x128x16xf32> -> vector<2x128x16xf32>
      %156 = tpu.transpose %155, [0, 2, 1] : vector<2x128x16xf32> -> vector<2x16x128xf32>
      "tpu.trace_stop"() : () -> ()
      %157 = arith.truncf %156 : vector<2x16x128xf32> to vector<2x16x128xbf16>
      "tpu.trace_start"() <{level = 10 : i32, message = "nm,bmc->bnc"}> : () -> ()
      %cst_70 = arith.constant dense<0.000000e+00> : vector<2x128x16xf32>
      %158 = tpu.matmul %157, %4, %cst_70 {dimension_numbers = #tpu.dot_dimension_numbers<[1], [1], [0, 2], [0], [0, 0, 0, 2, 1, 0], [], []>} : vector<2x16x128xbf16>, vector<16x16xbf16>, vector<2x128x16xf32> -> vector<2x128x16xf32>
      %159 = tpu.transpose %158, [0, 2, 1] : vector<2x128x16xf32> -> vector<2x16x128xf32>
      "tpu.trace_stop"() : () -> ()
      %cst_71 = arith.constant 2.000000e+00 : f32
      %160 = vector.broadcast %cst_71 : f32 to vector<2x16x128xf32>
      %161 = arith.mulf %160, %159 : vector<2x16x128xf32>
      %162 = arith.subf %161, %144 : vector<2x16x128xf32>
      %163 = arith.truncf %162 : vector<2x16x128xf32> to vector<2x16x128xbf16>
      %164 = tpu.concatenate %145, %148, %154, %157, %163 in 2 : vector<2x16x128xbf16>, vector<2x16x128xbf16>, vector<2x16x128xbf16>, vector<2x16x128xbf16>, vector<2x16x128xbf16> -> vector<2x16x640xbf16>
      %c0_72 = arith.constant 0 : index
      %c0_73 = arith.constant 0 : index
      %165 = vector.load %arg10[%c0_72, %c0_73] : memref<640x128xbf16, #tpu.memory_space<vmem>>, vector<640x128xbf16>
      "tpu.trace_start"() <{level = 10 : i32, message = "bnk,kh->bnh"}> : () -> ()
      %cst_74 = arith.constant dense<0.000000e+00> : vector<2x16x128xf32>
      %166 = tpu.matmul %164, %165, %cst_74 {dimension_numbers = #tpu.dot_dimension_numbers<[2], [0], [0, 1], [1], [0, 0, 0, 1, 1, 1], [], []>} : vector<2x16x640xbf16>, vector<640x128xbf16>, vector<2x16x128xf32> -> vector<2x16x128xf32>
      "tpu.trace_stop"() : () -> ()
      %167 = arith.addf %143, %166 : vector<2x16x128xf32>
      %168 = math.tanh %167 : vector<2x16x128xf32>
      %169 = arith.mulf %141, %arg15 : vector<2x16x128xf32>
      %cst_75 = arith.constant 1.000000e+00 : f32
      %170 = vector.broadcast %cst_75 : f32 to vector<2x16x128xf32>
      %171 = arith.subf %170, %141 : vector<2x16x128xf32>
      %172 = arith.mulf %171, %168 : vector<2x16x128xf32>
      %173 = arith.addf %169, %172 : vector<2x16x128xf32>
      scf.yield %85, %173 : vector<2x16x128xf32>, vector<2x16x128xf32>
    }
    %c8_i32_12 = arith.constant 8 : i32
    %c0_13 = arith.constant 0 : index
    %c0_14 = arith.constant 0 : index
    %c0_15 = arith.constant 0 : index
    %c0_16 = arith.constant 0 : index
    %11 = vector.load %arg12[%c0_13, %c0_14, %c0_15, %c0_16] : memref<2x2x16x128xf32, #tpu.memory_space<vmem>>, vector<1x2x16x128xf32>
    %12 = vector.shape_cast %11 : vector<1x2x16x128xf32> to vector<2x16x128xf32>
    %13 = vector.shape_cast %10#0 : vector<2x16x128xf32> to vector<1x2x16x128xf32>
    tpu.vector_store %arg12[%c0_13, %c0_14, %c0_15, %c0_16], %13 {strides = array<i32>} : memref<2x2x16x128xf32, #tpu.memory_space<vmem>>, vector<1x2x16x128xf32>,
    %c1_17 = arith.constant 1 : index
    %c0_18 = arith.constant 0 : index
    %c0_19 = arith.constant 0 : index
    %c0_20 = arith.constant 0 : index
    %14 = vector.load %arg12[%c1_17, %c0_18, %c0_19, %c0_20] : memref<2x2x16x128xf32, #tpu.memory_space<vmem>>, vector<1x2x16x128xf32>
    %15 = vector.shape_cast %14 : vector<1x2x16x128xf32> to vector<2x16x128xf32>
    %16 = vector.shape_cast %10#1 : vector<2x16x128xf32> to vector<1x2x16x128xf32>
    tpu.vector_store %arg12[%c1_17, %c0_18, %c0_19, %c0_20], %16 {strides = array<i32>} : memref<2x2x16x128xf32, #tpu.memory_space<vmem>>, vector<1x2x16x128xf32>,
    %c0_i32_21 = arith.constant 0 : i32
    %17 = arith.cmpi eq, %arg1, %c0_i32_21 : i32
    %18 = arith.extui %17 : i1 to i32
    %c0_i32_22 = arith.constant 0 : i32
    %19 = arith.cmpi ne, %18, %c0_i32_22 : i32
    scf.if %19 {
      %c0_23 = arith.constant 0 : index
      %c0_24 = arith.constant 0 : index
      %c0_25 = arith.constant 0 : index
      %c0_26 = arith.constant 0 : index
      %20 = vector.load %arg12[%c0_23, %c0_24, %c0_25, %c0_26] : memref<2x2x16x128xf32, #tpu.memory_space<vmem>>, vector<2x2x16x128xf32>
      %c0_27 = arith.constant 0 : index
      %c0_28 = arith.constant 0 : index
      %c0_29 = arith.constant 0 : index
      %c0_30 = arith.constant 0 : index
      %21 = vector.load %arg11[%c0_27, %c0_28, %c0_29, %c0_30] : memref<2x2x16x128xf32, #tpu.memory_space<vmem>>, vector<2x2x16x128xf32>
      tpu.vector_store %arg11[%c0_27, %c0_28, %c0_29, %c0_30], %20 {strides = array<i32>} : memref<2x2x16x128xf32, #tpu.memory_space<vmem>>, vector<2x2x16x128xf32>,
    } else {
    }
    return
  }
  func.func @transform_0(%arg0: i32, %arg1: i32) -> (i32, i32, i32, i32) {
    %c0_i32 = arith.constant 0 : i32
    %c0_i32_0 = arith.constant 0 : i32
    %c0_i32_1 = arith.constant 0 : i32
    return %arg1, %arg0, %c0_i32, %c0_i32_0 : i32, i32, i32, i32
  }
  func.func @transform_1(%arg0: i32, %arg1: i32) -> (i32, i32) {
    %c0_i32 = arith.constant 0 : i32
    %c0_i32_0 = arith.constant 0 : i32
    %c0_i32_1 = arith.constant 0 : i32
    return %c0_i32, %c0_i32_0 : i32, i32
  }
  func.func @transform_2(%arg0: i32, %arg1: i32) -> (i32, i32) {
    %c0_i32 = arith.constant 0 : i32
    %c0_i32_0 = arith.constant 0 : i32
    %c0_i32_1 = arith.constant 0 : i32
    return %c0_i32, %c0_i32_0 : i32, i32
  }
  func.func @transform_3(%arg0: i32, %arg1: i32) -> (i32, i32) {
    %c0_i32 = arith.constant 0 : i32
    %c0_i32_0 = arith.constant 0 : i32
    %c0_i32_1 = arith.constant 0 : i32
    return %c0_i32, %c0_i32_0 : i32, i32
  }
  func.func @transform_4(%arg0: i32, %arg1: i32) -> (i32, i32) {
    %c0_i32 = arith.constant 0 : i32
    %c0_i32_0 = arith.constant 0 : i32
    %c0_i32_1 = arith.constant 0 : i32
    return %c0_i32, %c0_i32_0 : i32, i32
  }
  func.func @transform_5(%arg0: i32, %arg1: i32) -> (i32, i32) {
    %c0_i32 = arith.constant 0 : i32
    %c0_i32_0 = arith.constant 0 : i32
    %c0_i32_1 = arith.constant 0 : i32
    return %c0_i32, %c0_i32_0 : i32, i32
  }
  func.func @transform_6(%arg0: i32, %arg1: i32) -> (i32, i32) {
    %c0_i32 = arith.constant 0 : i32
    %c0_i32_0 = arith.constant 0 : i32
    %c0_i32_1 = arith.constant 0 : i32
    return %c0_i32, %c0_i32_0 : i32, i32
  }
  func.func @transform_7(%arg0: i32, %arg1: i32) -> (i32, i32) {
    %c0_i32 = arith.constant 0 : i32
    %c0_i32_0 = arith.constant 0 : i32
    %c0_i32_1 = arith.constant 0 : i32
    return %c0_i32, %c0_i32_0 : i32, i32
  }
  func.func @transform_8(%arg0: i32, %arg1: i32) -> (i32, i32) {
    %c0_i32 = arith.constant 0 : i32
    %c0_i32_0 = arith.constant 0 : i32
    %c0_i32_1 = arith.constant 0 : i32
    return %c0_i32, %c0_i32_0 : i32, i32
  }
  func.func @transform_9(%arg0: i32, %arg1: i32) -> (i32, i32, i32, i32) {
    %c0_i32 = arith.constant 0 : i32
    %c0_i32_0 = arith.constant 0 : i32
    %c0_i32_1 = arith.constant 0 : i32
    %c0_i32_2 = arith.constant 0 : i32
    return %c0_i32, %arg0, %c0_i32_0, %c0_i32_1 : i32, i32, i32, i32
  }
}

</mosaic_0001>

<bundles_post_ra>
// kernel: encoder_forward.1
= control target key start
LH: loop header
LB: loop body
LE: loop exit
PB: predicated region body
PF: predicated region fallthrough
CT: control target
= control target key end

     0   :  { %14 = vsyncpa [#allocation4], 0  ;;  %v12824_v4 = vmov 0.0   ;;  %v12826_v5 = vmov 0.0   ;;  %v12828_v6 = vmov 0.0   ;;  %v12830_v7 = vmov 0.0   ;;  %s15257_s0 = inlined_call_operand.vmem [shape: bf16[8,2,16,384], index: 0, kind: input, shape index: {}]   ;;  %s15258_s1 = inlined_call_operand.vmem [shape: bf16[16,16], index: 1, kind: input, shape index: {}]   ;;  %s15259_s2 = inlined_call_operand.vmem [shape: bf16[16,16], index: 2, kind: input, shape index: {}]   ;;  %s15260_s3 = inlined_call_operand.vmem [shape: bf16[640,256], index: 3, kind: input, shape index: {}]   ;;  %s15261_s4 = inlined_call_operand.vmem [shape: bf16[640,128], index: 4, kind: input, shape index: {}]   ;;  %s15262_s5 = inlined_call_operand.vmem [shape: bf16[640,384], index: 5, kind: input, shape index: {}]   ;;  %s15263_s6 = inlined_call_operand.vmem [shape: f32[1,384], index: 6, kind: input, shape index: {}]   ;;  %s15264_s7 = inlined_call_operand.vmem [shape: bf16[640,256], index: 7, kind: input, shape index: {}]   ;;  %s15265_s8 = inlined_call_operand.vmem [shape: bf16[640,128], index: 8, kind: input, shape index: {}]   ;;  %s15266_s9 = inlined_call_operand.hbm [shape: f32[2,2,16,128], index: 9, kind: output, shape index: {}]  }
   0x1   :  { %v12807_v0 = vld [vmem:[%s15258_s1] sm:$0xf]  ;;  %v12812_v1 = vld [vmem:[%s15258_s1 + $0x4] sm:$0xf]  ;;  %v12832_v8 = vmov 0.0   ;;  %v12834_v9 = vmov 0.0  }
   0x2   :  { %15294 = vst [vmem:[#allocation6_spill] sm:$0xff] %v12807_v0  ;;  %15295 = vst [vmem:[#allocation7_spill] sm:$0xff] %v12812_v1  ;;  %v12817_v2 = vld [vmem:[%s15259_s2] sm:$0xf]  ;;  %v12822_v3 = vld [vmem:[%s15259_s2 + $0x4] sm:$0xf] }
   0x3   :  { %15296 = vst [vmem:[#allocation8_spill] sm:$0xff] %v12817_v2  ;;  %15297 = vst [vmem:[#allocation9_spill] sm:$0xff] %v12822_v3  ;;  %v12836_v10 = vmov 0.0   ;;  %v12838_v11 = vmov 0.0   ;;  %s12840_s1 = smov 0  }
   0x4 LB: > { %15298 = vst [vmem:[#allocation10_spill] sm:$0xff] %v12716_v4  ;;  %15299 = vst [vmem:[#allocation11_spill] sm:$0xff] %v12720_v5  ;;  %v12871_v12 = vpack.c.bf16 %v12740_v10, %v12744_v11  ;;  %vm135_vm0 = vcmask 130048   ;;  %v12890_v15 = vpack.c.bf16 %v12732_v8, %v12736_v9  ;;  %v12091_v34 = vld [vmem:[%s15260_s3] ss:$8 sps:$4 sm:$0xff]   ;;  %s10219_s22 = smul.u32 48, %s12748_s1  ;;  %s12748_s1 = sphi %s12840_s1, %s64_s1   ;;  %v12744_v11 = vphi %v12838_v11, %v15377_v11   ;;  %v12740_v10 = vphi %v12836_v10, %v15376_v10   ;;  %v12736_v9 = vphi %v12834_v9, %v15375_v9   ;;  %v12732_v8 = vphi %v12832_v8, %v15374_v8   ;;  %v12728_v7 = vphi %v12830_v7, %v15373_v7   ;;  %v12724_v6 = vphi %v12828_v6, %v15372_v6   ;;  %v12720_v5 = vphi %v12826_v5, %v15371_v5   ;;  %v12716_v4 = vphi %v12824_v4, %v15370_v4  }
   0x5   : > { %15300 = vst [vmem:[#allocation12_spill] sm:$0xff] %v12724_v6  ;;  %15301 = vst [vmem:[#allocation13_spill] sm:$0xff] %v12728_v7  ;;  %v12093_v35 = vld [vmem:[%s15260_s3 + $0x4] ss:$8 sps:$4 sm:$0xff]   ;;  %v12096_v36 = vld [vmem:[%s15260_s3 + $0x14] ss:$8 sps:$4 sm:$0xff]  }
   0x6   : > { %15302 = vst [vmem:[#allocation14_spill] sm:$0xff] %v12732_v8  ;;  %15303 = vst [vmem:[#allocation15_spill] sm:$0xff] %v12736_v9  ;;  %98 = vxpose.xlu0.c.b16.start.end [1/1] (short) %v12871_v12, 128  ;;  %v12094_v37 = vld [vmem:[%s15260_s3 + $0x10] ss:$8 sps:$4 sm:$0xff]   ;;  %v12097_v38 = vld [vmem:[%s15260_s3 + $0x20] ss:$8 sps:$4 sm:$0xff]   ;;  %s13326_s25 = scalar_lea.vmem %s15257_s0, %s10219_s22 }
   0x7   : > { %15304 = vst [vmem:[#allocation16_spill] sm:$0xff] %v12740_v10  ;;  %15305 = vst [vmem:[#allocation17_spill] sm:$0xff] %v12744_v11  ;;  %v12099_v39 = vld [vmem:[%s15260_s3 + $0x24] ss:$8 sps:$4 sm:$0xff]   ;;  %v12102_v40 = vld [vmem:[%s15260_s3 + $0x34] ss:$8 sps:$4 sm:$0xff]  }
   0x8   : > { %v12100_v41 = vld [vmem:[%s15260_s3 + $0x30] ss:$8 sps:$4 sm:$0xff]   ;;  %v12103_v42 = vld [vmem:[%s15260_s3 + $0x40] ss:$8 sps:$4 sm:$0xff]   ;;  %v12105_v43 = vld [vmem:[%s15260_s3 + $0x44] ss:$8 sps:$4 sm:$0xff]  }
   0x9   : > { %v15306_v1 = vld [vmem:[#allocation7_spill] sm:$0xff]  ;;  %v15307_v0 = vld [vmem:[#allocation6_spill] sm:$0xff]  ;;  %v12108_v44 = vld [vmem:[%s15260_s3 + $0x54] ss:$8 sps:$4 sm:$0xff]   ;;  %s64_s1 = sadd.s32 1, %s12748_s1  }
   0xa   : > { %v12875_v13 = vcombine.low %v15307_v0, %v15306_v1  ;;  %v15308_v3 = vld [vmem:[#allocation9_spill] sm:$0xff]  ;;  %v15309_v2 = vld [vmem:[#allocation8_spill] sm:$0xff]  ;;  %v12111_v47 = vld [vmem:[%s15260_s3 + $0x64] ss:$8 sps:$4 sm:$0xff]   ;;  %p61_p0 = scmp.ge.s32.totalorder %s64_s1, 8  }
   0xb   : > { %v12895_v16 = vcombine.low %v15309_v2, %v15308_v3  ;;  %v12106_v45 = vld [vmem:[%s15260_s3 + $0x50] ss:$8 sps:$4 sm:$0xff]   ;;  %v12109_v51 = vld [vmem:[%s15260_s3 + $0x60] ss:$8 sps:$4 sm:$0xff]   ;;  %v12114_v52 = vld [vmem:[%s15260_s3 + $0x74] ss:$8 sps:$4 sm:$0xff]  }
   0xc   : > { %11574 = vmatprep.subr.msk.bf16.mxu0 %vm135_vm0, %v12875_v13  ;;  %v12882_v14 = vsel %vm135_vm0, %v12875_v13, 0  ;;  %11575 = vmatprep.subr.msk.bf16.mxu1 %vm135_vm0, %v12875_v13  ;;  %v12112_v53 = vld [vmem:[%s15260_s3 + $0x70] ss:$8 sps:$4 sm:$0xff]   ;;  %v12117_v55 = vld [vmem:[%s15260_s3 + $0x84] ss:$8 sps:$4 sm:$0xff]   ;;  %s12751_s22 = smov (%p61_p0), [#allocation3]  }
   0xd   : > { %10759 = vmatpush3.bf16.xpose.msra.mxu0 %v12882_v14  ;;  %10793 = vmatpush3.bf16.xpose.msra.mxu1 %v12882_v14  ;;  %v12904_v18 = vsel %vm135_vm0, %v12895_v16, 0  ;;  %v12115_v59 = vld [vmem:[%s15260_s3 + $0x80] ss:$8 sps:$4 sm:$0xff]   ;;  %v12120_v60 = vld [vmem:[%s15260_s3 + $0x94] ss:$8 sps:$4 sm:$0xff]   ;;  %s9478_s23 = sshll.u32 (%p61_p0), %s12751_s22, 4  ;;  %s9479_s23 = int_to_ptr.vmem [resolvable:$true] %s9478_s23 }
   0xe   : > { %11576 = vmatprep.subr.msk.bf16.mxu0 %vm135_vm0, %v12895_v16  ;;  %11577 = vmatprep.subr.msk.bf16.mxu1 %vm135_vm0, %v12895_v16  ;;  %v12118_v61 = vld [vmem:[%s15260_s3 + $0x90] ss:$8 sps:$4 sm:$0xff]   ;;  %v12123_v63 = vld [vmem:[%s15260_s3 + $0xa4] ss:$8 sps:$4 sm:$0xff]   ;;  %s12654_s24 = scalar_lea.vmem (%p61_p0), %s9479_s23, 1024  ;;  %p12659_p2 = scmp.lt.s32.totalorder (%p61_p0), %s9479_s23, %s9479_s23 }
   0xf   :  { %p12655_p1 = scmp.ne.s32.totalorder (%p61_p0), %s9479_s23, %s12654_s24  ;;  %p12660_p3 = scmp.lt.s32.totalorder (%p61_p0), %s12654_s24, %s12654_s24 }
  0x11   :  { %p12661_p4 = por (%p61_p0), %p12660_p3, %p12659_p2 }
  0x13   :  { %p12662_p5 = pnand (%p61_p0), %p12661_p4, %p12655_p1 }
  0x23   : > { %114 = vxpose.xlu0.c.b16.start.end [1/1] (short) %v12890_v15, 128 }
  0x6c   : > { %v106_v17 = vpop.trf.xlu0 }
  0x6d   : > { %10760 = vmatprep.mubr.msk.bf16.mxu0 %vm135_vm0, %v106_v17 }
  0x70   : > { %v107_v19 = vpop.trf.xlu0 }
  0x71   : > { %10761 = vmatmul.mubr.msk.bf16.vlgmr.msra.gmra.mrb[0].mxu0 %vm135_vm0, %v107_v19 }
  0x72   : > { %10827 = vmatpush3.bf16.xpose.msra.mxu0 %v12904_v18 }
  0x73   : > { %1759 = vmatprep.subr.bf16.mxu0 %v12093_v35 }
  0x74   : > { %v108_v20 = vpop.trf.xlu0 }
  0x75   : > { %10764 = vmatprep.mubr.msk.bf16.mxu0 %vm135_vm0, %v108_v20 }
  0x78   : > { %v109_v21 = vpop.trf.xlu0 }
  0x79   : > { %10765 = vmatmul.mubr.msk.bf16.gmra.mrb[4].mxu0 %vm135_vm0, %v109_v21 }
  0x7c   : > { %v110_v22 = vpop.trf.xlu0 }
  0x7d   : > { %10768 = vmatprep.mubr.msk.bf16.mxu0 %vm135_vm0, %v110_v22 }
  0x80   : > { %v111_v23 = vpop.trf.xlu0 }
  0x81   : > { %10769 = vmatmul.mubr.msk.bf16.gmra.mrb[8].mxu0 %vm135_vm0, %v111_v23 }
  0x84   : > { %v112_v24 = vpop.trf.xlu0 }
  0x85   : > { %10772 = vmatprep.mubr.msk.bf16.mxu0 %vm135_vm0, %v112_v24 }
  0x88   : > { %v113_v25 = vpop.trf.xlu0 }
  0x89   : > { %10773 = vmatmul.mubr.msk.bf16.gmra.mrb[12].mxu0 %vm135_vm0, %v113_v25 }
  0x8c   : > { %v122_v26 = vpop.trf.xlu0 }
  0x8d   : > { %10776 = vmatprep.mubr.msk.bf16.mxu0 %vm135_vm0, %v122_v26 }
  0x90   : > { %v123_v27 = vpop.trf.xlu0 }
  0x91   : > { %10777 = vmatmul.mubr.msk.bf16.gmra.mrb[16].mxu0 %vm135_vm0, %v123_v27 }
  0x94   : > { %v124_v28 = vpop.trf.xlu0 }
  0x95   : > { %10780 = vmatprep.mubr.msk.bf16.mxu0 %vm135_vm0, %v124_v28 }
  0x98   : > { %v125_v29 = vpop.trf.xlu0 }
  0x99   : > { %10781 = vmatmul.mubr.msk.bf16.gmra.mrb[20].mxu0 %vm135_vm0, %v125_v29 }
  0x9c   : > { %v126_v30 = vpop.trf.xlu0 }
  0x9d   : > { %10784 = vmatprep.mubr.msk.bf16.mxu0 %vm135_vm0, %v126_v30 }
  0xa0   : > { %v127_v31 = vpop.trf.xlu0 }
  0xa1   : > { %10785 = vmatmul.mubr.msk.bf16.gmra.mrb[24].mxu0 %vm135_vm0, %v127_v31 }
  0xa4   : > { %v128_v32 = vpop.trf.xlu0 }
  0xa5   : > { %10788 = vmatprep.mubr.msk.bf16.mxu0 %vm135_vm0, %v128_v32 }
  0xa8   : > { %v129_v33 = vpop.trf.xlu0 }
  0xa9   : > { %10789 = vmatmul.mubr.msk.bf16.gmra.mrb[28].mxu0 %vm135_vm0, %v129_v33 }
  0xaa   : > { %10828 = vmatprep.mubr.msk.bf16.mxu0 %vm135_vm0, %v106_v17 }
  0xb1   : > { %10829 = vmatmul.mubr.msk.bf16.vlgmr.msra.gmra.mrb[32].mxu0 %vm135_vm0, %v107_v19 }
  0xb2   : > { %10832 = vmatprep.mubr.msk.bf16.mxu0 %vm135_vm0, %v108_v20  ;;  %1760 = vmatpush1.bf16.msra.mxu0 %v12091_v34 }
  0xb3   : > { %1761 = vmatprep.subr.bf16.mxu0 %v12096_v36 }
  0xb6   : > { %1762 = vmatpush1.bf16.msra.mxu0 %v12094_v37 }
  0xb7   : > { %1763 = vmatprep.subr.bf16.mxu0 %v12099_v39 }
  0xb9   : > { %10833 = vmatmul.mubr.msk.bf16.gmra.mrb[36].mxu0 %vm135_vm0, %v109_v21  ;;  %v12121_v21 = vld [vmem:[%s15260_s3 + $0xa0] ss:$8 sps:$4 sm:$0xff]  }
  0xba   : > { %10836 = vmatprep.mubr.msk.bf16.mxu0 %vm135_vm0, %v110_v22  ;;  %1764 = vmatpush1.bf16.msra.mxu0 %v12097_v38  ;;  %v12126_v22 = vld [vmem:[%s15260_s3 + $0xb4] ss:$8 sps:$4 sm:$0xff]  }
  0xbb   : > { %1765 = vmatprep.subr.bf16.mxu0 %v12102_v40  ;;  %v12135_v40 = vld [vmem:[%s15260_s3 + $0xe4] ss:$8 sps:$4 sm:$0xff]  }
  0xbe   : > { %1766 = vmatpush1.bf16.msra.mxu0 %v12100_v41  ;;  %v12133_v41 = vld [vmem:[%s15260_s3 + $0xe0] ss:$8 sps:$4 sm:$0xff]  }
  0xbf   : > { %1767 = vmatprep.subr.bf16.mxu0 %v12105_v43  ;;  %v12138_v43 = vld [vmem:[%s15260_s3 + $0xf4] ss:$8 sps:$4 sm:$0xff]  }
  0xc1   : > { %10837 = vmatmul.mubr.msk.bf16.gmra.mrb[40].mxu0 %vm135_vm0, %v111_v23  ;;  %v12124_v23 = vld [vmem:[%s15260_s3 + $0xb0] ss:$8 sps:$4 sm:$0xff]  }
  0xc2   : > { %10840 = vmatprep.mubr.msk.bf16.mxu0 %vm135_vm0, %v112_v24  ;;  %1768 = vmatpush1.bf16.msra.mxu0 %v12103_v42 }
  0xc3   : > { %1769 = vmatprep.subr.bf16.mxu0 %v12108_v44 }
  0xc6   : > { %1770 = vmatpush1.bf16.msra.mxu0 %v12106_v45 }
  0xc7   : > { %1771 = vmatprep.subr.bf16.mxu0 %v12111_v47 }
  0xc9   : > { %10841 = vmatmul.mubr.msk.bf16.gmra.mrb[44].mxu0 %vm135_vm0, %v113_v25  ;;  %v12129_v25 = vld [vmem:[%s15260_s3 + $0xc4] ss:$8 sps:$4 sm:$0xff]  }
  0xca   : > { %10844 = vmatprep.mubr.msk.bf16.mxu0 %vm135_vm0, %v122_v26  ;;  %1772 = vmatpush1.bf16.msra.mxu0 %v12109_v51 }
  0xcb   : > { %1773 = vmatprep.subr.bf16.mxu0 %v12114_v52 }
  0xce   : > { %1774 = vmatpush1.bf16.msra.mxu0 %v12112_v53 }
  0xcf   : > { %1775 = vmatprep.subr.bf16.mxu0 %v12117_v55 }
  0xd1   : > { %10845 = vmatmul.mubr.msk.bf16.gmra.mrb[48].mxu0 %vm135_vm0, %v123_v27 }
  0xd2   : > { %10848 = vmatprep.mubr.msk.bf16.mxu0 %vm135_vm0, %v124_v28  ;;  %1776 = vmatpush1.bf16.msra.mxu0 %v12115_v59 }
  0xd3   : > { %1777 = vmatprep.subr.bf16.mxu0 %v12120_v60 }
  0xd6   : > { %1778 = vmatpush1.bf16.msra.mxu0 %v12118_v61 }
  0xd7   : > { %1779 = vmatprep.subr.bf16.mxu0 %v12123_v63 }
  0xd9   : > { %10849 = vmatmul.mubr.msk.bf16.gmra.mrb[52].mxu0 %vm135_vm0, %v125_v29  ;;  %v12127_v29 = vld [vmem:[%s15260_s3 + $0xc0] ss:$8 sps:$4 sm:$0xff]  }
  0xda   : > { %10852 = vmatprep.mubr.msk.bf16.mxu0 %vm135_vm0, %v126_v30  ;;  %1780 = vmatpush1.bf16.msra.mxu0 %v12121_v21  ;;  %v12132_v30 = vld [vmem:[%s15260_s3 + $0xd4] ss:$8 sps:$4 sm:$0xff]  }
  0xdb   : > { %1781 = vmatprep.subr.bf16.mxu0 %v12126_v22 }
  0xde   : > { %1782 = vmatpush1.bf16.msra.mxu0 %v12124_v23 }
  0xdf   : > { %1783 = vmatprep.subr.bf16.mxu0 %v12129_v25 }
  0xe1   : > { %10853 = vmatmul.mubr.msk.bf16.gmra.mrb[56].mxu0 %vm135_vm0, %v127_v31  ;;  %v12130_v31 = vld [vmem:[%s15260_s3 + $0xd0] ss:$8 sps:$4 sm:$0xff]  }
  0xe2   : > { %10856 = vmatprep.mubr.msk.bf16.mxu0 %vm135_vm0, %v128_v32  ;;  %1784 = vmatpush1.bf16.msra.mxu0 %v12127_v29 }
  0xe3   : > { %1785 = vmatprep.subr.bf16.mxu0 %v12132_v30 }
  0xe6   : > { %1786 = vmatpush1.bf16.msra.mxu0 %v12130_v31 }
  0xe7   : > { %1787 = vmatprep.subr.bf16.mxu0 %v12135_v40 }
  0xe9   : > { %10857 = vmatmul.mubr.msk.bf16.gmra.mrb[60].mxu0 %vm135_vm0, %v129_v33 }
  0xea   : > { %1788 = vmatpush1.bf16.msra.mxu0 %v12133_v41 }
  0xeb   : > { %1789 = vmatprep.subr.bf16.mxu0 %v12138_v43 }
 0x144   : > { %v12974_v46 = vpop.f32.mrb[0].mxu0 }
 0x145   : > { %v221_v48 = vpop.f32.mrb[1].mxu0 }
 0x146   : > { %v12979_v49 = vpop.f32.mrb[2].mxu0 }
 0x147   : > { %v224_v50 = vpop.f32.mrb[3].mxu0 }
 0x14c   : > { %v12990_v54 = vpop.f32.mrb[4].mxu0 }
 0x14d   : > { %v12995_v56 = vpop.f32.mrb[5].mxu0 }
 0x14e   : > { %v12997_v57 = vpop.f32.mrb[6].mxu0 }
 0x14f   : > { %v12999_v58 = vpop.f32.mrb[7].mxu0 }
 0x154   : > { %v13010_v62 = vpop.f32.mrb[8].mxu0 }
 0x155   : > { %v13015_v17 = vpop.f32.mrb[9].mxu0 }
 0x156   : > { %v13017_v19 = vpop.f32.mrb[10].mxu0 }
 0x157   : > { %v13019_v20 = vpop.f32.mrb[11].mxu0 }
 0x15c   : > { %v13030_v24 = vpop.f32.mrb[12].mxu0 }
 0x15d   : > { %v13035_v26 = vpop.f32.mrb[13].mxu0 }
 0x15e   : > { %v13037_v27 = vpop.f32.mrb[14].mxu0 }
 0x15f   : > { %v13039_v28 = vpop.f32.mrb[15].mxu0 }
 0x164   : > { %v10778_v32 = vpop.f32.mrb[16].mxu0 }
 0x165   : > { %v285_v33 = vpop.f32.mrb[17].mxu0  ;;  %v11675_v34 = vpack.i.bf16 %v10778_v32, %v12974_v46  ;;  %v12136_v46 = vld [vmem:[%s15260_s3 + $0xf0] ss:$8 sps:$4 sm:$0xff]  }
 0x166   : > { %v10779_v35 = vpop.f32.mrb[18].mxu0  ;;  %v11671_v36 = vpack.i.bf16 %v285_v33, %v221_v48  ;;  %1790 = vmatpush1.bf16.msra.mxu0 %v12136_v46 }
 0x167   : > { %v288_v37 = vpop.f32.mrb[19].mxu0  ;;  %v11677_v38 = vpack.i.bf16 %v10779_v35, %v12979_v49 }
 0x168   : > { %11672 = vxpose.xlu1.b32.start [1/16] (narrow) %v11671_v36, 16  ;;  %v11673_v39 = vpack.i.bf16 %v288_v37, %v224_v50 }
 0x16c   : > { %11674 = vxpose.xlu1.b32.cont [2/16] (narrow) %v11673_v39, 16  ;;  %v10782_v42 = vpop.f32.mrb[20].mxu0 }
 0x16d   : > { %v301_v44 = vpop.f32.mrb[21].mxu0  ;;  %v11683_v45 = vpack.i.bf16 %v10782_v42, %v12990_v54 }
 0x16e   : > { %v10783_v47 = vpop.f32.mrb[22].mxu0  ;;  %v11679_v48 = vpack.i.bf16 %v301_v44, %v12995_v56 }
 0x16f   : > { %v304_v49 = vpop.f32.mrb[23].mxu0  ;;  %v11685_v50 = vpack.i.bf16 %v10783_v47, %v12997_v57 }
 0x170   : > { %11676 = vxpose.xlu1.b32.cont [3/16] (narrow) %v11675_v34, 16  ;;  %v11681_v51 = vpack.i.bf16 %v304_v49, %v12999_v58 }
 0x174   : > { %11678 = vxpose.xlu1.b32.cont [4/16] (narrow) %v11677_v38, 16  ;;  %v10786_v52 = vpop.f32.mrb[24].mxu0 }
 0x175   : > { %v317_v53 = vpop.f32.mrb[25].mxu0  ;;  %v11691_v54 = vpack.i.bf16 %v10786_v52, %v13010_v62 }
 0x176   : > { %v10787_v55 = vpop.f32.mrb[26].mxu0  ;;  %v11687_v59 = vpack.i.bf16 %v317_v53, %v13015_v17 }
 0x177   : > { %v320_v60 = vpop.f32.mrb[27].mxu0  ;;  %v11693_v61 = vpack.i.bf16 %v10787_v55, %v13017_v19 }
 0x178   : > { %11680 = vxpose.xlu1.b32.cont [5/16] (narrow) %v11679_v48, 16  ;;  %v11689_v56 = vpack.i.bf16 %v320_v60, %v13019_v20 }
 0x17c   : > { %11682 = vxpose.xlu1.b32.cont [6/16] (narrow) %v11681_v51, 16  ;;  %v10790_v57 = vpop.f32.mrb[28].mxu0 }
 0x17d   : > { %v333_v63 = vpop.f32.mrb[29].mxu0  ;;  %v11699_v21 = vpack.i.bf16 %v10790_v57, %v13030_v24 }
 0x17e   : > { %v10791_v58 = vpop.f32.mrb[30].mxu0  ;;  %v11695_v22 = vpack.i.bf16 %v333_v63, %v13035_v26 }
 0x17f   : > { %v336_v23 = vpop.f32.mrb[31].mxu0  ;;  %v11701_v62 = vpack.i.bf16 %v10791_v58, %v13037_v27 }
 0x180   : > { %11684 = vxpose.xlu1.b32.cont [7/16] (narrow) %v11683_v45, 16  ;;  %v11697_v17 = vpack.i.bf16 %v336_v23, %v13039_v28 }
 0x184   : > { %11686 = vxpose.xlu1.b32.cont [8/16] (narrow) %v11685_v50, 16  ;;  %v13076_v25 = vpop.f32.mrb[32].mxu0 }
 0x185   : > { %v13078_v19 = vpop.f32.mrb[33].mxu0 }
 0x186   : > { %v13080_v20 = vpop.f32.mrb[34].mxu0 }
 0x187   : > { %v13082_v29 = vpop.f32.mrb[35].mxu0 }
 0x188   : > { %11688 = vxpose.xlu1.b32.cont [9/16] (narrow) %v11687_v59, 16 }
 0x18c   : > { %11690 = vxpose.xlu1.b32.cont [10/16] (narrow) %v11689_v56, 16  ;;  %v13084_v24 = vpop.f32.mrb[36].mxu0 }
 0x18d   : > { %v13086_v26 = vpop.f32.mrb[37].mxu0 }
 0x18e   : > { %v13088_v30 = vpop.f32.mrb[38].mxu0 }
 0x18f   : > { %v13090_v27 = vpop.f32.mrb[39].mxu0 }
 0x190   : > { %11692 = vxpose.xlu1.b32.cont [11/16] (narrow) %v11691_v54, 16 }
 0x194   : > { %11694 = vxpose.xlu1.b32.cont [12/16] (narrow) %v11693_v61, 16  ;;  %v13092_v28 = vpop.f32.mrb[40].mxu0 }
 0x195   : > { %v13094_v31 = vpop.f32.mrb[41].mxu0 }
 0x196   : > { %v13096_v32 = vpop.f32.mrb[42].mxu0 }
 0x197   : > { %v13098_v33 = vpop.f32.mrb[43].mxu0 }
 0x198   : > { %11696 = vxpose.xlu1.b32.cont [13/16] (narrow) %v11695_v22, 16 }
 0x19c   : > { %11698 = vxpose.xlu1.b32.cont [14/16] (narrow) %v11697_v17, 16  ;;  %v13100_v34 = vpop.f32.mrb[44].mxu0 }
 0x19d   : > { %v13102_v35 = vpop.f32.mrb[45].mxu0 }
 0x19e   : > { %v13104_v36 = vpop.f32.mrb[46].mxu0 }
 0x19f   : > { %v822_v37 = vpop.f32.mrb[47].mxu0 }
 0x1a0   : > { %11700 = vxpose.xlu1.b32.cont [15/16] (narrow) %v11699_v21, 16 }
 0x1a4   : > { %11702 = vxpose.xlu1.b32.end [16/16] (narrow) %v11701_v62, 16  ;;  %v10846_v38 = vpop.f32.mrb[48].mxu0 }
 0x1a5   : > { %v11717_v39 = vpack.i.bf16 %v10846_v38, %v13076_v25  ;;  %v835_v40 = vpop.f32.mrb[49].mxu0 }
 0x1a6   : > { %v10847_v41 = vpop.f32.mrb[50].mxu0  ;;  %v11713_v42 = vpack.i.bf16 %v835_v40, %v13078_v19 }
 0x1a7   : > { %v11719_v43 = vpack.i.bf16 %v10847_v41, %v13080_v20  ;;  %v838_v44 = vpop.f32.mrb[51].mxu0 }
 0x1a8   : > { %v11715_v45 = vpack.i.bf16 %v838_v44, %v13082_v29 }
 0x1ac   : > { %v10850_v46 = vpop.f32.mrb[52].mxu0 }
 0x1ad   : > { %v11725_v47 = vpack.i.bf16 %v10850_v46, %v13084_v24  ;;  %v851_v48 = vpop.f32.mrb[53].mxu0 }
 0x1ae   : > { %v11721_v49 = vpack.i.bf16 %v851_v48, %v13086_v26  ;;  %v10851_v50 = vpop.f32.mrb[54].mxu0 }
 0x1af   : > { %v11727_v51 = vpack.i.bf16 %v10851_v50, %v13088_v30  ;;  %v854_v52 = vpop.f32.mrb[55].mxu0 }
 0x1b0   : > { %v11723_v53 = vpack.i.bf16 %v854_v52, %v13090_v27 }
 0x1b4   : > { %v10854_v54 = vpop.f32.mrb[56].mxu0 }
 0x1b5   : > { %v11733_v55 = vpack.i.bf16 %v10854_v54, %v13092_v28  ;;  %v867_v59 = vpop.f32.mrb[57].mxu0  ;;  %v12139_v54 = vld [vmem:[%s15260_s3 + $0x100] ss:$8 sps:$4 sm:$0xff]  }
 0x1b6   : > { %v11729_v60 = vpack.i.bf16 %v867_v59, %v13094_v31  ;;  %v10855_v61 = vpop.f32.mrb[58].mxu0  ;;  %v12144_v59 = vld [vmem:[%s15260_s3 + $0x114] ss:$8 sps:$4 sm:$0xff]  }
 0x1b7   : > { %v11735_v56 = vpack.i.bf16 %v10855_v61, %v13096_v32  ;;  %v870_v57 = vpop.f32.mrb[59].mxu0  ;;  %v12147_v61 = vld [vmem:[%s15260_s3 + $0x124] ss:$8 sps:$4 sm:$0xff]  }
 0x1b8   : > { %v11731_v63 = vpack.i.bf16 %v870_v57, %v13098_v33  ;;  %v12150_v57 = vld [vmem:[%s15260_s3 + $0x134] ss:$8 sps:$4 sm:$0xff]  }
 0x1bc   : > { %v10858_v21 = vpop.f32.mrb[60].mxu0 }
 0x1bd   : > { %v11741_v58 = vpack.i.bf16 %v10858_v21, %v13100_v34  ;;  %v883_v22 = vpop.f32.mrb[61].mxu0  ;;  %v12153_v21 = vld [vmem:[%s15260_s3 + $0x144] ss:$8 sps:$4 sm:$0xff]  }
 0x1be   : > { %v11737_v23 = vpack.i.bf16 %v883_v22, %v13102_v35  ;;  %v10859_v62 = vpop.f32.mrb[62].mxu0  ;;  %v12156_v22 = vld [vmem:[%s15260_s3 + $0x154] ss:$8 sps:$4 sm:$0xff]  }
 0x1bf   : > { %v11743_v17 = vpack.i.bf16 %v10859_v62, %v13104_v36  ;;  %v886_v25 = vpop.f32.mrb[63].mxu0  ;;  %v12154_v62 = vld [vmem:[%s15260_s3 + $0x150] ss:$8 sps:$4 sm:$0xff]  }
 0x1c0   : > { %v11739_v19 = vpack.i.bf16 %v886_v25, %v822_v37 }
 0x1e8   : > { %v11703_v20 = vpop.trf.xlu1 }
 0x1e9   : > { %v11707_v24 = vunpack.i.h.bf16 %v11703_v20  ;;  %v11704_v26 = vunpack.i.l.bf16 %v11703_v20  ;;  %v12162_v20 = vld [vmem:[%s15260_s3 + $0x174] ss:$8 sps:$4 sm:$0xff]  }
 0x1ec   : > { %v11708_v29 = vpop.trf.xlu1 }
 0x1ed   : > { %v11712_v30 = vunpack.i.h.bf16 %v11708_v29  ;;  %v11709_v27 = vunpack.i.l.bf16 %v11708_v29 }
 0x1ef   : > { %v413_v28 = vpack.c.bf16 %v11712_v30, %v11707_v24  ;;  %v412_v31 = vpack.c.bf16 %v11709_v27, %v11704_v26  ;;  %v12160_v24 = vld [vmem:[%s15260_s3 + $0x170] ss:$8 sps:$4 sm:$0xff]   ;;  %v12165_v26 = vld [vmem:[%s15260_s3 + $0x184] ss:$8 sps:$4 sm:$0xff]   ;;  %v12163_v27 = vld [vmem:[%s15260_s3 + $0x180] ss:$8 sps:$4 sm:$0xff]  }
 0x1f1   : > { %430 = vxpose.xlu1.c.b16.start.end [1/1] (short) %v413_v28, 128  ;;  %414 = vxpose.xlu0.c.b16.start.end [1/1] (short) %v412_v31, 128 }
 0x1f2   : > { %1791 = vmatprep.mubr.bf16.mxu0 %v412_v31 }
 0x1f3   : > { %1792 = vmatmul.mubr.bf16.vlgmr.msra.gmra.mrb[64].mxu0 %v12871_v12 }
 0x1f4   : > { %1801 = vmatprep.mubr.bf16.mxu0 %v413_v28  ;;  %v12168_v28 = vld [vmem:[%s15260_s3 + $0x194] ss:$8 sps:$4 sm:$0xff]  }
 0x1fb   : > { %1802 = vmatmul.mubr.bf16.gmra.mrb[68].mxu0 %v12890_v15 }
 0x211   : > { %11714 = vxpose.xlu0.b32.start [1/16] (narrow) %v11713_v42, 16 }
 0x215   : > { %11716 = vxpose.xlu0.b32.cont [2/16] (narrow) %v11715_v45, 16 }
 0x219   : > { %11718 = vxpose.xlu0.b32.cont [3/16] (narrow) %v11717_v39, 16 }
 0x21d   : > { %11720 = vxpose.xlu0.b32.cont [4/16] (narrow) %v11719_v43, 16 }
 0x221   : > { %11722 = vxpose.xlu0.b32.cont [5/16] (narrow) %v11721_v49, 16 }
 0x225   : > { %11724 = vxpose.xlu0.b32.cont [6/16] (narrow) %v11723_v53, 16 }
 0x229   : > { %11726 = vxpose.xlu0.b32.cont [7/16] (narrow) %v11725_v47, 16 }
 0x22d   : > { %11728 = vxpose.xlu0.b32.cont [8/16] (narrow) %v11727_v51, 16 }
 0x231   : > { %11730 = vxpose.xlu0.b32.cont [9/16] (narrow) %v11729_v60, 16  ;;  %v12142_v60 = vld [vmem:[%s15260_s3 + $0x110] ss:$8 sps:$4 sm:$0xff]  }
 0x235   : > { %11732 = vxpose.xlu0.b32.cont [10/16] (narrow) %v11731_v63, 16  ;;  %v12148_v63 = vld [vmem:[%s15260_s3 + $0x130] ss:$8 sps:$4 sm:$0xff]  }
 0x239   : > { %11734 = vxpose.xlu0.b32.cont [11/16] (narrow) %v11733_v55, 16  ;;  %v12141_v55 = vld [vmem:[%s15260_s3 + $0x104] ss:$8 sps:$4 sm:$0xff]  }
 0x23a   : > { %1812 = vmatprep.subr.bf16.mxu0 %v12141_v55 }
 0x23b   : > { %1813 = vmatpush1.bf16.msra.mxu0 %v12139_v54  ;;  %v12181_v54 = vld [vmem:[%s15260_s3 + $0x1e0] ss:$8 sps:$4 sm:$0xff]  }
 0x23c   : > { %1814 = vmatprep.subr.bf16.mxu0 %v12144_v59  ;;  %v12186_v59 = vld [vmem:[%s15260_s3 + $0x1f4] ss:$8 sps:$4 sm:$0xff]  }
 0x23d   : > { %11736 = vxpose.xlu0.b32.cont [12/16] (narrow) %v11735_v56, 16  ;;  %v12145_v56 = vld [vmem:[%s15260_s3 + $0x120] ss:$8 sps:$4 sm:$0xff]  }
 0x23f   : > { %1815 = vmatpush1.bf16.msra.mxu0 %v12142_v60 }
 0x240   : > { %1816 = vmatprep.subr.bf16.mxu0 %v12147_v61 }
 0x241   : > { %11738 = vxpose.xlu0.b32.cont [13/16] (narrow) %v11737_v23, 16 }
 0x243   : > { %1817 = vmatpush1.bf16.msra.mxu0 %v12145_v56  ;;  %v12184_v56 = vld [vmem:[%s15260_s3 + $0x1f0] ss:$8 sps:$4 sm:$0xff]  }
 0x244   : > { %1818 = vmatprep.subr.bf16.mxu0 %v12150_v57 }
 0x245   : > { %11740 = vxpose.xlu0.b32.cont [14/16] (narrow) %v11739_v19, 16  ;;  %v12157_v19 = vld [vmem:[%s15260_s3 + $0x160] ss:$8 sps:$4 sm:$0xff]  }
 0x247   : > { %1819 = vmatpush1.bf16.msra.mxu0 %v12148_v63 }
 0x248   : > { %1820 = vmatprep.subr.bf16.mxu0 %v12153_v21 }
 0x249   : > { %11742 = vxpose.xlu0.b32.cont [15/16] (narrow) %v11741_v58, 16  ;;  %v12151_v58 = vld [vmem:[%s15260_s3 + $0x140] ss:$8 sps:$4 sm:$0xff]  }
 0x24b   : > { %1821 = vmatpush1.bf16.msra.mxu0 %v12151_v58 }
 0x24c   : > { %1822 = vmatprep.subr.bf16.mxu0 %v12156_v22 }
 0x24d   : > { %11744 = vxpose.xlu0.b32.end [16/16] (narrow) %v11743_v17, 16  ;;  %v12159_v17 = vld [vmem:[%s15260_s3 + $0x164] ss:$8 sps:$4 sm:$0xff]  }
 0x24f   : > { %1823 = vmatpush1.bf16.msra.mxu0 %v12154_v62 }
 0x250   : > { %1824 = vmatprep.subr.bf16.mxu0 %v12159_v17 }
 0x253   : > { %1825 = vmatpush1.bf16.msra.mxu0 %v12157_v19 }
 0x254   : > { %1826 = vmatprep.subr.bf16.mxu0 %v12162_v20 }
 0x257   : > { %v422_v12 = vpop.trf.xlu0  ;;  %v438_v36 = vpop.trf.xlu1  ;;  %1827 = vmatpush1.bf16.msra.mxu0 %v12160_v24 }
 0x258   : > { %10794 = vmatprep.mubr.msk.bf16.mxu1 %vm135_vm0, %v422_v12  ;;  %1828 = vmatprep.subr.bf16.mxu0 %v12165_v26  ;;  %v12166_v12 = vld [vmem:[%s15260_s3 + $0x190] ss:$8 sps:$4 sm:$0xff]  }
 0x25b   : > { %v423_v15 = vpop.trf.xlu0  ;;  %v439_v39 = vpop.trf.xlu1  ;;  %1829 = vmatpush1.bf16.msra.mxu0 %v12163_v27 }
 0x25c   : > { %10795 = vmatmul.mubr.msk.bf16.vlgmr.msra.gmra.mrb[0].mxu1 %vm135_vm0, %v423_v15  ;;  %1830 = vmatprep.subr.bf16.mxu0 %v12168_v28  ;;  %v12171_v15 = vld [vmem:[%s15260_s3 + $0x1a4] ss:$8 sps:$4 sm:$0xff]  }
 0x25d   : > { %10861 = vmatpush3.bf16.xpose.msra.mxu1 %v12904_v18 }
 0x25e   : > { %11578 = vmatprep.subr.msk.bf16.mxu1 %vm135_vm0, %v12875_v13 }
 0x25f   : > { %v424_v32 = vpop.trf.xlu0  ;;  %v440_v40 = vpop.trf.xlu1  ;;  %1831 = vmatpush1.bf16.msra.mxu0 %v12166_v12 }
 0x260   : > { %10798 = vmatprep.mubr.msk.bf16.mxu1 %vm135_vm0, %v424_v32  ;;  %1832 = vmatprep.subr.bf16.mxu0 %v12171_v15 }
 0x263   : > { %v425_v33 = vpop.trf.xlu0  ;;  %v441_v41 = vpop.trf.xlu1 }
 0x264   : > { %10799 = vmatmul.mubr.msk.bf16.gmra.mrb[4].mxu1 %vm135_vm0, %v425_v33  ;;  %v12169_v33 = vld [vmem:[%s15260_s3 + $0x1a0] ss:$8 sps:$4 sm:$0xff]  }
 0x265   : > { %1833 = vmatpush1.bf16.msra.mxu0 %v12169_v33 }
 0x267   : > { %v426_v34 = vpop.trf.xlu0  ;;  %v442_v42 = vpop.trf.xlu1 }
 0x268   : > { %10802 = vmatprep.mubr.msk.bf16.mxu1 %vm135_vm0, %v426_v34  ;;  %v12174_v34 = vld [vmem:[%s15260_s3 + $0x1b4] ss:$8 sps:$4 sm:$0xff]  }
 0x269   : > { %1834 = vmatprep.subr.bf16.mxu0 %v12174_v34 }
 0x26b   : > { %v427_v35 = vpop.trf.xlu0  ;;  %v443_v43 = vpop.trf.xlu1 }
 0x26c   : > { %10803 = vmatmul.mubr.msk.bf16.gmra.mrb[8].mxu1 %vm135_vm0, %v427_v35 }
 0x26f   : > { %v428_v37 = vpop.trf.xlu0  ;;  %v444_v44 = vpop.trf.xlu1 }
 0x270   : > { %10806 = vmatprep.mubr.msk.bf16.mxu1 %vm135_vm0, %v428_v37  ;;  %v12177_v37 = vld [vmem:[%s15260_s3 + $0x1c4] ss:$8 sps:$4 sm:$0xff]  }
 0x273   : > { %v429_v38 = vpop.trf.xlu0  ;;  %v445_v46 = vpop.trf.xlu1 }
 0x274   : > { %10807 = vmatmul.mubr.msk.bf16.gmra.mrb[12].mxu1 %vm135_vm0, %v429_v38 }
 0x275   : > { %10810 = vmatprep.mubr.msk.bf16.mxu1 %vm135_vm0, %v438_v36  ;;  %v12172_v36 = vld [vmem:[%s15260_s3 + $0x1b0] ss:$8 sps:$4 sm:$0xff]  }
 0x276   : > { %1835 = vmatpush1.bf16.msra.mxu0 %v12172_v36 }
 0x277   : > { %1836 = vmatprep.subr.bf16.mxu0 %v12177_v37 }
 0x27c   : > { %10811 = vmatmul.mubr.msk.bf16.gmra.mrb[16].mxu1 %vm135_vm0, %v439_v39  ;;  %v12175_v39 = vld [vmem:[%s15260_s3 + $0x1c0] ss:$8 sps:$4 sm:$0xff]  }
 0x27d   : > { %10814 = vmatprep.mubr.msk.bf16.mxu1 %vm135_vm0, %v440_v40  ;;  %v12180_v40 = vld [vmem:[%s15260_s3 + $0x1d4] ss:$8 sps:$4 sm:$0xff]   ;;  %1837 = vmatpush1.bf16.msra.mxu0 %v12175_v39 }
 0x27e   : > { %1838 = vmatprep.subr.bf16.mxu0 %v12180_v40 }
 0x284   : > { %10815 = vmatmul.mubr.msk.bf16.gmra.mrb[20].mxu1 %vm135_vm0, %v441_v41 }
 0x285   : > { %10818 = vmatprep.mubr.msk.bf16.mxu1 %vm135_vm0, %v442_v42  ;;  %v12178_v42 = vld [vmem:[%s15260_s3 + $0x1d0] ss:$8 sps:$4 sm:$0xff]  }
 0x286   : > { %1839 = vmatpush1.bf16.msra.mxu0 %v12178_v42 }
 0x28c   : > { %10819 = vmatmul.mubr.msk.bf16.gmra.mrb[24].mxu1 %vm135_vm0, %v443_v43 }
 0x28d   : > { %10822 = vmatprep.mubr.msk.bf16.mxu1 %vm135_vm0, %v444_v44 }
 0x291   : > { %v11745_v45 = vpop.trf.xlu0 }
 0x292   : > { %v11746_v49 = vunpack.i.l.bf16 %v11745_v45  ;;  %v11749_v52 = vunpack.i.h.bf16 %v11745_v45 }
 0x294   : > { %10823 = vmatmul.mubr.msk.bf16.gmra.mrb[28].mxu1 %vm135_vm0, %v445_v46 }
 0x295   : > { %v11750_v47 = vpop.trf.xlu0 }
 0x296   : > { %v11751_v48 = vunpack.i.l.bf16 %v11750_v47  ;;  %v11754_v51 = vunpack.i.h.bf16 %v11750_v47 }
 0x298   : > { %v962_v50 = vpack.c.bf16 %v11751_v48, %v11746_v49  ;;  %v13142_v53 = vpack.c.bf16 %v11754_v51, %v11749_v52  ;;  %v12183_v51 = vld [vmem:[%s15260_s3 + $0x1e4] ss:$8 sps:$4 sm:$0xff]  }
 0x299   : > { %1840 = vmatprep.subr.bf16.mxu0 %v12183_v51  ;;  %v12193_v51 = vld [vmem:[%s15260_s3 + $0x220] ss:$8 sps:$4 sm:$0xff]  }
 0x29a   : > { %964 = vxpose.xlu1.c.b16.start.end [1/1] (short) %v962_v50, 128  ;;  %1844 = vmatprep.mubr.bf16.mxu0 %v962_v50 }
 0x29b   : > { %1841 = vmatpush1.bf16.msra.mxu0 %v12181_v54  ;;  %v12201_v54 = vld [vmem:[%s15260_s3 + $0x244] ss:$8 sps:$4 sm:$0xff]  }
 0x29c   : > { %1842 = vmatprep.subr.bf16.mxu0 %v12186_v59  ;;  %v12204_v59 = vld [vmem:[%s15260_s3 + $0x254] ss:$8 sps:$4 sm:$0xff]  }
 0x29f   : > { %1843 = vmatpush1.bf16.msra.mxu0 %v12184_v56 }
 0x2b7   : > { %980 = vxpose.xlu1.c.b16.start.end [1/1] (short) %v13142_v53, 128 }
 0x300   : > { %v972_v23 = vpop.trf.xlu1 }
 0x301   : > { %10862 = vmatprep.mubr.msk.bf16.mxu1 %vm135_vm0, %v972_v23 }
 0x304   : > { %v973_v25 = vpop.trf.xlu1 }
 0x305   : > { %10863 = vmatmul.mubr.msk.bf16.vlgmr.msra.gmra.mrb[32].mxu1 %vm135_vm0, %v973_v25 }
 0x306   : > { %10895 = vmatpush3.bf16.xpose.msra.mxu1 %v12882_v14 }
 0x307   : > { %11579 = vmatprep.subr.msk.bf16.mxu1 %vm135_vm0, %v12875_v13 }
 0x308   : > { %v974_v29 = vpop.trf.xlu1 }
 0x309   : > { %10866 = vmatprep.mubr.msk.bf16.mxu1 %vm135_vm0, %v974_v29 }
 0x30c   : > { %v975_v30 = vpop.trf.xlu1 }
 0x30d   : > { %10867 = vmatmul.mubr.msk.bf16.gmra.mrb[36].mxu1 %vm135_vm0, %v975_v30 }
 0x310   : > { %v976_v31 = vpop.trf.xlu1 }
 0x311   : > { %10870 = vmatprep.mubr.msk.bf16.mxu1 %vm135_vm0, %v976_v31 }
 0x314   : > { %v977_v32 = vpop.trf.xlu1 }
 0x315   : > { %10871 = vmatmul.mubr.msk.bf16.gmra.mrb[40].mxu1 %vm135_vm0, %v977_v32 }
 0x318   : > { %v978_v35 = vpop.trf.xlu1 }
 0x319   : > { %10874 = vmatprep.mubr.msk.bf16.mxu1 %vm135_vm0, %v978_v35 }
 0x31c   : > { %v979_v38 = vpop.trf.xlu1 }
 0x31d   : > { %10875 = vmatmul.mubr.msk.bf16.gmra.mrb[44].mxu1 %vm135_vm0, %v979_v38 }
 0x320   : > { %v988_v41 = vpop.trf.xlu1 }
 0x321   : > { %10878 = vmatprep.mubr.msk.bf16.mxu1 %vm135_vm0, %v988_v41 }
 0x324   : > { %v989_v43 = vpop.trf.xlu1 }
 0x325   : > { %10879 = vmatmul.mubr.msk.bf16.gmra.mrb[48].mxu1 %vm135_vm0, %v989_v43 }
 0x328   : > { %v990_v44 = vpop.trf.xlu1 }
 0x329   : > { %10882 = vmatprep.mubr.msk.bf16.mxu1 %vm135_vm0, %v990_v44  ;;  %v12189_v44 = vld [vmem:[%s15260_s3 + $0x204] ss:$8 sps:$4 sm:$0xff]  }
 0x32a   : > { %1865 = vmatprep.subr.bf16.mxu0 %v12189_v44 }
 0x32c   : > { %v991_v45 = vpop.trf.xlu1 }
 0x32d   : > { %10883 = vmatmul.mubr.msk.bf16.gmra.mrb[52].mxu1 %vm135_vm0, %v991_v45 }
 0x32f   : > { %v10796_v46 = vpop.f32.mrb[0].mxu1 }
 0x330   : > { %v528_v47 = vpop.f32.mrb[1].mxu1  ;;  %v992_v48 = vpop.trf.xlu1 }
 0x331   : > { %655 = vxpose.xlu1.b32.start [1/16] (narrow) %v528_v47, 16  ;;  %v10797_v49 = vpop.f32.mrb[2].mxu1  ;;  %10886 = vmatprep.mubr.msk.bf16.mxu1 %vm135_vm0, %v992_v48  ;;  %v12192_v48 = vld [vmem:[%s15260_s3 + $0x214] ss:$8 sps:$4 sm:$0xff]  }
 0x332   : > { %v531_v50 = vpop.f32.mrb[3].mxu1 }
 0x334   : > { %v993_v52 = vpop.trf.xlu1 }
 0x335   : > { %656 = vxpose.xlu1.b32.cont [2/16] (narrow) %v531_v50, 16  ;;  %10887 = vmatmul.mubr.msk.bf16.gmra.mrb[56].mxu1 %vm135_vm0, %v993_v52  ;;  %v12195_v50 = vld [vmem:[%s15260_s3 + $0x224] ss:$8 sps:$4 sm:$0xff]   ;;  %v12196_v52 = vld [vmem:[%s15260_s3 + $0x230] ss:$8 sps:$4 sm:$0xff]  }
 0x337   : > { %v10800_v55 = vpop.f32.mrb[4].mxu1 }
 0x338   : > { %v544_v60 = vpop.f32.mrb[5].mxu1  ;;  %v994_v61 = vpop.trf.xlu1 }
 0x339   : > { %657 = vxpose.xlu1.b32.cont [3/16] (narrow) %v10796_v46, 16  ;;  %v10801_v57 = vpop.f32.mrb[6].mxu1  ;;  %10890 = vmatprep.mubr.msk.bf16.mxu1 %vm135_vm0, %v994_v61  ;;  %v12187_v46 = vld [vmem:[%s15260_s3 + $0x200] ss:$8 sps:$4 sm:$0xff]  }
 0x33a   : > { %v547_v63 = vpop.f32.mrb[7].mxu1 }
 0x33c   : > { %v995_v21 = vpop.trf.xlu1 }
 0x33d   : > { %658 = vxpose.xlu1.b32.cont [4/16] (narrow) %v10797_v49, 16  ;;  %10891 = vmatmul.mubr.msk.bf16.gmra.mrb[60].mxu1 %vm135_vm0, %v995_v21  ;;  %v12190_v49 = vld [vmem:[%s15260_s3 + $0x210] ss:$8 sps:$4 sm:$0xff]  }
 0x33f   : > { %v10804_v58 = vpop.f32.mrb[8].mxu1 }
 0x340   : > { %v560_v22 = vpop.f32.mrb[9].mxu1 }
 0x341   : > { %659 = vxpose.xlu1.b32.cont [5/16] (narrow) %v544_v60, 16  ;;  %v10805_v23 = vpop.f32.mrb[10].mxu1  ;;  %v12202_v60 = vld [vmem:[%s15260_s3 + $0x250] ss:$8 sps:$4 sm:$0xff]  }
 0x342   : > { %v563_v62 = vpop.f32.mrb[11].mxu1 }
 0x345   : > { %660 = vxpose.xlu1.b32.cont [6/16] (narrow) %v547_v63, 16 }
 0x347   : > { %v10808_v17 = vpop.f32.mrb[12].mxu1 }
 0x348   : > { %v576_v25 = vpop.f32.mrb[13].mxu1 }
 0x349   : > { %661 = vxpose.xlu1.b32.cont [7/16] (narrow) %v10800_v55, 16  ;;  %v10809_v19 = vpop.f32.mrb[14].mxu1  ;;  %v12199_v55 = vld [vmem:[%s15260_s3 + $0x240] ss:$8 sps:$4 sm:$0xff]  }
 0x34a   : > { %v579_v20 = vpop.f32.mrb[15].mxu1 }
 0x34d   : > { %662 = vxpose.xlu1.b32.cont [8/16] (narrow) %v10801_v57, 16 }
 0x34f   : > { %v10812_v29 = vpop.f32.mrb[16].mxu1 }
 0x350   : > { %v592_v24 = vpop.f32.mrb[17].mxu1 }
 0x351   : > { %663 = vxpose.xlu1.b32.cont [9/16] (narrow) %v560_v22, 16  ;;  %687 = vxpose.xlu0.b32.start [1/16] (narrow) %v592_v24, 16  ;;  %v10813_v26 = vpop.f32.mrb[18].mxu1  ;;  %v12210_v24 = vld [vmem:[%s15260_s3 + $0x274] ss:$8 sps:$4 sm:$0xff]  }
 0x352   : > { %v595_v30 = vpop.f32.mrb[19].mxu1 }
 0x355   : > { %664 = vxpose.xlu1.b32.cont [10/16] (narrow) %v563_v62, 16  ;;  %688 = vxpose.xlu0.b32.cont [2/16] (narrow) %v595_v30, 16  ;;  %v12208_v30 = vld [vmem:[%s15260_s3 + $0x270] ss:$8 sps:$4 sm:$0xff]  }
 0x357   : > { %v10816_v27 = vpop.f32.mrb[20].mxu1 }
 0x358   : > { %v608_v28 = vpop.f32.mrb[21].mxu1 }
 0x359   : > { %665 = vxpose.xlu1.b32.cont [11/16] (narrow) %v10804_v58, 16  ;;  %689 = vxpose.xlu0.b32.cont [3/16] (narrow) %v10812_v29, 16  ;;  %v10817_v31 = vpop.f32.mrb[22].mxu1 }
 0x35a   : > { %v611_v12 = vpop.f32.mrb[23].mxu1 }
 0x35d   : > { %666 = vxpose.xlu1.b32.cont [12/16] (narrow) %v10805_v23, 16  ;;  %690 = vxpose.xlu0.b32.cont [4/16] (narrow) %v10813_v26, 16 }
 0x35f   : > { %v10820_v15 = vpop.f32.mrb[24].mxu1 }
 0x360   : > { %v624_v32 = vpop.f32.mrb[25].mxu1 }
 0x361   : > { %667 = vxpose.xlu1.b32.cont [13/16] (narrow) %v576_v25, 16  ;;  %691 = vxpose.xlu0.b32.cont [5/16] (narrow) %v608_v28, 16  ;;  %v10821_v33 = vpop.f32.mrb[26].mxu1 }
 0x362   : > { %v627_v34 = vpop.f32.mrb[27].mxu1 }
 0x365   : > { %668 = vxpose.xlu1.b32.cont [14/16] (narrow) %v579_v20, 16  ;;  %692 = vxpose.xlu0.b32.cont [6/16] (narrow) %v611_v12, 16  ;;  %v12205_v20 = vld [vmem:[%s15260_s3 + $0x260] ss:$8 sps:$4 sm:$0xff]  }
 0x367   : > { %v10824_v35 = vpop.f32.mrb[28].mxu1 }
 0x368   : > { %v640_v36 = vpop.f32.mrb[29].mxu1 }
 0x369   : > { %669 = vxpose.xlu1.b32.cont [15/16] (narrow) %v10808_v17, 16  ;;  %693 = vxpose.xlu0.b32.cont [7/16] (narrow) %v10816_v27, 16  ;;  %v10825_v37 = vpop.f32.mrb[30].mxu1 }
 0x36a   : > { %v643_v38 = vpop.f32.mrb[31].mxu1 }
 0x36d   : > { %670 = vxpose.xlu1.b32.end [16/16] (narrow) %v10809_v19, 16  ;;  %694 = vxpose.xlu0.b32.cont [8/16] (narrow) %v10817_v31, 16  ;;  %v12207_v19 = vld [vmem:[%s15260_s3 + $0x264] ss:$8 sps:$4 sm:$0xff]   ;;  %v15267_v31 = vmov 0  }
 0x371   : > { %695 = vxpose.xlu0.b32.cont [9/16] (narrow) %v624_v32, 16 }
 0x375   : > { %696 = vxpose.xlu0.b32.cont [10/16] (narrow) %v627_v34, 16 }
 0x379   : > { %697 = vxpose.xlu0.b32.cont [11/16] (narrow) %v10820_v15, 16 }
 0x37d   : > { %698 = vxpose.xlu0.b32.cont [12/16] (narrow) %v10821_v33, 16 }
 0x381   : > { %699 = vxpose.xlu0.b32.cont [13/16] (narrow) %v640_v36, 16 }
 0x385   : > { %700 = vxpose.xlu0.b32.cont [14/16] (narrow) %v643_v38, 16 }
 0x389   : > { %701 = vxpose.xlu0.b32.cont [15/16] (narrow) %v10824_v35, 16 }
 0x38d   : > { %702 = vxpose.xlu0.b32.end [16/16] (narrow) %v10825_v37, 16 }
 0x3b1   : > { %v671_v39 = vpop.trf.xlu1 }
 0x3b2   : > { %v719_v40 = vmul.f32 2.0, %v671_v39 }
 0x3b4   : > { %v723_v42 = vsub.f32 %v719_v40, %v12744_v11 }
 0x3b5   : > { %v672_v41 = vpop.trf.xlu1 }
 0x3b6   : > { %v720_v43 = vmul.f32 2.0, %v672_v41 }
 0x3b8   : > { %v724_v45 = vsub.f32 %v720_v43, %v12740_v10 }
 0x3ba   : > { %v727_v47 = vpack.c.bf16 %v724_v45, %v723_v42 }
 0x3bc   : > { %1845 = vmatmul.mubr.bf16.vlgmr.msra.gmra.mrb[64].mxu0 %v727_v47 }
 0x3bd   : > { %1854 = vmatprep.mubr.bf16.mxu0 %v13142_v53  ;;  %1866 = vmatpush1.bf16.msra.mxu0 %v12187_v46  ;;  %v12198_v53 = vld [vmem:[%s15260_s3 + $0x234] ss:$8 sps:$4 sm:$0xff]  }
 0x3be   : > { %1867 = vmatprep.subr.bf16.mxu0 %v12192_v48 }
 0x3c1   : > { %1868 = vmatpush1.bf16.msra.mxu0 %v12190_v49 }
 0x3c2   : > { %1869 = vmatprep.subr.bf16.mxu0 %v12195_v50 }
 0x3c5   : > { %1870 = vmatpush1.bf16.msra.mxu0 %v12193_v51 }
 0x3c6   : > { %1871 = vmatprep.subr.bf16.mxu0 %v12198_v53 }
 0x3c9   : > { %1872 = vmatpush1.bf16.msra.mxu0 %v12196_v52 }
 0x3ca   : > { %1873 = vmatprep.subr.bf16.mxu0 %v12201_v54 }
 0x3cd   : > { %1874 = vmatpush1.bf16.msra.mxu0 %v12199_v55 }
 0x3ce   : > { %1875 = vmatprep.subr.bf16.mxu0 %v12204_v59 }
 0x3d1   : > { %v703_v61 = vpop.trf.xlu0  ;;  %1876 = vmatpush1.bf16.msra.mxu0 %v12202_v60 }
 0x3d2   : > { %v721_v56 = vmul.f32 2.0, %v703_v61  ;;  %1877 = vmatprep.subr.bf16.mxu0 %v12207_v19  ;;  %v78_v19 = vld [vmem:[%s13326_s25 + $0xc] sm:$0xff] }
 0x3d4   : > { %v725_v63 = vsub.f32 %v721_v56, %v12736_v9 }
 0x3d5   : > { %v704_v57 = vpop.trf.xlu0  ;;  %1878 = vmatpush1.bf16.msra.mxu0 %v12205_v20 }
 0x3d6   : > { %v722_v21 = vmul.f32 2.0, %v704_v57  ;;  %1879 = vmatprep.subr.bf16.mxu0 %v12210_v24 }
 0x3d8   : > { %v10864_v58 = vpop.f32.mrb[32].mxu1  ;;  %v726_v22 = vsub.f32 %v722_v21, %v12732_v8 }
 0x3d9   : > { %v1078_v23 = vpop.f32.mrb[33].mxu1  ;;  %1880 = vmatpush1.bf16.msra.mxu0 %v12208_v30 }
 0x3da   : > { %1205 = vxpose.xlu0.b32.start [1/16] (narrow) %v1078_v23, 16  ;;  %v10865_v62 = vpop.f32.mrb[34].mxu1  ;;  %v728_v17 = vpack.c.bf16 %v726_v22, %v725_v63  ;;  %11580 = vmatprep.subr.msk.bf16.mxu0 %vm135_vm0, %v12895_v16 }
 0x3db   : > { %v1081_v25 = vpop.f32.mrb[35].mxu1 }
 0x3dc   : > { %1855 = vmatmul.mubr.bf16.gmra.mrb[68].mxu0 %v728_v17 }
 0x3dd   : > { %1897 = vmatprep.mubr.bf16.mxu0 %v15267_v31 }
 0x3de   : > { %1206 = vxpose.xlu0.b32.cont [2/16] (narrow) %v1081_v25, 16  ;;  %v76_v25 = vld [vmem:[%s13326_s25] sm:$0xff] }
 0x3df   : > { %v85_v20 = vunpack.c.h.bf16 %v76_v25 }
 0x3e0   : > { %v10868_v29 = vpop.f32.mrb[36].mxu1 }
 0x3e1   : > { %v1094_v26 = vpop.f32.mrb[37].mxu1 }
 0x3e2   : > { %1207 = vxpose.xlu0.b32.cont [3/16] (narrow) %v10864_v58, 16  ;;  %v10869_v27 = vpop.f32.mrb[38].mxu1 }
 0x3e3   : > { %v1097_v28 = vpop.f32.mrb[39].mxu1 }
 0x3e6   : > { %1208 = vxpose.xlu0.b32.cont [4/16] (narrow) %v10865_v62, 16 }
 0x3e8   : > { %v10872_v12 = vpop.f32.mrb[40].mxu1 }
 0x3e9   : > { %v1110_v15 = vpop.f32.mrb[41].mxu1 }
 0x3ea   : > { %1209 = vxpose.xlu0.b32.cont [5/16] (narrow) %v1094_v26, 16  ;;  %v10873_v32 = vpop.f32.mrb[42].mxu1  ;;  %v88_v26 = vunpack.c.h.bf16 %v78_v19 }
 0x3eb   : > { %v1113_v33 = vpop.f32.mrb[43].mxu1 }
 0x3ee   : > { %1210 = vxpose.xlu0.b32.cont [6/16] (narrow) %v1097_v28, 16 }
 0x3f0   : > { %v10876_v34 = vpop.f32.mrb[44].mxu1 }
 0x3f1   : > { %v1126_v35 = vpop.f32.mrb[45].mxu1 }
 0x3f2   : > { %1211 = vxpose.xlu0.b32.cont [7/16] (narrow) %v10868_v29, 16  ;;  %v10877_v36 = vpop.f32.mrb[46].mxu1  ;;  %v87_v29 = vunpack.c.l.bf16 %v78_v19 }
 0x3f3   : > { %v1129_v37 = vpop.f32.mrb[47].mxu1 }
 0x3f6   : > { %1212 = vxpose.xlu0.b32.cont [8/16] (narrow) %v10869_v27, 16 }
 0x3f8   : > { %v10880_v38 = vpop.f32.mrb[48].mxu1 }
 0x3f9   : > { %v1142_v39 = vpop.f32.mrb[49].mxu1 }
 0x3fa   : > { %1213 = vxpose.xlu0.b32.cont [9/16] (narrow) %v1110_v15, 16  ;;  %1237 = vxpose.xlu1.b32.start [1/16] (narrow) %v1142_v39, 16  ;;  %v10881_v40 = vpop.f32.mrb[50].mxu1  ;;  %v80_v39 = vld [vmem:[%s13326_s25 + $0x18] sm:$0xff] }
 0x3fb   : > { %v1145_v41 = vpop.f32.mrb[51].mxu1 }
 0x3fe   : > { %1214 = vxpose.xlu0.b32.cont [10/16] (narrow) %v1113_v33, 16  ;;  %1238 = vxpose.xlu1.b32.cont [2/16] (narrow) %v1145_v41, 16 }
 0x400   : > { %v10884_v42 = vpop.f32.mrb[52].mxu1 }
 0x401   : > { %v1158_v43 = vpop.f32.mrb[53].mxu1 }
 0x402   : > { %1215 = vxpose.xlu0.b32.cont [11/16] (narrow) %v10872_v12, 16  ;;  %1239 = vxpose.xlu1.b32.cont [3/16] (narrow) %v10880_v38, 16  ;;  %v10885_v44 = vpop.f32.mrb[54].mxu1 }
 0x403   : > { %v1161_v45 = vpop.f32.mrb[55].mxu1 }
 0x406   : > { %1216 = vxpose.xlu0.b32.cont [12/16] (narrow) %v10873_v32, 16  ;;  %1240 = vxpose.xlu1.b32.cont [4/16] (narrow) %v10881_v40, 16  ;;  %v82_v40 = vld [vmem:[%s13326_s25 + $0x24] sm:$0xff] }
 0x408   : > { %v10888_v46 = vpop.f32.mrb[56].mxu1 }
 0x409   : > { %v1174_v47 = vpop.f32.mrb[57].mxu1 }
 0x40a   : > { %1217 = vxpose.xlu0.b32.cont [13/16] (narrow) %v1126_v35, 16  ;;  %1241 = vxpose.xlu1.b32.cont [5/16] (narrow) %v1158_v43, 16  ;;  %v10889_v48 = vpop.f32.mrb[58].mxu1  ;;  %v91_v43 = vunpack.c.h.bf16 %v80_v39 }
 0x40b   : > { %v1177_v49 = vpop.f32.mrb[59].mxu1 }
 0x40e   : > { %1218 = vxpose.xlu0.b32.cont [14/16] (narrow) %v1129_v37, 16  ;;  %1242 = vxpose.xlu1.b32.cont [6/16] (narrow) %v1161_v45, 16  ;;  %v93_v45 = vunpack.c.l.bf16 %v82_v40 }
 0x410   : > { %v10892_v50 = vpop.f32.mrb[60].mxu1 }
 0x411   : > { %v1190_v51 = vpop.f32.mrb[61].mxu1 }
 0x412   : > { %1219 = vxpose.xlu0.b32.cont [15/16] (narrow) %v10876_v34, 16  ;;  %1243 = vxpose.xlu1.b32.cont [7/16] (narrow) %v10884_v42, 16  ;;  %v10893_v53 = vpop.f32.mrb[62].mxu1  ;;  %v90_v42 = vunpack.c.l.bf16 %v80_v39 }
 0x413   : > { %v1193_v52 = vpop.f32.mrb[63].mxu1 }
 0x416   : > { %1220 = vxpose.xlu0.b32.end [16/16] (narrow) %v10877_v36, 16  ;;  %1244 = vxpose.xlu1.b32.cont [8/16] (narrow) %v10885_v44, 16 }
 0x41a   : > { %1245 = vxpose.xlu1.b32.cont [9/16] (narrow) %v1174_v47, 16  ;;  %v94_v47 = vunpack.c.h.bf16 %v82_v40  ;;  %v12211_v40 = vld [vmem:[%s15261_s4 + $0x40] sm:$0xff]  }
 0x41e   : > { %1246 = vxpose.xlu1.b32.cont [10/16] (narrow) %v1177_v49, 16 }
 0x422   : > { %1247 = vxpose.xlu1.b32.cont [11/16] (narrow) %v10888_v46, 16 }
 0x426   : > { %1248 = vxpose.xlu1.b32.cont [12/16] (narrow) %v10889_v48, 16 }
 0x42a   : > { %1249 = vxpose.xlu1.b32.cont [13/16] (narrow) %v1190_v51, 16 }
 0x42e   : > { %1250 = vxpose.xlu1.b32.cont [14/16] (narrow) %v1193_v52, 16 }
 0x432   : > { %1251 = vxpose.xlu1.b32.cont [15/16] (narrow) %v10892_v50, 16 }
 0x436   : > { %1252 = vxpose.xlu1.b32.end [16/16] (narrow) %v10893_v53, 16 }
 0x45a   : > { %v1221_v54 = vpop.trf.xlu0 }
 0x45b   : > { %v1269_v55 = vmul.f32 2.0, %v1221_v54 }
 0x45d   : > { %v1273_v61 = vsub.f32 %v1269_v55, %v12744_v11 }
 0x45e   : > { %v1222_v59 = vpop.trf.xlu0 }
 0x45f   : > { %v1270_v60 = vmul.f32 2.0, %v1222_v59 }
 0x461   : > { %v1274_v56 = vsub.f32 %v1270_v60, %v12740_v10 }
 0x463   : > { %v1277_v57 = vpack.c.bf16 %v1274_v56, %v1273_v61 }
 0x465   : > { %1898 = vmatmul.mubr.bf16.vlgmr.msra.gmra.mrb[64].mxu0 %v1277_v57 }
 0x466   : > { %1907 = vmatprep.mubr.bf16.mxu0 %v15267_v31  ;;  %10963 = vmatpush3.bf16.xpose.msra.mxu0 %v12904_v18 }
 0x467   : > { %10356 = vmatprep.subr.bf16.mxu0 %v12211_v40 }
 0x47a   : > { %v1253_v63 = vpop.trf.xlu1 }
 0x47b   : > { %v1271_v21 = vmul.f32 2.0, %v1253_v63 }
 0x47d   : > { %v1275_v23 = vsub.f32 %v1271_v21, %v12736_v9 }
 0x47e   : > { %v1254_v58 = vpop.trf.xlu1 }
 0x47f   : > { %v1272_v22 = vmul.f32 2.0, %v1254_v58 }
 0x481   : > { %v1276_v62 = vsub.f32 %v1272_v22, %v12732_v8 }
 0x483   : > { %v1278_v17 = vpack.c.bf16 %v1276_v62, %v1275_v23 }
 0x485   : > { %1908 = vmatmul.mubr.bf16.gmra.mrb[68].mxu0 %v1278_v17 }
 0x538   : > { %v13330_v24 = vpop.f32.mrb[64].mxu0 }
 0x539   : > { %v1901_v30 = vpop.f32.mrb[65].mxu0 }
 0x53a   : > { %v1919_v27 = vadd.f32 %v1901_v30, %v85_v20  ;;  %v1903_v28 = vpop.f32.mrb[66].mxu0 }
 0x53b   : > { %v13332_v12 = vadd.f32 %v1903_v28, %v87_v29  ;;  %v1905_v15 = vpop.f32.mrb[67].mxu0 }
 0x53c   : > { %v9668_v32 = vmul.f32 -1.442695, %v1919_v27  ;;  %v1921_v33 = vadd.f32 %v1905_v15, %v88_v26 }
 0x53e   : > { %12571 = vpow2.f32 %v9668_v32  ;;  %v9670_v34 = vmul.f32 -1.442695, %v1921_v33 }
 0x540   : > { %12573 = vpow2.f32 %v9670_v34 }
 0x548   : > { %v12572_v35 = vpop.eup %12571 }
 0x549   : > { %v1951_v36 = vadd.f32 1.0, %v12572_v35 }
 0x54a   : > { %v12574_v37 = vpop.eup %12573 }
 0x54b   : > { %12575 = vrcp.f32 %v1951_v36  ;;  %v1953_v38 = vadd.f32 1.0, %v12574_v37 }
 0x54d   : > { %12577 = vrcp.f32 %v1953_v38 }
 0x555   : > { %v12576_v41 = vpop.eup %12575 }
 0x556   : > { %v13337_v48 = vmul.f32 %v12744_v11, %v12576_v41  ;;  %v12212_v41 = vld [vmem:[%s15261_s4] sm:$0xff]  }
 0x557   : > { %v12578_v44 = vpop.eup %12577 }
 0x558   : > { %v1909_v46 = vpop.f32.mrb[68].mxu0  ;;  %v13340_v49 = vmul.f32 %v12740_v10, %v12578_v44  ;;  %v12215_v44 = vld [vmem:[%s15261_s4 + $0x50] sm:$0xff]  }
 0x559   : > { %v13342_v50 = vadd.f32 %v1909_v46, %v90_v42  ;;  %v1911_v51 = vpop.f32.mrb[69].mxu0  ;;  %v12213_v42 = vld [vmem:[%s15261_s4 + $0x48] sm:$0xff]   ;;  %v12217_v46 = vld [vmem:[%s15261_s4 + $0x58] sm:$0xff]  }
 0x55a   : > { %v1923_v53 = vadd.f32 %v1911_v51, %v91_v43  ;;  %v1913_v52 = vpop.f32.mrb[70].mxu0  ;;  %v13346_v54 = vpack.c.bf16 %v13340_v49, %v13337_v48  ;;  %v12214_v43 = vld [vmem:[%s15261_s4 + $0x8] sm:$0xff]   ;;  %v12219_v51 = vld [vmem:[%s15261_s4 + $0x60] sm:$0xff]  }
 0x55b   : > { %v13348_v55 = vadd.f32 %v1913_v52, %v93_v45  ;;  %v1915_v59 = vpop.f32.mrb[71].mxu0  ;;  %v12216_v45 = vld [vmem:[%s15261_s4 + $0x10] sm:$0xff]   ;;  %v12221_v52 = vld [vmem:[%s15261_s4 + $0x68] sm:$0xff]  }
 0x55c   : > { %v9672_v60 = vmul.f32 -1.442695, %v1923_v53  ;;  %v1925_v61 = vadd.f32 %v1915_v59, %v94_v47  ;;  %1980 = vxpose.xlu0.c.b16.start.end [1/1] (short) %v13346_v54, 128  ;;  %v12218_v47 = vld [vmem:[%s15261_s4 + $0x18] sm:$0xff]   ;;  %v12220_v53 = vld [vmem:[%s15261_s4 + $0x20] sm:$0xff]   ;;  %v12222_v59 = vld [vmem:[%s15261_s4 + $0x28] sm:$0xff]  }
 0x55d   : > { %15310 = vst [vmem:[#allocation18_spill] sm:$0xff] %v13348_v55 }
 0x55e   : > { %12579 = vpow2.f32 %v9672_v60  ;;  %v9674_v56 = vmul.f32 -1.442695, %v1925_v61 }
 0x560   : > { %12581 = vpow2.f32 %v9674_v56 }
 0x568   : > { %v12580_v57 = vpop.eup %12579 }
 0x569   : > { %v1955_v63 = vadd.f32 1.0, %v12580_v57 }
 0x56a   : > { %v12582_v21 = vpop.eup %12581 }
 0x56b   : > { %12583 = vrcp.f32 %v1955_v63  ;;  %v1957_v58 = vadd.f32 1.0, %v12582_v21 }
 0x56d   : > { %12585 = vrcp.f32 %v1957_v58 }
 0x575   : > { %v12584_v22 = vpop.eup %12583 }
 0x576   : > { %v13352_v62 = vmul.f32 %v12736_v9, %v12584_v22 }
 0x577   : > { %v12586_v23 = vpop.eup %12585 }
 0x578   : > { %v13355_v17 = vmul.f32 %v12732_v8, %v12586_v23 }
 0x57a   : > { %v13359_v25 = vpack.c.bf16 %v13355_v17, %v13352_v62 }
 0x57c   : > { %1996 = vxpose.xlu1.c.b16.start.end [1/1] (short) %v13359_v25, 128 }
 0x5c2   : > { %v1988_v19 = vpop.trf.xlu0 }
 0x5c3   : > { %10896 = vmatprep.mubr.msk.bf16.mxu1 %vm135_vm0, %v1988_v19  ;;  %10964 = vmatprep.mubr.msk.bf16.mxu0 %vm135_vm0, %v1988_v19 }
 0x5c6   : > { %v1989_v20 = vpop.trf.xlu0 }
 0x5c7   : > { %10897 = vmatmul.mubr.msk.bf16.vlgmr.msra.gmra.mrb[64].mxu1 %vm135_vm0, %v1989_v20  ;;  %10965 = vmatmul.mubr.msk.bf16.vlgmr.msra.gmra.mrb[72].mxu0 %vm135_vm0, %v1989_v20 }
 0x5c8   : > { %10929 = vmatpush3.bf16.xpose.msra.mxu1 %v12882_v14  ;;  %10357 = vmatpush3.bf16.msra.mxu0 %v12212_v41 }
 0x5c9   : > { %11581 = vmatprep.subr.msk.bf16.mxu1 %vm135_vm0, %v12895_v16  ;;  %10358 = vmatprep.subr.bf16.mxu0 %v12213_v42 }
 0x5ca   : > { %v1990_v29 = vpop.trf.xlu0 }
 0x5cb   : > { %10900 = vmatprep.mubr.msk.bf16.mxu1 %vm135_vm0, %v1990_v29  ;;  %10968 = vmatprep.mubr.msk.bf16.mxu0 %vm135_vm0, %v1990_v29 }
 0x5cc   : > { %10359 = vmatpush3.bf16.msra.mxu0 %v12214_v43 }
 0x5cd   : > { %10360 = vmatprep.subr.bf16.mxu0 %v12215_v44 }
 0x5ce   : > { %v1991_v26 = vpop.trf.xlu0 }
 0x5cf   : > { %10901 = vmatmul.mubr.msk.bf16.gmra.mrb[68].mxu1 %vm135_vm0, %v1991_v26  ;;  %10969 = vmatmul.mubr.msk.bf16.gmra.mrb[76].mxu0 %vm135_vm0, %v1991_v26 }
 0x5d0   : > { %10361 = vmatpush3.bf16.msra.mxu0 %v12216_v45 }
 0x5d1   : > { %10362 = vmatprep.subr.bf16.mxu0 %v12217_v46 }
 0x5d2   : > { %v1992_v30 = vpop.trf.xlu0 }
 0x5d3   : > { %10904 = vmatprep.mubr.msk.bf16.mxu1 %vm135_vm0, %v1992_v30  ;;  %10972 = vmatprep.mubr.msk.bf16.mxu0 %vm135_vm0, %v1992_v30 }
 0x5d4   : > { %10363 = vmatpush3.bf16.msra.mxu0 %v12218_v47 }
 0x5d5   : > { %10364 = vmatprep.subr.bf16.mxu0 %v12219_v51 }
 0x5d6   : > { %v1993_v27 = vpop.trf.xlu0 }
 0x5d7   : > { %10905 = vmatmul.mubr.msk.bf16.gmra.mrb[72].mxu1 %vm135_vm0, %v1993_v27  ;;  %10973 = vmatmul.mubr.msk.bf16.gmra.mrb[80].mxu0 %vm135_vm0, %v1993_v27 }
 0x5d8   : > { %10365 = vmatpush3.bf16.msra.mxu0 %v12220_v53 }
 0x5d9   : > { %10366 = vmatprep.subr.bf16.mxu0 %v12221_v52  ;;  %v12225_v52 = vld [vmem:[%s15261_s4 + $0x78] sm:$0xff]  }
 0x5da   : > { %v1994_v28 = vpop.trf.xlu0 }
 0x5db   : > { %10908 = vmatprep.mubr.msk.bf16.mxu1 %vm135_vm0, %v1994_v28  ;;  %10976 = vmatprep.mubr.msk.bf16.mxu0 %vm135_vm0, %v1994_v28 }
 0x5dc   : > { %10367 = vmatpush3.bf16.msra.mxu0 %v12222_v59 }
 0x5de   : > { %v1995_v15 = vpop.trf.xlu0 }
 0x5df   : > { %10909 = vmatmul.mubr.msk.bf16.gmra.mrb[76].mxu1 %vm135_vm0, %v1995_v15  ;;  %10977 = vmatmul.mubr.msk.bf16.gmra.mrb[84].mxu0 %vm135_vm0, %v1995_v15 }
 0x5e2   : > { %v2004_v32 = vpop.trf.xlu1 }
 0x5e3   : > { %10912 = vmatprep.mubr.msk.bf16.mxu1 %vm135_vm0, %v2004_v32  ;;  %10980 = vmatprep.mubr.msk.bf16.mxu0 %vm135_vm0, %v2004_v32 }
 0x5e6   : > { %v2005_v33 = vpop.trf.xlu1 }
 0x5e7   : > { %10913 = vmatmul.mubr.msk.bf16.gmra.mrb[80].mxu1 %vm135_vm0, %v2005_v33  ;;  %10981 = vmatmul.mubr.msk.bf16.gmra.mrb[88].mxu0 %vm135_vm0, %v2005_v33 }
 0x5ea   : > { %v2006_v34 = vpop.trf.xlu1 }
 0x5eb   : > { %10916 = vmatprep.mubr.msk.bf16.mxu1 %vm135_vm0, %v2006_v34  ;;  %10984 = vmatprep.mubr.msk.bf16.mxu0 %vm135_vm0, %v2006_v34 }
 0x5ee   : > { %v2007_v35 = vpop.trf.xlu1 }
 0x5ef   : > { %10917 = vmatmul.mubr.msk.bf16.gmra.mrb[84].mxu1 %vm135_vm0, %v2007_v35  ;;  %10985 = vmatmul.mubr.msk.bf16.gmra.mrb[92].mxu0 %vm135_vm0, %v2007_v35 }
 0x5f2   : > { %v2008_v36 = vpop.trf.xlu1 }
 0x5f3   : > { %10920 = vmatprep.mubr.msk.bf16.mxu1 %vm135_vm0, %v2008_v36  ;;  %10988 = vmatprep.mubr.msk.bf16.mxu0 %vm135_vm0, %v2008_v36 }
 0x5f6   : > { %v2009_v37 = vpop.trf.xlu1 }
 0x5f7   : > { %10921 = vmatmul.mubr.msk.bf16.gmra.mrb[88].mxu1 %vm135_vm0, %v2009_v37  ;;  %10989 = vmatmul.mubr.msk.bf16.gmra.mrb[96].mxu0 %vm135_vm0, %v2009_v37 }
 0x5fa   : > { %v2010_v38 = vpop.trf.xlu1 }
 0x5fb   : > { %10924 = vmatprep.mubr.msk.bf16.mxu1 %vm135_vm0, %v2010_v38  ;;  %10992 = vmatprep.mubr.msk.bf16.mxu0 %vm135_vm0, %v2010_v38 }
 0x5fe   : > { %v2011_v39 = vpop.trf.xlu1 }
 0x5ff   : > { %10925 = vmatmul.mubr.msk.bf16.gmra.mrb[92].mxu1 %vm135_vm0, %v2011_v39  ;;  %10993 = vmatmul.mubr.msk.bf16.gmra.mrb[100].mxu0 %vm135_vm0, %v2011_v39 }
 0x69a   : > { %v13433_v60 = vpop.f32.mrb[64].mxu1  ;;  %v13435_v61 = vpop.f32.mrb[72].mxu0 }
 0x69b   : > { %v2094_v56 = vpop.f32.mrb[65].mxu1  ;;  %v13437_v57 = vpop.f32.mrb[73].mxu0 }
 0x69c   : > { %v13439_v63 = vpop.f32.mrb[66].mxu1  ;;  %v13441_v21 = vpop.f32.mrb[74].mxu0 }
 0x69d   : > { %v2097_v58 = vpop.f32.mrb[67].mxu1  ;;  %v13443_v22 = vpop.f32.mrb[75].mxu0 }
 0x6a2   : > { %v13445_v23 = vpop.f32.mrb[68].mxu1  ;;  %v13447_v19 = vpop.f32.mrb[76].mxu0 }
 0x6a3   : > { %v13449_v20 = vpop.f32.mrb[69].mxu1  ;;  %v13451_v29 = vpop.f32.mrb[77].mxu0 }
 0x6a4   : > { %v13453_v26 = vpop.f32.mrb[70].mxu1  ;;  %v13455_v30 = vpop.f32.mrb[78].mxu0 }
 0x6a5   : > { %v13457_v27 = vpop.f32.mrb[71].mxu1  ;;  %v13459_v28 = vpop.f32.mrb[79].mxu0 }
 0x6aa   : > { %v13461_v15 = vpop.f32.mrb[72].mxu1  ;;  %v13463_v32 = vpop.f32.mrb[80].mxu0 }
 0x6ab   : > { %v13465_v33 = vpop.f32.mrb[73].mxu1  ;;  %v13467_v34 = vpop.f32.mrb[81].mxu0 }
 0x6ac   : > { %v13469_v35 = vpop.f32.mrb[74].mxu1  ;;  %v13471_v36 = vpop.f32.mrb[82].mxu0 }
 0x6ad   : > { %v13473_v37 = vpop.f32.mrb[75].mxu1  ;;  %v13475_v38 = vpop.f32.mrb[83].mxu0 }
 0x6b2   : > { %v13477_v39 = vpop.f32.mrb[76].mxu1  ;;  %v13479_v40 = vpop.f32.mrb[84].mxu0 }
 0x6b3   : > { %v13481_v41 = vpop.f32.mrb[77].mxu1  ;;  %v13483_v42 = vpop.f32.mrb[85].mxu0 }
 0x6b4   : > { %v13485_v43 = vpop.f32.mrb[78].mxu1  ;;  %v13487_v44 = vpop.f32.mrb[86].mxu0 }
 0x6b5   : > { %v13489_v45 = vpop.f32.mrb[79].mxu1  ;;  %v13491_v46 = vpop.f32.mrb[87].mxu0 }
 0x6ba   : > { %v10914_v47 = vpop.f32.mrb[80].mxu1  ;;  %v13493_v51 = vpop.f32.mrb[88].mxu0 }
 0x6bb   : > { %v11759_v53 = vpack.i.bf16 %v10914_v47, %v13433_v60  ;;  %v2158_v59 = vpop.f32.mrb[81].mxu1  ;;  %v13498_v31 = vpop.f32.mrb[89].mxu0 }
 0x6bc   : > { %v10915_v0 = vpop.f32.mrb[82].mxu1  ;;  %v13500_v1 = vpop.f32.mrb[90].mxu0  ;;  %v11755_v2 = vpack.i.bf16 %v2158_v59, %v2094_v56  ;;  %v12223_v56 = vld [vmem:[%s15261_s4 + $0x70] sm:$0xff]  }
 0x6bd   : > { %v11761_v4 = vpack.i.bf16 %v10915_v0, %v13439_v63  ;;  %v2161_v6 = vpop.f32.mrb[83].mxu1  ;;  %v13507_v60 = vpop.f32.mrb[91].mxu0  ;;  %v12224_v59 = vld [vmem:[%s15261_s4 + $0x30] sm:$0xff]   ;;  %10368 = vmatprep.subr.bf16.mxu0 %v12223_v56 }
 0x6be   : > { %v11757_v47 = vpack.i.bf16 %v2161_v6, %v2097_v58  ;;  %11756 = vxpose.xlu0.b32.start [1/16] (narrow) %v11755_v2, 16  ;;  %10369 = vmatpush3.bf16.msra.mxu0 %v12224_v59 }
 0x6bf   : > { %10370 = vmatprep.subr.bf16.mxu0 %v12225_v52 }
 0x6c2   : > { %11758 = vxpose.xlu0.b32.cont [2/16] (narrow) %v11757_v47, 16  ;;  %v10918_v0 = vpop.f32.mrb[84].mxu1  ;;  %v13517_v63 = vpop.f32.mrb[92].mxu0  ;;  %v12226_v47 = vld [vmem:[%s15261_s4 + $0x38] sm:$0xff]  }
 0x6c3   : > { %v11767_v6 = vpack.i.bf16 %v10918_v0, %v13445_v23  ;;  %v2174_v2 = vpop.f32.mrb[85].mxu1  ;;  %v13522_v5 = vpop.f32.mrb[93].mxu0  ;;  %10371 = vmatpush3.bf16.msra.mxu0 %v12226_v47 }
 0x6c4   : > { %v11763_v56 = vpack.i.bf16 %v2174_v2, %v13449_v20  ;;  %v10919_v23 = vpop.f32.mrb[86].mxu1  ;;  %v13533_v0 = vpop.f32.mrb[94].mxu0 }
 0x6c5   : > { %v11769_v58 = vpack.i.bf16 %v10919_v23, %v13453_v26  ;;  %v2177_v7 = vpop.f32.mrb[87].mxu1  ;;  %v13538_v8 = vpop.f32.mrb[95].mxu0 }
 0x6c6   : > { %v11765_v9 = vpack.i.bf16 %v2177_v7, %v13457_v27  ;;  %11760 = vxpose.xlu0.b32.cont [3/16] (narrow) %v11759_v53, 16 }
 0x6ca   : > { %11762 = vxpose.xlu0.b32.cont [4/16] (narrow) %v11761_v4, 16  ;;  %v10922_v2 = vpop.f32.mrb[88].mxu1  ;;  %v13543_v59 = vpop.f32.mrb[96].mxu0 }
 0x6cb   : > { %v11775_v26 = vpack.i.bf16 %v10922_v2, %v13461_v15  ;;  %v2190_v3 = vpop.f32.mrb[89].mxu1  ;;  %v2732_v10 = vpop.f32.mrb[97].mxu0 }
 0x6cc   : > { %v11771_v52 = vpack.i.bf16 %v2190_v3, %v13465_v33  ;;  %v11813_v7 = vpack.i.bf16 %v2732_v10, %v13467_v34  ;;  %v10923_v27 = vpop.f32.mrb[90].mxu1  ;;  %v10991_v55 = vpop.f32.mrb[98].mxu0 }
 0x6cd   : > { %v11777_v53 = vpack.i.bf16 %v10923_v27, %v13469_v35  ;;  %v11819_v4 = vpack.i.bf16 %v10991_v55, %v13471_v36  ;;  %v2193_v47 = vpop.f32.mrb[91].mxu1  ;;  %v2735_v20 = vpop.f32.mrb[99].mxu0 }
 0x6ce   : > { %v11773_v11 = vpack.i.bf16 %v2193_v47, %v13473_v37  ;;  %v11815_v15 = vpack.i.bf16 %v2735_v20, %v13475_v38  ;;  %11764 = vxpose.xlu0.b32.cont [5/16] (narrow) %v11763_v56, 16 }
 0x6d2   : > { %11766 = vxpose.xlu0.b32.cont [6/16] (narrow) %v11765_v9, 16  ;;  %v10926_v2 = vpop.f32.mrb[92].mxu1  ;;  %v10994_v23 = vpop.f32.mrb[100].mxu0 }
 0x6d3   : > { %v11783_v3 = vpack.i.bf16 %v10926_v2, %v13477_v39  ;;  %v11825_v10 = vpack.i.bf16 %v10994_v23, %v13479_v40  ;;  %v2206_v33 = vpop.f32.mrb[93].mxu1  ;;  %v2748_v34 = vpop.f32.mrb[101].mxu0 }
 0x6d4   : > { %v11779_v35 = vpack.i.bf16 %v2206_v33, %v13481_v41  ;;  %v11821_v55 = vpack.i.bf16 %v2748_v34, %v13483_v42  ;;  %v10927_v36 = vpop.f32.mrb[94].mxu1  ;;  %v10995_v27 = vpop.f32.mrb[102].mxu0 }
 0x6d5   : > { %v11785_v37 = vpack.i.bf16 %v10927_v36, %v13485_v43  ;;  %v11827_v38 = vpack.i.bf16 %v10995_v27, %v13487_v44  ;;  %v2209_v56 = vpop.f32.mrb[95].mxu1  ;;  %v2751_v9 = vpop.f32.mrb[103].mxu0 }
 0x6d6   : > { %v11781_v20 = vpack.i.bf16 %v2209_v56, %v13489_v45  ;;  %v11823_v39 = vpack.i.bf16 %v2751_v9, %v13491_v46  ;;  %11768 = vxpose.xlu0.b32.cont [7/16] (narrow) %v11767_v6, 16  ;;  %v15312_v46 = vpack.i.bf16 %v13507_v60, %v13443_v22  ;;  %v15313_v6 = vpack.i.bf16 %v13493_v51, %v13435_v61 }
 0x6d7   : > { %v15318_v61 = vpack.i.bf16 %v13533_v0, %v13455_v30 }
 0x6da   : > { %11770 = vxpose.xlu0.b32.cont [8/16] (narrow) %v11769_v58, 16  ;;  %v15314_v58 = vpack.i.bf16 %v13500_v1, %v13441_v21  ;;  %v15319_v1 = vpack.i.bf16 %v13543_v59, %v13463_v32 }
 0x6de   : > { %11772 = vxpose.xlu0.b32.cont [9/16] (narrow) %v11771_v52, 16 }
 0x6e2   : > { %11774 = vxpose.xlu0.b32.cont [10/16] (narrow) %v11773_v11, 16  ;;  %v15311_v11 = vpack.i.bf16 %v13498_v31, %v13437_v57  ;;  %v15316_v31 = vpack.i.bf16 %v13538_v8, %v13459_v28 }
 0x6e6   : > { %11776 = vxpose.xlu0.b32.cont [11/16] (narrow) %v11775_v26, 16 }
 0x6ea   : > { %11778 = vxpose.xlu0.b32.cont [12/16] (narrow) %v11777_v53, 16 }
 0x6ee   : > { %11780 = vxpose.xlu0.b32.cont [13/16] (narrow) %v11779_v35, 16 }
 0x6f2   : > { %11782 = vxpose.xlu0.b32.cont [14/16] (narrow) %v11781_v20, 16 }
 0x6f6   : > { %11784 = vxpose.xlu0.b32.cont [15/16] (narrow) %v11783_v3, 16 }
 0x6fa   : > { %11786 = vxpose.xlu0.b32.end [16/16] (narrow) %v11785_v37, 16 }
 0x73e   : > { %v11787_v40 = vpop.trf.xlu0 }
 0x73f   : > { %v11791_v42 = vunpack.i.h.bf16 %v11787_v40  ;;  %v11788_v43 = vunpack.i.l.bf16 %v11787_v40  ;;  %v12227_v40 = vld [vmem:[%s15261_s4 + $0xc0] sm:$0xff]  }
 0x742   : > { %v11792_v41 = vpop.trf.xlu0 }
 0x743   : > { %v11796_v44 = vunpack.i.h.bf16 %v11792_v41  ;;  %v11793_v23 = vunpack.i.l.bf16 %v11792_v41 }
 0x745   : > { %v2286_v47 = vpack.c.bf16 %v11796_v44, %v11791_v42  ;;  %v2285_v45 = vpack.c.bf16 %v11793_v23, %v11788_v43  ;;  %v12228_v42 = vld [vmem:[%s15261_s4 + $0x80] sm:$0xff]   ;;  %v12229_v43 = vld [vmem:[%s15261_s4 + $0xc8] sm:$0xff]  }
 0x746   : > { %v12230_v23 = vld [vmem:[%s15261_s4 + $0x88] sm:$0xff]  }
 0x747   : > { %2303 = vxpose.xlu0.c.b16.start.end [1/1] (short) %v2286_v47, 128  ;;  %2287 = vxpose.xlu1.c.b16.start.end [1/1] (short) %v2285_v45, 128 }
 0x748   : > { %3496 = vmatprep.mubr.bf16.mxu0 %v2285_v45 }
 0x749   : > { %3497 = vmatmul.mubr.bf16.vlgmr.msra.gmra.mrb[104].mxu0 %v13346_v54  ;;  %v15315_v54 = vpack.i.bf16 %v13522_v5, %v13451_v29 }
 0x74a   : > { %3504 = vmatprep.mubr.bf16.mxu0 %v2286_v47  ;;  %v12231_v47 = vld [vmem:[%s15261_s4 + $0xd0] sm:$0xff]  }
 0x751   : > { %3505 = vmatmul.mubr.bf16.gmra.mrb[108].mxu0 %v13359_v25  ;;  %v15317_v25 = vpack.i.bf16 %v13517_v63, %v13447_v19 }
 0x76d   : > { %11798 = vxpose.xlu1.b32.start [1/16] (narrow) %v15311_v11, 16  ;;  %v12232_v11 = vld [vmem:[%s15261_s4 + $0x90] sm:$0xff]  }
 0x771   : > { %11800 = vxpose.xlu1.b32.cont [2/16] (narrow) %v15312_v46, 16  ;;  %v12233_v46 = vld [vmem:[%s15261_s4 + $0xd8] sm:$0xff]  }
 0x775   : > { %11802 = vxpose.xlu1.b32.cont [3/16] (narrow) %v15313_v6, 16 }
 0x779   : > { %11804 = vxpose.xlu1.b32.cont [4/16] (narrow) %v15314_v58, 16  ;;  %v12234_v58 = vld [vmem:[%s15261_s4 + $0x98] sm:$0xff]  }
 0x77d   : > { %11806 = vxpose.xlu1.b32.cont [5/16] (narrow) %v15315_v54, 16  ;;  %v12235_v54 = vld [vmem:[%s15261_s4 + $0xe0] sm:$0xff]  }
 0x781   : > { %11808 = vxpose.xlu1.b32.cont [6/16] (narrow) %v15316_v31, 16 }
 0x785   : > { %11810 = vxpose.xlu1.b32.cont [7/16] (narrow) %v15317_v25, 16 }
 0x789   : > { %11812 = vxpose.xlu1.b32.cont [8/16] (narrow) %v15318_v61, 16  ;;  %v12236_v61 = vld [vmem:[%s15261_s4 + $0xa0] sm:$0xff]  }
 0x78d   : > { %11814 = vxpose.xlu1.b32.cont [9/16] (narrow) %v11813_v7, 16 }
 0x791   : > { %11816 = vxpose.xlu1.b32.cont [10/16] (narrow) %v11815_v15, 16 }
 0x795   : > { %11818 = vxpose.xlu1.b32.cont [11/16] (narrow) %v15319_v1, 16  ;;  %v12237_v1 = vld [vmem:[%s15261_s4 + $0xe8] sm:$0xff]  }
 0x799   : > { %11820 = vxpose.xlu1.b32.cont [12/16] (narrow) %v11819_v4, 16 }
 0x79d   : > { %11822 = vxpose.xlu1.b32.cont [13/16] (narrow) %v11821_v55, 16 }
 0x7a1   : > { %11824 = vxpose.xlu1.b32.cont [14/16] (narrow) %v11823_v39, 16 }
 0x7a5   : > { %11826 = vxpose.xlu1.b32.cont [15/16] (narrow) %v11825_v10, 16 }
 0x7a9   : > { %11828 = vxpose.xlu1.b32.end [16/16] (narrow) %v11827_v38, 16 }
 0x7ad   : > { %v2295_v5 = vpop.trf.xlu1  ;;  %v2311_v19 = vpop.trf.xlu0 }
 0x7ae   : > { %10930 = vmatprep.mubr.msk.bf16.mxu1 %vm135_vm0, %v2295_v5 }
 0x7b1   : > { %v2296_v8 = vpop.trf.xlu1  ;;  %v2312_v30 = vpop.trf.xlu0 }
 0x7b2   : > { %10931 = vmatmul.mubr.msk.bf16.vlgmr.msra.gmra.mrb[96].mxu1 %vm135_vm0, %v2296_v8 }
 0x7b3   : > { %10997 = vmatpush3.bf16.xpose.msra.mxu1 %v12904_v18 }
 0x7b4   : > { %10384 = vmatprep.subr.bf16.mxu1 %v12227_v40 }
 0x7b5   : > { %v2297_v57 = vpop.trf.xlu1  ;;  %v2313_v51 = vpop.trf.xlu0 }
 0x7b6   : > { %10934 = vmatprep.mubr.msk.bf16.mxu1 %vm135_vm0, %v2297_v57  ;;  %v12238_v57 = vld [vmem:[%s15261_s4 + $0xa8] sm:$0xff]  }
 0x7b9   : > { %v2298_v21 = vpop.trf.xlu1  ;;  %v2314_v60 = vpop.trf.xlu0 }
 0x7ba   : > { %10935 = vmatmul.mubr.msk.bf16.gmra.mrb[100].mxu1 %vm135_vm0, %v2298_v21 }
 0x7bd   : > { %v2299_v22 = vpop.trf.xlu1  ;;  %v2315_v63 = vpop.trf.xlu0 }
 0x7be   : > { %10938 = vmatprep.mubr.msk.bf16.mxu1 %vm135_vm0, %v2299_v22 }
 0x7c1   : > { %v2300_v29 = vpop.trf.xlu1  ;;  %v2316_v59 = vpop.trf.xlu0 }
 0x7c2   : > { %10939 = vmatmul.mubr.msk.bf16.gmra.mrb[104].mxu1 %vm135_vm0, %v2300_v29 }
 0x7c5   : > { %v2301_v28 = vpop.trf.xlu1  ;;  %v2317_v0 = vpop.trf.xlu0 }
 0x7c6   : > { %10942 = vmatprep.mubr.msk.bf16.mxu1 %vm135_vm0, %v2301_v28 }
 0x7c9   : > { %v2302_v32 = vpop.trf.xlu1  ;;  %v2318_v26 = vpop.trf.xlu0 }
 0x7ca   : > { %10943 = vmatmul.mubr.msk.bf16.gmra.mrb[108].mxu1 %vm135_vm0, %v2302_v32 }
 0x7cb   : > { %10946 = vmatprep.mubr.msk.bf16.mxu1 %vm135_vm0, %v2311_v19 }
 0x7d2   : > { %10947 = vmatmul.mubr.msk.bf16.gmra.mrb[112].mxu1 %vm135_vm0, %v2312_v30 }
 0x7d3   : > { %10950 = vmatprep.mubr.msk.bf16.mxu1 %vm135_vm0, %v2313_v51 }
 0x7da   : > { %10951 = vmatmul.mubr.msk.bf16.gmra.mrb[116].mxu1 %vm135_vm0, %v2314_v60 }
 0x7db   : > { %10954 = vmatprep.mubr.msk.bf16.mxu1 %vm135_vm0, %v2315_v63  ;;  %v12239_v63 = vld [vmem:[%s15261_s4 + $0xf0] sm:$0xff]  }
 0x7e2   : > { %10955 = vmatmul.mubr.msk.bf16.gmra.mrb[120].mxu1 %vm135_vm0, %v2316_v59 }
 0x7e3   : > { %10958 = vmatprep.mubr.msk.bf16.mxu1 %vm135_vm0, %v2317_v0  ;;  %v12240_v0 = vld [vmem:[%s15261_s4 + $0xb0] sm:$0xff]  }
 0x7ea   : > { %10959 = vmatmul.mubr.msk.bf16.gmra.mrb[124].mxu1 %vm135_vm0, %v2318_v26 }
 0x7ed   : > { %v11829_v52 = vpop.trf.xlu1 }
 0x7ee   : > { %v11833_v7 = vunpack.i.h.bf16 %v11829_v52  ;;  %v11830_v53 = vunpack.i.l.bf16 %v11829_v52  ;;  %v12241_v52 = vld [vmem:[%s15261_s4 + $0xf8] sm:$0xff]  }
 0x7f1   : > { %v11834_v4 = vpop.trf.xlu1 }
 0x7f2   : > { %v11838_v15 = vunpack.i.h.bf16 %v11834_v4  ;;  %v11835_v2 = vunpack.i.l.bf16 %v11834_v4 }
 0x7f4   : > { %v13608_v3 = vpack.c.bf16 %v11838_v15, %v11833_v7  ;;  %v13610_v10 = vpack.c.bf16 %v11835_v2, %v11830_v53  ;;  %v12242_v53 = vld [vmem:[%s15261_s4 + $0xb8] sm:$0xff]  }
 0x7f6   : > { %2845 = vxpose.xlu1.c.b16.start.end [1/1] (short) %v13608_v3, 128  ;;  %2829 = vxpose.xlu0.c.b16.start.end [1/1] (short) %v13610_v10, 128 }
 0x81c   : > { %v10372_v33 = vpop.f32.mrb[104].mxu0 }
 0x81d   : > { %v10373_v34 = vpop.f32.mrb[105].mxu0 }
 0x81e   : > { %v13614_v35 = vadd.f32 %v10373_v34, %v10372_v33  ;;  %v10375_v55 = vpop.f32.mrb[106].mxu0 }
 0x81f   : > { %v10376_v36 = vpop.f32.mrb[107].mxu0 }
 0x820   : > { %v13616_v27 = vadd.f32 %v10376_v36, %v10375_v55 }
 0x824   : > { %v10378_v37 = vpop.f32.mrb[108].mxu0 }
 0x825   : > { %v10379_v38 = vpop.f32.mrb[109].mxu0 }
 0x826   : > { %v13618_v56 = vadd.f32 %v10379_v38, %v10378_v37  ;;  %v10381_v9 = vpop.f32.mrb[110].mxu0 }
 0x827   : > { %v10382_v20 = vpop.f32.mrb[111].mxu0 }
 0x828   : > { %v13620_v39 = vadd.f32 %v10382_v20, %v10381_v9 }
 0x85c   : > { %v2837_v41 = vpop.trf.xlu0  ;;  %v2853_v25 = vpop.trf.xlu1 }
 0x85d   : > { %10998 = vmatprep.mubr.msk.bf16.mxu1 %vm135_vm0, %v2837_v41 }
 0x860   : > { %v2838_v44 = vpop.trf.xlu0  ;;  %v2854_v8 = vpop.trf.xlu1 }
 0x861   : > { %10999 = vmatmul.mubr.msk.bf16.vlgmr.msra.gmra.mrb[128].mxu1 %vm135_vm0, %v2838_v44 }
 0x862   : > { %10385 = vmatpush3.bf16.msra.mxu1 %v12228_v42 }
 0x863   : > { %10386 = vmatprep.subr.bf16.mxu1 %v12229_v43 }
 0x864   : > { %v2839_v45 = vpop.trf.xlu0  ;;  %v2855_v19 = vpop.trf.xlu1 }
 0x865   : > { %11002 = vmatprep.mubr.msk.bf16.mxu1 %vm135_vm0, %v2839_v45 }
 0x866   : > { %10387 = vmatpush3.bf16.msra.mxu1 %v12230_v23 }
 0x867   : > { %10388 = vmatprep.subr.bf16.mxu1 %v12231_v47 }
 0x868   : > { %v2840_v6 = vpop.trf.xlu0  ;;  %v2856_v29 = vpop.trf.xlu1 }
 0x869   : > { %11003 = vmatmul.mubr.msk.bf16.gmra.mrb[132].mxu1 %vm135_vm0, %v2840_v6 }
 0x86a   : > { %10389 = vmatpush3.bf16.msra.mxu1 %v12232_v11 }
 0x86b   : > { %10390 = vmatprep.subr.bf16.mxu1 %v12233_v46 }
 0x86c   : > { %v2841_v31 = vpop.trf.xlu0  ;;  %v2857_v30 = vpop.trf.xlu1 }
 0x86d   : > { %11006 = vmatprep.mubr.msk.bf16.mxu1 %vm135_vm0, %v2841_v31 }
 0x86e   : > { %10391 = vmatpush3.bf16.msra.mxu1 %v12234_v58 }
 0x86f   : > { %10392 = vmatprep.subr.bf16.mxu1 %v12235_v54 }
 0x870   : > { %v2842_v5 = vpop.trf.xlu0  ;;  %v2858_v59 = vpop.trf.xlu1 }
 0x871   : > { %11007 = vmatmul.mubr.msk.bf16.gmra.mrb[136].mxu1 %vm135_vm0, %v2842_v5 }
 0x872   : > { %10393 = vmatpush3.bf16.msra.mxu1 %v12236_v61 }
 0x873   : > { %10394 = vmatprep.subr.bf16.mxu1 %v12237_v1 }
 0x874   : > { %v2843_v21 = vpop.trf.xlu0  ;;  %v2859_v15 = vpop.trf.xlu1 }
 0x875   : > { %11010 = vmatprep.mubr.msk.bf16.mxu1 %vm135_vm0, %v2843_v21 }
 0x876   : > { %10395 = vmatpush3.bf16.msra.mxu1 %v12238_v57 }
 0x877   : > { %10396 = vmatprep.subr.bf16.mxu1 %v12239_v63  ;;  %v12243_v63 = vld [vmem:[%s15261_s4 + $0x100] sm:$0xff]  }
 0x878   : > { %v2844_v22 = vpop.trf.xlu0  ;;  %v2860_v34 = vpop.trf.xlu1  ;;  %11030 = vmatprep.subr.bf16.mxu0 %v12243_v63 }
 0x879   : > { %11011 = vmatmul.mubr.msk.bf16.gmra.mrb[140].mxu1 %vm135_vm0, %v2844_v22  ;;  %11031 = vmatpush3.bf16.msra.mxu0 %v12243_v63 }
 0x87a   : > { %11014 = vmatprep.mubr.msk.bf16.mxu1 %vm135_vm0, %v2853_v25  ;;  %10397 = vmatpush3.bf16.msra.mxu1 %v12240_v0  ;;  %v12244_v0 = vld [vmem:[%s15261_s4 + $0x108] sm:$0xff]  }
 0x87b   : > { %10398 = vmatprep.subr.bf16.mxu1 %v12241_v52  ;;  %11032 = vmatprep.subr.bf16.mxu0 %v12244_v0 }
 0x87d   : > { %11033 = vmatpush3.bf16.msra.mxu0 %v12244_v0 }
 0x87e   : > { %10399 = vmatpush3.bf16.msra.mxu1 %v12242_v53  ;;  %v12246_v53 = vld [vmem:[%s15261_s4 + $0x118] sm:$0xff]  }
 0x87f   : > { %11582 = vmatprep.subr.msk.bf16.mxu1 %vm135_vm0, %v12875_v13 }
 0x881   : > { %11015 = vmatmul.mubr.msk.bf16.gmra.mrb[144].mxu1 %vm135_vm0, %v2854_v8 }
 0x882   : > { %11018 = vmatprep.mubr.msk.bf16.mxu1 %vm135_vm0, %v2855_v19 }
 0x885   : > { %v10932_v28 = vpop.f32.mrb[96].mxu1 }
 0x886   : > { %v2401_v32 = vpop.f32.mrb[97].mxu1 }
 0x887   : > { %2528 = vxpose.xlu0.b32.start [1/16] (narrow) %v2401_v32, 16  ;;  %v10933_v51 = vpop.f32.mrb[98].mxu1 }
 0x888   : > { %v2404_v60 = vpop.f32.mrb[99].mxu1 }
 0x889   : > { %11019 = vmatmul.mubr.msk.bf16.gmra.mrb[148].mxu1 %vm135_vm0, %v2856_v29 }
 0x88a   : > { %11022 = vmatprep.mubr.msk.bf16.mxu1 %vm135_vm0, %v2857_v30 }
 0x88b   : > { %2529 = vxpose.xlu0.b32.cont [2/16] (narrow) %v2404_v60, 16 }
 0x88d   : > { %v10936_v26 = vpop.f32.mrb[100].mxu1 }
 0x88e   : > { %v2417_v7 = vpop.f32.mrb[101].mxu1 }
 0x88f   : > { %2530 = vxpose.xlu0.b32.cont [3/16] (narrow) %v10932_v28, 16  ;;  %v10937_v4 = vpop.f32.mrb[102].mxu1 }
 0x890   : > { %v2420_v2 = vpop.f32.mrb[103].mxu1 }
 0x891   : > { %11023 = vmatmul.mubr.msk.bf16.gmra.mrb[152].mxu1 %vm135_vm0, %v2858_v59 }
 0x892   : > { %11026 = vmatprep.mubr.msk.bf16.mxu1 %vm135_vm0, %v2859_v15 }
 0x893   : > { %2531 = vxpose.xlu0.b32.cont [4/16] (narrow) %v10933_v51, 16 }
 0x895   : > { %v10940_v33 = vpop.f32.mrb[104].mxu1 }
 0x896   : > { %v2433_v55 = vpop.f32.mrb[105].mxu1 }
 0x897   : > { %2532 = vxpose.xlu0.b32.cont [5/16] (narrow) %v2417_v7, 16  ;;  %v10941_v36 = vpop.f32.mrb[106].mxu1 }
 0x898   : > { %v2436_v37 = vpop.f32.mrb[107].mxu1 }
 0x899   : > { %11027 = vmatmul.mubr.msk.bf16.gmra.mrb[156].mxu1 %vm135_vm0, %v2860_v34 }
 0x89a   : > { %3545 = vmatprep.mubr.bf16.mxu1 %v13610_v10 }
 0x89b   : > { %2533 = vxpose.xlu0.b32.cont [6/16] (narrow) %v2420_v2, 16  ;;  %v12247_v2 = vld [vmem:[%s15261_s4 + $0x120] sm:$0xff]  }
 0x89d   : > { %v10944_v38 = vpop.f32.mrb[108].mxu1 }
 0x89e   : > { %v2449_v9 = vpop.f32.mrb[109].mxu1 }
 0x89f   : > { %2534 = vxpose.xlu0.b32.cont [7/16] (narrow) %v10936_v26, 16  ;;  %v10945_v20 = vpop.f32.mrb[110].mxu1  ;;  %v12245_v26 = vld [vmem:[%s15261_s4 + $0x110] sm:$0xff]  }
 0x8a0   : > { %v2452_v40 = vpop.f32.mrb[111].mxu1  ;;  %11034 = vmatprep.subr.bf16.mxu0 %v12245_v26 }
 0x8a1   : > { %11035 = vmatpush3.bf16.msra.mxu0 %v12245_v26 }
 0x8a2   : > { %11036 = vmatprep.subr.bf16.mxu0 %v12246_v53 }
 0x8a3   : > { %2535 = vxpose.xlu0.b32.cont [8/16] (narrow) %v10937_v4, 16 }
 0x8a5   : > { %v13689_v41 = vpop.f32.mrb[112].mxu1  ;;  %11037 = vmatpush3.bf16.msra.mxu0 %v12246_v53 }
 0x8a6   : > { %v13691_v42 = vpop.f32.mrb[113].mxu1  ;;  %11038 = vmatprep.subr.bf16.mxu0 %v12247_v2 }
 0x8a7   : > { %2536 = vxpose.xlu0.b32.cont [9/16] (narrow) %v2433_v55, 16  ;;  %v13693_v43 = vpop.f32.mrb[114].mxu1  ;;  %v12248_v55 = vld [vmem:[%s15261_s4 + $0x128] sm:$0xff]  }
 0x8a8   : > { %v13695_v44 = vpop.f32.mrb[115].mxu1 }
 0x8a9   : > { %11039 = vmatpush3.bf16.msra.mxu0 %v12247_v2 }
 0x8aa   : > { %11040 = vmatprep.subr.bf16.mxu0 %v12248_v55 }
 0x8ab   : > { %2537 = vxpose.xlu0.b32.cont [10/16] (narrow) %v2436_v37, 16 }
 0x8ad   : > { %v13697_v23 = vpop.f32.mrb[116].mxu1  ;;  %11041 = vmatpush3.bf16.msra.mxu0 %v12248_v55 }
 0x8ae   : > { %v13699_v10 = vpop.f32.mrb[117].mxu1 }
 0x8af   : > { %2538 = vxpose.xlu0.b32.cont [11/16] (narrow) %v10940_v33, 16  ;;  %v13701_v47 = vpop.f32.mrb[118].mxu1 }
 0x8b0   : > { %v13703_v45 = vpop.f32.mrb[119].mxu1 }
 0x8b3   : > { %2539 = vxpose.xlu0.b32.cont [12/16] (narrow) %v10941_v36, 16 }
 0x8b5   : > { %v13705_v11 = vpop.f32.mrb[120].mxu1 }
 0x8b6   : > { %v13707_v46 = vpop.f32.mrb[121].mxu1 }
 0x8b7   : > { %2540 = vxpose.xlu0.b32.cont [13/16] (narrow) %v2449_v9, 16  ;;  %v13709_v6 = vpop.f32.mrb[122].mxu1 }
 0x8b8   : > { %v13711_v58 = vpop.f32.mrb[123].mxu1 }
 0x8bb   : > { %2541 = vxpose.xlu0.b32.cont [14/16] (narrow) %v2452_v40, 16 }
 0x8bd   : > { %v13713_v54 = vpop.f32.mrb[124].mxu1 }
 0x8be   : > { %v13715_v31 = vpop.f32.mrb[125].mxu1 }
 0x8bf   : > { %2542 = vxpose.xlu0.b32.cont [15/16] (narrow) %v10944_v38, 16  ;;  %v13717_v25 = vpop.f32.mrb[126].mxu1 }
 0x8c0   : > { %v13719_v61 = vpop.f32.mrb[127].mxu1 }
 0x8c3   : > { %2543 = vxpose.xlu0.b32.end [16/16] (narrow) %v10945_v20, 16 }
 0x907   : > { %v2544_v1 = vpop.trf.xlu0 }
 0x908   : > { %v2592_v5 = vmul.f32 2.0, %v2544_v1  ;;  %v12249_v1 = vld [vmem:[%s15261_s4 + $0x130] sm:$0xff]  }
 0x909   : > { %11042 = vmatprep.subr.bf16.mxu0 %v12249_v1 }
 0x90a   : > { %v2596_v21 = vsub.f32 %v2592_v5, %v13337_v48  ;;  %11043 = vmatpush3.bf16.msra.mxu0 %v12249_v1 }
 0x90b   : > { %v2545_v8 = vpop.trf.xlu0 }
 0x90c   : > { %v2593_v57 = vmul.f32 2.0, %v2545_v8  ;;  %v12250_v8 = vld [vmem:[%s15261_s4 + $0x138] sm:$0xff]  }
 0x90d   : > { %11044 = vmatprep.subr.bf16.mxu0 %v12250_v8 }
 0x90e   : > { %v2597_v22 = vsub.f32 %v2593_v57, %v13340_v49  ;;  %11045 = vmatpush3.bf16.msra.mxu0 %v12250_v8 }
 0x90f   : > { %11583 = vmatprep.subr.msk.bf16.mxu0 %vm135_vm0, %v12875_v13 }
 0x910   : > { %v2600_v19 = vpack.c.bf16 %v2597_v22, %v2596_v21 }
 0x912   : > { %3546 = vmatmul.mubr.bf16.vlgmr.msra.gmra.mrb[160].mxu1 %v2600_v19 }
 0x913   : > { %3553 = vmatprep.mubr.bf16.mxu1 %v13608_v3  ;;  %11051 = vmatpush3.bf16.xpose.msra.mxu1 %v12882_v14 }
 0x914   : > { %11584 = vmatprep.subr.msk.bf16.mxu1 %vm135_vm0, %v12895_v16 }
 0x934   : > { %v11000_v29 = vpop.f32.mrb[128].mxu1 }
 0x935   : > { %v2943_v30 = vpop.f32.mrb[129].mxu1 }
 0x936   : > { %3070 = vxpose.xlu1.b32.start [1/16] (narrow) %v2943_v30, 16  ;;  %v11001_v28 = vpop.f32.mrb[130].mxu1 }
 0x937   : > { %v2946_v32 = vpop.f32.mrb[131].mxu1 }
 0x93a   : > { %3071 = vxpose.xlu1.b32.cont [2/16] (narrow) %v2946_v32, 16 }
 0x93c   : > { %v11004_v51 = vpop.f32.mrb[132].mxu1 }
 0x93d   : > { %v2959_v60 = vpop.f32.mrb[133].mxu1 }
 0x93e   : > { %3072 = vxpose.xlu1.b32.cont [3/16] (narrow) %v11000_v29, 16  ;;  %v11005_v59 = vpop.f32.mrb[134].mxu1 }
 0x93f   : > { %v2962_v3 = vpop.f32.mrb[135].mxu1 }
 0x942   : > { %3073 = vxpose.xlu1.b32.cont [4/16] (narrow) %v11001_v28, 16 }
 0x944   : > { %v11008_v52 = vpop.f32.mrb[136].mxu1 }
 0x945   : > { %v2975_v7 = vpop.f32.mrb[137].mxu1 }
 0x946   : > { %3074 = vxpose.xlu1.b32.cont [5/16] (narrow) %v2959_v60, 16  ;;  %v11009_v4 = vpop.f32.mrb[138].mxu1 }
 0x947   : > { %v2978_v15 = vpop.f32.mrb[139].mxu1 }
 0x94a   : > { %3075 = vxpose.xlu1.b32.cont [6/16] (narrow) %v2962_v3, 16 }
 0x94c   : > { %v11012_v33 = vpop.f32.mrb[140].mxu1 }
 0x94d   : > { %v2991_v34 = vpop.f32.mrb[141].mxu1 }
 0x94e   : > { %3076 = vxpose.xlu1.b32.cont [7/16] (narrow) %v11004_v51, 16  ;;  %v11013_v36 = vpop.f32.mrb[142].mxu1 }
 0x94f   : > { %v2994_v37 = vpop.f32.mrb[143].mxu1 }
 0x952   : > { %3077 = vxpose.xlu1.b32.cont [8/16] (narrow) %v11005_v59, 16 }
 0x954   : > { %v11016_v38 = vpop.f32.mrb[144].mxu1 }
 0x955   : > { %v3007_v9 = vpop.f32.mrb[145].mxu1 }
 0x956   : > { %3078 = vxpose.xlu1.b32.cont [9/16] (narrow) %v2975_v7, 16  ;;  %3102 = vxpose.xlu0.b32.start [1/16] (narrow) %v3007_v9, 16  ;;  %v11017_v20 = vpop.f32.mrb[146].mxu1  ;;  %v77_v9 = vld [vmem:[%s13326_s25 + $0x8] ss:$12 sps:$4 sm:$0xff]  }
 0x957   : > { %v3010_v40 = vpop.f32.mrb[147].mxu1 }
 0x95a   : > { %3079 = vxpose.xlu1.b32.cont [10/16] (narrow) %v2978_v15, 16  ;;  %3103 = vxpose.xlu0.b32.cont [2/16] (narrow) %v3010_v40, 16 }
 0x95c   : > { %v11020_v5 = vpop.f32.mrb[148].mxu1 }
 0x95d   : > { %v3023_v57 = vpop.f32.mrb[149].mxu1 }
 0x95e   : > { %3080 = vxpose.xlu1.b32.cont [11/16] (narrow) %v11008_v52, 16  ;;  %3104 = vxpose.xlu0.b32.cont [3/16] (narrow) %v11016_v38, 16  ;;  %v11021_v21 = vpop.f32.mrb[150].mxu1 }
 0x95f   : > { %v3026_v22 = vpop.f32.mrb[151].mxu1 }
 0x962   : > { %3081 = vxpose.xlu1.b32.cont [12/16] (narrow) %v11009_v4, 16  ;;  %3105 = vxpose.xlu0.b32.cont [4/16] (narrow) %v11017_v20, 16 }
 0x964   : > { %v11024_v19 = vpop.f32.mrb[152].mxu1 }
 0x965   : > { %v3039_v29 = vpop.f32.mrb[153].mxu1 }
 0x966   : > { %3082 = vxpose.xlu1.b32.cont [13/16] (narrow) %v2991_v34, 16  ;;  %3106 = vxpose.xlu0.b32.cont [5/16] (narrow) %v3023_v57, 16  ;;  %v11025_v30 = vpop.f32.mrb[154].mxu1  ;;  %v12651_v34 = vld [vmem:[%s13326_s25] sm:$0xff]  ;;  %v89_v57 = vunpack.c.h.bf16 %v77_v9 }
 0x967   : > { %v3042_v28 = vpop.f32.mrb[155].mxu1  ;;  %v84_v55 = vunpack.c.l.bf16 %v12651_v34 }
 0x96a   : > { %3083 = vxpose.xlu1.b32.cont [14/16] (narrow) %v2994_v37, 16  ;;  %3107 = vxpose.xlu0.b32.cont [6/16] (narrow) %v3026_v22, 16 }
 0x96c   : > { %v11028_v32 = vpop.f32.mrb[156].mxu1 }
 0x96d   : > { %v3055_v51 = vpop.f32.mrb[157].mxu1 }
 0x96e   : > { %3084 = vxpose.xlu1.b32.cont [15/16] (narrow) %v11012_v33, 16  ;;  %3108 = vxpose.xlu0.b32.cont [7/16] (narrow) %v11020_v5, 16  ;;  %v11029_v60 = vpop.f32.mrb[158].mxu1 }
 0x96f   : > { %v3058_v63 = vpop.f32.mrb[159].mxu1 }
 0x972   : > { %3085 = vxpose.xlu1.b32.end [16/16] (narrow) %v11013_v36, 16  ;;  %3109 = vxpose.xlu0.b32.cont [8/16] (narrow) %v11021_v21, 16  ;;  %v1918_v36 = vadd.f32 %v13330_v24, %v84_v55 }
 0x974   : > { %v9667_v37 = vmul.f32 -1.442695, %v1918_v36 }
 0x976   : > { %2560 = vxpose.xlu1.b32.start [1/16] (narrow) %v13691_v42, 16  ;;  %3110 = vxpose.xlu0.b32.cont [9/16] (narrow) %v3039_v29, 16  ;;  %12587 = vpow2.f32 %v9667_v37  ;;  %v15327_v37 = vld [vmem:[#allocation15_spill] sm:$0xff] }
 0x97a   : > { %2561 = vxpose.xlu1.b32.cont [2/16] (narrow) %v13695_v44, 16  ;;  %3111 = vxpose.xlu0.b32.cont [10/16] (narrow) %v3042_v28, 16 }
 0x97e   : > { %2562 = vxpose.xlu1.b32.cont [3/16] (narrow) %v13689_v41, 16  ;;  %3112 = vxpose.xlu0.b32.cont [11/16] (narrow) %v11024_v19, 16 }
 0x982   : > { %2563 = vxpose.xlu1.b32.cont [4/16] (narrow) %v13693_v43, 16  ;;  %3113 = vxpose.xlu0.b32.cont [12/16] (narrow) %v11025_v30, 16 }
 0x986   : > { %2564 = vxpose.xlu1.b32.cont [5/16] (narrow) %v13699_v10, 16  ;;  %3114 = vxpose.xlu0.b32.cont [13/16] (narrow) %v3055_v51, 16  ;;  %v15320_v51 = vld [vmem:[#allocation17_spill] sm:$0xff] }
 0x98a   : > { %2565 = vxpose.xlu1.b32.cont [6/16] (narrow) %v13703_v45, 16  ;;  %3115 = vxpose.xlu0.b32.cont [14/16] (narrow) %v3058_v63, 16 }
 0x98e   : > { %2566 = vxpose.xlu1.b32.cont [7/16] (narrow) %v13697_v23, 16  ;;  %3116 = vxpose.xlu0.b32.cont [15/16] (narrow) %v11028_v32, 16  ;;  %v9671_v32 = vmul.f32 -1.442695, %v13342_v50 }
 0x992   : > { %2567 = vxpose.xlu1.b32.cont [8/16] (narrow) %v13701_v47, 16  ;;  %3117 = vxpose.xlu0.b32.end [16/16] (narrow) %v11029_v60, 16 }
 0x996   : > { %2568 = vxpose.xlu1.b32.cont [9/16] (narrow) %v13707_v46, 16 }
 0x99a   : > { %2569 = vxpose.xlu1.b32.cont [10/16] (narrow) %v13711_v58, 16 }
 0x99e   : > { %2570 = vxpose.xlu1.b32.cont [11/16] (narrow) %v13705_v11, 16 }
 0x9a2   : > { %2571 = vxpose.xlu1.b32.cont [12/16] (narrow) %v13709_v6, 16 }
 0x9a6   : > { %2572 = vxpose.xlu1.b32.cont [13/16] (narrow) %v13715_v31, 16 }
 0x9aa   : > { %2573 = vxpose.xlu1.b32.cont [14/16] (narrow) %v13719_v61, 16 }
 0x9ae   : > { %2574 = vxpose.xlu1.b32.cont [15/16] (narrow) %v13713_v54, 16 }
 0x9b2   : > { %2575 = vxpose.xlu1.b32.end [16/16] (narrow) %v13717_v25, 16 }
 0x9b6   : > { %v3086_v41 = vpop.trf.xlu1 }
 0x9b7   : > { %v3134_v42 = vmul.f32 2.0, %v3086_v41 }
 0x9b9   : > { %v3138_v23 = vsub.f32 %v3134_v42, %v13337_v48 }
 0x9ba   : > { %v3087_v43 = vpop.trf.xlu1 }
 0x9bb   : > { %v3135_v44 = vmul.f32 2.0, %v3087_v43  ;;  %v15321_v43 = vld [vmem:[#allocation18_spill] sm:$0xff] }
 0x9bd   : > { %v3139_v10 = vsub.f32 %v3135_v44, %v13340_v49  ;;  %v9673_v44 = vmul.f32 -1.442695, %v15321_v43  ;;  %v12256_v43 = vld [vmem:[%s15262_s5 + $0x1c] ss:$12 sps:$4 sm:$0xff]  }
 0x9bf   : > { %v3142_v47 = vpack.c.bf16 %v3139_v10, %v3138_v23  ;;  %v15322_v23 = vld [vmem:[#allocation16_spill] sm:$0xff] }
 0x9c1   : > { %11046 = vmatprep.mubr.bf16.mxu0 %v3142_v47 }
 0x9d6   : > { %v3118_v45 = vpop.trf.xlu0 }
 0x9d7   : > { %v3136_v11 = vmul.f32 2.0, %v3118_v45 }
 0x9d9   : > { %v3140_v58 = vsub.f32 %v3136_v11, %v13352_v62 }
 0x9da   : > { %v3119_v46 = vpop.trf.xlu0 }
 0x9db   : > { %v3137_v6 = vmul.f32 2.0, %v3119_v46 }
 0x9dd   : > { %v3141_v54 = vsub.f32 %v3137_v6, %v13355_v17 }
 0x9df   : > { %v3143_v31 = vpack.c.bf16 %v3141_v54, %v3140_v58 }
 0x9e1   : > { %11047 = vmatmul.mubr.bf16.vlgmr.msra.gmra.mrb[112].mxu0 %v3143_v31  ;;  %v81_v31 = vld [vmem:[%s13326_s25 + $0x20] ss:$12 sps:$4 sm:$0xff]  }
 0x9e2   : > { %11085 = vmatpush3.bf16.xpose.msra.mxu0 %v12882_v14 }
 0x9e3   : > { %11585 = vmatprep.subr.msk.bf16.mxu0 %vm135_vm0, %v12895_v16 }
 0x9e5   : > { %v10400_v48 = vpop.f32.mrb[160].mxu1 }
 0x9e6   : > { %v10401_v49 = vpop.f32.mrb[161].mxu1 }
 0x9e7   : > { %v10402_v25 = vadd.f32 %v10401_v49, %v10400_v48  ;;  %v10403_v61 = vpop.f32.mrb[162].mxu1 }
 0x9e8   : > { %v10404_v59 = vpop.f32.mrb[163].mxu1 }
 0x9e9   : > { %v10405_v3 = vadd.f32 %v10404_v59, %v10403_v61  ;;  %v3548_v0 = vadd.f32 %v10402_v25, %v13614_v35  ;;  %v9669_v35 = vmul.f32 -1.442695, %v13332_v12 }
 0x9eb   : > { %v3551_v26 = vadd.f32 %v10405_v3, %v13616_v27  ;;  %12589 = vpow2.f32 %v9669_v35  ;;  %v12588_v27 = vpop.eup %12587  ;;  %v92_v3 = vunpack.c.l.bf16 %v81_v31 }
 0x9ec   : > { %v1950_v20 = vadd.f32 1.0, %v12588_v27 }
 0x9ee   : > { %12591 = vrcp.f32 %v1950_v20 }
 0x9f5   : > { %v12590_v38 = vpop.eup %12589 }
 0x9f6   : > { %v2576_v52 = vpop.trf.xlu1  ;;  %v1952_v40 = vadd.f32 1.0, %v12590_v38 }
 0x9f7   : > { %v2594_v7 = vmul.f32 2.0, %v2576_v52 }
 0x9f8   : > { %12593 = vrcp.f32 %v1952_v40  ;;  %v12592_v19 = vpop.eup %12591 }
 0x9f9   : > { %v2598_v15 = vsub.f32 %v2594_v7, %v13352_v62  ;;  %v86_v62 = vunpack.c.l.bf16 %v77_v9  ;;  %v3623_v30 = vsub.f32 1.0, %v12592_v19  ;;  %v3619_v60 = vmul.f32 %v15320_v51, %v12592_v19  ;;  %v15328_v9 = vld [vmem:[#allocation14_spill] sm:$0xff] }
 0x9fa   : > { %v2577_v53 = vpop.trf.xlu1  ;;  %v95_v7 = vunpack.c.h.bf16 %v81_v31  ;;  %v12265_v31 = vld [vmem:[%s15262_s5 + $0x64] ss:$12 sps:$4 sm:$0xff]  }
 0x9fb   : > { %v2595_v4 = vmul.f32 2.0, %v2577_v53 }
 0x9fd   : > { %v2599_v2 = vsub.f32 %v2595_v4, %v13355_v17 }
 0x9ff   : > { %v2601_v33 = vpack.c.bf16 %v2599_v2, %v2598_v15 }
 0xa01   : > { %3554 = vmatmul.mubr.bf16.gmra.mrb[164].mxu1 %v2601_v33 }
 0xa02   : > { %v12594_v29 = vpop.eup %12593 }
 0xa03   : > { %v3624_v63 = vsub.f32 1.0, %v12594_v29  ;;  %v3620_v10 = vmul.f32 %v15322_v23, %v12594_v29  ;;  %v12257_v23 = vld [vmem:[%s15262_s5 + $0x30] ss:$12 sps:$4 sm:$0xff]  }
 0xab4   : > { %v11048_v1 = vpop.f32.mrb[112].mxu0 }
 0xab5   : > { %v3596_v5 = vpop.f32.mrb[113].mxu0 }
 0xab6   : > { %v3597_v17 = vadd.f32 %v3596_v5, %v3548_v0  ;;  %v11049_v8 = vpop.f32.mrb[114].mxu0 }
 0xab7   : > { %v3599_v21 = vpop.f32.mrb[115].mxu0 }
 0xab8   : > { %v3611_v24 = vadd.f32 %v3597_v17, %v86_v62  ;;  %v3600_v22 = vadd.f32 %v3599_v21, %v3551_v26 }
 0xaba   : > { %12595 = vtanh.f32 %v3611_v24  ;;  %v3612_v12 = vadd.f32 %v3600_v22, %v89_v57 }
 0xabc   : > { %12597 = vtanh.f32 %v3612_v12 }
 0xabd   : > { %12599 = vpow2.f32 %v9671_v32 }
 0xabe   : > { %12601 = vpow2.f32 %v9673_v44  ;;  %v12254_v44 = vld [vmem:[%s15262_s5 + $0x18] ss:$12 sps:$4 sm:$0xff]  }
 0xac4   : > { %v12596_v28 = vpop.eup %12595 }
 0xac5   : > { %v3627_v41 = vmul.f32 %v12596_v28, %v3623_v30 }
 0xac6   : > { %v12598_v42 = vpop.eup %12597 }
 0xac7   : > { %v3628_v47 = vmul.f32 %v12598_v42, %v3624_v63  ;;  %v13788_v11 = vadd.f32 %v3627_v41, %v3619_v60   ;;  %v12600_v6 = vpop.eup %12599  ;;  %v12251_v41 = vld [vmem:[%s15262_s5] ss:$12 sps:$4 sm:$0xff]   ;;  %v12253_v42 = vld [vmem:[%s15262_s5 + $0x4] ss:$12 sps:$4 sm:$0xff]  }
 0xac8   : > { %v12602_v54 = vpop.eup %12601  ;;  %v1954_v49 = vadd.f32 1.0, %v12600_v6  ;;  %v12260_v6 = vld [vmem:[%s15262_s5 + $0x48] ss:$12 sps:$4 sm:$0xff]  }
 0xac9   : > { %15323 = vst [vmem:[#allocation19_spill] sm:$0xff] %v13788_v11  ;;  %v15324_v45 = vmov %v13788_v11  ;;  %v13790_v10 = vadd.f32 %v3628_v47, %v3620_v10   ;;  %v1956_v11 = vadd.f32 1.0, %v12602_v54  ;;  %v12262_v47 = vld [vmem:[%s15262_s5 + $0x4c] ss:$12 sps:$4 sm:$0xff]  }
 0xaca   : > { %12603 = vrcp.f32 %v1954_v49  ;;  %v12263_v54 = vld [vmem:[%s15262_s5 + $0x60] ss:$12 sps:$4 sm:$0xff]   ;;  %v12268_v49 = vld [vmem:[%s15262_s5 + $0x7c] ss:$12 sps:$4 sm:$0xff]  }
 0xacb   : > { %15325 = vst [vmem:[#allocation20_spill] sm:$0xff] %v13790_v10  ;;  %v15326_v46 = vmov %v13790_v10  ;;  %12605 = vrcp.f32 %v1956_v11  ;;  %v12259_v10 = vld [vmem:[%s15262_s5 + $0x34] ss:$12 sps:$4 sm:$0xff]  }
 0xacc   : > { %v13794_v50 = vpack.c.bf16 %v15326_v46, %v15324_v45  ;;  %v12271_v11 = vld [vmem:[%s15262_s5 + $0x94] ss:$12 sps:$4 sm:$0xff]  }
 0xace   : > { %3637 = vxpose.xlu0.c.b16.start.end [1/1] (short) %v13794_v50, 128 }
 0xad4   : > { %v10406_v58 = vpop.f32.mrb[164].mxu1  ;;  %v12604_v33 = vpop.eup %12603 }
 0xad5   : > { %v10407_v48 = vpop.f32.mrb[165].mxu1  ;;  %v12606_v34 = vpop.eup %12605  ;;  %v3625_v55 = vsub.f32 1.0, %v12604_v33  ;;  %v3621_v35 = vmul.f32 %v15327_v37, %v12604_v33  ;;  %v12275_v33 = vld [vmem:[%s15262_s5 + $0xc0] ss:$12 sps:$4 sm:$0xff]  }
 0xad6   : > { %v10408_v25 = vadd.f32 %v10407_v48, %v10406_v58  ;;  %v10409_v61 = vpop.f32.mrb[166].mxu1  ;;  %v3626_v27 = vsub.f32 1.0, %v12606_v34  ;;  %v3622_v20 = vmul.f32 %v15328_v9, %v12606_v34 }
 0xad7   : > { %v10410_v59 = vpop.f32.mrb[167].mxu1 }
 0xad8   : > { %v3556_v0 = vadd.f32 %v10408_v25, %v13618_v56  ;;  %v10411_v26 = vadd.f32 %v10410_v59, %v10409_v61  ;;  %v12266_v59 = vld [vmem:[%s15262_s5 + $0x78] ss:$12 sps:$4 sm:$0xff]  }
 0xada   : > { %v3605_v52 = vadd.f32 %v11048_v1, %v3556_v0  ;;  %v3559_v53 = vadd.f32 %v10411_v26, %v13620_v39  ;;  %v12269_v0 = vld [vmem:[%s15262_s5 + $0x90] ss:$12 sps:$4 sm:$0xff]  }
 0xadc   : > { %v3613_v4 = vadd.f32 %v3605_v52, %v92_v3  ;;  %v3608_v15 = vadd.f32 %v11049_v8, %v3559_v53  ;;  %v12274_v52 = vld [vmem:[%s15262_s5 + $0xac] ss:$12 sps:$4 sm:$0xff]  }
 0xade   : > { %12607 = vtanh.f32 %v3613_v4  ;;  %v3614_v2 = vadd.f32 %v3608_v15, %v95_v7  ;;  %v12272_v4 = vld [vmem:[%s15262_s5 + $0xa8] ss:$12 sps:$4 sm:$0xff]   ;;  %v12277_v15 = vld [vmem:[%s15262_s5 + $0xc4] ss:$12 sps:$4 sm:$0xff]  }
 0xae0   : > { %12609 = vtanh.f32 %v3614_v2 }
 0xae8   : > { %v12608_v36 = vpop.eup %12607 }
 0xae9   : > { %v3629_v56 = vmul.f32 %v12608_v36, %v3625_v55  ;;  %v12280_v55 = vld [vmem:[%s15262_s5 + $0xdc] ss:$12 sps:$4 sm:$0xff]  }
 0xaea   : > { %v12610_v38 = vpop.eup %12609 }
 0xaeb   : > { %v3630_v40 = vmul.f32 %v12610_v38, %v3626_v27  ;;  %v13802_v9 = vadd.f32 %v3629_v56, %v3621_v35   ;;  %v12278_v35 = vld [vmem:[%s15262_s5 + $0xd8] ss:$12 sps:$4 sm:$0xff]   ;;  %v12283_v27 = vld [vmem:[%s15262_s5 + $0xf4] ss:$12 sps:$4 sm:$0xff]   ;;  %v12281_v38 = vld [vmem:[%s15262_s5 + $0xf0] ss:$12 sps:$4 sm:$0xff]  }
 0xaed   : > { %15329 = vst [vmem:[#allocation21_spill] sm:$0xff] %v13802_v9  ;;  %v15330_v39 = vmov %v13802_v9  ;;  %v13804_v8 = vadd.f32 %v3630_v40, %v3622_v20   ;;  %v12286_v20 = vld [vmem:[%s15262_s5 + $0x10c] ss:$12 sps:$4 sm:$0xff]  }
 0xaef   : > { %15331 = vst [vmem:[#allocation22_spill] sm:$0xff] %v13804_v8  ;;  %v15332_v1 = vmov %v13804_v8 }
 0xaf0   : > { %v13808_v62 = vpack.c.bf16 %v15332_v1, %v15330_v39 }
 0xaf2   : > { %3653 = vxpose.xlu1.c.b16.start.end [1/1] (short) %v13808_v62, 128 }
 0xb34   : > { %v3645_v5 = vpop.trf.xlu0 }
 0xb35   : > { %11052 = vmatprep.mubr.msk.bf16.mxu1 %vm135_vm0, %v3645_v5 }
 0xb38   : > { %v3646_v17 = vpop.trf.xlu0 }
 0xb39   : > { %11053 = vmatmul.mubr.msk.bf16.vlgmr.msra.gmra.mrb[168].mxu1 %vm135_vm0, %v3646_v17 }
 0xb3a   : > { %11119 = vmatpush3.bf16.xpose.msra.mxu1 %v12904_v18 }
 0xb3b   : > { %5618 = vmatprep.subr.bf16.mxu1 %v12253_v42 }
 0xb3c   : > { %v3647_v57 = vpop.trf.xlu0 }
 0xb3d   : > { %11056 = vmatprep.mubr.msk.bf16.mxu1 %vm135_vm0, %v3647_v57 }
 0xb40   : > { %v3648_v21 = vpop.trf.xlu0 }
 0xb41   : > { %11057 = vmatmul.mubr.msk.bf16.gmra.mrb[172].mxu1 %vm135_vm0, %v3648_v21 }
 0xb44   : > { %v3649_v8 = vpop.trf.xlu0 }
 0xb45   : > { %11060 = vmatprep.mubr.msk.bf16.mxu1 %vm135_vm0, %v3649_v8 }
 0xb48   : > { %v3650_v24 = vpop.trf.xlu0 }
 0xb49   : > { %11061 = vmatmul.mubr.msk.bf16.gmra.mrb[176].mxu1 %vm135_vm0, %v3650_v24 }
 0xb4c   : > { %v3651_v22 = vpop.trf.xlu0 }
 0xb4d   : > { %11064 = vmatprep.mubr.msk.bf16.mxu1 %vm135_vm0, %v3651_v22 }
 0xb50   : > { %v3652_v12 = vpop.trf.xlu0 }
 0xb51   : > { %11065 = vmatmul.mubr.msk.bf16.gmra.mrb[180].mxu1 %vm135_vm0, %v3652_v12 }
 0xb58   : > { %v3661_v19 = vpop.trf.xlu1 }
 0xb59   : > { %11068 = vmatprep.mubr.msk.bf16.mxu1 %vm135_vm0, %v3661_v19 }
 0xb5c   : > { %v3662_v29 = vpop.trf.xlu1 }
 0xb5d   : > { %11069 = vmatmul.mubr.msk.bf16.gmra.mrb[184].mxu1 %vm135_vm0, %v3662_v29 }
 0xb60   : > { %v3663_v30 = vpop.trf.xlu1 }
 0xb61   : > { %11072 = vmatprep.mubr.msk.bf16.mxu1 %vm135_vm0, %v3663_v30 }
 0xb64   : > { %v3664_v28 = vpop.trf.xlu1 }
 0xb65   : > { %11073 = vmatmul.mubr.msk.bf16.gmra.mrb[188].mxu1 %vm135_vm0, %v3664_v28 }
 0xb68   : > { %v3665_v32 = vpop.trf.xlu1 }
 0xb69   : > { %11076 = vmatprep.mubr.msk.bf16.mxu1 %vm135_vm0, %v3665_v32 }
 0xb6c   : > { %v3666_v51 = vpop.trf.xlu1 }
 0xb6d   : > { %11077 = vmatmul.mubr.msk.bf16.gmra.mrb[192].mxu1 %vm135_vm0, %v3666_v51 }
 0xb70   : > { %v3667_v60 = vpop.trf.xlu1 }
 0xb71   : > { %11080 = vmatprep.mubr.msk.bf16.mxu1 %vm135_vm0, %v3667_v60 }
 0xb74   : > { %v3668_v63 = vpop.trf.xlu1 }
 0xb75   : > { %11081 = vmatmul.mubr.msk.bf16.gmra.mrb[196].mxu1 %vm135_vm0, %v3668_v63 }
 0xb76   : > { %11120 = vmatprep.mubr.msk.bf16.mxu1 %vm135_vm0, %v3645_v5 }
 0xb7d   : > { %11121 = vmatmul.mubr.msk.bf16.vlgmr.msra.gmra.mrb[200].mxu1 %vm135_vm0, %v3646_v17  ;;  %v12284_v17 = vld [vmem:[%s15262_s5 + $0x108] ss:$12 sps:$4 sm:$0xff]  }
 0xb7e   : > { %11124 = vmatprep.mubr.msk.bf16.mxu1 %vm135_vm0, %v3647_v57  ;;  %5619 = vmatpush1.bf16.msra.mxu1 %v12251_v41  ;;  %v12289_v57 = vld [vmem:[%s15262_s5 + $0x124] ss:$12 sps:$4 sm:$0xff]  }
 0xb7f   : > { %5620 = vmatprep.subr.bf16.mxu1 %v12256_v43 }
 0xb82   : > { %5621 = vmatpush1.bf16.msra.mxu1 %v12254_v44  ;;  %v12296_v44 = vld [vmem:[%s15262_s5 + $0x168] ss:$12 sps:$4 sm:$0xff]  }
 0xb83   : > { %5622 = vmatprep.subr.bf16.mxu1 %v12259_v10 }
 0xb85   : > { %11125 = vmatmul.mubr.msk.bf16.gmra.mrb[204].mxu1 %vm135_vm0, %v3648_v21  ;;  %v12287_v21 = vld [vmem:[%s15262_s5 + $0x120] ss:$12 sps:$4 sm:$0xff]  }
 0xb86   : > { %11128 = vmatprep.mubr.msk.bf16.mxu1 %vm135_vm0, %v3649_v8  ;;  %5623 = vmatpush1.bf16.msra.mxu1 %v12257_v23  ;;  %v12292_v8 = vld [vmem:[%s15262_s5 + $0x13c] ss:$12 sps:$4 sm:$0xff]   ;;  %v12298_v23 = vld [vmem:[%s15262_s5 + $0x16c] ss:$12 sps:$4 sm:$0xff]  }
 0xb87   : > { %5624 = vmatprep.subr.bf16.mxu1 %v12262_v47 }
 0xb8a   : > { %5625 = vmatpush1.bf16.msra.mxu1 %v12260_v6 }
 0xb8b   : > { %5626 = vmatprep.subr.bf16.mxu1 %v12265_v31 }
 0xb8d   : > { %11129 = vmatmul.mubr.msk.bf16.gmra.mrb[208].mxu1 %vm135_vm0, %v3650_v24 }
 0xb8e   : > { %11132 = vmatprep.mubr.msk.bf16.mxu1 %vm135_vm0, %v3651_v22  ;;  %5627 = vmatpush1.bf16.msra.mxu1 %v12263_v54  ;;  %v12290_v22 = vld [vmem:[%s15262_s5 + $0x138] ss:$12 sps:$4 sm:$0xff]  }
 0xb8f   : > { %5628 = vmatprep.subr.bf16.mxu1 %v12268_v49 }
 0xb92   : > { %5629 = vmatpush1.bf16.msra.mxu1 %v12266_v59 }
 0xb93   : > { %5630 = vmatprep.subr.bf16.mxu1 %v12271_v11 }
 0xb95   : > { %11133 = vmatmul.mubr.msk.bf16.gmra.mrb[212].mxu1 %vm135_vm0, %v3652_v12 }
 0xb96   : > { %11136 = vmatprep.mubr.msk.bf16.mxu1 %vm135_vm0, %v3661_v19  ;;  %5631 = vmatpush1.bf16.msra.mxu1 %v12269_v0 }
 0xb97   : > { %5632 = vmatprep.subr.bf16.mxu1 %v12274_v52 }
 0xb9a   : > { %5633 = vmatpush1.bf16.msra.mxu1 %v12272_v4 }
 0xb9b   : > { %5634 = vmatprep.subr.bf16.mxu1 %v12277_v15 }
 0xb9d   : > { %11137 = vmatmul.mubr.msk.bf16.gmra.mrb[216].mxu1 %vm135_vm0, %v3662_v29 }
 0xb9e   : > { %11140 = vmatprep.mubr.msk.bf16.mxu1 %vm135_vm0, %v3663_v30  ;;  %5635 = vmatpush1.bf16.msra.mxu1 %v12275_v33 }
 0xb9f   : > { %5636 = vmatprep.subr.bf16.mxu1 %v12280_v55 }
 0xba2   : > { %5637 = vmatpush1.bf16.msra.mxu1 %v12278_v35 }
 0xba3   : > { %5638 = vmatprep.subr.bf16.mxu1 %v12283_v27 }
 0xba5   : > { %11141 = vmatmul.mubr.msk.bf16.gmra.mrb[220].mxu1 %vm135_vm0, %v3664_v28 }
 0xba6   : > { %11144 = vmatprep.mubr.msk.bf16.mxu1 %vm135_vm0, %v3665_v32  ;;  %5639 = vmatpush1.bf16.msra.mxu1 %v12281_v38 }
 0xba7   : > { %5640 = vmatprep.subr.bf16.mxu1 %v12286_v20 }
 0xbaa   : > { %5641 = vmatpush1.bf16.msra.mxu1 %v12284_v17 }
 0xbab   : > { %5642 = vmatprep.subr.bf16.mxu1 %v12289_v57 }
 0xbad   : > { %11145 = vmatmul.mubr.msk.bf16.gmra.mrb[224].mxu1 %vm135_vm0, %v3666_v51 }
 0xbae   : > { %11148 = vmatprep.mubr.msk.bf16.mxu1 %vm135_vm0, %v3667_v60  ;;  %5643 = vmatpush1.bf16.msra.mxu1 %v12287_v21  ;;  %v12293_v60 = vld [vmem:[%s15262_s5 + $0x150] ss:$12 sps:$4 sm:$0xff]  }
 0xbaf   : > { %5644 = vmatprep.subr.bf16.mxu1 %v12292_v8 }
 0xbb2   : > { %5645 = vmatpush1.bf16.msra.mxu1 %v12290_v22 }
 0xbb5   : > { %11149 = vmatmul.mubr.msk.bf16.gmra.mrb[228].mxu1 %vm135_vm0, %v3668_v63  ;;  %v12295_v63 = vld [vmem:[%s15262_s5 + $0x154] ss:$12 sps:$4 sm:$0xff]  }
 0xbb6   : > { %5646 = vmatprep.subr.bf16.mxu1 %v12295_v63 }
 0xbb7   : > { %5647 = vmatpush1.bf16.msra.mxu1 %v12293_v60 }
 0xbb8   : > { %5648 = vmatprep.subr.bf16.mxu1 %v12298_v23 }
 0xbbb   : > { %5649 = vmatpush1.bf16.msra.mxu1 %v12296_v44 }
 0xc0c   : > { %v13868_v58 = vpop.f32.mrb[168].mxu1 }
 0xc0d   : > { %v3751_v48 = vpop.f32.mrb[169].mxu1 }
 0xc0e   : > { %v13879_v25 = vpop.f32.mrb[170].mxu1 }
 0xc0f   : > { %v3754_v61 = vpop.f32.mrb[171].mxu1 }
 0xc14   : > { %v13887_v3 = vpop.f32.mrb[172].mxu1 }
 0xc15   : > { %v13892_v26 = vpop.f32.mrb[173].mxu1 }
 0xc16   : > { %v13897_v7 = vpop.f32.mrb[174].mxu1 }
 0xc17   : > { %v13899_v53 = vpop.f32.mrb[175].mxu1 }
 0xc1c   : > { %v13907_v2 = vpop.f32.mrb[176].mxu1 }
 0xc1d   : > { %v13912_v34 = vpop.f32.mrb[177].mxu1 }
 0xc1e   : > { %v13917_v36 = vpop.f32.mrb[178].mxu1 }
 0xc1f   : > { %v13919_v37 = vpop.f32.mrb[179].mxu1 }
 0xc24   : > { %v13927_v56 = vpop.f32.mrb[180].mxu1 }
 0xc25   : > { %v13932_v9 = vpop.f32.mrb[181].mxu1 }
 0xc26   : > { %v13937_v40 = vpop.f32.mrb[182].mxu1 }
 0xc27   : > { %v13939_v5 = vpop.f32.mrb[183].mxu1 }
 0xc30   : > { %v11070_v24 = vpop.f32.mrb[184].mxu1 }
 0xc31   : > { %v11843_v12 = vpack.i.bf16 %v11070_v24, %v13868_v58  ;;  %v3815_v19 = vpop.f32.mrb[185].mxu1 }
 0xc32   : > { %v11839_v29 = vpack.i.bf16 %v3815_v19, %v3751_v48  ;;  %v11071_v30 = vpop.f32.mrb[186].mxu1 }
 0xc33   : > { %v11845_v28 = vpack.i.bf16 %v11071_v30, %v13879_v25  ;;  %v3818_v32 = vpop.f32.mrb[187].mxu1 }
 0xc34   : > { %v11841_v51 = vpack.i.bf16 %v3818_v32, %v3754_v61  ;;  %11840 = vxpose.xlu0.b32.start [1/16] (narrow) %v11839_v29, 16 }
 0xc38   : > { %11842 = vxpose.xlu0.b32.cont [2/16] (narrow) %v11841_v51, 16  ;;  %v11074_v41 = vpop.f32.mrb[188].mxu1 }
 0xc39   : > { %v11851_v42 = vpack.i.bf16 %v11074_v41, %v13887_v3  ;;  %v3831_v43 = vpop.f32.mrb[189].mxu1 }
 0xc3a   : > { %v11847_v10 = vpack.i.bf16 %v3831_v43, %v13892_v26  ;;  %v11075_v47 = vpop.f32.mrb[190].mxu1 }
 0xc3b   : > { %v11853_v6 = vpack.i.bf16 %v11075_v47, %v13897_v7  ;;  %v3834_v58 = vpop.f32.mrb[191].mxu1 }
 0xc3c   : > { %v11849_v54 = vpack.i.bf16 %v3834_v58, %v13899_v53  ;;  %11844 = vxpose.xlu0.b32.cont [3/16] (narrow) %v11843_v12, 16 }
 0xc40   : > { %11846 = vxpose.xlu0.b32.cont [4/16] (narrow) %v11845_v28, 16  ;;  %v11078_v31 = vpop.f32.mrb[192].mxu1 }
 0xc41   : > { %v11859_v48 = vpack.i.bf16 %v11078_v31, %v13907_v2  ;;  %v3847_v49 = vpop.f32.mrb[193].mxu1 }
 0xc42   : > { %v11855_v25 = vpack.i.bf16 %v3847_v49, %v13912_v34  ;;  %v11079_v61 = vpop.f32.mrb[194].mxu1 }
 0xc43   : > { %v11861_v59 = vpack.i.bf16 %v11079_v61, %v13917_v36  ;;  %v3850_v11 = vpop.f32.mrb[195].mxu1 }
 0xc44   : > { %v11857_v3 = vpack.i.bf16 %v3850_v11, %v13919_v37  ;;  %11848 = vxpose.xlu0.b32.cont [5/16] (narrow) %v11847_v10, 16 }
 0xc48   : > { %11850 = vxpose.xlu0.b32.cont [6/16] (narrow) %v11849_v54, 16  ;;  %v11082_v0 = vpop.f32.mrb[196].mxu1 }
 0xc49   : > { %v11867_v26 = vpack.i.bf16 %v11082_v0, %v13927_v56  ;;  %v3863_v52 = vpop.f32.mrb[197].mxu1 }
 0xc4a   : > { %v11863_v7 = vpack.i.bf16 %v3863_v52, %v13932_v9  ;;  %v11083_v53 = vpop.f32.mrb[198].mxu1 }
 0xc4b   : > { %v11869_v4 = vpack.i.bf16 %v11083_v53, %v13937_v40  ;;  %v3866_v15 = vpop.f32.mrb[199].mxu1 }
 0xc4c   : > { %v11865_v2 = vpack.i.bf16 %v3866_v15, %v13939_v5  ;;  %11852 = vxpose.xlu0.b32.cont [7/16] (narrow) %v11851_v42, 16 }
 0xc50   : > { %11854 = vxpose.xlu0.b32.cont [8/16] (narrow) %v11853_v6, 16  ;;  %v13982_v33 = vpop.f32.mrb[200].mxu1 }
 0xc51   : > { %v13984_v34 = vpop.f32.mrb[201].mxu1 }
 0xc52   : > { %v13986_v55 = vpop.f32.mrb[202].mxu1 }
 0xc53   : > { %v13988_v36 = vpop.f32.mrb[203].mxu1 }
 0xc54   : > { %11856 = vxpose.xlu0.b32.cont [9/16] (narrow) %v11855_v25, 16 }
 0xc58   : > { %11858 = vxpose.xlu0.b32.cont [10/16] (narrow) %v11857_v3, 16  ;;  %v13990_v37 = vpop.f32.mrb[204].mxu1 }
 0xc59   : > { %v13992_v35 = vpop.f32.mrb[205].mxu1 }
 0xc5a   : > { %v13994_v27 = vpop.f32.mrb[206].mxu1 }
 0xc5b   : > { %v13996_v56 = vpop.f32.mrb[207].mxu1 }
 0xc5c   : > { %11860 = vxpose.xlu0.b32.cont [11/16] (narrow) %v11859_v48, 16 }
 0xc60   : > { %11862 = vxpose.xlu0.b32.cont [12/16] (narrow) %v11861_v59, 16  ;;  %v13998_v38 = vpop.f32.mrb[208].mxu1 }
 0xc61   : > { %v14000_v9 = vpop.f32.mrb[209].mxu1 }
 0xc62   : > { %v14002_v20 = vpop.f32.mrb[210].mxu1 }
 0xc63   : > { %v14004_v40 = vpop.f32.mrb[211].mxu1 }
 0xc64   : > { %11864 = vxpose.xlu0.b32.cont [13/16] (narrow) %v11863_v7, 16 }
 0xc68   : > { %11866 = vxpose.xlu0.b32.cont [14/16] (narrow) %v11865_v2, 16  ;;  %v14006_v5 = vpop.f32.mrb[212].mxu1 }
 0xc69   : > { %v14008_v17 = vpop.f32.mrb[213].mxu1 }
 0xc6a   : > { %v14010_v57 = vpop.f32.mrb[214].mxu1 }
 0xc6b   : > { %v4344_v21 = vpop.f32.mrb[215].mxu1 }
 0xc6c   : > { %11868 = vxpose.xlu0.b32.cont [15/16] (narrow) %v11867_v26, 16 }
 0xc70   : > { %11870 = vxpose.xlu0.b32.end [16/16] (narrow) %v11869_v4, 16  ;;  %v11138_v8 = vpop.f32.mrb[216].mxu1 }
 0xc71   : > { %v11885_v24 = vpack.i.bf16 %v11138_v8, %v13982_v33  ;;  %v4357_v22 = vpop.f32.mrb[217].mxu1 }
 0xc72   : > { %v11881_v12 = vpack.i.bf16 %v4357_v22, %v13984_v34  ;;  %v11139_v19 = vpop.f32.mrb[218].mxu1 }
 0xc73   : > { %v11887_v29 = vpack.i.bf16 %v11139_v19, %v13986_v55  ;;  %v4360_v30 = vpop.f32.mrb[219].mxu1 }
 0xc74   : > { %v11883_v28 = vpack.i.bf16 %v4360_v30, %v13988_v36 }
 0xc78   : > { %v11142_v32 = vpop.f32.mrb[220].mxu1 }
 0xc79   : > { %v11893_v51 = vpack.i.bf16 %v11142_v32, %v13990_v37  ;;  %v4373_v60 = vpop.f32.mrb[221].mxu1 }
 0xc7a   : > { %v11889_v63 = vpack.i.bf16 %v4373_v60, %v13992_v35  ;;  %v11143_v41 = vpop.f32.mrb[222].mxu1  ;;  %v12299_v60 = vld [vmem:[%s15262_s5 + $0xc8] ss:$12 sps:$4 sm:$0xff]  }
 0xc7b   : > { %v11895_v42 = vpack.i.bf16 %v11143_v41, %v13994_v27  ;;  %v4376_v43 = vpop.f32.mrb[223].mxu1  ;;  %v12317_v41 = vld [vmem:[%s15262_s5 + $0x184] ss:$12 sps:$4 sm:$0xff]  }
 0xc7c   : > { %v11891_v44 = vpack.i.bf16 %v4376_v43, %v13996_v56  ;;  %5671 = vmatprep.subr.bf16.mxu1 %v12317_v41  ;;  %v12320_v43 = vld [vmem:[%s15262_s5 + $0x19c] ss:$12 sps:$4 sm:$0xff]   ;;  %v12361_v41 = vld [vmem:[%s15262_s5 + $0x2a4] ss:$12 sps:$4 sm:$0xff]  }
 0xc80   : > { %v11146_v23 = vpop.f32.mrb[224].mxu1 }
 0xc81   : > { %v11901_v10 = vpack.i.bf16 %v11146_v23, %v13998_v38  ;;  %v4389_v47 = vpop.f32.mrb[225].mxu1  ;;  %v12323_v23 = vld [vmem:[%s15262_s5 + $0x1b4] ss:$12 sps:$4 sm:$0xff]  }
 0xc82   : > { %v11897_v6 = vpack.i.bf16 %v4389_v47, %v14000_v9  ;;  %v11147_v58 = vpop.f32.mrb[226].mxu1  ;;  %v12326_v47 = vld [vmem:[%s15262_s5 + $0x1cc] ss:$12 sps:$4 sm:$0xff]  }
 0xc83   : > { %v11903_v54 = vpack.i.bf16 %v11147_v58, %v14002_v20  ;;  %v4392_v31 = vpop.f32.mrb[227].mxu1  ;;  %v12300_v58 = vld [vmem:[%s15262_s5 + $0x8] ss:$12 sps:$4 sm:$0xff]  }
 0xc84   : > { %v11899_v48 = vpack.i.bf16 %v4392_v31, %v14004_v40  ;;  %v12327_v31 = vld [vmem:[%s15262_s5 + $0x1e0] ss:$12 sps:$4 sm:$0xff]  }
 0xc88   : > { %v11150_v49 = vpop.f32.mrb[228].mxu1 }
 0xc89   : > { %v11909_v25 = vpack.i.bf16 %v11150_v49, %v14006_v5  ;;  %v4405_v61 = vpop.f32.mrb[229].mxu1 }
 0xc8a   : > { %v11905_v59 = vpack.i.bf16 %v4405_v61, %v14008_v17  ;;  %v11151_v11 = vpop.f32.mrb[230].mxu1  ;;  %v12303_v61 = vld [vmem:[%s15262_s5 + $0xf8] ss:$12 sps:$4 sm:$0xff]  }
 0xc8b   : > { %v11911_v3 = vpack.i.bf16 %v11151_v11, %v14010_v57  ;;  %v4408_v0 = vpop.f32.mrb[231].mxu1  ;;  %v12332_v11 = vld [vmem:[%s15262_s5 + $0x1fc] ss:$12 sps:$4 sm:$0xff]  }
 0xc8c   : > { %v11907_v26 = vpack.i.bf16 %v4408_v0, %v4344_v21  ;;  %v12335_v0 = vld [vmem:[%s15262_s5 + $0x214] ss:$12 sps:$4 sm:$0xff]  }
 0xcb4   : > { %v11871_v52 = vpop.trf.xlu0 }
 0xcb5   : > { %v11875_v53 = vunpack.i.h.bf16 %v11871_v52  ;;  %v11872_v4 = vunpack.i.l.bf16 %v11871_v52  ;;  %v12333_v52 = vld [vmem:[%s15262_s5 + $0x210] ss:$12 sps:$4 sm:$0xff]  }
 0xcb8   : > { %v11876_v7 = vpop.trf.xlu0 }
 0xcb9   : > { %v11880_v15 = vunpack.i.h.bf16 %v11876_v7  ;;  %v11877_v2 = vunpack.i.l.bf16 %v11876_v7  ;;  %v12305_v7 = vld [vmem:[%s15262_s5 + $0x110] ss:$12 sps:$4 sm:$0xff]  }
 0xcbb   : > { %v14027_v33 = vpack.c.bf16 %v11880_v15, %v11875_v53  ;;  %v14029_v34 = vpack.c.bf16 %v11877_v2, %v11872_v4  ;;  %v12338_v53 = vld [vmem:[%s15262_s5 + $0x22c] ss:$12 sps:$4 sm:$0xff]   ;;  %v12306_v15 = vld [vmem:[%s15262_s5 + $0x50] ss:$12 sps:$4 sm:$0xff]   ;;  %v12336_v2 = vld [vmem:[%s15262_s5 + $0x228] ss:$12 sps:$4 sm:$0xff]  }
 0xcbd   : > { %3960 = vxpose.xlu0.c.b16.start.end [1/1] (short) %v14027_v33, 128  ;;  %3944 = vxpose.xlu1.c.b16.start.end [1/1] (short) %v14029_v34, 128 }
 0xcbe   : > { %5650 = vmatprep.mubr.bf16.mxu1 %v14029_v34 }
 0xcbf   : > { %5651 = vmatmul.mubr.bf16.vlgmr.msra.gmra.mrb[232].mxu1 %v13794_v50 }
 0xcc0   : > { %5660 = vmatprep.mubr.bf16.mxu1 %v14027_v33 }
 0xcc7   : > { %5661 = vmatmul.mubr.bf16.gmra.mrb[236].mxu1 %v13808_v62 }
 0xce3   : > { %11882 = vxpose.xlu1.b32.start [1/16] (narrow) %v11881_v12, 16 }
 0xce7   : > { %11884 = vxpose.xlu1.b32.cont [2/16] (narrow) %v11883_v28, 16 }
 0xceb   : > { %11886 = vxpose.xlu1.b32.cont [3/16] (narrow) %v11885_v24, 16 }
 0xcef   : > { %11888 = vxpose.xlu1.b32.cont [4/16] (narrow) %v11887_v29, 16 }
 0xcf3   : > { %11890 = vxpose.xlu1.b32.cont [5/16] (narrow) %v11889_v63, 16  ;;  %v12315_v63 = vld [vmem:[%s15262_s5 + $0x180] ss:$12 sps:$4 sm:$0xff]  }
 0xcf4   : > { %5672 = vmatpush1.bf16.msra.mxu1 %v12315_v63  ;;  %v12354_v63 = vld [vmem:[%s15262_s5 + $0x288] ss:$12 sps:$4 sm:$0xff]  }
 0xcf5   : > { %5673 = vmatprep.subr.bf16.mxu1 %v12320_v43  ;;  %v12359_v43 = vld [vmem:[%s15262_s5 + $0x2a0] ss:$12 sps:$4 sm:$0xff]  }
 0xcf7   : > { %11892 = vxpose.xlu1.b32.cont [6/16] (narrow) %v11891_v44, 16  ;;  %v12321_v44 = vld [vmem:[%s15262_s5 + $0x1b0] ss:$12 sps:$4 sm:$0xff]  }
 0xcfb   : > { %11894 = vxpose.xlu1.b32.cont [7/16] (narrow) %v11893_v51, 16 }
 0xcff   : > { %11896 = vxpose.xlu1.b32.cont [8/16] (narrow) %v11895_v42, 16  ;;  %v12318_v42 = vld [vmem:[%s15262_s5 + $0x198] ss:$12 sps:$4 sm:$0xff]  }
 0xd00   : > { %5674 = vmatpush1.bf16.msra.mxu1 %v12318_v42 }
 0xd01   : > { %5675 = vmatprep.subr.bf16.mxu1 %v12323_v23  ;;  %v12364_v23 = vld [vmem:[%s15262_s5 + $0x2b8] ss:$12 sps:$4 sm:$0xff]  }
 0xd03   : > { %11898 = vxpose.xlu1.b32.cont [9/16] (narrow) %v11897_v6, 16 }
 0xd04   : > { %5676 = vmatpush1.bf16.msra.mxu1 %v12321_v44  ;;  %v12366_v44 = vld [vmem:[%s15262_s5 + $0x2bc] ss:$12 sps:$4 sm:$0xff]  }
 0xd05   : > { %5677 = vmatprep.subr.bf16.mxu1 %v12326_v47 }
 0xd07   : > { %11900 = vxpose.xlu1.b32.cont [10/16] (narrow) %v11899_v48, 16  ;;  %v12329_v48 = vld [vmem:[%s15262_s5 + $0x1e4] ss:$12 sps:$4 sm:$0xff]  }
 0xd0b   : > { %11902 = vxpose.xlu1.b32.cont [11/16] (narrow) %v11901_v10, 16  ;;  %v12324_v10 = vld [vmem:[%s15262_s5 + $0x1c8] ss:$12 sps:$4 sm:$0xff]  }
 0xd0c   : > { %5678 = vmatpush1.bf16.msra.mxu1 %v12324_v10 }
 0xd0d   : > { %5679 = vmatprep.subr.bf16.mxu1 %v12329_v48 }
 0xd0f   : > { %11904 = vxpose.xlu1.b32.cont [12/16] (narrow) %v11903_v54, 16  ;;  %v12301_v54 = vld [vmem:[%s15262_s5 + $0xe0] ss:$12 sps:$4 sm:$0xff]  }
 0xd10   : > { %5680 = vmatpush1.bf16.msra.mxu1 %v12327_v31  ;;  %v12371_v31 = vld [vmem:[%s15262_s5 + $0x2d4] ss:$12 sps:$4 sm:$0xff]  }
 0xd11   : > { %5681 = vmatprep.subr.bf16.mxu1 %v12332_v11  ;;  %v12374_v11 = vld [vmem:[%s15262_s5 + $0x2e8] ss:$12 sps:$4 sm:$0xff]  }
 0xd13   : > { %11906 = vxpose.xlu1.b32.cont [13/16] (narrow) %v11905_v59, 16  ;;  %v12330_v59 = vld [vmem:[%s15262_s5 + $0x1f8] ss:$12 sps:$4 sm:$0xff]  }
 0xd14   : > { %5682 = vmatpush1.bf16.msra.mxu1 %v12330_v59 }
 0xd15   : > { %5683 = vmatprep.subr.bf16.mxu1 %v12335_v0 }
 0xd17   : > { %11908 = vxpose.xlu1.b32.cont [14/16] (narrow) %v11907_v26, 16  ;;  %v12304_v26 = vld [vmem:[%s15262_s5 + $0x38] ss:$12 sps:$4 sm:$0xff]  }
 0xd18   : > { %5684 = vmatpush1.bf16.msra.mxu1 %v12333_v52 }
 0xd19   : > { %5685 = vmatprep.subr.bf16.mxu1 %v12338_v53 }
 0xd1b   : > { %11910 = vxpose.xlu1.b32.cont [15/16] (narrow) %v11909_v25, 16  ;;  %v12302_v25 = vld [vmem:[%s15262_s5 + $0x20] ss:$12 sps:$4 sm:$0xff]  }
 0xd1c   : > { %5686 = vmatpush1.bf16.msra.mxu1 %v12336_v2 }
 0xd1f   : > { %11912 = vxpose.xlu1.b32.end [16/16] (narrow) %v11911_v3, 16 }
 0xd23   : > { %v3952_v55 = vpop.trf.xlu1  ;;  %v3968_v38 = vpop.trf.xlu0 }
 0xd24   : > { %11086 = vmatprep.mubr.msk.bf16.mxu0 %vm135_vm0, %v3952_v55  ;;  %v12307_v55 = vld [vmem:[%s15262_s5 + $0x128] ss:$12 sps:$4 sm:$0xff]  }
 0xd27   : > { %v3953_v36 = vpop.trf.xlu1  ;;  %v3969_v40 = vpop.trf.xlu0 }
 0xd28   : > { %11087 = vmatmul.mubr.msk.bf16.vlgmr.msra.gmra.mrb[116].mxu0 %vm135_vm0, %v3953_v36  ;;  %v12341_v36 = vld [vmem:[%s15262_s5 + $0x244] ss:$12 sps:$4 sm:$0xff]  }
 0xd29   : > { %11153 = vmatpush3.bf16.xpose.msra.mxu0 %v12904_v18  ;;  %5687 = vmatprep.subr.bf16.mxu1 %v12341_v36  ;;  %v12343_v36 = vld [vmem:[%s15262_s5 + $0x188] ss:$12 sps:$4 sm:$0xff]  }
 0xd2a   : > { %10490 = vmatprep.subr.bf16.mxu0 %v12299_v60  ;;  %v12342_v60 = vld [vmem:[%s15262_s5 + $0x248] ss:$12 sps:$4 sm:$0xff]  }
 0xd2b   : > { %v3954_v37 = vpop.trf.xlu1  ;;  %v3970_v5 = vpop.trf.xlu0 }
 0xd2c   : > { %11090 = vmatprep.mubr.msk.bf16.mxu0 %vm135_vm0, %v3954_v37 }
 0xd2f   : > { %v3955_v35 = vpop.trf.xlu1  ;;  %v3971_v17 = vpop.trf.xlu0 }
 0xd30   : > { %11091 = vmatmul.mubr.msk.bf16.gmra.mrb[120].mxu0 %vm135_vm0, %v3955_v35 }
 0xd33   : > { %v3956_v27 = vpop.trf.xlu1  ;;  %v3972_v57 = vpop.trf.xlu0 }
 0xd34   : > { %11094 = vmatprep.mubr.msk.bf16.mxu0 %vm135_vm0, %v3956_v27  ;;  %v12308_v27 = vld [vmem:[%s15262_s5 + $0x68] ss:$12 sps:$4 sm:$0xff]  }
 0xd37   : > { %v3957_v56 = vpop.trf.xlu1  ;;  %v3973_v21 = vpop.trf.xlu0 }
 0xd38   : > { %11095 = vmatmul.mubr.msk.bf16.gmra.mrb[124].mxu0 %vm135_vm0, %v3957_v56  ;;  %v12339_v56 = vld [vmem:[%s15262_s5 + $0x240] ss:$12 sps:$4 sm:$0xff]  }
 0xd39   : > { %5688 = vmatpush1.bf16.msra.mxu1 %v12339_v56  ;;  %v12352_v56 = vld [vmem:[%s15262_s5 + $0x278] ss:$12 sps:$4 sm:$0xff]  }
 0xd3b   : > { %v3958_v9 = vpop.trf.xlu1  ;;  %v3974_v8 = vpop.trf.xlu0 }
 0xd3c   : > { %11098 = vmatprep.mubr.msk.bf16.mxu0 %vm135_vm0, %v3958_v9  ;;  %v12346_v9 = vld [vmem:[%s15262_s5 + $0x25c] ss:$12 sps:$4 sm:$0xff]  }
 0xd3d   : > { %5689 = vmatprep.subr.bf16.mxu1 %v12346_v9 }
 0xd3f   : > { %v3959_v20 = vpop.trf.xlu1  ;;  %v3975_v24 = vpop.trf.xlu0 }
 0xd40   : > { %11099 = vmatmul.mubr.msk.bf16.gmra.mrb[128].mxu0 %vm135_vm0, %v3959_v20 }
 0xd41   : > { %11102 = vmatprep.mubr.msk.bf16.mxu0 %vm135_vm0, %v3968_v38  ;;  %v12309_v38 = vld [vmem:[%s15262_s5 + $0x140] ss:$12 sps:$4 sm:$0xff]  }
 0xd48   : > { %11103 = vmatmul.mubr.msk.bf16.gmra.mrb[132].mxu0 %vm135_vm0, %v3969_v40 }
 0xd49   : > { %11106 = vmatprep.mubr.msk.bf16.mxu0 %vm135_vm0, %v3970_v5  ;;  %v12310_v5 = vld [vmem:[%s15262_s5 + $0x80] ss:$12 sps:$4 sm:$0xff]  }
 0xd50   : > { %11107 = vmatmul.mubr.msk.bf16.gmra.mrb[136].mxu0 %vm135_vm0, %v3971_v17  ;;  %v12344_v17 = vld [vmem:[%s15262_s5 + $0x258] ss:$12 sps:$4 sm:$0xff]  }
 0xd51   : > { %11110 = vmatprep.mubr.msk.bf16.mxu0 %vm135_vm0, %v3972_v57  ;;  %v12311_v57 = vld [vmem:[%s15262_s5 + $0x158] ss:$12 sps:$4 sm:$0xff]   ;;  %5690 = vmatpush1.bf16.msra.mxu1 %v12344_v17  ;;  %v12362_v17 = vld [vmem:[%s15262_s5 + $0x2a8] ss:$12 sps:$4 sm:$0xff]  }
 0xd58   : > { %11111 = vmatmul.mubr.msk.bf16.gmra.mrb[140].mxu0 %vm135_vm0, %v3973_v21  ;;  %v12351_v21 = vld [vmem:[%s15262_s5 + $0x274] ss:$12 sps:$4 sm:$0xff]  }
 0xd59   : > { %11114 = vmatprep.mubr.msk.bf16.mxu0 %vm135_vm0, %v3974_v8  ;;  %5691 = vmatprep.subr.bf16.mxu1 %v12351_v21 }
 0xd60   : > { %11115 = vmatmul.mubr.msk.bf16.gmra.mrb[144].mxu0 %vm135_vm0, %v3975_v24  ;;  %v12312_v24 = vld [vmem:[%s15262_s5 + $0x98] ss:$12 sps:$4 sm:$0xff]  }
 0xd63   : > { %v11913_v22 = vpop.trf.xlu1 }
 0xd64   : > { %v11917_v12 = vunpack.i.h.bf16 %v11913_v22  ;;  %v11914_v19 = vunpack.i.l.bf16 %v11913_v22  ;;  %v12313_v22 = vld [vmem:[%s15262_s5 + $0x170] ss:$12 sps:$4 sm:$0xff]  }
 0xd67   : > { %v11918_v29 = vpop.trf.xlu1 }
 0xd68   : > { %v11922_v30 = vunpack.i.h.bf16 %v11918_v29  ;;  %v11919_v28 = vunpack.i.l.bf16 %v11918_v29 }
 0xd6a   : > { %v14054_v32 = vpack.c.bf16 %v11922_v30, %v11917_v12  ;;  %v14056_v51 = vpack.c.bf16 %v11919_v28, %v11914_v19  ;;  %v12349_v12 = vld [vmem:[%s15262_s5 + $0x270] ss:$12 sps:$4 sm:$0xff]   ;;  %v12356_v30 = vld [vmem:[%s15262_s5 + $0x28c] ss:$12 sps:$4 sm:$0xff]  }
 0xd6b   : > { %v12314_v28 = vld [vmem:[%s15262_s5 + $0xb0] ss:$12 sps:$4 sm:$0xff]   ;;  %5692 = vmatpush1.bf16.msra.mxu1 %v12349_v12  ;;  %v12372_v12 = vld [vmem:[%s15262_s5 + $0x2d8] ss:$12 sps:$4 sm:$0xff]  }
 0xd6c   : > { %4502 = vxpose.xlu1.c.b16.start.end [1/1] (short) %v14054_v32, 128  ;;  %4486 = vxpose.xlu0.c.b16.start.end [1/1] (short) %v14056_v51, 128 }
 0xd6d   : > { %5703 = vmatprep.mubr.bf16.mxu1 %v14056_v51  ;;  %5693 = vmatprep.subr.bf16.mxu1 %v12356_v30  ;;  %v12373_v30 = vld [vmem:[%s15262_s5 + $0x218] ss:$12 sps:$4 sm:$0xff]  }
 0xd6f   : > { %5694 = vmatpush1.bf16.msra.mxu1 %v12354_v63  ;;  %v12377_v63 = vld [vmem:[%s15262_s5 + $0x2f0] ss:$12 sps:$4 sm:$0xff]  }
 0xd70   : > { %5695 = vmatprep.subr.bf16.mxu1 %v12361_v41  ;;  %v12378_v41 = vld [vmem:[%s15262_s5 + $0x230] ss:$12 sps:$4 sm:$0xff]  }
 0xd73   : > { %5696 = vmatpush1.bf16.msra.mxu1 %v12359_v43 }
 0xd74   : > { %5697 = vmatprep.subr.bf16.mxu1 %v12366_v44 }
 0xd77   : > { %5698 = vmatpush1.bf16.msra.mxu1 %v12364_v23 }
 0xd78   : > { %5699 = vmatprep.subr.bf16.mxu1 %v12371_v31 }
 0xdd2   : > { %v4494_v6 = vpop.trf.xlu0  ;;  %v4510_v35 = vpop.trf.xlu1 }
 0xdd3   : > { %11154 = vmatprep.mubr.msk.bf16.mxu0 %vm135_vm0, %v4494_v6 }
 0xdd6   : > { %v4495_v49 = vpop.trf.xlu0  ;;  %v4511_v40 = vpop.trf.xlu1 }
 0xdd7   : > { %11155 = vmatmul.mubr.msk.bf16.vlgmr.msra.gmra.mrb[148].mxu0 %vm135_vm0, %v4495_v49  ;;  %v12369_v49 = vld [vmem:[%s15262_s5 + $0x2d0] ss:$12 sps:$4 sm:$0xff]  }
 0xdd8   : > { %10491 = vmatpush3.bf16.msra.mxu0 %v12300_v58  ;;  %5700 = vmatpush1.bf16.msra.mxu1 %v12369_v49  ;;  %v12379_v49 = vld [vmem:[%s15262_s5 + $0x300] ss:$12 sps:$4 sm:$0xff]  }
 0xdd9   : > { %10492 = vmatprep.subr.bf16.mxu0 %v12301_v54 }
 0xdda   : > { %v4496_v3 = vpop.trf.xlu0  ;;  %v4512_v29 = vpop.trf.xlu1 }
 0xddb   : > { %11158 = vmatprep.mubr.msk.bf16.mxu0 %vm135_vm0, %v4496_v3 }
 0xddc   : > { %10493 = vmatpush3.bf16.msra.mxu0 %v12302_v25 }
 0xddd   : > { %10494 = vmatprep.subr.bf16.mxu0 %v12303_v61  ;;  %v12376_v61 = vld [vmem:[%s15262_s5 + $0x2ec] ss:$12 sps:$4 sm:$0xff]  }
 0xdde   : > { %v4497_v4 = vpop.trf.xlu0  ;;  %v4513_v42 = vpop.trf.xlu1  ;;  %5701 = vmatprep.subr.bf16.mxu1 %v12376_v61  ;;  %v12384_v61 = vld [vmem:[%s15262_s5 + $0x31c] ss:$12 sps:$4 sm:$0xff]  }
 0xddf   : > { %11159 = vmatmul.mubr.msk.bf16.gmra.mrb[152].mxu0 %vm135_vm0, %v4497_v4  ;;  %5702 = vmatpush1.bf16.msra.mxu1 %v12374_v11  ;;  %v12385_v11 = vld [vmem:[%s15262_s5 + $0x330] ss:$12 sps:$4 sm:$0xff]  }
 0xde0   : > { %10495 = vmatpush3.bf16.msra.mxu0 %v12304_v26 }
 0xde1   : > { %10496 = vmatprep.subr.bf16.mxu0 %v12305_v7 }
 0xde2   : > { %v4498_v37 = vpop.trf.xlu0  ;;  %v4514_v10 = vpop.trf.xlu1 }
 0xde3   : > { %11162 = vmatprep.mubr.msk.bf16.mxu0 %vm135_vm0, %v4498_v37 }
 0xde4   : > { %10497 = vmatpush3.bf16.msra.mxu0 %v12306_v15 }
 0xde5   : > { %10498 = vmatprep.subr.bf16.mxu0 %v12307_v55 }
 0xde6   : > { %v4499_v20 = vpop.trf.xlu0  ;;  %v4515_v48 = vpop.trf.xlu1 }
 0xde7   : > { %11163 = vmatmul.mubr.msk.bf16.gmra.mrb[156].mxu0 %vm135_vm0, %v4499_v20 }
 0xde8   : > { %10499 = vmatpush3.bf16.msra.mxu0 %v12308_v27 }
 0xde9   : > { %10500 = vmatprep.subr.bf16.mxu0 %v12309_v38 }
 0xdea   : > { %v4500_v8 = vpop.trf.xlu0  ;;  %v4516_v0 = vpop.trf.xlu1 }
 0xdeb   : > { %11166 = vmatprep.mubr.msk.bf16.mxu0 %vm135_vm0, %v4500_v8 }
 0xdec   : > { %10501 = vmatpush3.bf16.msra.mxu0 %v12310_v5  ;;  %v12358_v5 = vld [vmem:[%s15262_s5 + $0x1d0] ss:$12 sps:$4 sm:$0xff]  }
 0xded   : > { %10502 = vmatprep.subr.bf16.mxu0 %v12311_v57 }
 0xdee   : > { %v4501_v19 = vpop.trf.xlu0  ;;  %v4517_v7 = vpop.trf.xlu1 }
 0xdef   : > { %11167 = vmatmul.mubr.msk.bf16.gmra.mrb[160].mxu0 %vm135_vm0, %v4501_v19 }
 0xdf0   : > { %11170 = vmatprep.mubr.msk.bf16.mxu0 %vm135_vm0, %v4510_v35  ;;  %10503 = vmatpush3.bf16.msra.mxu0 %v12312_v24  ;;  %v12347_v35 = vld [vmem:[%s15262_s5 + $0x260] ss:$12 sps:$4 sm:$0xff]  }
 0xdf1   : > { %10504 = vmatprep.subr.bf16.mxu0 %v12313_v22  ;;  %v12367_v24 = vld [vmem:[%s15262_s5 + $0x2c0] ss:$12 sps:$4 sm:$0xff]  }
 0xdf2   : > { %v12368_v22 = vld [vmem:[%s15262_s5 + $0x200] ss:$12 sps:$4 sm:$0xff]  }
 0xdf4   : > { %10505 = vmatpush3.bf16.msra.mxu0 %v12314_v28 }
 0xdf5   : > { %10518 = vmatprep.subr.bf16.mxu0 %v12342_v60 }
 0xdf7   : > { %11171 = vmatmul.mubr.msk.bf16.gmra.mrb[164].mxu0 %vm135_vm0, %v4511_v40  ;;  %v12357_v40 = vld [vmem:[%s15262_s5 + $0x290] ss:$12 sps:$4 sm:$0xff]  }
 0xdf8   : > { %11174 = vmatprep.mubr.msk.bf16.mxu0 %vm135_vm0, %v4512_v29 }
 0xdfb   : > { %v11088_v47 = vpop.f32.mrb[116].mxu0 }
 0xdfc   : > { %v4058_v6 = vpop.f32.mrb[117].mxu0 }
 0xdfd   : > { %4185 = vxpose.xlu0.b32.start [1/16] (narrow) %v4058_v6, 16  ;;  %v11089_v58 = vpop.f32.mrb[118].mxu0 }
 0xdfe   : > { %v4061_v54 = vpop.f32.mrb[119].mxu0 }
 0xdff   : > { %11175 = vmatmul.mubr.msk.bf16.gmra.mrb[168].mxu0 %vm135_vm0, %v4513_v42 }
 0xe00   : > { %11178 = vmatprep.mubr.msk.bf16.mxu0 %vm135_vm0, %v4514_v10 }
 0xe01   : > { %4186 = vxpose.xlu0.b32.cont [2/16] (narrow) %v4061_v54, 16 }
 0xe03   : > { %v11092_v25 = vpop.f32.mrb[120].mxu0 }
 0xe04   : > { %v4074_v59 = vpop.f32.mrb[121].mxu0 }
 0xe05   : > { %4187 = vxpose.xlu0.b32.cont [3/16] (narrow) %v11088_v47, 16  ;;  %v11093_v3 = vpop.f32.mrb[122].mxu0 }
 0xe06   : > { %v4077_v26 = vpop.f32.mrb[123].mxu0 }
 0xe07   : > { %11179 = vmatmul.mubr.msk.bf16.gmra.mrb[172].mxu0 %vm135_vm0, %v4515_v48 }
 0xe08   : > { %11182 = vmatprep.mubr.msk.bf16.mxu0 %vm135_vm0, %v4516_v0  ;;  %v12388_v0 = vld [vmem:[%s15262_s5 + $0x348] ss:$12 sps:$4 sm:$0xff]  }
 0xe09   : > { %4188 = vxpose.xlu0.b32.cont [4/16] (narrow) %v11089_v58, 16 }
 0xe0b   : > { %v11096_v52 = vpop.f32.mrb[124].mxu0 }
 0xe0c   : > { %v4090_v53 = vpop.f32.mrb[125].mxu0 }
 0xe0d   : > { %4189 = vxpose.xlu0.b32.cont [5/16] (narrow) %v4074_v59, 16  ;;  %v11097_v4 = vpop.f32.mrb[126].mxu0  ;;  %v12382_v59 = vld [vmem:[%s15262_s5 + $0x318] ss:$12 sps:$4 sm:$0xff]  }
 0xe0e   : > { %v4093_v15 = vpop.f32.mrb[127].mxu0 }
 0xe0f   : > { %11183 = vmatmul.mubr.msk.bf16.gmra.mrb[176].mxu0 %vm135_vm0, %v4517_v7  ;;  %v12396_v7 = vld [vmem:[%s15262_s5 + $0x37c] ss:$12 sps:$4 sm:$0xff]  }
 0xe10   : > { %5809 = vmatprep.mubr.bf16.mxu0 %v14029_v34  ;;  %v12348_v34 = vld [vmem:[%s15262_s5 + $0x1a0] ss:$12 sps:$4 sm:$0xff]  }
 0xe11   : > { %4190 = vxpose.xlu0.b32.cont [6/16] (narrow) %v4077_v26, 16  ;;  %v12393_v26 = vld [vmem:[%s15262_s5 + $0x364] ss:$12 sps:$4 sm:$0xff]  }
 0xe13   : > { %v14225_v2 = vpop.f32.mrb[128].mxu0 }
 0xe14   : > { %v4106_v55 = vpop.f32.mrb[129].mxu0 }
 0xe15   : > { %4191 = vxpose.xlu0.b32.cont [7/16] (narrow) %v11092_v25, 16  ;;  %v14230_v37 = vpop.f32.mrb[130].mxu0  ;;  %v12381_v25 = vld [vmem:[%s15262_s5 + $0x304] ss:$12 sps:$4 sm:$0xff]  }
 0xe16   : > { %v4109_v27 = vpop.f32.mrb[131].mxu0  ;;  %5724 = vmatprep.subr.bf16.mxu1 %v12381_v25 }
 0xe17   : > { %5810 = vmatmul.mubr.bf16.vlgmr.msra.gmra.mrb[180].mxu0 %v13794_v50  ;;  %v12353_v50 = vld [vmem:[%s15262_s5 + $0x1b8] ss:$12 sps:$4 sm:$0xff]  }
 0xe18   : > { %5817 = vmatprep.mubr.bf16.mxu0 %v14027_v33  ;;  %10519 = vmatpush3.bf16.msra.mxu0 %v12343_v36 }
 0xe19   : > { %4192 = vxpose.xlu0.b32.cont [8/16] (narrow) %v11093_v3, 16  ;;  %10520 = vmatprep.subr.bf16.mxu0 %v12347_v35  ;;  %v12390_v3 = vld [vmem:[%s15262_s5 + $0x34c] ss:$12 sps:$4 sm:$0xff]  }
 0xe1b   : > { %v11104_v38 = vpop.f32.mrb[132].mxu0 }
 0xe1c   : > { %v4122_v9 = vpop.f32.mrb[133].mxu0  ;;  %10521 = vmatpush3.bf16.msra.mxu0 %v12348_v34 }
 0xe1d   : > { %4217 = vxpose.xlu1.b32.start [1/16] (narrow) %v4122_v9, 16  ;;  %4193 = vxpose.xlu0.b32.cont [9/16] (narrow) %v4090_v53, 16  ;;  %v11105_v33 = vpop.f32.mrb[134].mxu0 }
 0xe1e   : > { %v4125_v20 = vpop.f32.mrb[135].mxu0  ;;  %10522 = vmatprep.subr.bf16.mxu0 %v12352_v56 }
 0xe1f   : > { %5818 = vmatmul.mubr.bf16.gmra.mrb[184].mxu0 %v13808_v62  ;;  %v12363_v62 = vld [vmem:[%s15262_s5 + $0x1e8] ss:$12 sps:$4 sm:$0xff]  }
 0xe20   : > { %5858 = vmatprep.mubr.bf16.mxu0 %v14056_v51  ;;  %10523 = vmatpush3.bf16.msra.mxu0 %v12353_v50  ;;  %v12399_v50 = vld [vmem:[%s15262_s5 + $0x394] ss:$12 sps:$4 sm:$0xff]  }
 0xe21   : > { %4218 = vxpose.xlu1.b32.cont [2/16] (narrow) %v4125_v20, 16  ;;  %4194 = vxpose.xlu0.b32.cont [10/16] (narrow) %v4093_v15, 16 }
 0xe22   : > { %10524 = vmatprep.subr.bf16.mxu0 %v12357_v40  ;;  %v12402_v40 = vld [vmem:[%s15262_s5 + $0x3ac] ss:$12 sps:$4 sm:$0xff]  }
 0xe23   : > { %v11108_v57 = vpop.f32.mrb[136].mxu0 }
 0xe24   : > { %v4138_v21 = vpop.f32.mrb[137].mxu0  ;;  %10525 = vmatpush3.bf16.msra.mxu0 %v12358_v5 }
 0xe25   : > { %4219 = vxpose.xlu1.b32.cont [3/16] (narrow) %v11104_v38, 16  ;;  %4195 = vxpose.xlu0.b32.cont [11/16] (narrow) %v11096_v52, 16  ;;  %v11109_v51 = vpop.f32.mrb[138].mxu0  ;;  %v12391_v52 = vld [vmem:[%s15262_s5 + $0x360] ss:$12 sps:$4 sm:$0xff]  }
 0xe26   : > { %v4141_v8 = vpop.f32.mrb[139].mxu0  ;;  %10526 = vmatprep.subr.bf16.mxu0 %v12362_v17  ;;  %v12400_v17 = vld [vmem:[%s15262_s5 + $0x3a8] ss:$12 sps:$4 sm:$0xff]  }
 0xe28   : > { %10527 = vmatpush3.bf16.msra.mxu0 %v12363_v62  ;;  %v12403_v62 = vld [vmem:[%s15262_s5 + $0x308] ss:$12 sps:$4 sm:$0xff]  }
 0xe29   : > { %4220 = vxpose.xlu1.b32.cont [4/16] (narrow) %v11105_v33, 16  ;;  %4196 = vxpose.xlu0.b32.cont [12/16] (narrow) %v11097_v4, 16  ;;  %v12394_v4 = vld [vmem:[%s15262_s5 + $0x378] ss:$12 sps:$4 sm:$0xff]   ;;  %v12397_v33 = vld [vmem:[%s15262_s5 + $0x390] ss:$12 sps:$4 sm:$0xff]  }
 0xe2a   : > { %10528 = vmatprep.subr.bf16.mxu0 %v12367_v24  ;;  %v12405_v24 = vld [vmem:[%s15262_s5 + $0x338] ss:$12 sps:$4 sm:$0xff]  }
 0xe2b   : > { %v11112_v19 = vpop.f32.mrb[140].mxu0 }
 0xe2c   : > { %v4154_v29 = vpop.f32.mrb[141].mxu0  ;;  %10529 = vmatpush3.bf16.msra.mxu0 %v12368_v22 }
 0xe2d   : > { %4221 = vxpose.xlu1.b32.cont [5/16] (narrow) %v4138_v21, 16  ;;  %4197 = vxpose.xlu0.b32.cont [13/16] (narrow) %v4106_v55, 16  ;;  %v11113_v28 = vpop.f32.mrb[142].mxu0 }
 0xe2e   : > { %v4157_v60 = vpop.f32.mrb[143].mxu0  ;;  %10530 = vmatprep.subr.bf16.mxu0 %v12372_v12 }
 0xe30   : > { %10531 = vmatpush3.bf16.msra.mxu0 %v12373_v30 }
 0xe31   : > { %4222 = vxpose.xlu1.b32.cont [6/16] (narrow) %v4141_v8, 16  ;;  %4198 = vxpose.xlu0.b32.cont [14/16] (narrow) %v4109_v27, 16  ;;  %v15333_v27 = vmov 0  }
 0xe32   : > { %10532 = vmatprep.subr.bf16.mxu0 %v12377_v63 }
 0xe33   : > { %v11116_v42 = vpop.f32.mrb[144].mxu0 }
 0xe34   : > { %v4170_v43 = vpop.f32.mrb[145].mxu0  ;;  %10533 = vmatpush3.bf16.msra.mxu0 %v12378_v41 }
 0xe35   : > { %4223 = vxpose.xlu1.b32.cont [7/16] (narrow) %v11108_v57, 16  ;;  %4199 = vxpose.xlu0.b32.cont [15/16] (narrow) %v14225_v2, 16  ;;  %v11117_v44 = vpop.f32.mrb[146].mxu0 }
 0xe36   : > { %v4173_v23 = vpop.f32.mrb[147].mxu0  ;;  %11186 = vmatprep.subr.bf16.mxu0 %v12403_v62 }
 0xe39   : > { %4224 = vxpose.xlu1.b32.cont [8/16] (narrow) %v11109_v51, 16  ;;  %4200 = vxpose.xlu0.b32.end [16/16] (narrow) %v14230_v37, 16  ;;  %v12404_v51 = vld [vmem:[%s15262_s5 + $0x320] ss:$12 sps:$4 sm:$0xff]  }
 0xe3d   : > { %4225 = vxpose.xlu1.b32.cont [9/16] (narrow) %v4154_v29, 16  ;;  %v12406_v29 = vld [vmem:[%s15262_s5 + $0x350] ss:$12 sps:$4 sm:$0xff]  }
 0xe41   : > { %4226 = vxpose.xlu1.b32.cont [10/16] (narrow) %v4157_v60, 16 }
 0xe45   : > { %4227 = vxpose.xlu1.b32.cont [11/16] (narrow) %v11112_v19, 16 }
 0xe49   : > { %4228 = vxpose.xlu1.b32.cont [12/16] (narrow) %v11113_v28, 16  ;;  %v12407_v28 = vld [vmem:[%s15262_s5 + $0x368] ss:$12 sps:$4 sm:$0xff]  }
 0xe4d   : > { %4229 = vxpose.xlu1.b32.cont [13/16] (narrow) %v4170_v43, 16 }
 0xe51   : > { %4230 = vxpose.xlu1.b32.cont [14/16] (narrow) %v4173_v23, 16 }
 0xe55   : > { %4231 = vxpose.xlu1.b32.cont [15/16] (narrow) %v11116_v42, 16  ;;  %v12408_v42 = vld [vmem:[%s15262_s5 + $0x380] ss:$12 sps:$4 sm:$0xff]  }
 0xe59   : > { %4232 = vxpose.xlu1.b32.end [16/16] (narrow) %v11117_v44, 16 }
 0xe7d   : > { %v4201_v10 = vpop.trf.xlu0 }
 0xe7e   : > { %v4249_v47 = vmul.f32 2.0, %v4201_v10 }
 0xe80   : > { %v4253_v54 = vsub.f32 %v4249_v47, %v15324_v45  ;;  %v12409_v47 = vld [vmem:[%s15262_s5 + $0x398] ss:$12 sps:$4 sm:$0xff]  }
 0xe81   : > { %v4202_v6 = vpop.trf.xlu0 }
 0xe82   : > { %v4250_v58 = vmul.f32 2.0, %v4202_v6 }
 0xe84   : > { %v4254_v31 = vsub.f32 %v4250_v58, %v15326_v46  ;;  %v12410_v58 = vld [vmem:[%s15262_s5 + $0x3b0] ss:$12 sps:$4 sm:$0xff]  }
 0xe86   : > { %v4257_v48 = vpack.c.bf16 %v4254_v31, %v4253_v54 }
 0xe88   : > { %5704 = vmatmul.mubr.bf16.vlgmr.msra.gmra.mrb[232].mxu1 %v4257_v48  ;;  %5859 = vmatmul.mubr.bf16.vlgmr.msra.gmra.mrb[188].mxu0 %v4257_v48 }
 0xe89   : > { %5713 = vmatprep.mubr.bf16.mxu1 %v14054_v32  ;;  %5866 = vmatprep.mubr.bf16.mxu0 %v14054_v32  ;;  %v12387_v32 = vld [vmem:[%s15262_s5 + $0x334] ss:$12 sps:$4 sm:$0xff]  }
 0xe8a   : > { %5725 = vmatpush1.bf16.msra.mxu1 %v12379_v49  ;;  %11187 = vmatpush3.bf16.msra.mxu0 %v12403_v62 }
 0xe8b   : > { %5726 = vmatprep.subr.bf16.mxu1 %v12384_v61  ;;  %11188 = vmatprep.subr.bf16.mxu0 %v12404_v51 }
 0xe8e   : > { %5727 = vmatpush1.bf16.msra.mxu1 %v12382_v59  ;;  %11189 = vmatpush3.bf16.msra.mxu0 %v12404_v51 }
 0xe8f   : > { %5728 = vmatprep.subr.bf16.mxu1 %v12387_v32  ;;  %11190 = vmatprep.subr.bf16.mxu0 %v12405_v24 }
 0xe92   : > { %5729 = vmatpush1.bf16.msra.mxu1 %v12385_v11  ;;  %11191 = vmatpush3.bf16.msra.mxu0 %v12405_v24  ;;  %v4963_v24 = vlaneseq }
 0xe93   : > { %5730 = vmatprep.subr.bf16.mxu1 %v12390_v3  ;;  %11192 = vmatprep.subr.bf16.mxu0 %v12406_v29 }
 0xe96   : > { %5731 = vmatpush1.bf16.msra.mxu1 %v12388_v0  ;;  %11193 = vmatpush3.bf16.msra.mxu0 %v12406_v29 }
 0xe97   : > { %5732 = vmatprep.subr.bf16.mxu1 %v12393_v26  ;;  %11194 = vmatprep.subr.bf16.mxu0 %v12407_v28 }
 0xe9a   : > { %5733 = vmatpush1.bf16.msra.mxu1 %v12391_v52  ;;  %11195 = vmatpush3.bf16.msra.mxu0 %v12407_v28 }
 0xe9b   : > { %5734 = vmatprep.subr.bf16.mxu1 %v12396_v7  ;;  %11196 = vmatprep.subr.bf16.mxu0 %v12408_v42 }
 0xe9d   : > { %v4233_v53 = vpop.trf.xlu1 }
 0xe9e   : > { %v4251_v15 = vmul.f32 2.0, %v4233_v53  ;;  %5735 = vmatpush1.bf16.msra.mxu1 %v12394_v4  ;;  %11197 = vmatpush3.bf16.msra.mxu0 %v12408_v42 }
 0xe9f   : > { %5736 = vmatprep.subr.bf16.mxu1 %v12399_v50  ;;  %11198 = vmatprep.subr.bf16.mxu0 %v12409_v47  ;;  %v15336_v50 = vld [vmem:[#allocation11_spill] sm:$0xff] }
 0xea0   : > { %v4255_v36 = vsub.f32 %v4251_v15, %v15330_v39 }
 0xea1   : > { %v4234_v2 = vpop.trf.xlu1 }
 0xea2   : > { %v4252_v55 = vmul.f32 2.0, %v4234_v2  ;;  %5737 = vmatpush1.bf16.msra.mxu1 %v12397_v33  ;;  %11199 = vmatpush3.bf16.msra.mxu0 %v12409_v47  ;;  %v15337_v33 = vld [vmem:[#allocation10_spill] sm:$0xff] }
 0xea3   : > { %5738 = vmatprep.subr.bf16.mxu1 %v12402_v40  ;;  %11200 = vmatprep.subr.bf16.mxu0 %v12410_v58 }
 0xea4   : > { %v4256_v37 = vsub.f32 %v4252_v55, %v15332_v1 }
 0xea6   : > { %v4258_v35 = vpack.c.bf16 %v4256_v37, %v4255_v36  ;;  %5739 = vmatpush1.bf16.msra.mxu1 %v12400_v17  ;;  %11201 = vmatpush3.bf16.msra.mxu0 %v12410_v58 }
 0xea7   : > { %11587 = vmatprep.subr.msk.bf16.mxu1 %vm135_vm0, %v12875_v13  ;;  %11586 = vmatprep.subr.msk.bf16.mxu0 %vm135_vm0, %v12875_v13 }
 0xea8   : > { %5714 = vmatmul.mubr.bf16.gmra.mrb[236].mxu1 %v4258_v35  ;;  %5867 = vmatmul.mubr.bf16.gmra.mrb[192].mxu0 %v4258_v35 }
 0xea9   : > { %5756 = vmatprep.mubr.bf16.mxu1 %v15333_v27 }
 0xeaa   : > { %v11156_v34 = vpop.f32.mrb[148].mxu0 }
 0xeab   : > { %v4600_v56 = vpop.f32.mrb[149].mxu0 }
 0xeac   : > { %4727 = vxpose.xlu0.b32.start [1/16] (narrow) %v4600_v56, 16  ;;  %v11157_v38 = vpop.f32.mrb[150].mxu0  ;;  %v15334_v56 = vld [vmem:[#allocation13_spill] sm:$0xff] }
 0xead   : > { %v4603_v9 = vpop.f32.mrb[151].mxu0 }
 0xeb0   : > { %4728 = vxpose.xlu0.b32.cont [2/16] (narrow) %v4603_v9, 16 }
 0xeb2   : > { %v11160_v20 = vpop.f32.mrb[152].mxu0 }
 0xeb3   : > { %v4616_v5 = vpop.f32.mrb[153].mxu0 }
 0xeb4   : > { %4729 = vxpose.xlu0.b32.cont [3/16] (narrow) %v11156_v34, 16  ;;  %v11161_v57 = vpop.f32.mrb[154].mxu0 }
 0xeb5   : > { %v4619_v21 = vpop.f32.mrb[155].mxu0 }
 0xeb8   : > { %4730 = vxpose.xlu0.b32.cont [4/16] (narrow) %v11157_v38, 16  ;;  %v15335_v38 = vld [vmem:[#allocation12_spill] sm:$0xff] }
 0xeb9   : > { %v14367_v9 = vpack.c.bf16 %v15335_v38, %v15334_v56 }
 0xeba   : > { %v11164_v8 = vpop.f32.mrb[156].mxu0 }
 0xebb   : > { %v4632_v22 = vpop.f32.mrb[157].mxu0 }
 0xebc   : > { %4731 = vxpose.xlu0.b32.cont [5/16] (narrow) %v4616_v5, 16  ;;  %v11165_v12 = vpop.f32.mrb[158].mxu0 }
 0xebd   : > { %v4635_v19 = vpop.f32.mrb[159].mxu0 }
 0xec0   : > { %4732 = vxpose.xlu0.b32.cont [6/16] (narrow) %v4619_v21, 16 }
 0xec2   : > { %v11168_v30 = vpop.f32.mrb[160].mxu0 }
 0xec3   : > { %v4648_v60 = vpop.f32.mrb[161].mxu0 }
 0xec4   : > { %4733 = vxpose.xlu0.b32.cont [7/16] (narrow) %v11160_v20, 16  ;;  %v11169_v63 = vpop.f32.mrb[162].mxu0  ;;  %v14372_v20 = vpack.c.bf16 %v15337_v33, %v15336_v50 }
 0xec5   : > { %v4651_v41 = vpop.f32.mrb[163].mxu0 }
 0xec8   : > { %4734 = vxpose.xlu0.b32.cont [8/16] (narrow) %v11161_v57, 16 }
 0xeca   : > { %v11172_v43 = vpop.f32.mrb[164].mxu0 }
 0xecb   : > { %v4664_v44 = vpop.f32.mrb[165].mxu0 }
 0xecc   : > { %4735 = vxpose.xlu0.b32.cont [9/16] (narrow) %v4632_v22, 16  ;;  %4759 = vxpose.xlu1.b32.start [1/16] (narrow) %v4664_v44, 16  ;;  %v11173_v23 = vpop.f32.mrb[166].mxu0 }
 0xecd   : > { %v4667_v10 = vpop.f32.mrb[167].mxu0 }
 0xed0   : > { %4736 = vxpose.xlu0.b32.cont [10/16] (narrow) %v4635_v19, 16  ;;  %4760 = vxpose.xlu1.b32.cont [2/16] (narrow) %v4667_v10, 16  ;;  %v14381_v19 = vshrl.u32 %v4963_v24, 7 }
 0xed2   : > { %v11176_v6 = vpop.f32.mrb[168].mxu0  ;;  %15338 = vst [vmem:[#allocation17_spill] sm:$0xff] %v14381_v19 }
 0xed3   : > { %v4680_v54 = vpop.f32.mrb[169].mxu0 }
 0xed4   : > { %4737 = vxpose.xlu0.b32.cont [11/16] (narrow) %v11164_v8, 16  ;;  %4761 = vxpose.xlu1.b32.cont [3/16] (narrow) %v11172_v43, 16  ;;  %v11177_v31 = vpop.f32.mrb[170].mxu0 }
 0xed5   : > { %v4683_v48 = vpop.f32.mrb[171].mxu0 }
 0xed8   : > { %4738 = vxpose.xlu0.b32.cont [12/16] (narrow) %v11165_v12, 16  ;;  %4762 = vxpose.xlu1.b32.cont [4/16] (narrow) %v11173_v23, 16 }
 0xeda   : > { %v11180_v49 = vpop.f32.mrb[172].mxu0 }
 0xedb   : > { %v4696_v25 = vpop.f32.mrb[173].mxu0 }
 0xedc   : > { %4739 = vxpose.xlu0.b32.cont [13/16] (narrow) %v4648_v60, 16  ;;  %4763 = vxpose.xlu1.b32.cont [5/16] (narrow) %v4680_v54, 16  ;;  %v11181_v61 = vpop.f32.mrb[174].mxu0  ;;  %v4973_v60 = vsub.s32 2, %v14381_v19 }
 0xedd   : > { %v4699_v59 = vpop.f32.mrb[175].mxu0 }
 0xee0   : > { %4740 = vxpose.xlu0.b32.cont [14/16] (narrow) %v4651_v41, 16  ;;  %4764 = vxpose.xlu1.b32.cont [6/16] (narrow) %v4683_v48, 16  ;;  %v4961_v41 = vld [vmem:[%s15263_s6] sm:$0x7] }
 0xee1   : > { %v4974_v42 = vrot.slane %v4961_v41, %v4973_v60 }
 0xee2   : > { %v11184_v32 = vpop.f32.mrb[176].mxu0 }
 0xee3   : > { %v4712_v11 = vpop.f32.mrb[177].mxu0 }
 0xee4   : > { %4741 = vxpose.xlu0.b32.cont [15/16] (narrow) %v11168_v30, 16  ;;  %4765 = vxpose.xlu1.b32.cont [7/16] (narrow) %v11176_v6, 16  ;;  %v11185_v3 = vpop.f32.mrb[178].mxu0 }
 0xee5   : > { %v4715_v0 = vpop.f32.mrb[179].mxu0 }
 0xee8   : > { %4742 = vxpose.xlu0.b32.end [16/16] (narrow) %v11169_v63, 16  ;;  %4766 = vxpose.xlu1.b32.cont [8/16] (narrow) %v11177_v31, 16 }
 0xeea   : > { %v10506_v26 = vpop.f32.mrb[180].mxu0 }
 0xeeb   : > { %v10507_v52 = vpop.f32.mrb[181].mxu0 }
 0xeec   : > { %v10508_v7 = vadd.f32 %v10507_v52, %v10506_v26  ;;  %4767 = vxpose.xlu1.b32.cont [9/16] (narrow) %v4696_v25, 16  ;;  %v10509_v53 = vpop.f32.mrb[182].mxu0 }
 0xeed   : > { %v10510_v4 = vpop.f32.mrb[183].mxu0 }
 0xeee   : > { %v10511_v15 = vadd.f32 %v10510_v4, %v10509_v53  ;;  %v5812_v23 = vadd.f32 %v10508_v7, %v4974_v42 }
 0xef0   : > { %4768 = vxpose.xlu1.b32.cont [10/16] (narrow) %v4699_v59, 16  ;;  %v5815_v58 = vadd.f32 %v10511_v15, %v4974_v42 }
 0xef2   : > { %v10512_v2 = vpop.f32.mrb[184].mxu0 }
 0xef3   : > { %v10513_v55 = vpop.f32.mrb[185].mxu0 }
 0xef4   : > { %v10514_v36 = vadd.f32 %v10513_v55, %v10512_v2  ;;  %4769 = vxpose.xlu1.b32.cont [11/16] (narrow) %v11180_v49, 16  ;;  %v10515_v37 = vpop.f32.mrb[186].mxu0 }
 0xef5   : > { %v10516_v35 = vpop.f32.mrb[187].mxu0 }
 0xef6   : > { %v14363_v34 = vadd.f32 %v10516_v35, %v10515_v37 }
 0xef8   : > { %4770 = vxpose.xlu1.b32.cont [12/16] (narrow) %v11181_v61, 16  ;;  %v5823_v7 = vadd.f32 %v14363_v34, %v4974_v42 }
 0xefc   : > { %4771 = vxpose.xlu1.b32.cont [13/16] (narrow) %v4712_v11, 16  ;;  %v5820_v11 = vadd.f32 %v10514_v36, %v4974_v42 }
 0xf00   : > { %4772 = vxpose.xlu1.b32.cont [14/16] (narrow) %v4715_v0, 16 }
 0xf04   : > { %4773 = vxpose.xlu1.b32.cont [15/16] (narrow) %v11184_v32, 16 }
 0xf08   : > { %4774 = vxpose.xlu1.b32.end [16/16] (narrow) %v11185_v3, 16 }
 0xf0c   : > { %5926 = vxpose.xlu0.c.b16.start.end [1/1] (short) %v14367_v9, 128 }
 0xf26   : > { %5942 = vxpose.xlu1.c.b16.start.end [1/1] (short) %v14372_v20, 128 }
 0xf2c   : > { %v4743_v40 = vpop.trf.xlu0 }
 0xf2d   : > { %v4791_v5 = vmul.f32 2.0, %v4743_v40 }
 0xf2f   : > { %v4795_v21 = vsub.f32 %v4791_v5, %v15324_v45 }
 0xf30   : > { %v4744_v17 = vpop.trf.xlu0 }
 0xf31   : > { %v4792_v57 = vmul.f32 2.0, %v4744_v17 }
 0xf33   : > { %v4796_v62 = vsub.f32 %v4792_v57, %v15326_v46 }
 0xf35   : > { %v4799_v51 = vpack.c.bf16 %v4796_v62, %v4795_v21 }
 0xf37   : > { %5757 = vmatmul.mubr.bf16.vlgmr.msra.gmra.mrb[232].mxu1 %v4799_v51  ;;  %11202 = vmatprep.mubr.bf16.mxu0 %v4799_v51 }
 0xf38   : > { %5766 = vmatprep.mubr.bf16.mxu1 %v15333_v27  ;;  %11241 = vmatpush3.bf16.xpose.msra.mxu1 %v12882_v14 }
 0xf39   : > { %11589 = vmatprep.subr.msk.bf16.mxu1 %vm135_vm0, %v12895_v16 }
 0xf4c   : > { %v4775_v8 = vpop.trf.xlu1 }
 0xf4d   : > { %v4793_v22 = vmul.f32 2.0, %v4775_v8 }
 0xf4f   : > { %v4797_v30 = vsub.f32 %v4793_v22, %v15330_v39 }
 0xf50   : > { %v4776_v12 = vpop.trf.xlu1 }
 0xf51   : > { %v4794_v29 = vmul.f32 2.0, %v4776_v12 }
 0xf53   : > { %v4798_v28 = vsub.f32 %v4794_v29, %v15332_v1 }
 0xf55   : > { %v4800_v63 = vpack.c.bf16 %v4798_v28, %v4797_v30 }
 0xf57   : > { %5767 = vmatmul.mubr.bf16.gmra.mrb[236].mxu1 %v4800_v63  ;;  %11203 = vmatmul.mubr.bf16.vlgmr.msra.gmra.mrb[196].mxu0 %v4800_v63 }
 0xf58   : > { %11207 = vmatpush3.bf16.xpose.msra.mxu0 %v12882_v14 }
 0xf59   : > { %11588 = vmatprep.subr.msk.bf16.mxu0 %vm135_vm0, %v12895_v16 }
 0xf5b   : > { %v10534_v43 = vpop.f32.mrb[188].mxu0 }
 0xf5c   : > { %v10535_v44 = vpop.f32.mrb[189].mxu0 }
 0xf5d   : > { %v10536_v10 = vadd.f32 %v10535_v44, %v10534_v43  ;;  %v10537_v47 = vpop.f32.mrb[190].mxu0 }
 0xf5e   : > { %v10538_v6 = vpop.f32.mrb[191].mxu0 }
 0xf5f   : > { %v14392_v54 = vadd.f32 %v10536_v10, %v5812_v23  ;;  %v10539_v31 = vadd.f32 %v10538_v6, %v10537_v47 }
 0xf61   : > { %15339 = vst [vmem:[#allocation18_spill] sm:$0xff] %v14392_v54  ;;  %v14394_v48 = vadd.f32 %v10539_v31, %v5815_v58 }
 0xf63   : > { %15340 = vst [vmem:[#allocation16_spill] sm:$0xff] %v14394_v48 }
 0xf72   : > { %v5934_v49 = vpop.trf.xlu0 }
 0xf73   : > { %11208 = vmatprep.mubr.msk.bf16.mxu0 %vm135_vm0, %v5934_v49 }
 0xf76   : > { %v5935_v25 = vpop.trf.xlu0 }
 0xf77   : > { %11209 = vmatmul.mubr.msk.bf16.vlgmr.msra.gmra.mrb[200].mxu0 %vm135_vm0, %v5935_v25 }
 0xf78   : > { %11275 = vmatpush3.bf16.xpose.msra.mxu0 %v12904_v18 }
 0xf79   : > { %11590 = vmatprep.subr.msk.bf16.mxu0 %vm135_vm0, %v12875_v13 }
 0xf7a   : > { %v5936_v61 = vpop.trf.xlu0 }
 0xf7b   : > { %v10540_v59 = vpop.f32.mrb[192].mxu0  ;;  %11212 = vmatprep.mubr.msk.bf16.mxu0 %vm135_vm0, %v5936_v61 }
 0xf7c   : > { %v10541_v32 = vpop.f32.mrb[193].mxu0 }
 0xf7d   : > { %v10542_v3 = vadd.f32 %v10541_v32, %v10540_v59  ;;  %v10543_v0 = vpop.f32.mrb[194].mxu0 }
 0xf7e   : > { %v10544_v26 = vpop.f32.mrb[195].mxu0  ;;  %v5937_v52 = vpop.trf.xlu0 }
 0xf7f   : > { %v14403_v53 = vadd.f32 %v10542_v3, %v5820_v11  ;;  %v10545_v4 = vadd.f32 %v10544_v26, %v10543_v0  ;;  %11213 = vmatmul.mubr.msk.bf16.gmra.mrb[204].mxu0 %vm135_vm0, %v5937_v52 }
 0xf81   : > { %15341 = vst [vmem:[#allocation15_spill] sm:$0xff] %v14403_v53  ;;  %v14406_v15 = vadd.f32 %v10545_v4, %v5823_v7 }
 0xf82   : > { %v5938_v2 = vpop.trf.xlu0 }
 0xf83   : > { %15342 = vst [vmem:[#allocation14_spill] sm:$0xff] %v14406_v15  ;;  %11216 = vmatprep.mubr.msk.bf16.mxu0 %vm135_vm0, %v5938_v2 }
 0xf86   : > { %v5939_v55 = vpop.trf.xlu0 }
 0xf87   : > { %11217 = vmatmul.mubr.msk.bf16.gmra.mrb[208].mxu0 %vm135_vm0, %v5939_v55 }
 0xf8a   : > { %v5940_v36 = vpop.trf.xlu0 }
 0xf8b   : > { %11220 = vmatprep.mubr.msk.bf16.mxu0 %vm135_vm0, %v5940_v36 }
 0xf8c   : > { %v5950_v37 = vpop.trf.xlu1 }
 0xf8e   : > { %v5941_v35 = vpop.trf.xlu0 }
 0xf8f   : > { %11221 = vmatmul.mubr.msk.bf16.gmra.mrb[212].mxu0 %vm135_vm0, %v5941_v35 }
 0xf90   : > { %11224 = vmatprep.mubr.msk.bf16.mxu0 %vm135_vm0, %v5950_v37  ;;  %v5951_v34 = vpop.trf.xlu1 }
 0xf94   : > { %v5952_v40 = vpop.trf.xlu1 }
 0xf97   : > { %11225 = vmatmul.mubr.msk.bf16.gmra.mrb[216].mxu0 %vm135_vm0, %v5951_v34 }
 0xf98   : > { %11228 = vmatprep.mubr.msk.bf16.mxu0 %vm135_vm0, %v5952_v40  ;;  %v5953_v5 = vpop.trf.xlu1 }
 0xf9c   : > { %v5954_v17 = vpop.trf.xlu1 }
 0xf9f   : > { %11229 = vmatmul.mubr.msk.bf16.gmra.mrb[220].mxu0 %vm135_vm0, %v5953_v5 }
 0xfa0   : > { %11232 = vmatprep.mubr.msk.bf16.mxu0 %vm135_vm0, %v5954_v17  ;;  %v5955_v57 = vpop.trf.xlu1 }
 0xfa4   : > { %v5956_v21 = vpop.trf.xlu1 }
 0xfa7   : > { %11233 = vmatmul.mubr.msk.bf16.gmra.mrb[224].mxu0 %vm135_vm0, %v5955_v57 }
 0xfa8   : > { %11236 = vmatprep.mubr.msk.bf16.mxu0 %vm135_vm0, %v5956_v21  ;;  %v5957_v62 = vpop.trf.xlu1 }
 0xfaf   : > { %11237 = vmatmul.mubr.msk.bf16.gmra.mrb[228].mxu0 %vm135_vm0, %v5957_v62 }
 0xfb0   : > { %11276 = vmatprep.mubr.msk.bf16.mxu0 %vm135_vm0, %v5934_v49 }
 0xfb7   : > { %11277 = vmatmul.mubr.msk.bf16.vlgmr.msra.gmra.mrb[232].mxu0 %vm135_vm0, %v5935_v25 }
 0xfb8   : > { %11280 = vmatprep.mubr.msk.bf16.mxu0 %vm135_vm0, %v5936_v61  ;;  %11343 = vmatpush3.bf16.xpose.msra.mxu0 %v12882_v14 }
 0xfb9   : > { %11591 = vmatprep.subr.msk.bf16.mxu0 %vm135_vm0, %v12875_v13 }
 0xfbf   : > { %11281 = vmatmul.mubr.msk.bf16.gmra.mrb[236].mxu0 %vm135_vm0, %v5937_v52 }
 0xfc0   : > { %11284 = vmatprep.mubr.msk.bf16.mxu0 %vm135_vm0, %v5938_v2 }
 0xfc7   : > { %11285 = vmatmul.mubr.msk.bf16.gmra.mrb[240].mxu0 %vm135_vm0, %v5939_v55 }
 0xfc8   : > { %11288 = vmatprep.mubr.msk.bf16.mxu0 %vm135_vm0, %v5940_v36 }
 0xfcf   : > { %11289 = vmatmul.mubr.msk.bf16.gmra.mrb[244].mxu0 %vm135_vm0, %v5941_v35 }
 0xfd0   : > { %11292 = vmatprep.mubr.msk.bf16.mxu0 %vm135_vm0, %v5950_v37 }
 0xfd7   : > { %11293 = vmatmul.mubr.msk.bf16.gmra.mrb[248].mxu0 %vm135_vm0, %v5951_v34 }
 0xfd8   : > { %11296 = vmatprep.mubr.msk.bf16.mxu0 %vm135_vm0, %v5952_v40 }
 0xfdf   : > { %11297 = vmatmul.mubr.msk.bf16.gmra.mrb[252].mxu0 %vm135_vm0, %v5953_v5 }
 0xfe0   : > { %11300 = vmatprep.mubr.msk.bf16.mxu0 %vm135_vm0, %v5954_v17 }
 0xfe7   : > { %11301 = vmatmul.mubr.msk.bf16.gmra.mrb[0].mxu0 %vm135_vm0, %v5955_v57 }
 0xfe8   : > { %11304 = vmatprep.mubr.msk.bf16.mxu0 %vm135_vm0, %v5956_v21 }
 0xfef   : > { %11305 = vmatmul.mubr.msk.bf16.gmra.mrb[4].mxu0 %vm135_vm0, %v5957_v62 }
0x104a   : > { %v11210_v13 = vpop.f32.mrb[200].mxu0 }
0x104b   : > { %v6040_v51 = vpop.f32.mrb[201].mxu0 }
0x104c   : > { %v11211_v8 = vpop.f32.mrb[202].mxu0 }
0x104d   : > { %v6043_v24 = vpop.f32.mrb[203].mxu0 }
0x1052   : > { %v11214_v22 = vpop.f32.mrb[204].mxu0 }
0x1053   : > { %v6056_v12 = vpop.f32.mrb[205].mxu0 }
0x1054   : > { %v11215_v29 = vpop.f32.mrb[206].mxu0 }
0x1055   : > { %v6059_v30 = vpop.f32.mrb[207].mxu0 }
0x105a   : > { %v11218_v28 = vpop.f32.mrb[208].mxu0 }
0x105b   : > { %v6072_v60 = vpop.f32.mrb[209].mxu0 }
0x105c   : > { %v11219_v63 = vpop.f32.mrb[210].mxu0 }
0x105d   : > { %v6075_v41 = vpop.f32.mrb[211].mxu0 }
0x1062   : > { %v14439_v42 = vpop.f32.mrb[212].mxu0 }
0x1063   : > { %v6088_v43 = vpop.f32.mrb[213].mxu0 }
0x1064   : > { %v14441_v44 = vpop.f32.mrb[214].mxu0 }
0x1065   : > { %v6091_v23 = vpop.f32.mrb[215].mxu0 }
0x106a   : > { %v11226_v10 = vpop.f32.mrb[216].mxu0 }
0x106b   : > { %v11927_v47 = vpack.i.bf16 %v11226_v10, %v11210_v13  ;;  %v6104_v6 = vpop.f32.mrb[217].mxu0 }
0x106c   : > { %v11923_v58 = vpack.i.bf16 %v6104_v6, %v6040_v51  ;;  %v11227_v31 = vpop.f32.mrb[218].mxu0 }
0x106d   : > { %v11929_v49 = vpack.i.bf16 %v11227_v31, %v11211_v8  ;;  %v6107_v25 = vpop.f32.mrb[219].mxu0 }
0x106e   : > { %v11925_v61 = vpack.i.bf16 %v6107_v25, %v6043_v24  ;;  %11924 = vxpose.xlu0.b32.start [1/16] (narrow) %v11923_v58, 16 }
0x1072   : > { %11926 = vxpose.xlu0.b32.cont [2/16] (narrow) %v11925_v61, 16  ;;  %v11230_v59 = vpop.f32.mrb[220].mxu0 }
0x1073   : > { %v11935_v32 = vpack.i.bf16 %v11230_v59, %v11214_v22  ;;  %v6120_v11 = vpop.f32.mrb[221].mxu0 }
0x1074   : > { %v11931_v3 = vpack.i.bf16 %v6120_v11, %v6056_v12  ;;  %v11231_v0 = vpop.f32.mrb[222].mxu0 }
0x1075   : > { %v11937_v26 = vpack.i.bf16 %v11231_v0, %v11215_v29  ;;  %v6123_v52 = vpop.f32.mrb[223].mxu0 }
0x1076   : > { %v11933_v7 = vpack.i.bf16 %v6123_v52, %v6059_v30  ;;  %11928 = vxpose.xlu0.b32.cont [3/16] (narrow) %v11927_v47, 16 }
0x107a   : > { %11930 = vxpose.xlu0.b32.cont [4/16] (narrow) %v11929_v49, 16  ;;  %v11234_v4 = vpop.f32.mrb[224].mxu0 }
0x107b   : > { %v11943_v2 = vpack.i.bf16 %v11234_v4, %v11218_v28  ;;  %v6136_v55 = vpop.f32.mrb[225].mxu0 }
0x107c   : > { %v11939_v36 = vpack.i.bf16 %v6136_v55, %v6072_v60  ;;  %v11235_v37 = vpop.f32.mrb[226].mxu0 }
0x107d   : > { %v11945_v35 = vpack.i.bf16 %v11235_v37, %v11219_v63  ;;  %v6139_v34 = vpop.f32.mrb[227].mxu0 }
0x107e   : > { %v11941_v40 = vpack.i.bf16 %v6139_v34, %v6075_v41  ;;  %11932 = vxpose.xlu0.b32.cont [5/16] (narrow) %v11931_v3, 16 }
0x1082   : > { %11934 = vxpose.xlu0.b32.cont [6/16] (narrow) %v11933_v7, 16  ;;  %v11238_v5 = vpop.f32.mrb[228].mxu0 }
0x1083   : > { %v11951_v17 = vpack.i.bf16 %v11238_v5, %v14439_v42  ;;  %v6152_v57 = vpop.f32.mrb[229].mxu0 }
0x1084   : > { %v11947_v21 = vpack.i.bf16 %v6152_v57, %v6088_v43  ;;  %v11239_v62 = vpop.f32.mrb[230].mxu0 }
0x1085   : > { %v11953_v13 = vpack.i.bf16 %v11239_v62, %v14441_v44  ;;  %v6155_v51 = vpop.f32.mrb[231].mxu0 }
0x1086   : > { %v11949_v8 = vpack.i.bf16 %v6155_v51, %v6091_v23  ;;  %11936 = vxpose.xlu0.b32.cont [7/16] (narrow) %v11935_v32, 16 }
0x108a   : > { %11938 = vxpose.xlu0.b32.cont [8/16] (narrow) %v11937_v26, 16  ;;  %v14445_v24 = vpop.f32.mrb[232].mxu0 }
0x108b   : > { %v14447_v22 = vpop.f32.mrb[233].mxu0 }
0x108c   : > { %v14449_v12 = vpop.f32.mrb[234].mxu0 }
0x108d   : > { %v14451_v29 = vpop.f32.mrb[235].mxu0 }
0x108e   : > { %11940 = vxpose.xlu0.b32.cont [9/16] (narrow) %v11939_v36, 16 }
0x1092   : > { %11942 = vxpose.xlu0.b32.cont [10/16] (narrow) %v11941_v40, 16  ;;  %v14453_v30 = vpop.f32.mrb[236].mxu0 }
0x1093   : > { %v14455_v28 = vpop.f32.mrb[237].mxu0 }
0x1094   : > { %v14457_v60 = vpop.f32.mrb[238].mxu0 }
0x1095   : > { %v6601_v63 = vpop.f32.mrb[239].mxu0 }
0x1096   : > { %11944 = vxpose.xlu0.b32.cont [11/16] (narrow) %v11943_v2, 16 }
0x109a   : > { %11946 = vxpose.xlu0.b32.cont [12/16] (narrow) %v11945_v35, 16  ;;  %v14459_v41 = vpop.f32.mrb[240].mxu0 }
0x109b   : > { %v6614_v42 = vpop.f32.mrb[241].mxu0 }
0x109c   : > { %v14461_v43 = vpop.f32.mrb[242].mxu0 }
0x109d   : > { %v6617_v44 = vpop.f32.mrb[243].mxu0 }
0x109e   : > { %11948 = vxpose.xlu0.b32.cont [13/16] (narrow) %v11947_v21, 16 }
0x10a2   : > { %11950 = vxpose.xlu0.b32.cont [14/16] (narrow) %v11949_v8, 16  ;;  %v11290_v23 = vpop.f32.mrb[244].mxu0 }
0x10a3   : > { %v6630_v10 = vpop.f32.mrb[245].mxu0 }
0x10a4   : > { %v11291_v47 = vpop.f32.mrb[246].mxu0 }
0x10a5   : > { %v6633_v6 = vpop.f32.mrb[247].mxu0 }
0x10a6   : > { %11952 = vxpose.xlu0.b32.cont [15/16] (narrow) %v11951_v17, 16 }
0x10aa   : > { %11954 = vxpose.xlu0.b32.end [16/16] (narrow) %v11953_v13, 16  ;;  %v11294_v58 = vpop.f32.mrb[248].mxu0 }
0x10ab   : > { %v11969_v31 = vpack.i.bf16 %v11294_v58, %v14445_v24  ;;  %v6646_v49 = vpop.f32.mrb[249].mxu0 }
0x10ac   : > { %v11965_v25 = vpack.i.bf16 %v6646_v49, %v14447_v22  ;;  %v11295_v61 = vpop.f32.mrb[250].mxu0 }
0x10ad   : > { %v11971_v59 = vpack.i.bf16 %v11295_v61, %v14449_v12  ;;  %v6649_v32 = vpop.f32.mrb[251].mxu0 }
0x10ae   : > { %v11967_v11 = vpack.i.bf16 %v6649_v32, %v14451_v29 }
0x10b2   : > { %v11298_v3 = vpop.f32.mrb[252].mxu0 }
0x10b3   : > { %v11977_v0 = vpack.i.bf16 %v11298_v3, %v14453_v30  ;;  %v6662_v26 = vpop.f32.mrb[253].mxu0 }
0x10b4   : > { %v11973_v52 = vpack.i.bf16 %v6662_v26, %v14455_v28  ;;  %v11299_v7 = vpop.f32.mrb[254].mxu0 }
0x10b5   : > { %v11979_v4 = vpack.i.bf16 %v11299_v7, %v14457_v60  ;;  %v6665_v2 = vpop.f32.mrb[255].mxu0 }
0x10b6   : > { %v11975_v55 = vpack.i.bf16 %v6665_v2, %v6601_v63 }
0x10ba   : > { %v11302_v36 = vpop.f32.mrb[0].mxu0 }
0x10bb   : > { %v11985_v37 = vpack.i.bf16 %v11302_v36, %v14459_v41  ;;  %v6678_v35 = vpop.f32.mrb[1].mxu0 }
0x10bc   : > { %v11981_v34 = vpack.i.bf16 %v6678_v35, %v6614_v42  ;;  %v11303_v40 = vpop.f32.mrb[2].mxu0 }
0x10bd   : > { %v11987_v5 = vpack.i.bf16 %v11303_v40, %v14461_v43  ;;  %v6681_v17 = vpop.f32.mrb[3].mxu0 }
0x10be   : > { %v11983_v57 = vpack.i.bf16 %v6681_v17, %v6617_v44  ;;  %v12416_v17 = vld [vmem:[%s15264_s7 + $0x14] ss:$8 sps:$4 sm:$0xff]  }
0x10c2   : > { %v11306_v21 = vpop.f32.mrb[4].mxu0 }
0x10c3   : > { %v11993_v62 = vpack.i.bf16 %v11306_v21, %v11290_v23  ;;  %v6694_v13 = vpop.f32.mrb[5].mxu0  ;;  %v12414_v21 = vld [vmem:[%s15264_s7 + $0x10] ss:$8 sps:$4 sm:$0xff]  }
0x10c4   : > { %v11989_v51 = vpack.i.bf16 %v6694_v13, %v6630_v10  ;;  %v11307_v8 = vpop.f32.mrb[6].mxu0 }
0x10c5   : > { %v11995_v24 = vpack.i.bf16 %v11307_v8, %v11291_v47  ;;  %v6697_v22 = vpop.f32.mrb[7].mxu0  ;;  %v12422_v8 = vld [vmem:[%s15264_s7 + $0x34] ss:$8 sps:$4 sm:$0xff]  }
0x10c6   : > { %v11991_v12 = vpack.i.bf16 %v6697_v22, %v6633_v6  ;;  %v12420_v22 = vld [vmem:[%s15264_s7 + $0x30] ss:$8 sps:$4 sm:$0xff]  }
0x10ee   : > { %v11955_v29 = vpop.trf.xlu0 }
0x10ef   : > { %v11959_v28 = vunpack.i.h.bf16 %v11955_v29  ;;  %v11956_v60 = vunpack.i.l.bf16 %v11955_v29 }
0x10f2   : > { %v11960_v30 = vpop.trf.xlu0 }
0x10f3   : > { %v11964_v63 = vunpack.i.h.bf16 %v11960_v30  ;;  %v11961_v41 = vunpack.i.l.bf16 %v11960_v30 }
0x10f5   : > { %v14472_v42 = vpack.c.bf16 %v11964_v63, %v11959_v28  ;;  %v14474_v58 = vpack.c.bf16 %v11961_v41, %v11956_v60  ;;  %v12423_v28 = vld [vmem:[%s15264_s7 + $0x40] ss:$8 sps:$4 sm:$0xff]   ;;  %v12428_v60 = vld [vmem:[%s15264_s7 + $0x54] ss:$8 sps:$4 sm:$0xff]   ;;  %v12426_v41 = vld [vmem:[%s15264_s7 + $0x50] ss:$8 sps:$4 sm:$0xff]  }
0x10f7   : > { %6249 = vxpose.xlu0.c.b16.start.end [1/1] (short) %v14472_v42, 128  ;;  %6233 = vxpose.xlu1.c.b16.start.end [1/1] (short) %v14474_v58, 128 }
0x111d   : > { %11966 = vxpose.xlu1.b32.start [1/16] (narrow) %v11965_v25, 16 }
0x1121   : > { %11968 = vxpose.xlu1.b32.cont [2/16] (narrow) %v11967_v11, 16 }
0x1125   : > { %11970 = vxpose.xlu1.b32.cont [3/16] (narrow) %v11969_v31, 16 }
0x1129   : > { %11972 = vxpose.xlu1.b32.cont [4/16] (narrow) %v11971_v59, 16 }
0x112d   : > { %11974 = vxpose.xlu1.b32.cont [5/16] (narrow) %v11973_v52, 16 }
0x1131   : > { %11976 = vxpose.xlu1.b32.cont [6/16] (narrow) %v11975_v55, 16 }
0x1135   : > { %11978 = vxpose.xlu1.b32.cont [7/16] (narrow) %v11977_v0, 16  ;;  %v12413_v0 = vld [vmem:[%s15264_s7 + $0x4] ss:$8 sps:$4 sm:$0xff]  }
0x1139   : > { %11980 = vxpose.xlu1.b32.cont [8/16] (narrow) %v11979_v4, 16 }
0x113d   : > { %11982 = vxpose.xlu1.b32.cont [9/16] (narrow) %v11981_v34, 16 }
0x1141   : > { %11984 = vxpose.xlu1.b32.cont [10/16] (narrow) %v11983_v57, 16 }
0x1145   : > { %11986 = vxpose.xlu1.b32.cont [11/16] (narrow) %v11985_v37, 16 }
0x1149   : > { %11988 = vxpose.xlu1.b32.cont [12/16] (narrow) %v11987_v5, 16  ;;  %v12411_v5 = vld [vmem:[%s15264_s7] ss:$8 sps:$4 sm:$0xff]  }
0x114d   : > { %11990 = vxpose.xlu1.b32.cont [13/16] (narrow) %v11989_v51, 16  ;;  %v12417_v51 = vld [vmem:[%s15264_s7 + $0x20] ss:$8 sps:$4 sm:$0xff]  }
0x1151   : > { %11992 = vxpose.xlu1.b32.cont [14/16] (narrow) %v11991_v12, 16  ;;  %v12425_v12 = vld [vmem:[%s15264_s7 + $0x44] ss:$8 sps:$4 sm:$0xff]  }
0x1155   : > { %11994 = vxpose.xlu1.b32.cont [15/16] (narrow) %v11993_v62, 16  ;;  %v12419_v62 = vld [vmem:[%s15264_s7 + $0x24] ss:$8 sps:$4 sm:$0xff]  }
0x1159   : > { %11996 = vxpose.xlu1.b32.end [16/16] (narrow) %v11995_v24, 16 }
0x115d   : > { %v6241_v43 = vpop.trf.xlu1  ;;  %v6257_v31 = vpop.trf.xlu0 }
0x115e   : > { %11242 = vmatprep.mubr.msk.bf16.mxu1 %vm135_vm0, %v6241_v43 }
0x1161   : > { %v6242_v44 = vpop.trf.xlu1  ;;  %v6258_v61 = vpop.trf.xlu0 }
0x1162   : > { %11243 = vmatmul.mubr.msk.bf16.vlgmr.msra.gmra.mrb[240].mxu1 %vm135_vm0, %v6242_v44  ;;  %v12431_v44 = vld [vmem:[%s15264_s7 + $0x64] ss:$8 sps:$4 sm:$0xff]  }
0x1163   : > { %11309 = vmatpush3.bf16.xpose.msra.mxu1 %v12904_v18 }
0x1164   : > { %7570 = vmatprep.subr.bf16.mxu1 %v12413_v0 }
0x1165   : > { %v6243_v23 = vpop.trf.xlu1  ;;  %v6259_v59 = vpop.trf.xlu0 }
0x1166   : > { %11246 = vmatprep.mubr.msk.bf16.mxu1 %vm135_vm0, %v6243_v23 }
0x1169   : > { %v6244_v10 = vpop.trf.xlu1  ;;  %v6260_v32 = vpop.trf.xlu0 }
0x116a   : > { %11247 = vmatmul.mubr.msk.bf16.gmra.mrb[244].mxu1 %vm135_vm0, %v6244_v10  ;;  %v12429_v10 = vld [vmem:[%s15264_s7 + $0x60] ss:$8 sps:$4 sm:$0xff]  }
0x116d   : > { %v6245_v47 = vpop.trf.xlu1  ;;  %v6261_v11 = vpop.trf.xlu0 }
0x116e   : > { %11250 = vmatprep.mubr.msk.bf16.mxu1 %vm135_vm0, %v6245_v47  ;;  %v12434_v47 = vld [vmem:[%s15264_s7 + $0x74] ss:$8 sps:$4 sm:$0xff]  }
0x1171   : > { %v6246_v6 = vpop.trf.xlu1  ;;  %v6262_v3 = vpop.trf.xlu0 }
0x1172   : > { %11251 = vmatmul.mubr.msk.bf16.gmra.mrb[248].mxu1 %vm135_vm0, %v6246_v6 }
0x1175   : > { %v6247_v49 = vpop.trf.xlu1  ;;  %v6263_v26 = vpop.trf.xlu0 }
0x1176   : > { %11254 = vmatprep.mubr.msk.bf16.mxu1 %vm135_vm0, %v6247_v49  ;;  %v12432_v49 = vld [vmem:[%s15264_s7 + $0x70] ss:$8 sps:$4 sm:$0xff]  }
0x1179   : > { %v6248_v25 = vpop.trf.xlu1  ;;  %v6264_v52 = vpop.trf.xlu0 }
0x117a   : > { %11255 = vmatmul.mubr.msk.bf16.gmra.mrb[252].mxu1 %vm135_vm0, %v6248_v25  ;;  %v12437_v25 = vld [vmem:[%s15264_s7 + $0x84] ss:$8 sps:$4 sm:$0xff]  }
0x117b   : > { %11258 = vmatprep.mubr.msk.bf16.mxu1 %vm135_vm0, %v6257_v31 }
0x1182   : > { %11259 = vmatmul.mubr.msk.bf16.gmra.mrb[0].mxu1 %vm135_vm0, %v6258_v61  ;;  %v12435_v61 = vld [vmem:[%s15264_s7 + $0x80] ss:$8 sps:$4 sm:$0xff]  }
0x1183   : > { %11262 = vmatprep.mubr.msk.bf16.mxu1 %vm135_vm0, %v6259_v59 }
0x118a   : > { %11263 = vmatmul.mubr.msk.bf16.gmra.mrb[4].mxu1 %vm135_vm0, %v6260_v32  ;;  %v12440_v32 = vld [vmem:[%s15264_s7 + $0x94] ss:$8 sps:$4 sm:$0xff]  }
0x118b   : > { %11266 = vmatprep.mubr.msk.bf16.mxu1 %vm135_vm0, %v6261_v11  ;;  %v12438_v11 = vld [vmem:[%s15264_s7 + $0x90] ss:$8 sps:$4 sm:$0xff]  }
0x1192   : > { %11267 = vmatmul.mubr.msk.bf16.gmra.mrb[8].mxu1 %vm135_vm0, %v6262_v3  ;;  %v12443_v3 = vld [vmem:[%s15264_s7 + $0xa4] ss:$8 sps:$4 sm:$0xff]  }
0x1193   : > { %11270 = vmatprep.mubr.msk.bf16.mxu1 %vm135_vm0, %v6263_v26 }
0x119a   : > { %11271 = vmatmul.mubr.msk.bf16.gmra.mrb[12].mxu1 %vm135_vm0, %v6264_v52 }
0x119d   : > { %v11997_v7 = vpop.trf.xlu1 }
0x119e   : > { %v12001_v4 = vunpack.i.h.bf16 %v11997_v7  ;;  %v11998_v2 = vunpack.i.l.bf16 %v11997_v7  ;;  %v12441_v7 = vld [vmem:[%s15264_s7 + $0xa0] ss:$8 sps:$4 sm:$0xff]  }
0x11a1   : > { %v12002_v55 = vpop.trf.xlu1 }
0x11a2   : > { %v12006_v36 = vunpack.i.h.bf16 %v12002_v55  ;;  %v12003_v37 = vunpack.i.l.bf16 %v12002_v55 }
0x11a4   : > { %v14498_v35 = vpack.c.bf16 %v12006_v36, %v12001_v4  ;;  %v14500_v34 = vpack.c.bf16 %v12003_v37, %v11998_v2  ;;  %v12446_v2 = vld [vmem:[%s15264_s7 + $0xb4] ss:$8 sps:$4 sm:$0xff]   ;;  %v12444_v36 = vld [vmem:[%s15264_s7 + $0xb0] ss:$8 sps:$4 sm:$0xff]  }
0x11a6   : > { %6791 = vxpose.xlu1.c.b16.start.end [1/1] (short) %v14498_v35, 128  ;;  %6775 = vxpose.xlu0.c.b16.start.end [1/1] (short) %v14500_v34, 128 }
0x120c   : > { %v6783_v40 = vpop.trf.xlu0  ;;  %v6799_v30 = vpop.trf.xlu1 }
0x120d   : > { %11310 = vmatprep.mubr.msk.bf16.mxu1 %vm135_vm0, %v6783_v40  ;;  %v12449_v40 = vld [vmem:[%s15264_s7 + $0xc4] ss:$8 sps:$4 sm:$0xff]  }
0x1210   : > { %v6784_v57 = vpop.trf.xlu0  ;;  %v6800_v43 = vpop.trf.xlu1 }
0x1211   : > { %11311 = vmatmul.mubr.msk.bf16.vlgmr.msra.gmra.mrb[16].mxu1 %vm135_vm0, %v6784_v57 }
0x1212   : > { %7571 = vmatpush1.bf16.msra.mxu1 %v12411_v5 }
0x1213   : > { %7572 = vmatprep.subr.bf16.mxu1 %v12416_v17  ;;  %v12447_v17 = vld [vmem:[%s15264_s7 + $0xc0] ss:$8 sps:$4 sm:$0xff]  }
0x1214   : > { %v6785_v13 = vpop.trf.xlu0  ;;  %v6801_v31 = vpop.trf.xlu1 }
0x1215   : > { %11314 = vmatprep.mubr.msk.bf16.mxu1 %vm135_vm0, %v6785_v13 }
0x1216   : > { %7573 = vmatpush1.bf16.msra.mxu1 %v12414_v21  ;;  %v12452_v21 = vld [vmem:[%s15264_s7 + $0xd4] ss:$8 sps:$4 sm:$0xff]  }
0x1217   : > { %7574 = vmatprep.subr.bf16.mxu1 %v12419_v62 }
0x1218   : > { %v6786_v24 = vpop.trf.xlu0  ;;  %v6802_v59 = vpop.trf.xlu1 }
0x1219   : > { %11315 = vmatmul.mubr.msk.bf16.gmra.mrb[20].mxu1 %vm135_vm0, %v6786_v24  ;;  %v12455_v24 = vld [vmem:[%s15264_s7 + $0xe4] ss:$8 sps:$4 sm:$0xff]  }
0x121a   : > { %7575 = vmatpush1.bf16.msra.mxu1 %v12417_v51 }
0x121b   : > { %7576 = vmatprep.subr.bf16.mxu1 %v12422_v8  ;;  %v12450_v8 = vld [vmem:[%s15264_s7 + $0xd0] ss:$8 sps:$4 sm:$0xff]  }
0x121c   : > { %v6787_v29 = vpop.trf.xlu0  ;;  %v6803_v0 = vpop.trf.xlu1 }
0x121d   : > { %11318 = vmatprep.mubr.msk.bf16.mxu1 %vm135_vm0, %v6787_v29  ;;  %v12453_v29 = vld [vmem:[%s15264_s7 + $0xe0] ss:$8 sps:$4 sm:$0xff]  }
0x121e   : > { %7577 = vmatpush1.bf16.msra.mxu1 %v12420_v22 }
0x121f   : > { %7578 = vmatprep.subr.bf16.mxu1 %v12425_v12 }
0x1220   : > { %v6788_v63 = vpop.trf.xlu0  ;;  %v6804_v37 = vpop.trf.xlu1 }
0x1221   : > { %11319 = vmatmul.mubr.msk.bf16.gmra.mrb[24].mxu1 %vm135_vm0, %v6788_v63 }
0x1222   : > { %7579 = vmatpush1.bf16.msra.mxu1 %v12423_v28  ;;  %v12458_v28 = vld [vmem:[%s15264_s7 + $0xf4] ss:$8 sps:$4 sm:$0xff]  }
0x1223   : > { %7580 = vmatprep.subr.bf16.mxu1 %v12428_v60 }
0x1224   : > { %v6789_v23 = vpop.trf.xlu0  ;;  %v6805_v13 = vpop.trf.xlu1 }
0x1225   : > { %11322 = vmatprep.mubr.msk.bf16.mxu1 %vm135_vm0, %v6789_v23 }
0x1226   : > { %7581 = vmatpush1.bf16.msra.mxu1 %v12426_v41  ;;  %v12456_v41 = vld [vmem:[%s15264_s7 + $0xf0] ss:$8 sps:$4 sm:$0xff]  }
0x1227   : > { %7582 = vmatprep.subr.bf16.mxu1 %v12431_v44 }
0x1228   : > { %v6790_v6 = vpop.trf.xlu0  ;;  %v6806_v12 = vpop.trf.xlu1 }
0x1229   : > { %11323 = vmatmul.mubr.msk.bf16.gmra.mrb[28].mxu1 %vm135_vm0, %v6790_v6 }
0x122a   : > { %7583 = vmatpush1.bf16.msra.mxu1 %v12429_v10  ;;  %11326 = vmatprep.mubr.msk.bf16.mxu1 %vm135_vm0, %v6799_v30  ;;  %v12459_v10 = vld [vmem:[%s15264_s7 + $0x100] ss:$8 sps:$4 sm:$0xff]  }
0x122b   : > { %7584 = vmatprep.subr.bf16.mxu1 %v12434_v47  ;;  %v12464_v47 = vld [vmem:[%s15264_s7 + $0x114] ss:$8 sps:$4 sm:$0xff]  }
0x122e   : > { %7585 = vmatpush1.bf16.msra.mxu1 %v12432_v49  ;;  %v12467_v49 = vld [vmem:[%s15264_s7 + $0x124] ss:$8 sps:$4 sm:$0xff]  }
0x122f   : > { %7586 = vmatprep.subr.bf16.mxu1 %v12437_v25 }
0x1231   : > { %11327 = vmatmul.mubr.msk.bf16.gmra.mrb[32].mxu1 %vm135_vm0, %v6800_v43  ;;  %v12461_v43 = vld [vmem:[%s15264_s7 + $0x104] ss:$8 sps:$4 sm:$0xff]  }
0x1232   : > { %7587 = vmatpush1.bf16.msra.mxu1 %v12435_v61  ;;  %11330 = vmatprep.mubr.msk.bf16.mxu1 %vm135_vm0, %v6801_v31  ;;  %v12462_v31 = vld [vmem:[%s15264_s7 + $0x110] ss:$8 sps:$4 sm:$0xff]   ;;  %v12465_v61 = vld [vmem:[%s15264_s7 + $0x120] ss:$8 sps:$4 sm:$0xff]  }
0x1233   : > { %7588 = vmatprep.subr.bf16.mxu1 %v12440_v32 }
0x1235   : > { %v11244_v26 = vpop.f32.mrb[240].mxu1 }
0x1236   : > { %v6347_v52 = vpop.f32.mrb[241].mxu1  ;;  %7589 = vmatpush1.bf16.msra.mxu1 %v12438_v11  ;;  %v12468_v11 = vld [vmem:[%s15264_s7 + $0x130] ss:$8 sps:$4 sm:$0xff]  }
0x1237   : > { %6474 = vxpose.xlu0.b32.start [1/16] (narrow) %v6347_v52, 16  ;;  %v11245_v4 = vpop.f32.mrb[242].mxu1  ;;  %7590 = vmatprep.subr.bf16.mxu1 %v12443_v3  ;;  %v12473_v3 = vld [vmem:[%s15264_s7 + $0x144] ss:$8 sps:$4 sm:$0xff]  }
0x1238   : > { %v6350_v55 = vpop.f32.mrb[243].mxu1 }
0x1239   : > { %11331 = vmatmul.mubr.msk.bf16.gmra.mrb[36].mxu1 %vm135_vm0, %v6802_v59 }
0x123a   : > { %7591 = vmatpush1.bf16.msra.mxu1 %v12441_v7  ;;  %11334 = vmatprep.mubr.msk.bf16.mxu1 %vm135_vm0, %v6803_v0 }
0x123b   : > { %6475 = vxpose.xlu0.b32.cont [2/16] (narrow) %v6350_v55, 16  ;;  %7592 = vmatprep.subr.bf16.mxu1 %v12446_v2  ;;  %v12479_v2 = vld [vmem:[%s15264_s7 + $0x164] ss:$8 sps:$4 sm:$0xff]  }
0x123d   : > { %v11248_v5 = vpop.f32.mrb[244].mxu1 }
0x123e   : > { %7593 = vmatpush1.bf16.msra.mxu1 %v12444_v36  ;;  %v6363_v57 = vpop.f32.mrb[245].mxu1  ;;  %v12477_v36 = vld [vmem:[%s15264_s7 + $0x160] ss:$8 sps:$4 sm:$0xff]  }
0x123f   : > { %6476 = vxpose.xlu0.b32.cont [3/16] (narrow) %v11244_v26, 16  ;;  %7594 = vmatprep.subr.bf16.mxu1 %v12449_v40  ;;  %v11249_v62 = vpop.f32.mrb[246].mxu1  ;;  %v12482_v40 = vld [vmem:[%s15264_s7 + $0x174] ss:$8 sps:$4 sm:$0xff]  }
0x1240   : > { %v6366_v51 = vpop.f32.mrb[247].mxu1 }
0x1241   : > { %11335 = vmatmul.mubr.msk.bf16.gmra.mrb[40].mxu1 %vm135_vm0, %v6804_v37 }
0x1242   : > { %7595 = vmatpush1.bf16.msra.mxu1 %v12447_v17  ;;  %11338 = vmatprep.mubr.msk.bf16.mxu1 %vm135_vm0, %v6805_v13  ;;  %v12483_v13 = vld [vmem:[%s15264_s7 + $0x180] ss:$8 sps:$4 sm:$0xff]  }
0x1243   : > { %6477 = vxpose.xlu0.b32.cont [4/16] (narrow) %v11245_v4, 16  ;;  %7596 = vmatprep.subr.bf16.mxu1 %v12452_v21  ;;  %v12474_v4 = vld [vmem:[%s15264_s7 + $0x150] ss:$8 sps:$4 sm:$0xff]   ;;  %v12485_v21 = vld [vmem:[%s15264_s7 + $0x184] ss:$8 sps:$4 sm:$0xff]  }
0x1245   : > { %v11252_v22 = vpop.f32.mrb[248].mxu1 }
0x1246   : > { %7597 = vmatpush1.bf16.msra.mxu1 %v12450_v8  ;;  %v6379_v30 = vpop.f32.mrb[249].mxu1  ;;  %v12488_v8 = vld [vmem:[%s15264_s7 + $0x194] ss:$8 sps:$4 sm:$0xff]  }
0x1247   : > { %6478 = vxpose.xlu0.b32.cont [5/16] (narrow) %v6363_v57, 16  ;;  %7598 = vmatprep.subr.bf16.mxu1 %v12455_v24  ;;  %v11253_v60 = vpop.f32.mrb[250].mxu1  ;;  %v12480_v57 = vld [vmem:[%s15264_s7 + $0x170] ss:$8 sps:$4 sm:$0xff]  }
0x1248   : > { %v6382_v63 = vpop.f32.mrb[251].mxu1 }
0x1249   : > { %11339 = vmatmul.mubr.msk.bf16.gmra.mrb[44].mxu1 %vm135_vm0, %v6806_v12  ;;  %v12486_v12 = vld [vmem:[%s15264_s7 + $0x190] ss:$8 sps:$4 sm:$0xff]  }
0x124a   : > { %7599 = vmatpush1.bf16.msra.mxu1 %v12453_v29  ;;  %7602 = vmatprep.mubr.bf16.mxu1 %v14474_v58  ;;  %v12491_v29 = vld [vmem:[%s15264_s7 + $0x1a4] ss:$8 sps:$4 sm:$0xff]  }
0x124b   : > { %6479 = vxpose.xlu0.b32.cont [6/16] (narrow) %v6366_v51, 16  ;;  %7600 = vmatprep.subr.bf16.mxu1 %v12458_v28  ;;  %v12494_v28 = vld [vmem:[%s15264_s7 + $0x1b4] ss:$8 sps:$4 sm:$0xff]  }
0x124d   : > { %v14617_v44 = vpop.f32.mrb[252].mxu1 }
0x124e   : > { %7601 = vmatpush1.bf16.msra.mxu1 %v12456_v41  ;;  %v6395_v23 = vpop.f32.mrb[253].mxu1  ;;  %v12495_v41 = vld [vmem:[%s15264_s7 + $0x1c0] ss:$8 sps:$4 sm:$0xff]  }
0x124f   : > { %6480 = vxpose.xlu0.b32.cont [7/16] (narrow) %v11248_v5, 16  ;;  %v14622_v58 = vpop.f32.mrb[254].mxu1  ;;  %7623 = vmatprep.subr.bf16.mxu1 %v12461_v43  ;;  %v12500_v43 = vld [vmem:[%s15264_s7 + $0x1d4] ss:$8 sps:$4 sm:$0xff]  }
0x1250   : > { %v6398_v6 = vpop.f32.mrb[255].mxu1 }
0x1251   : > { %7603 = vmatmul.mubr.bf16.vlgmr.msra.gmra.mrb[232].mxu1 %v14367_v9 }
0x1252   : > { %7612 = vmatprep.mubr.bf16.mxu1 %v14472_v42  ;;  %7624 = vmatpush1.bf16.msra.mxu1 %v12459_v10  ;;  %v12470_v42 = vld [vmem:[%s15264_s7 + $0x134] ss:$8 sps:$4 sm:$0xff]   ;;  %v12501_v10 = vld [vmem:[%s15264_s7 + $0x1e0] ss:$8 sps:$4 sm:$0xff]  }
0x1253   : > { %6481 = vxpose.xlu0.b32.cont [8/16] (narrow) %v11249_v62, 16  ;;  %7625 = vmatprep.subr.bf16.mxu1 %v12464_v47  ;;  %v12504_v47 = vld [vmem:[%s15264_s7 + $0x1f0] ss:$8 sps:$4 sm:$0xff]  }
0x1255   : > { %v11260_v25 = vpop.f32.mrb[0].mxu1 }
0x1256   : > { %7626 = vmatpush1.bf16.msra.mxu1 %v12462_v31  ;;  %v6411_v9 = vpop.f32.mrb[1].mxu1 }
0x1257   : > { %6482 = vxpose.xlu0.b32.cont [9/16] (narrow) %v6379_v30, 16  ;;  %7627 = vmatprep.subr.bf16.mxu1 %v12467_v49  ;;  %v11261_v59 = vpop.f32.mrb[2].mxu1  ;;  %v12489_v30 = vld [vmem:[%s15264_s7 + $0x1a0] ss:$8 sps:$4 sm:$0xff]  }
0x1258   : > { %6506 = vxpose.xlu1.b32.start [1/16] (narrow) %v6411_v9, 16  ;;  %v6414_v32 = vpop.f32.mrb[3].mxu1 }
0x1259   : > { %7613 = vmatmul.mubr.bf16.gmra.mrb[236].mxu1 %v14372_v20  ;;  %v12471_v20 = vld [vmem:[%s15264_s7 + $0x140] ss:$8 sps:$4 sm:$0xff]  }
0x125a   : > { %7655 = vmatprep.mubr.bf16.mxu1 %v14500_v34  ;;  %7628 = vmatpush1.bf16.msra.mxu1 %v12465_v61  ;;  %v12476_v34 = vld [vmem:[%s15264_s7 + $0x154] ss:$8 sps:$4 sm:$0xff]  }
0x125b   : > { %6483 = vxpose.xlu0.b32.cont [10/16] (narrow) %v6382_v63, 16  ;;  %7629 = vmatprep.subr.bf16.mxu1 %v12470_v42  ;;  %v12497_v63 = vld [vmem:[%s15264_s7 + $0x1c4] ss:$8 sps:$4 sm:$0xff]  }
0x125c   : > { %6507 = vxpose.xlu1.b32.cont [2/16] (narrow) %v6414_v32, 16  ;;  %v12509_v32 = vld [vmem:[%s15264_s7 + $0x204] ss:$8 sps:$4 sm:$0xff]  }
0x125d   : > { %v11264_v0 = vpop.f32.mrb[4].mxu1 }
0x125e   : > { %7630 = vmatpush1.bf16.msra.mxu1 %v12468_v11  ;;  %v6427_v26 = vpop.f32.mrb[5].mxu1  ;;  %v12512_v11 = vld [vmem:[%s15264_s7 + $0x214] ss:$8 sps:$4 sm:$0xff]  }
0x125f   : > { %6484 = vxpose.xlu0.b32.cont [11/16] (narrow) %v11252_v22, 16  ;;  %7631 = vmatprep.subr.bf16.mxu1 %v12473_v3  ;;  %v11265_v52 = vpop.f32.mrb[6].mxu1  ;;  %v12510_v3 = vld [vmem:[%s15264_s7 + $0x210] ss:$8 sps:$4 sm:$0xff]  }
0x1260   : > { %6508 = vxpose.xlu1.b32.cont [3/16] (narrow) %v11260_v25, 16  ;;  %v6430_v7 = vpop.f32.mrb[7].mxu1 }
0x1262   : > { %7632 = vmatpush1.bf16.msra.mxu1 %v12471_v20  ;;  %v12518_v20 = vld [vmem:[%s15264_s7 + $0x234] ss:$8 sps:$4 sm:$0xff]  }
0x1263   : > { %6485 = vxpose.xlu0.b32.cont [12/16] (narrow) %v11253_v60, 16  ;;  %7633 = vmatprep.subr.bf16.mxu1 %v12476_v34  ;;  %v12492_v60 = vld [vmem:[%s15264_s7 + $0x1b0] ss:$8 sps:$4 sm:$0xff]   ;;  %v12521_v34 = vld [vmem:[%s15264_s7 + $0x244] ss:$8 sps:$4 sm:$0xff]  }
0x1264   : > { %6509 = vxpose.xlu1.b32.cont [4/16] (narrow) %v11261_v59, 16  ;;  %v12507_v59 = vld [vmem:[%s15264_s7 + $0x200] ss:$8 sps:$4 sm:$0xff]  }
0x1265   : > { %v11268_v55 = vpop.f32.mrb[8].mxu1 }
0x1266   : > { %7634 = vmatpush1.bf16.msra.mxu1 %v12474_v4  ;;  %v6443_v37 = vpop.f32.mrb[9].mxu1  ;;  %v12522_v4 = vld [vmem:[%s15264_s7 + $0x250] ss:$8 sps:$4 sm:$0xff]  }
0x1267   : > { %6486 = vxpose.xlu0.b32.cont [13/16] (narrow) %v6395_v23, 16  ;;  %7635 = vmatprep.subr.bf16.mxu1 %v12479_v2  ;;  %v11269_v5 = vpop.f32.mrb[10].mxu1  ;;  %v12503_v23 = vld [vmem:[%s15264_s7 + $0x1e4] ss:$8 sps:$4 sm:$0xff]  }
0x1268   : > { %6510 = vxpose.xlu1.b32.cont [5/16] (narrow) %v6427_v26, 16  ;;  %v6446_v17 = vpop.f32.mrb[11].mxu1  ;;  %v12516_v26 = vld [vmem:[%s15264_s7 + $0x230] ss:$8 sps:$4 sm:$0xff]  }
0x126a   : > { %7636 = vmatpush1.bf16.msra.mxu1 %v12477_v36 }
0x126b   : > { %6487 = vxpose.xlu0.b32.cont [14/16] (narrow) %v6398_v6, 16  ;;  %7637 = vmatprep.subr.bf16.mxu1 %v12482_v40 }
0x126c   : > { %6511 = vxpose.xlu1.b32.cont [6/16] (narrow) %v6430_v7, 16  ;;  %v12524_v7 = vld [vmem:[%s15264_s7 + $0x254] ss:$8 sps:$4 sm:$0xff]  }
0x126d   : > { %v11272_v62 = vpop.f32.mrb[12].mxu1 }
0x126e   : > { %7638 = vmatpush1.bf16.msra.mxu1 %v12480_v57  ;;  %v6459_v51 = vpop.f32.mrb[13].mxu1 }
0x126f   : > { %6488 = vxpose.xlu0.b32.cont [15/16] (narrow) %v14617_v44, 16  ;;  %7639 = vmatprep.subr.bf16.mxu1 %v12485_v21  ;;  %v11273_v24 = vpop.f32.mrb[14].mxu1  ;;  %v12498_v44 = vld [vmem:[%s15264_s7 + $0x1d0] ss:$8 sps:$4 sm:$0xff]  }
0x1270   : > { %6512 = vxpose.xlu1.b32.cont [7/16] (narrow) %v11264_v0, 16  ;;  %v6462_v22 = vpop.f32.mrb[15].mxu1  ;;  %v12515_v0 = vld [vmem:[%s15264_s7 + $0x224] ss:$8 sps:$4 sm:$0xff]  }
0x1272   : > { %7640 = vmatpush1.bf16.msra.mxu1 %v12483_v13 }
0x1273   : > { %6489 = vxpose.xlu0.b32.end [16/16] (narrow) %v14622_v58, 16  ;;  %7641 = vmatprep.subr.bf16.mxu1 %v12488_v8  ;;  %v12506_v58 = vld [vmem:[%s15264_s7 + $0x1f4] ss:$8 sps:$4 sm:$0xff]   ;;  %v12525_v8 = vld [vmem:[%s15264_s7 + $0x260] ss:$8 sps:$4 sm:$0xff]  }
0x1274   : > { %6513 = vxpose.xlu1.b32.cont [8/16] (narrow) %v11265_v52, 16  ;;  %v12519_v52 = vld [vmem:[%s15264_s7 + $0x240] ss:$8 sps:$4 sm:$0xff]  }
0x1276   : > { %7642 = vmatpush1.bf16.msra.mxu1 %v12486_v12 }
0x1277   : > { %7643 = vmatprep.subr.bf16.mxu1 %v12491_v29  ;;  %v12528_v29 = vld [vmem:[%s15264_s7 + $0x270] ss:$8 sps:$4 sm:$0xff]  }
0x1278   : > { %6514 = vxpose.xlu1.b32.cont [9/16] (narrow) %v6443_v37, 16 }
0x127a   : > { %7644 = vmatpush1.bf16.msra.mxu1 %v12489_v30 }
0x127b   : > { %7645 = vmatprep.subr.bf16.mxu1 %v12494_v28 }
0x127c   : > { %6515 = vxpose.xlu1.b32.cont [10/16] (narrow) %v6446_v17, 16 }
0x127e   : > { %7646 = vmatpush1.bf16.msra.mxu1 %v12492_v60 }
0x127f   : > { %7647 = vmatprep.subr.bf16.mxu1 %v12497_v63 }
0x1280   : > { %6516 = vxpose.xlu1.b32.cont [11/16] (narrow) %v11268_v55, 16 }
0x1282   : > { %7648 = vmatpush1.bf16.msra.mxu1 %v12495_v41 }
0x1283   : > { %7649 = vmatprep.subr.bf16.mxu1 %v12500_v43 }
0x1284   : > { %6517 = vxpose.xlu1.b32.cont [12/16] (narrow) %v11269_v5, 16 }
0x1286   : > { %7650 = vmatpush1.bf16.msra.mxu1 %v12498_v44 }
0x1287   : > { %7651 = vmatprep.subr.bf16.mxu1 %v12503_v23 }
0x1288   : > { %6518 = vxpose.xlu1.b32.cont [13/16] (narrow) %v6459_v51, 16  ;;  %v12527_v51 = vld [vmem:[%s15264_s7 + $0x264] ss:$8 sps:$4 sm:$0xff]  }
0x128a   : > { %7652 = vmatpush1.bf16.msra.mxu1 %v12501_v10 }
0x128b   : > { %7653 = vmatprep.subr.bf16.mxu1 %v12506_v58 }
0x128c   : > { %6519 = vxpose.xlu1.b32.cont [14/16] (narrow) %v6462_v22, 16  ;;  %v12530_v22 = vld [vmem:[%s15264_s7 + $0x274] ss:$8 sps:$4 sm:$0xff]  }
0x128e   : > { %7654 = vmatpush1.bf16.msra.mxu1 %v12504_v47 }
0x128f   : > { %7676 = vmatprep.subr.bf16.mxu1 %v12509_v32 }
0x1290   : > { %6520 = vxpose.xlu1.b32.cont [15/16] (narrow) %v11272_v62, 16 }
0x1294   : > { %6521 = vxpose.xlu1.b32.end [16/16] (narrow) %v11273_v24, 16 }
0x12b7   : > { %v6490_v6 = vpop.trf.xlu0 }
0x12b8   : > { %v6538_v31 = vmul.f32 2.0, %v6490_v6 }
0x12ba   : > { %v6542_v25 = vsub.f32 %v6538_v31, %v15334_v56 }
0x12bb   : > { %v6491_v49 = vpop.trf.xlu0 }
0x12bc   : > { %v6539_v61 = vmul.f32 2.0, %v6491_v49 }
0x12be   : > { %v6543_v9 = vsub.f32 %v6539_v61, %v15335_v38 }
0x12c0   : > { %v6546_v42 = vpack.c.bf16 %v6543_v9, %v6542_v25 }
0x12c2   : > { %7656 = vmatmul.mubr.bf16.vlgmr.msra.gmra.mrb[232].mxu1 %v6546_v42 }
0x12c3   : > { %7665 = vmatprep.mubr.bf16.mxu1 %v14498_v35  ;;  %7677 = vmatpush1.bf16.msra.mxu1 %v12507_v59  ;;  %v12513_v35 = vld [vmem:[%s15264_s7 + $0x220] ss:$8 sps:$4 sm:$0xff]  }
0x12c4   : > { %7678 = vmatprep.subr.bf16.mxu1 %v12512_v11 }
0x12c7   : > { %7679 = vmatpush1.bf16.msra.mxu1 %v12510_v3 }
0x12c8   : > { %7680 = vmatprep.subr.bf16.mxu1 %v12515_v0 }
0x12cb   : > { %7681 = vmatpush1.bf16.msra.mxu1 %v12513_v35 }
0x12cc   : > { %7682 = vmatprep.subr.bf16.mxu1 %v12518_v20 }
0x12cf   : > { %7683 = vmatpush1.bf16.msra.mxu1 %v12516_v26 }
0x12d0   : > { %7684 = vmatprep.subr.bf16.mxu1 %v12521_v34 }
0x12d3   : > { %7685 = vmatpush1.bf16.msra.mxu1 %v12519_v52 }
0x12d4   : > { %7686 = vmatprep.subr.bf16.mxu1 %v12524_v7 }
0x12d7   : > { %7687 = vmatpush1.bf16.msra.mxu1 %v12522_v4 }
0x12d8   : > { %v6522_v2 = vpop.trf.xlu1  ;;  %7688 = vmatprep.subr.bf16.mxu1 %v12527_v51  ;;  %v12652_v51 = vld [vmem:[%s15263_s6] sm:$0x7] }
0x12d9   : > { %v6540_v55 = vmul.f32 2.0, %v6522_v2 }
0x12db   : > { %v6544_v37 = vsub.f32 %v6540_v55, %v15336_v50  ;;  %7689 = vmatpush1.bf16.msra.mxu1 %v12525_v8 }
0x12dc   : > { %v6523_v36 = vpop.trf.xlu1  ;;  %7690 = vmatprep.subr.bf16.mxu1 %v12530_v22 }
0x12dd   : > { %v6541_v40 = vmul.f32 2.0, %v6523_v36 }
0x12df   : > { %v6545_v5 = vsub.f32 %v6541_v40, %v15337_v33  ;;  %7691 = vmatpush1.bf16.msra.mxu1 %v12528_v29 }
0x12e0   : > { %11593 = vmatprep.subr.msk.bf16.mxu1 %vm135_vm0, %v12895_v16 }
0x12e1   : > { %v6547_v17 = vpack.c.bf16 %v6545_v5, %v6544_v37 }
0x12e3   : > { %7666 = vmatmul.mubr.bf16.gmra.mrb[236].mxu1 %v6547_v17 }
0x12e4   : > { %v11312_v57 = vpop.f32.mrb[16].mxu1  ;;  %7708 = vmatprep.mubr.bf16.mxu1 %v15333_v27 }
0x12e5   : > { %v6889_v21 = vpop.f32.mrb[17].mxu1 }
0x12e6   : > { %7016 = vxpose.xlu0.b32.start [1/16] (narrow) %v6889_v21, 16  ;;  %v11313_v62 = vpop.f32.mrb[18].mxu1 }
0x12e7   : > { %v6892_v13 = vpop.f32.mrb[19].mxu1 }
0x12ea   : > { %7017 = vxpose.xlu0.b32.cont [2/16] (narrow) %v6892_v13, 16  ;;  %v4969_v13 = vsub.s32 1, %v14381_v19 }
0x12ec   : > { %v11316_v24 = vpop.f32.mrb[20].mxu1  ;;  %v4970_v8 = vrot.slane %v12652_v51, %v4969_v13 }
0x12ed   : > { %v6905_v12 = vpop.f32.mrb[21].mxu1 }
0x12ee   : > { %7018 = vxpose.xlu0.b32.cont [3/16] (narrow) %v11312_v57, 16  ;;  %v11317_v30 = vpop.f32.mrb[22].mxu1 }
0x12ef   : > { %v6908_v28 = vpop.f32.mrb[23].mxu1 }
0x12f2   : > { %7019 = vxpose.xlu0.b32.cont [4/16] (narrow) %v11313_v62, 16 }
0x12f4   : > { %v11320_v60 = vpop.f32.mrb[24].mxu1 }
0x12f5   : > { %v6921_v63 = vpop.f32.mrb[25].mxu1 }
0x12f6   : > { %7020 = vxpose.xlu0.b32.cont [5/16] (narrow) %v6905_v12, 16  ;;  %v11321_v41 = vpop.f32.mrb[26].mxu1 }
0x12f7   : > { %v6924_v43 = vpop.f32.mrb[27].mxu1 }
0x12fa   : > { %7021 = vxpose.xlu0.b32.cont [6/16] (narrow) %v6908_v28, 16 }
0x12fc   : > { %v11324_v44 = vpop.f32.mrb[28].mxu1 }
0x12fd   : > { %v6937_v23 = vpop.f32.mrb[29].mxu1 }
0x12fe   : > { %7022 = vxpose.xlu0.b32.cont [7/16] (narrow) %v11316_v24, 16  ;;  %v11325_v10 = vpop.f32.mrb[30].mxu1 }
0x12ff   : > { %v6940_v58 = vpop.f32.mrb[31].mxu1 }
0x1302   : > { %7023 = vxpose.xlu0.b32.cont [8/16] (narrow) %v11317_v30, 16 }
0x1304   : > { %v11328_v47 = vpop.f32.mrb[32].mxu1 }
0x1305   : > { %v6953_v6 = vpop.f32.mrb[33].mxu1 }
0x1306   : > { %7024 = vxpose.xlu0.b32.cont [9/16] (narrow) %v6921_v63, 16  ;;  %7048 = vxpose.xlu1.b32.start [1/16] (narrow) %v6953_v6, 16  ;;  %v11329_v31 = vpop.f32.mrb[34].mxu1 }
0x1307   : > { %v6956_v49 = vpop.f32.mrb[35].mxu1 }
0x130a   : > { %7025 = vxpose.xlu0.b32.cont [10/16] (narrow) %v6924_v43, 16  ;;  %7049 = vxpose.xlu1.b32.cont [2/16] (narrow) %v6956_v49, 16 }
0x130c   : > { %v11332_v25 = vpop.f32.mrb[36].mxu1 }
0x130d   : > { %v6969_v61 = vpop.f32.mrb[37].mxu1 }
0x130e   : > { %7026 = vxpose.xlu0.b32.cont [11/16] (narrow) %v11320_v60, 16  ;;  %7050 = vxpose.xlu1.b32.cont [3/16] (narrow) %v11328_v47, 16  ;;  %v11333_v9 = vpop.f32.mrb[38].mxu1 }
0x130f   : > { %v6972_v42 = vpop.f32.mrb[39].mxu1 }
0x1312   : > { %7027 = vxpose.xlu0.b32.cont [12/16] (narrow) %v11321_v41, 16  ;;  %7051 = vxpose.xlu1.b32.cont [4/16] (narrow) %v11329_v31, 16 }
0x1314   : > { %v11336_v59 = vpop.f32.mrb[40].mxu1 }
0x1315   : > { %v6985_v32 = vpop.f32.mrb[41].mxu1 }
0x1316   : > { %7028 = vxpose.xlu0.b32.cont [13/16] (narrow) %v6937_v23, 16  ;;  %7052 = vxpose.xlu1.b32.cont [5/16] (narrow) %v6969_v61, 16  ;;  %v11337_v11 = vpop.f32.mrb[42].mxu1 }
0x1317   : > { %v6988_v3 = vpop.f32.mrb[43].mxu1 }
0x131a   : > { %7029 = vxpose.xlu0.b32.cont [14/16] (narrow) %v6940_v58, 16  ;;  %7053 = vxpose.xlu1.b32.cont [6/16] (narrow) %v6972_v42, 16 }
0x131c   : > { %v11340_v0 = vpop.f32.mrb[44].mxu1 }
0x131d   : > { %v7001_v35 = vpop.f32.mrb[45].mxu1 }
0x131e   : > { %7030 = vxpose.xlu0.b32.cont [15/16] (narrow) %v11324_v44, 16  ;;  %7054 = vxpose.xlu1.b32.cont [7/16] (narrow) %v11332_v25, 16  ;;  %v11341_v20 = vpop.f32.mrb[46].mxu1 }
0x131f   : > { %v7004_v26 = vpop.f32.mrb[47].mxu1 }
0x1322   : > { %7031 = vxpose.xlu0.b32.end [16/16] (narrow) %v11325_v10, 16  ;;  %7055 = vxpose.xlu1.b32.cont [8/16] (narrow) %v11333_v9, 16 }
0x1326   : > { %7056 = vxpose.xlu1.b32.cont [9/16] (narrow) %v6985_v32, 16 }
0x132a   : > { %7057 = vxpose.xlu1.b32.cont [10/16] (narrow) %v6988_v3, 16 }
0x132e   : > { %7058 = vxpose.xlu1.b32.cont [11/16] (narrow) %v11336_v59, 16 }
0x1332   : > { %7059 = vxpose.xlu1.b32.cont [12/16] (narrow) %v11337_v11, 16 }
0x1336   : > { %7060 = vxpose.xlu1.b32.cont [13/16] (narrow) %v7001_v35, 16 }
0x133a   : > { %7061 = vxpose.xlu1.b32.cont [14/16] (narrow) %v7004_v26, 16 }
0x133e   : > { %7062 = vxpose.xlu1.b32.cont [15/16] (narrow) %v11340_v0, 16 }
0x1342   : > { %7063 = vxpose.xlu1.b32.end [16/16] (narrow) %v11341_v20, 16 }
0x1366   : > { %v7032_v34 = vpop.trf.xlu0 }
0x1367   : > { %v7080_v52 = vmul.f32 2.0, %v7032_v34 }
0x1369   : > { %v7084_v2 = vsub.f32 %v7080_v52, %v15334_v56 }
0x136a   : > { %v7033_v7 = vpop.trf.xlu0 }
0x136b   : > { %v7081_v4 = vmul.f32 2.0, %v7033_v7 }
0x136d   : > { %v7085_v55 = vsub.f32 %v7081_v4, %v15335_v38 }
0x136f   : > { %v7088_v36 = vpack.c.bf16 %v7085_v55, %v7084_v2 }
0x1371   : > { %7709 = vmatmul.mubr.bf16.vlgmr.msra.gmra.mrb[232].mxu1 %v7088_v36 }
0x1372   : > { %7718 = vmatprep.mubr.bf16.mxu1 %v15333_v27  ;;  %11445 = vmatpush3.bf16.xpose.msra.mxu1 %v12904_v18 }
0x1386   : > { %v7064_v37 = vpop.trf.xlu1 }
0x1387   : > { %v7082_v40 = vmul.f32 2.0, %v7064_v37 }
0x1389   : > { %v7086_v57 = vsub.f32 %v7082_v40, %v15336_v50 }
0x138a   : > { %v7065_v5 = vpop.trf.xlu1 }
0x138b   : > { %v7083_v17 = vmul.f32 2.0, %v7065_v5 }
0x138d   : > { %v7087_v21 = vsub.f32 %v7083_v17, %v15337_v33 }
0x138f   : > { %v7089_v62 = vpack.c.bf16 %v7087_v21, %v7086_v57 }
0x1391   : > { %7719 = vmatmul.mubr.bf16.gmra.mrb[236].mxu1 %v7089_v62 }
0x1444   : > { %v14786_v27 = vpop.f32.mrb[232].mxu1 }
0x1445   : > { %15343 = vst [vmem:[#allocation23_spill] sm:$0xff] %v14786_v27  ;;  %v7712_v24 = vpop.f32.mrb[233].mxu1 }
0x1446   : > { %v11499_v22 = vadd.f32 %v7712_v24, %v4970_v8  ;;  %v14788_v12 = vpop.f32.mrb[234].mxu1 }
0x1447   : > { %15344 = vst [vmem:[#allocation24_spill] sm:$0xff] %v14788_v12  ;;  %v7716_v29 = vpop.f32.mrb[235].mxu1 }
0x1448   : > { %v10108_v30 = vmul.f32 -1.442695, %v11499_v22  ;;  %v11501_v28 = vadd.f32 %v7716_v29, %v4970_v8 }
0x144a   : > { %12611 = vpow2.f32 %v10108_v30  ;;  %v10110_v60 = vmul.f32 -1.442695, %v11501_v28 }
0x144c   : > { %12613 = vpow2.f32 %v10110_v60 }
0x1454   : > { %v12612_v63 = vpop.eup %12611 }
0x1455   : > { %v7762_v41 = vadd.f32 1.0, %v12612_v63 }
0x1456   : > { %v12614_v43 = vpop.eup %12613 }
0x1457   : > { %12615 = vrcp.f32 %v7762_v41  ;;  %v7764_v44 = vadd.f32 1.0, %v12614_v43 }
0x1459   : > { %12617 = vrcp.f32 %v7764_v44 }
0x1461   : > { %v12616_v23 = vpop.eup %12615 }
0x1462   : > { %v14793_v47 = vmul.f32 %v15334_v56, %v12616_v23 }
0x1463   : > { %v12618_v10 = vpop.eup %12617 }
0x1464   : > { %v14790_v58 = vpop.f32.mrb[236].mxu1  ;;  %15346 = vst [vmem:[#allocation26_spill] sm:$0xff] %v14793_v47  ;;  %v14796_v6 = vmul.f32 %v15335_v38, %v12618_v10 }
0x1465   : > { %15345 = vst [vmem:[#allocation25_spill] sm:$0xff] %v14790_v58  ;;  %v7722_v31 = vpop.f32.mrb[237].mxu1 }
0x1466   : > { %15347 = vst [vmem:[#allocation27_spill] sm:$0xff] %v14796_v6  ;;  %v11503_v49 = vadd.f32 %v7722_v31, %v4970_v8  ;;  %v14798_v25 = vpop.f32.mrb[238].mxu1  ;;  %v14802_v61 = vpack.c.bf16 %v14796_v6, %v14793_v47 }
0x1467   : > { %15348 = vst [vmem:[#allocation28_spill] sm:$0xff] %v14798_v25  ;;  %v7726_v9 = vpop.f32.mrb[239].mxu1 }
0x1468   : > { %v10112_v42 = vmul.f32 -1.442695, %v11503_v49  ;;  %v11505_v59 = vadd.f32 %v7726_v9, %v4970_v8  ;;  %7791 = vxpose.xlu0.c.b16.start.end [1/1] (short) %v14802_v61, 128 }
0x146a   : > { %12619 = vpow2.f32 %v10112_v42  ;;  %v10114_v32 = vmul.f32 -1.442695, %v11505_v59 }
0x146c   : > { %12621 = vpow2.f32 %v10114_v32 }
0x1474   : > { %v12620_v11 = vpop.eup %12619 }
0x1475   : > { %v7766_v3 = vadd.f32 1.0, %v12620_v11 }
0x1476   : > { %v12622_v0 = vpop.eup %12621 }
0x1477   : > { %12623 = vrcp.f32 %v7766_v3  ;;  %v7768_v35 = vadd.f32 1.0, %v12622_v0 }
0x1479   : > { %12625 = vrcp.f32 %v7768_v35 }
0x1481   : > { %v12624_v20 = vpop.eup %12623 }
0x1482   : > { %v14806_v34 = vmul.f32 %v15336_v50, %v12624_v20 }
0x1483   : > { %v12626_v26 = vpop.eup %12625 }
0x1484   : > { %15349 = vst [vmem:[#allocation29_spill] sm:$0xff] %v14806_v34  ;;  %v14809_v52 = vmul.f32 %v15337_v33, %v12626_v26 }
0x1486   : > { %15350 = vst [vmem:[#allocation30_spill] sm:$0xff] %v14809_v52  ;;  %v14813_v7 = vpack.c.bf16 %v14809_v52, %v14806_v34 }
0x1488   : > { %7807 = vxpose.xlu1.c.b16.start.end [1/1] (short) %v14813_v7, 128 }
0x14ce   : > { %v14816_v4 = vpop.trf.xlu0 }
0x14cf   : > { %11344 = vmatprep.mubr.msk.bf16.mxu0 %vm135_vm0, %v14816_v4 }
0x14d2   : > { %v14820_v2 = vpop.trf.xlu0 }
0x14d3   : > { %11345 = vmatmul.mubr.msk.bf16.vlgmr.msra.gmra.mrb[8].mxu0 %vm135_vm0, %v14820_v2 }
0x14d4   : > { %11377 = vmatpush3.bf16.xpose.msra.mxu0 %v12882_v14 }
0x14d5   : > { %11592 = vmatprep.subr.msk.bf16.mxu0 %vm135_vm0, %v12895_v16 }
0x14d6   : > { %v14827_v55 = vpop.trf.xlu0 }
0x14d7   : > { %11348 = vmatprep.mubr.msk.bf16.mxu0 %vm135_vm0, %v14827_v55 }
0x14da   : > { %v14831_v36 = vpop.trf.xlu0 }
0x14db   : > { %11349 = vmatmul.mubr.msk.bf16.gmra.mrb[12].mxu0 %vm135_vm0, %v14831_v36 }
0x14de   : > { %v14835_v37 = vpop.trf.xlu0 }
0x14df   : > { %11352 = vmatprep.mubr.msk.bf16.mxu0 %vm135_vm0, %v14835_v37 }
0x14e2   : > { %v14839_v40 = vpop.trf.xlu0 }
0x14e3   : > { %11353 = vmatmul.mubr.msk.bf16.gmra.mrb[16].mxu0 %vm135_vm0, %v14839_v40 }
0x14e6   : > { %v14843_v14 = vpop.trf.xlu0 }
0x14e7   : > { %11356 = vmatprep.mubr.msk.bf16.mxu0 %vm135_vm0, %v14843_v14 }
0x14ea   : > { %v14847_v16 = vpop.trf.xlu0 }
0x14eb   : > { %11357 = vmatmul.mubr.msk.bf16.gmra.mrb[20].mxu0 %vm135_vm0, %v14847_v16 }
0x14ee   : > { %v14851_v5 = vpop.trf.xlu1 }
0x14ef   : > { %11360 = vmatprep.mubr.msk.bf16.mxu0 %vm135_vm0, %v14851_v5 }
0x14f2   : > { %v14855_v17 = vpop.trf.xlu1 }
0x14f3   : > { %11361 = vmatmul.mubr.msk.bf16.gmra.mrb[24].mxu0 %vm135_vm0, %v14855_v17 }
0x14f6   : > { %v14859_v57 = vpop.trf.xlu1 }
0x14f7   : > { %11364 = vmatprep.mubr.msk.bf16.mxu0 %vm135_vm0, %v14859_v57 }
0x14fa   : > { %v14863_v21 = vpop.trf.xlu1 }
0x14fb   : > { %11365 = vmatmul.mubr.msk.bf16.gmra.mrb[28].mxu0 %vm135_vm0, %v14863_v21 }
0x14fe   : > { %v14867_v62 = vpop.trf.xlu1 }
0x14ff   : > { %11368 = vmatprep.mubr.msk.bf16.mxu0 %vm135_vm0, %v14867_v62 }
0x1502   : > { %v14871_v13 = vpop.trf.xlu1 }
0x1503   : > { %11369 = vmatmul.mubr.msk.bf16.gmra.mrb[32].mxu0 %vm135_vm0, %v14871_v13 }
0x1506   : > { %v14875_v51 = vpop.trf.xlu1 }
0x1507   : > { %11372 = vmatprep.mubr.msk.bf16.mxu0 %vm135_vm0, %v14875_v51 }
0x150a   : > { %v14879_v8 = vpop.trf.xlu1 }
0x150b   : > { %11373 = vmatmul.mubr.msk.bf16.gmra.mrb[36].mxu0 %vm135_vm0, %v14879_v8 }
0x15a6   : > { %v11346_v24 = vpop.f32.mrb[8].mxu0 }
0x15a7   : > { %v7905_v22 = vpop.f32.mrb[9].mxu0 }
0x15a8   : > { %v11347_v29 = vpop.f32.mrb[10].mxu0 }
0x15a9   : > { %v7908_v30 = vpop.f32.mrb[11].mxu0 }
0x15ae   : > { %v11350_v28 = vpop.f32.mrb[12].mxu0 }
0x15af   : > { %v7921_v60 = vpop.f32.mrb[13].mxu0 }
0x15b0   : > { %v11351_v63 = vpop.f32.mrb[14].mxu0 }
0x15b1   : > { %v7924_v41 = vpop.f32.mrb[15].mxu0 }
0x15b6   : > { %v11354_v43 = vpop.f32.mrb[16].mxu0 }
0x15b7   : > { %v7937_v44 = vpop.f32.mrb[17].mxu0 }
0x15b8   : > { %v11355_v23 = vpop.f32.mrb[18].mxu0 }
0x15b9   : > { %v7940_v10 = vpop.f32.mrb[19].mxu0 }
0x15be   : > { %v11358_v31 = vpop.f32.mrb[20].mxu0 }
0x15bf   : > { %v7953_v49 = vpop.f32.mrb[21].mxu0 }
0x15c0   : > { %v11359_v9 = vpop.f32.mrb[22].mxu0 }
0x15c1   : > { %v7956_v42 = vpop.f32.mrb[23].mxu0 }
0x15c6   : > { %v11362_v59 = vpop.f32.mrb[24].mxu0 }
0x15c7   : > { %v12011_v32 = vpack.i.bf16 %v11362_v59, %v11346_v24  ;;  %v7969_v11 = vpop.f32.mrb[25].mxu0 }
0x15c8   : > { %v12007_v3 = vpack.i.bf16 %v7969_v11, %v7905_v22  ;;  %v11363_v0 = vpop.f32.mrb[26].mxu0 }
0x15c9   : > { %v12013_v35 = vpack.i.bf16 %v11363_v0, %v11347_v29  ;;  %v7972_v20 = vpop.f32.mrb[27].mxu0 }
0x15ca   : > { %v12009_v26 = vpack.i.bf16 %v7972_v20, %v7908_v30  ;;  %12008 = vxpose.xlu0.b32.start [1/16] (narrow) %v12007_v3, 16 }
0x15ce   : > { %12010 = vxpose.xlu0.b32.cont [2/16] (narrow) %v12009_v26, 16  ;;  %v11366_v45 = vpop.f32.mrb[28].mxu0 }
0x15cf   : > { %v12019_v46 = vpack.i.bf16 %v11366_v45, %v11350_v28  ;;  %v7985_v39 = vpop.f32.mrb[29].mxu0 }
0x15d0   : > { %v12015_v1 = vpack.i.bf16 %v7985_v39, %v7921_v60  ;;  %v11367_v38 = vpop.f32.mrb[30].mxu0 }
0x15d1   : > { %v12021_v33 = vpack.i.bf16 %v11367_v38, %v11351_v63  ;;  %v7988_v56 = vpop.f32.mrb[31].mxu0 }
0x15d2   : > { %v12017_v50 = vpack.i.bf16 %v7988_v56, %v7924_v41  ;;  %12012 = vxpose.xlu0.b32.cont [3/16] (narrow) %v12011_v32, 16 }
0x15d6   : > { %12014 = vxpose.xlu0.b32.cont [4/16] (narrow) %v12013_v35, 16  ;;  %v11370_v12 = vpop.f32.mrb[32].mxu0 }
0x15d7   : > { %v12027_v24 = vpack.i.bf16 %v11370_v12, %v11354_v43  ;;  %v8001_v59 = vpop.f32.mrb[33].mxu0 }
0x15d8   : > { %v12023_v22 = vpack.i.bf16 %v8001_v59, %v7937_v44  ;;  %v11371_v11 = vpop.f32.mrb[34].mxu0 }
0x15d9   : > { %v12029_v29 = vpack.i.bf16 %v11371_v11, %v11355_v23  ;;  %v8004_v0 = vpop.f32.mrb[35].mxu0 }
0x15da   : > { %v12025_v30 = vpack.i.bf16 %v8004_v0, %v7940_v10  ;;  %12016 = vxpose.xlu0.b32.cont [5/16] (narrow) %v12015_v1, 16  ;;  %v12531_v10 = vld [vmem:[%s15265_s8 + $0x40] sm:$0xff]  }
0x15de   : > { %12018 = vxpose.xlu0.b32.cont [6/16] (narrow) %v12017_v50, 16  ;;  %v11374_v3 = vpop.f32.mrb[36].mxu0 }
0x15df   : > { %v12035_v45 = vpack.i.bf16 %v11374_v3, %v11358_v31  ;;  %v8017_v28 = vpop.f32.mrb[37].mxu0  ;;  %v12533_v3 = vld [vmem:[%s15265_s8 + $0x48] sm:$0xff]  }
0x15e0   : > { %v12031_v39 = vpack.i.bf16 %v8017_v28, %v7953_v49  ;;  %v11375_v60 = vpop.f32.mrb[38].mxu0  ;;  %v12536_v28 = vld [vmem:[%s15265_s8 + $0x10] sm:$0xff]  }
0x15e1   : > { %v12037_v38 = vpack.i.bf16 %v11375_v60, %v11359_v9  ;;  %v8020_v63 = vpop.f32.mrb[39].mxu0  ;;  %v12540_v60 = vld [vmem:[%s15265_s8 + $0x20] sm:$0xff]  }
0x15e2   : > { %v12033_v56 = vpack.i.bf16 %v8020_v63, %v7956_v42  ;;  %12020 = vxpose.xlu0.b32.cont [7/16] (narrow) %v12019_v46, 16  ;;  %v12544_v63 = vld [vmem:[%s15265_s8 + $0x30] sm:$0xff]  }
0x15e6   : > { %12022 = vxpose.xlu0.b32.cont [8/16] (narrow) %v12021_v33, 16 }
0x15ea   : > { %12024 = vxpose.xlu0.b32.cont [9/16] (narrow) %v12023_v22, 16 }
0x15ee   : > { %12026 = vxpose.xlu0.b32.cont [10/16] (narrow) %v12025_v30, 16  ;;  %v12532_v30 = vld [vmem:[%s15265_s8] sm:$0xff]  }
0x15f2   : > { %12028 = vxpose.xlu0.b32.cont [11/16] (narrow) %v12027_v24, 16 }
0x15f6   : > { %12030 = vxpose.xlu0.b32.cont [12/16] (narrow) %v12029_v29, 16 }
0x15fa   : > { %12032 = vxpose.xlu0.b32.cont [13/16] (narrow) %v12031_v39, 16  ;;  %v12539_v39 = vld [vmem:[%s15265_s8 + $0x60] sm:$0xff]  }
0x15fe   : > { %12034 = vxpose.xlu0.b32.cont [14/16] (narrow) %v12033_v56, 16 }
0x1602   : > { %12036 = vxpose.xlu0.b32.cont [15/16] (narrow) %v12035_v45, 16  ;;  %v12534_v45 = vld [vmem:[%s15265_s8 + $0x8] sm:$0xff]  }
0x1606   : > { %12038 = vxpose.xlu0.b32.end [16/16] (narrow) %v12037_v38, 16  ;;  %v12543_v38 = vld [vmem:[%s15265_s8 + $0x70] sm:$0xff]  }
0x164a   : > { %v12039_v1 = vpop.trf.xlu0 }
0x164b   : > { %v12040_v12 = vunpack.i.l.bf16 %v12039_v1  ;;  %v12043_v23 = vunpack.i.h.bf16 %v12039_v1 }
0x164e   : > { %v12044_v50 = vpop.trf.xlu0 }
0x164f   : > { %v12045_v41 = vunpack.i.l.bf16 %v12044_v50  ;;  %v12048_v44 = vunpack.i.h.bf16 %v12044_v50 }
0x1651   : > { %v14883_v43 = vpack.c.bf16 %v12045_v41, %v12040_v12  ;;  %v14886_v46 = vpack.c.bf16 %v12048_v44, %v12043_v23 }
0x1653   : > { %8098 = vxpose.xlu1.c.b16.start.end [1/1] (short) %v14883_v43, 128 }
0x1670   : > { %8114 = vxpose.xlu1.c.b16.start.end [1/1] (short) %v14886_v46, 128 }
0x16b9   : > { %v8106_v33 = vpop.trf.xlu1 }
0x16ba   : > { %11378 = vmatprep.mubr.msk.bf16.mxu0 %vm135_vm0, %v8106_v33 }
0x16bd   : > { %v8107_v31 = vpop.trf.xlu1 }
0x16be   : > { %11379 = vmatmul.mubr.msk.bf16.vlgmr.msra.gmra.mrb[40].mxu0 %vm135_vm0, %v8107_v31 }
0x16bf   : > { %11411 = vmatpush3.bf16.xpose.msra.mxu0 %v12904_v18 }
0x16c0   : > { %10692 = vmatprep.subr.bf16.mxu0 %v12531_v10 }
0x16c1   : > { %v8108_v49 = vpop.trf.xlu1 }
0x16c2   : > { %11382 = vmatprep.mubr.msk.bf16.mxu0 %vm135_vm0, %v8108_v49 }
0x16c5   : > { %v8109_v9 = vpop.trf.xlu1 }
0x16c6   : > { %11383 = vmatmul.mubr.msk.bf16.gmra.mrb[44].mxu0 %vm135_vm0, %v8109_v9 }
0x16c9   : > { %v8110_v42 = vpop.trf.xlu1 }
0x16ca   : > { %11386 = vmatprep.mubr.msk.bf16.mxu0 %vm135_vm0, %v8110_v42 }
0x16cd   : > { %v8111_v32 = vpop.trf.xlu1 }
0x16ce   : > { %11387 = vmatmul.mubr.msk.bf16.gmra.mrb[48].mxu0 %vm135_vm0, %v8111_v32 }
0x16d1   : > { %v8112_v35 = vpop.trf.xlu1 }
0x16d2   : > { %11390 = vmatprep.mubr.msk.bf16.mxu0 %vm135_vm0, %v8112_v35 }
0x16d5   : > { %v8113_v20 = vpop.trf.xlu1 }
0x16d6   : > { %11391 = vmatmul.mubr.msk.bf16.gmra.mrb[52].mxu0 %vm135_vm0, %v8113_v20 }
0x16d9   : > { %v8122_v18 = vpop.trf.xlu1 }
0x16da   : > { %11394 = vmatprep.mubr.msk.bf16.mxu0 %vm135_vm0, %v8122_v18 }
0x16dd   : > { %v8123_v26 = vpop.trf.xlu1 }
0x16de   : > { %11395 = vmatmul.mubr.msk.bf16.gmra.mrb[56].mxu0 %vm135_vm0, %v8123_v26 }
0x16e1   : > { %v8124_v24 = vpop.trf.xlu1 }
0x16e2   : > { %11398 = vmatprep.mubr.msk.bf16.mxu0 %vm135_vm0, %v8124_v24 }
0x16e5   : > { %v8125_v59 = vpop.trf.xlu1 }
0x16e6   : > { %11399 = vmatmul.mubr.msk.bf16.gmra.mrb[60].mxu0 %vm135_vm0, %v8125_v59 }
0x16e9   : > { %v8126_v22 = vpop.trf.xlu1 }
0x16ea   : > { %11402 = vmatprep.mubr.msk.bf16.mxu0 %vm135_vm0, %v8126_v22 }
0x16ed   : > { %v8127_v11 = vpop.trf.xlu1 }
0x16ee   : > { %11403 = vmatmul.mubr.msk.bf16.gmra.mrb[64].mxu0 %vm135_vm0, %v8127_v11 }
0x16f1   : > { %v8128_v29 = vpop.trf.xlu1 }
0x16f2   : > { %11406 = vmatprep.mubr.msk.bf16.mxu0 %vm135_vm0, %v8128_v29 }
0x16f5   : > { %v8129_v0 = vpop.trf.xlu1 }
0x16f6   : > { %11407 = vmatmul.mubr.msk.bf16.gmra.mrb[68].mxu0 %vm135_vm0, %v8129_v0 }
0x16f7   : > { %11412 = vmatprep.mubr.msk.bf16.mxu0 %vm135_vm0, %v14816_v4  ;;  %v12535_v4 = vld [vmem:[%s15265_s8 + $0x50] sm:$0xff]  }
0x16fe   : > { %11413 = vmatmul.mubr.msk.bf16.vlgmr.msra.gmra.mrb[72].mxu0 %vm135_vm0, %v14820_v2  ;;  %v12537_v2 = vld [vmem:[%s15265_s8 + $0x58] sm:$0xff]  }
0x16ff   : > { %11416 = vmatprep.mubr.msk.bf16.mxu0 %vm135_vm0, %v14827_v55  ;;  %10693 = vmatpush3.bf16.msra.mxu0 %v12532_v30  ;;  %v12538_v55 = vld [vmem:[%s15265_s8 + $0x18] sm:$0xff]  }
0x1700   : > { %10694 = vmatprep.subr.bf16.mxu0 %v12533_v3 }
0x1703   : > { %10695 = vmatpush3.bf16.msra.mxu0 %v12534_v45 }
0x1704   : > { %10696 = vmatprep.subr.bf16.mxu0 %v12535_v4 }
0x1706   : > { %11417 = vmatmul.mubr.msk.bf16.gmra.mrb[76].mxu0 %vm135_vm0, %v14831_v36  ;;  %v12541_v36 = vld [vmem:[%s15265_s8 + $0x68] sm:$0xff]  }
0x1707   : > { %11420 = vmatprep.mubr.msk.bf16.mxu0 %vm135_vm0, %v14835_v37  ;;  %10697 = vmatpush3.bf16.msra.mxu0 %v12536_v28  ;;  %v12542_v37 = vld [vmem:[%s15265_s8 + $0x28] sm:$0xff]  }
0x1708   : > { %10698 = vmatprep.subr.bf16.mxu0 %v12537_v2 }
0x170b   : > { %10699 = vmatpush3.bf16.msra.mxu0 %v12538_v55 }
0x170c   : > { %10700 = vmatprep.subr.bf16.mxu0 %v12539_v39 }
0x170e   : > { %11421 = vmatmul.mubr.msk.bf16.gmra.mrb[80].mxu0 %vm135_vm0, %v14839_v40  ;;  %v12545_v40 = vld [vmem:[%s15265_s8 + $0x78] sm:$0xff]  }
0x170f   : > { %11424 = vmatprep.mubr.msk.bf16.mxu0 %vm135_vm0, %v14843_v14  ;;  %10701 = vmatpush3.bf16.msra.mxu0 %v12540_v60  ;;  %v12546_v14 = vld [vmem:[%s15265_s8 + $0x38] sm:$0xff]  }
0x1710   : > { %10702 = vmatprep.subr.bf16.mxu0 %v12541_v36 }
0x1713   : > { %10703 = vmatpush3.bf16.msra.mxu0 %v12542_v37 }
0x1714   : > { %10704 = vmatprep.subr.bf16.mxu0 %v12543_v38 }
0x1716   : > { %11425 = vmatmul.mubr.msk.bf16.gmra.mrb[84].mxu0 %vm135_vm0, %v14847_v16 }
0x1717   : > { %11428 = vmatprep.mubr.msk.bf16.mxu0 %vm135_vm0, %v14851_v5  ;;  %10705 = vmatpush3.bf16.msra.mxu0 %v12544_v63 }
0x1718   : > { %10706 = vmatprep.subr.bf16.mxu0 %v12545_v40 }
0x171b   : > { %10707 = vmatpush3.bf16.msra.mxu0 %v12546_v14 }
0x171e   : > { %11429 = vmatmul.mubr.msk.bf16.gmra.mrb[88].mxu0 %vm135_vm0, %v14855_v17 }
0x171f   : > { %11432 = vmatprep.mubr.msk.bf16.mxu0 %vm135_vm0, %v14859_v57 }
0x1726   : > { %11433 = vmatmul.mubr.msk.bf16.gmra.mrb[92].mxu0 %vm135_vm0, %v14863_v21 }
0x1727   : > { %11436 = vmatprep.mubr.msk.bf16.mxu0 %vm135_vm0, %v14867_v62 }
0x172e   : > { %11437 = vmatmul.mubr.msk.bf16.gmra.mrb[96].mxu0 %vm135_vm0, %v14871_v13 }
0x172f   : > { %11440 = vmatprep.mubr.msk.bf16.mxu0 %vm135_vm0, %v14875_v51 }
0x1736   : > { %11441 = vmatmul.mubr.msk.bf16.gmra.mrb[100].mxu0 %vm135_vm0, %v14879_v8 }
0x1737   : > { %9307 = vmatprep.mubr.bf16.mxu0 %v14883_v43 }
0x173e   : > { %9308 = vmatmul.mubr.bf16.vlgmr.msra.gmra.mrb[104].mxu0 %v14802_v61 }
0x173f   : > { %9315 = vmatprep.mubr.bf16.mxu0 %v14886_v46 }
0x1746   : > { %9316 = vmatmul.mubr.bf16.gmra.mrb[108].mxu0 %v14813_v7 }
0x1791   : > { %v14990_v16 = vpop.f32.mrb[40].mxu0 }
0x1792   : > { %v14992_v5 = vpop.f32.mrb[41].mxu0 }
0x1793   : > { %v14994_v17 = vpop.f32.mrb[42].mxu0 }
0x1794   : > { %v14996_v57 = vpop.f32.mrb[43].mxu0 }
0x1799   : > { %v14998_v21 = vpop.f32.mrb[44].mxu0 }
0x179a   : > { %v15000_v62 = vpop.f32.mrb[45].mxu0 }
0x179b   : > { %v15002_v13 = vpop.f32.mrb[46].mxu0 }
0x179c   : > { %v15004_v51 = vpop.f32.mrb[47].mxu0 }
0x17a1   : > { %v15006_v61 = vpop.f32.mrb[48].mxu0 }
0x17a2   : > { %v15008_v8 = vpop.f32.mrb[49].mxu0 }
0x17a3   : > { %v15010_v7 = vpop.f32.mrb[50].mxu0 }
0x17a4   : > { %v15012_v56 = vpop.f32.mrb[51].mxu0 }
0x17a9   : > { %v15014_v1 = vpop.f32.mrb[52].mxu0 }
0x17aa   : > { %v15016_v50 = vpop.f32.mrb[53].mxu0 }
0x17ab   : > { %v15018_v12 = vpop.f32.mrb[54].mxu0 }
0x17ac   : > { %15351 = vst [vmem:[#allocation31_spill] sm:$0xff] %v15018_v12  ;;  %v15020_v41 = vpop.f32.mrb[55].mxu0 }
0x17b1   : > { %v15022_v43 = vpop.f32.mrb[56].mxu0 }
0x17b2   : > { %v15024_v44 = vpop.f32.mrb[57].mxu0 }
0x17b3   : > { %v15026_v23 = vpop.f32.mrb[58].mxu0 }
0x17b4   : > { %v15028_v46 = vpop.f32.mrb[59].mxu0 }
0x17b9   : > { %v15030_v33 = vpop.f32.mrb[60].mxu0 }
0x17ba   : > { %v15032_v10 = vpop.f32.mrb[61].mxu0 }
0x17bb   : > { %v15034_v31 = vpop.f32.mrb[62].mxu0 }
0x17bc   : > { %v15036_v49 = vpop.f32.mrb[63].mxu0 }
0x17c1   : > { %v15038_v9 = vpop.f32.mrb[64].mxu0 }
0x17c2   : > { %v15040_v42 = vpop.f32.mrb[65].mxu0 }
0x17c3   : > { %v15042_v32 = vpop.f32.mrb[66].mxu0 }
0x17c4   : > { %v15044_v35 = vpop.f32.mrb[67].mxu0 }
0x17c9   : > { %v15046_v20 = vpop.f32.mrb[68].mxu0 }
0x17ca   : > { %v15048_v18 = vpop.f32.mrb[69].mxu0 }
0x17cb   : > { %v15050_v26 = vpop.f32.mrb[70].mxu0 }
0x17cc   : > { %v15052_v24 = vpop.f32.mrb[71].mxu0 }
0x17d1   : > { %v11414_v59 = vpop.f32.mrb[72].mxu0 }
0x17d2   : > { %v8447_v22 = vpop.f32.mrb[73].mxu0 }
0x17d3   : > { %v11415_v11 = vpop.f32.mrb[74].mxu0 }
0x17d4   : > { %v8450_v29 = vpop.f32.mrb[75].mxu0 }
0x17d9   : > { %v11418_v0 = vpop.f32.mrb[76].mxu0 }
0x17da   : > { %v8463_v30 = vpop.f32.mrb[77].mxu0 }
0x17db   : > { %v11419_v3 = vpop.f32.mrb[78].mxu0 }
0x17dc   : > { %v8466_v45 = vpop.f32.mrb[79].mxu0 }
0x17e1   : > { %v11422_v4 = vpop.f32.mrb[80].mxu0 }
0x17e2   : > { %v8479_v28 = vpop.f32.mrb[81].mxu0 }
0x17e3   : > { %v11423_v2 = vpop.f32.mrb[82].mxu0 }
0x17e4   : > { %v8482_v55 = vpop.f32.mrb[83].mxu0 }
0x17e9   : > { %v11426_v39 = vpop.f32.mrb[84].mxu0 }
0x17ea   : > { %v8495_v60 = vpop.f32.mrb[85].mxu0 }
0x17eb   : > { %v11427_v36 = vpop.f32.mrb[86].mxu0 }
0x17ec   : > { %v8498_v37 = vpop.f32.mrb[87].mxu0 }
0x17f1   : > { %v11430_v38 = vpop.f32.mrb[88].mxu0 }
0x17f2   : > { %v12053_v63 = vpack.i.bf16 %v11430_v38, %v11414_v59  ;;  %v8511_v40 = vpop.f32.mrb[89].mxu0 }
0x17f3   : > { %v12049_v14 = vpack.i.bf16 %v8511_v40, %v8447_v22  ;;  %v11431_v25 = vpop.f32.mrb[90].mxu0 }
0x17f4   : > { %v12055_v27 = vpack.i.bf16 %v11431_v25, %v11415_v11  ;;  %v8514_v58 = vpop.f32.mrb[91].mxu0 }
0x17f5   : > { %v12051_v19 = vpack.i.bf16 %v8514_v58, %v8450_v29  ;;  %12050 = vxpose.xlu1.b32.start [1/16] (narrow) %v12049_v14, 16 }
0x17f9   : > { %12052 = vxpose.xlu1.b32.cont [2/16] (narrow) %v12051_v19, 16  ;;  %v11434_v15 = vpop.f32.mrb[92].mxu0 }
0x17fa   : > { %v12061_v53 = vpack.i.bf16 %v11434_v15, %v11418_v0  ;;  %v8527_v48 = vpop.f32.mrb[93].mxu0 }
0x17fb   : > { %v12057_v54 = vpack.i.bf16 %v8527_v48, %v8463_v30  ;;  %v11435_v34 = vpop.f32.mrb[94].mxu0 }
0x17fc   : > { %v12063_v52 = vpack.i.bf16 %v11435_v34, %v11419_v3  ;;  %v8530_v6 = vpop.f32.mrb[95].mxu0 }
0x17fd   : > { %v12059_v47 = vpack.i.bf16 %v8530_v6, %v8466_v45  ;;  %12054 = vxpose.xlu1.b32.cont [3/16] (narrow) %v12053_v63, 16 }
0x1801   : > { %12056 = vxpose.xlu1.b32.cont [4/16] (narrow) %v12055_v27, 16  ;;  %v11438_v12 = vpop.f32.mrb[96].mxu0 }
0x1802   : > { %v12069_v59 = vpack.i.bf16 %v11438_v12, %v11422_v4  ;;  %v8543_v38 = vpop.f32.mrb[97].mxu0 }
0x1803   : > { %v12065_v22 = vpack.i.bf16 %v8543_v38, %v8479_v28  ;;  %v11439_v40 = vpop.f32.mrb[98].mxu0 }
0x1804   : > { %v12071_v25 = vpack.i.bf16 %v11439_v40, %v11423_v2  ;;  %v8546_v11 = vpop.f32.mrb[99].mxu0 }
0x1805   : > { %v12067_v58 = vpack.i.bf16 %v8546_v11, %v8482_v55  ;;  %12058 = vxpose.xlu1.b32.cont [5/16] (narrow) %v12057_v54, 16 }
0x1809   : > { %12060 = vxpose.xlu1.b32.cont [6/16] (narrow) %v12059_v47, 16  ;;  %v11442_v19 = vpop.f32.mrb[100].mxu0 }
0x180a   : > { %v12077_v15 = vpack.i.bf16 %v11442_v19, %v11426_v39  ;;  %v8559_v29 = vpop.f32.mrb[101].mxu0 }
0x180b   : > { %v12073_v48 = vpack.i.bf16 %v8559_v29, %v8495_v60  ;;  %v11443_v0 = vpop.f32.mrb[102].mxu0 }
0x180c   : > { %v12079_v34 = vpack.i.bf16 %v11443_v0, %v11427_v36  ;;  %v8562_v30 = vpop.f32.mrb[103].mxu0 }
0x180d   : > { %v12075_v6 = vpack.i.bf16 %v8562_v30, %v8498_v37  ;;  %12062 = vxpose.xlu1.b32.cont [7/16] (narrow) %v12061_v53, 16 }
0x1811   : > { %12064 = vxpose.xlu1.b32.cont [8/16] (narrow) %v12063_v52, 16  ;;  %v10708_v27 = vpop.f32.mrb[104].mxu0 }
0x1812   : > { %v10709_v12 = vpop.f32.mrb[105].mxu0 }
0x1813   : > { %v15054_v3 = vadd.f32 %v10709_v12, %v10708_v27  ;;  %v10711_v45 = vpop.f32.mrb[106].mxu0 }
0x1814   : > { %v10712_v4 = vpop.f32.mrb[107].mxu0 }
0x1815   : > { %v15056_v28 = vadd.f32 %v10712_v4, %v10711_v45  ;;  %12066 = vxpose.xlu1.b32.cont [9/16] (narrow) %v12065_v22, 16  ;;  %v15355_v45 = vld [vmem:[#allocation30_spill] sm:$0xff] }
0x1819   : > { %12068 = vxpose.xlu1.b32.cont [10/16] (narrow) %v12067_v58, 16  ;;  %v10714_v54 = vpop.f32.mrb[108].mxu0 }
0x181a   : > { %v10715_v47 = vpop.f32.mrb[109].mxu0 }
0x181b   : > { %v15058_v2 = vadd.f32 %v10715_v47, %v10714_v54  ;;  %v10717_v55 = vpop.f32.mrb[110].mxu0  ;;  %v15356_v54 = vld [vmem:[#allocation29_spill] sm:$0xff] }
0x181c   : > { %v10718_v39 = vpop.f32.mrb[111].mxu0 }
0x181d   : > { %v15060_v60 = vadd.f32 %v10718_v39, %v10717_v55  ;;  %12070 = vxpose.xlu1.b32.cont [11/16] (narrow) %v12069_v59, 16 }
0x1821   : > { %12072 = vxpose.xlu1.b32.cont [12/16] (narrow) %v12071_v25, 16 }
0x1825   : > { %12074 = vxpose.xlu1.b32.cont [13/16] (narrow) %v12073_v48, 16  ;;  %v15353_v48 = vld [vmem:[#allocation26_spill] sm:$0xff] }
0x1829   : > { %12076 = vxpose.xlu1.b32.cont [14/16] (narrow) %v12075_v6, 16 }
0x182d   : > { %12078 = vxpose.xlu1.b32.cont [15/16] (narrow) %v12077_v15, 16 }
0x1831   : > { %12080 = vxpose.xlu1.b32.end [16/16] (narrow) %v12079_v34, 16  ;;  %v15354_v34 = vld [vmem:[#allocation27_spill] sm:$0xff] }
0x1835   : > { %8371 = vxpose.xlu1.b32.start [1/16] (narrow) %v15024_v44, 16 }
0x1839   : > { %8372 = vxpose.xlu1.b32.cont [2/16] (narrow) %v15028_v46, 16 }
0x183d   : > { %8373 = vxpose.xlu1.b32.cont [3/16] (narrow) %v15022_v43, 16 }
0x1841   : > { %8374 = vxpose.xlu1.b32.cont [4/16] (narrow) %v15026_v23, 16 }
0x1845   : > { %8375 = vxpose.xlu1.b32.cont [5/16] (narrow) %v15032_v10, 16 }
0x1849   : > { %8376 = vxpose.xlu1.b32.cont [6/16] (narrow) %v15036_v49, 16  ;;  %v15352_v49 = vld [vmem:[#allocation31_spill] sm:$0xff] }
0x184d   : > { %8377 = vxpose.xlu1.b32.cont [7/16] (narrow) %v15030_v33, 16 }
0x1851   : > { %8378 = vxpose.xlu1.b32.cont [8/16] (narrow) %v15034_v31, 16  ;;  %v12547_v31 = vld [vmem:[%s15265_s8 + $0xc0] sm:$0xff]  }
0x1852   : > { %10720 = vmatprep.subr.bf16.mxu1 %v12547_v31  ;;  %v12564_v31 = vld [vmem:[%s15265_s8 + $0x108] sm:$0xff]  }
0x1855   : > { %8379 = vxpose.xlu1.b32.cont [9/16] (narrow) %v15040_v42, 16  ;;  %v12558_v42 = vld [vmem:[%s15265_s8 + $0xa8] sm:$0xff]  }
0x1859   : > { %8380 = vxpose.xlu1.b32.cont [10/16] (narrow) %v15044_v35, 16 }
0x185d   : > { %8381 = vxpose.xlu1.b32.cont [11/16] (narrow) %v15038_v9, 16 }
0x1861   : > { %8382 = vxpose.xlu1.b32.cont [12/16] (narrow) %v15042_v32, 16  ;;  %v12559_v32 = vld [vmem:[%s15265_s8 + $0xf0] sm:$0xff]  }
0x1865   : > { %8383 = vxpose.xlu1.b32.cont [13/16] (narrow) %v15048_v18, 16  ;;  %v12561_v18 = vld [vmem:[%s15265_s8 + $0xf8] sm:$0xff]  }
0x1869   : > { %8384 = vxpose.xlu1.b32.cont [14/16] (narrow) %v15052_v24, 16  ;;  %v12562_v24 = vld [vmem:[%s15265_s8 + $0xb8] sm:$0xff]  }
0x186d   : > { %8385 = vxpose.xlu1.b32.cont [15/16] (narrow) %v15046_v20, 16  ;;  %v12560_v20 = vld [vmem:[%s15265_s8 + $0xb0] sm:$0xff]  }
0x1871   : > { %8386 = vxpose.xlu1.b32.end [16/16] (narrow) %v15050_v26, 16 }
0x1875   : > { %v12081_v53 = vpop.trf.xlu1 }
0x1876   : > { %v12082_v43 = vunpack.i.l.bf16 %v12081_v53  ;;  %v12085_v33 = vunpack.i.h.bf16 %v12081_v53 }
0x1879   : > { %v12086_v52 = vpop.trf.xlu1 }
0x187a   : > { %v12087_v44 = vunpack.i.l.bf16 %v12086_v52  ;;  %v12090_v46 = vunpack.i.h.bf16 %v12086_v52 }
0x187c   : > { %v15078_v23 = vpack.c.bf16 %v12087_v44, %v12082_v43  ;;  %v15081_v10 = vpack.c.bf16 %v12090_v46, %v12085_v33 }
0x187e   : > { %8640 = vxpose.xlu0.c.b16.start.end [1/1] (short) %v15078_v23, 128 }
0x189b   : > { %8656 = vxpose.xlu0.c.b16.start.end [1/1] (short) %v15081_v10, 128 }
0x18b5   : > { %v8387_v25 = vpop.trf.xlu1 }
0x18b6   : > { %v8405_v12 = vmul.f32 2.0, %v8387_v25 }
0x18b8   : > { %v8409_v47 = vsub.f32 %v8405_v12, %v15356_v54 }
0x18b9   : > { %v8388_v29 = vpop.trf.xlu1 }
0x18ba   : > { %v8406_v6 = vmul.f32 2.0, %v8388_v29 }
0x18bb   : > { %8339 = vxpose.xlu0.b32.start [1/16] (narrow) %v14992_v5, 16 }
0x18bc   : > { %v8410_v4 = vsub.f32 %v8406_v6, %v15355_v45 }
0x18be   : > { %v8412_v55 = vpack.c.bf16 %v8410_v4, %v8409_v47 }
0x18bf   : > { %8340 = vxpose.xlu0.b32.cont [2/16] (narrow) %v14996_v57, 16 }
0x18c3   : > { %8341 = vxpose.xlu0.b32.cont [3/16] (narrow) %v14990_v16, 16  ;;  %v12548_v16 = vld [vmem:[%s15265_s8 + $0x80] sm:$0xff]  }
0x18c7   : > { %8342 = vxpose.xlu0.b32.cont [4/16] (narrow) %v14994_v17, 16  ;;  %v12549_v17 = vld [vmem:[%s15265_s8 + $0xc8] sm:$0xff]  }
0x18cb   : > { %8343 = vxpose.xlu0.b32.cont [5/16] (narrow) %v15000_v62, 16  ;;  %v12551_v62 = vld [vmem:[%s15265_s8 + $0xd0] sm:$0xff]  }
0x18cf   : > { %8344 = vxpose.xlu0.b32.cont [6/16] (narrow) %v15004_v51, 16  ;;  %v12552_v51 = vld [vmem:[%s15265_s8 + $0x90] sm:$0xff]  }
0x18d3   : > { %8345 = vxpose.xlu0.b32.cont [7/16] (narrow) %v14998_v21, 16  ;;  %v12550_v21 = vld [vmem:[%s15265_s8 + $0x88] sm:$0xff]  }
0x18d7   : > { %8346 = vxpose.xlu0.b32.cont [8/16] (narrow) %v15002_v13, 16 }
0x18db   : > { %8347 = vxpose.xlu0.b32.cont [9/16] (narrow) %v15008_v8, 16 }
0x18df   : > { %8348 = vxpose.xlu0.b32.cont [10/16] (narrow) %v15012_v56, 16  ;;  %v12555_v56 = vld [vmem:[%s15265_s8 + $0xe0] sm:$0xff]  }
0x18e3   : > { %8349 = vxpose.xlu0.b32.cont [11/16] (narrow) %v15006_v61, 16  ;;  %v12553_v61 = vld [vmem:[%s15265_s8 + $0xd8] sm:$0xff]  }
0x18e4   : > { %v8648_v5 = vpop.trf.xlu0 }
0x18e5   : > { %11446 = vmatprep.mubr.msk.bf16.mxu1 %vm135_vm0, %v8648_v5  ;;  %v12565_v5 = vld [vmem:[%s15265_s8 + $0x110] sm:$0xff]  }
0x18e7   : > { %8350 = vxpose.xlu0.b32.cont [12/16] (narrow) %v15010_v7, 16  ;;  %v12554_v7 = vld [vmem:[%s15265_s8 + $0x98] sm:$0xff]  }
0x18e8   : > { %v8649_v57 = vpop.trf.xlu0 }
0x18e9   : > { %11447 = vmatmul.mubr.msk.bf16.vlgmr.msra.gmra.mrb[48].mxu1 %vm135_vm0, %v8649_v57 }
0x18ea   : > { %10721 = vmatpush3.bf16.msra.mxu1 %v12548_v16 }
0x18eb   : > { %8351 = vxpose.xlu0.b32.cont [13/16] (narrow) %v15016_v50, 16  ;;  %10722 = vmatprep.subr.bf16.mxu1 %v12549_v17 }
0x18ec   : > { %v8650_v13 = vpop.trf.xlu0 }
0x18ed   : > { %11450 = vmatprep.mubr.msk.bf16.mxu1 %vm135_vm0, %v8650_v13  ;;  %v12567_v13 = vld [vmem:[%s15265_s8 + $0x120] sm:$0xff]  }
0x18ee   : > { %10723 = vmatpush3.bf16.msra.mxu1 %v12550_v21 }
0x18ef   : > { %8352 = vxpose.xlu0.b32.cont [14/16] (narrow) %v15020_v41, 16  ;;  %10724 = vmatprep.subr.bf16.mxu1 %v12551_v62  ;;  %v12556_v41 = vld [vmem:[%s15265_s8 + $0xa0] sm:$0xff]   ;;  %v12566_v62 = vld [vmem:[%s15265_s8 + $0x118] sm:$0xff]  }
0x18f0   : > { %v8651_v8 = vpop.trf.xlu0 }
0x18f1   : > { %11451 = vmatmul.mubr.msk.bf16.gmra.mrb[52].mxu1 %vm135_vm0, %v8651_v8 }
0x18f2   : > { %10725 = vmatpush3.bf16.msra.mxu1 %v12552_v51 }
0x18f3   : > { %8353 = vxpose.xlu0.b32.cont [15/16] (narrow) %v15014_v1, 16  ;;  %10726 = vmatprep.subr.bf16.mxu1 %v12553_v61  ;;  %v12557_v1 = vld [vmem:[%s15265_s8 + $0xe8] sm:$0xff]  }
0x18f4   : > { %v8652_v50 = vpop.trf.xlu0 }
0x18f5   : > { %11454 = vmatprep.mubr.msk.bf16.mxu1 %vm135_vm0, %v8652_v50 }
0x18f6   : > { %10727 = vmatpush3.bf16.msra.mxu1 %v12554_v7 }
0x18f7   : > { %8354 = vxpose.xlu0.b32.end [16/16] (narrow) %v15352_v49, 16  ;;  %10728 = vmatprep.subr.bf16.mxu1 %v12555_v56  ;;  %v12568_v56 = vld [vmem:[%s15265_s8 + $0x128] sm:$0xff]  }
0x18f8   : > { %v8653_v9 = vpop.trf.xlu0 }
0x18f9   : > { %11455 = vmatmul.mubr.msk.bf16.gmra.mrb[56].mxu1 %vm135_vm0, %v8653_v9  ;;  %v12569_v9 = vld [vmem:[%s15265_s8 + $0x130] sm:$0xff]  }
0x18fa   : > { %10729 = vmatpush3.bf16.msra.mxu1 %v12556_v41 }
0x18fb   : > { %10730 = vmatprep.subr.bf16.mxu1 %v12557_v1 }
0x18fc   : > { %v8654_v35 = vpop.trf.xlu0 }
0x18fd   : > { %11458 = vmatprep.mubr.msk.bf16.mxu1 %vm135_vm0, %v8654_v35 }
0x18fe   : > { %10731 = vmatpush3.bf16.msra.mxu1 %v12558_v42 }
0x18ff   : > { %10732 = vmatprep.subr.bf16.mxu1 %v12559_v32  ;;  %v12570_v32 = vld [vmem:[%s15265_s8 + $0x138] sm:$0xff]  }
0x1900   : > { %v8655_v26 = vpop.trf.xlu0 }
0x1901   : > { %11459 = vmatmul.mubr.msk.bf16.gmra.mrb[60].mxu1 %vm135_vm0, %v8655_v26 }
0x1902   : > { %10733 = vmatpush3.bf16.msra.mxu1 %v12560_v20 }
0x1903   : > { %10734 = vmatprep.subr.bf16.mxu1 %v12561_v18 }
0x1904   : > { %v8664_v36 = vpop.trf.xlu0 }
0x1905   : > { %11462 = vmatprep.mubr.msk.bf16.mxu1 %vm135_vm0, %v8664_v36 }
0x1906   : > { %10735 = vmatpush3.bf16.msra.mxu1 %v12562_v24 }
0x1908   : > { %v8665_v37 = vpop.trf.xlu0 }
0x1909   : > { %11463 = vmatmul.mubr.msk.bf16.gmra.mrb[64].mxu1 %vm135_vm0, %v8665_v37 }
0x190c   : > { %v8666_v63 = vpop.trf.xlu0 }
0x190d   : > { %11466 = vmatprep.mubr.msk.bf16.mxu1 %vm135_vm0, %v8666_v63 }
0x1910   : > { %v8667_v14 = vpop.trf.xlu0 }
0x1911   : > { %11467 = vmatmul.mubr.msk.bf16.gmra.mrb[68].mxu1 %vm135_vm0, %v8667_v14 }
0x1914   : > { %v8668_v59 = vpop.trf.xlu0 }
0x1915   : > { %11470 = vmatprep.mubr.msk.bf16.mxu1 %vm135_vm0, %v8668_v59 }
0x1918   : > { %v8669_v38 = vpop.trf.xlu0 }
0x1919   : > { %11471 = vmatmul.mubr.msk.bf16.gmra.mrb[72].mxu1 %vm135_vm0, %v8669_v38 }
0x191c   : > { %v8670_v22 = vpop.trf.xlu0 }
0x191d   : > { %11474 = vmatprep.mubr.msk.bf16.mxu1 %vm135_vm0, %v8670_v22 }
0x1920   : > { %v8671_v40 = vpop.trf.xlu0 }
0x1921   : > { %11475 = vmatmul.mubr.msk.bf16.gmra.mrb[76].mxu1 %vm135_vm0, %v8671_v40 }
0x1922   : > { %9356 = vmatprep.mubr.bf16.mxu1 %v15078_v23 }
0x193b   : > { %v8355_v11 = vpop.trf.xlu0 }
0x193c   : > { %v8403_v58 = vmul.f32 2.0, %v8355_v11 }
0x193e   : > { %v8407_v0 = vsub.f32 %v8403_v58, %v15353_v48 }
0x193f   : > { %v8356_v19 = vpop.trf.xlu0 }
0x1940   : > { %v8404_v15 = vmul.f32 2.0, %v8356_v19 }
0x1942   : > { %v8408_v30 = vsub.f32 %v8404_v15, %v15354_v34 }
0x1944   : > { %v8411_v27 = vpack.c.bf16 %v8408_v30, %v8407_v0  ;;  %v15357_v0 = vld [vmem:[#allocation18_spill] sm:$0xff] }
0x1946   : > { %9357 = vmatmul.mubr.bf16.vlgmr.msra.gmra.mrb[80].mxu1 %v8411_v27  ;;  %v15358_v27 = vld [vmem:[#allocation16_spill] sm:$0xff] }
0x1947   : > { %9364 = vmatprep.mubr.bf16.mxu1 %v15081_v10  ;;  %v12563_v10 = vld [vmem:[%s15265_s8 + $0x100] sm:$0xff]  }
0x1948   : > { %11478 = vmatprep.subr.bf16.mxu0 %v12563_v10 }
0x1949   : > { %11479 = vmatpush3.bf16.msra.mxu0 %v12563_v10 }
0x194a   : > { %11480 = vmatprep.subr.bf16.mxu0 %v12564_v31 }
0x194d   : > { %11481 = vmatpush3.bf16.msra.mxu0 %v12564_v31 }
0x194e   : > { %9365 = vmatmul.mubr.bf16.gmra.mrb[84].mxu1 %v8412_v55  ;;  %11482 = vmatprep.subr.bf16.mxu0 %v12565_v5 }
0x1951   : > { %11483 = vmatpush3.bf16.msra.mxu0 %v12565_v5 }
0x1952   : > { %11484 = vmatprep.subr.bf16.mxu0 %v12566_v62 }
0x1955   : > { %11485 = vmatpush3.bf16.msra.mxu0 %v12566_v62 }
0x1956   : > { %11486 = vmatprep.subr.bf16.mxu0 %v12567_v13 }
0x1959   : > { %11487 = vmatpush3.bf16.msra.mxu0 %v12567_v13 }
0x195a   : > { %11488 = vmatprep.subr.bf16.mxu0 %v12568_v56 }
0x195d   : > { %11489 = vmatpush3.bf16.msra.mxu0 %v12568_v56 }
0x195e   : > { %11490 = vmatprep.subr.bf16.mxu0 %v12569_v9 }
0x1961   : > { %11491 = vmatpush3.bf16.msra.mxu0 %v12569_v9  ;;  %v15365_v9 = vld [vmem:[#allocation24_spill] sm:$0xff] }
0x1962   : > { %11492 = vmatprep.subr.bf16.mxu0 %v12570_v32 }
0x1965   : > { %11493 = vmatpush3.bf16.msra.mxu0 %v12570_v32 }
0x19bc   : > { %v11448_v39 = vpop.f32.mrb[48].mxu1 }
0x19bd   : > { %v8754_v53 = vpop.f32.mrb[49].mxu1 }
0x19be   : > { %8881 = vxpose.xlu1.b32.start [1/16] (narrow) %v8754_v53, 16  ;;  %v11449_v52 = vpop.f32.mrb[50].mxu1 }
0x19bf   : > { %v8757_v43 = vpop.f32.mrb[51].mxu1 }
0x19c2   : > { %8882 = vxpose.xlu1.b32.cont [2/16] (narrow) %v8757_v43, 16 }
0x19c4   : > { %v11452_v44 = vpop.f32.mrb[52].mxu1 }
0x19c5   : > { %v8770_v23 = vpop.f32.mrb[53].mxu1 }
0x19c6   : > { %8883 = vxpose.xlu1.b32.cont [3/16] (narrow) %v11448_v39, 16  ;;  %v11453_v46 = vpop.f32.mrb[54].mxu1 }
0x19c7   : > { %v8773_v33 = vpop.f32.mrb[55].mxu1 }
0x19ca   : > { %8884 = vxpose.xlu1.b32.cont [4/16] (narrow) %v11449_v52, 16 }
0x19cc   : > { %v11456_v16 = vpop.f32.mrb[56].mxu1 }
0x19cd   : > { %v8786_v17 = vpop.f32.mrb[57].mxu1 }
0x19ce   : > { %8885 = vxpose.xlu1.b32.cont [5/16] (narrow) %v8770_v23, 16  ;;  %v11457_v57 = vpop.f32.mrb[58].mxu1 }
0x19cf   : > { %v8789_v21 = vpop.f32.mrb[59].mxu1 }
0x19d2   : > { %8886 = vxpose.xlu1.b32.cont [6/16] (narrow) %v8773_v33, 16 }
0x19d4   : > { %v11460_v51 = vpop.f32.mrb[60].mxu1 }
0x19d5   : > { %v8802_v61 = vpop.f32.mrb[61].mxu1 }
0x19d6   : > { %8887 = vxpose.xlu1.b32.cont [7/16] (narrow) %v11452_v44, 16  ;;  %v11461_v8 = vpop.f32.mrb[62].mxu1  ;;  %v15359_v44 = vld [vmem:[#allocation15_spill] sm:$0xff] }
0x19d7   : > { %v8805_v7 = vpop.f32.mrb[63].mxu1 }
0x19da   : > { %8888 = vxpose.xlu1.b32.cont [8/16] (narrow) %v11453_v46, 16 }
0x19dc   : > { %v11464_v50 = vpop.f32.mrb[64].mxu1 }
0x19dd   : > { %v8818_v41 = vpop.f32.mrb[65].mxu1 }
0x19de   : > { %8889 = vxpose.xlu1.b32.cont [9/16] (narrow) %v8786_v17, 16  ;;  %8913 = vxpose.xlu0.b32.start [1/16] (narrow) %v8818_v41, 16  ;;  %v11465_v49 = vpop.f32.mrb[66].mxu1 }
0x19df   : > { %v8821_v1 = vpop.f32.mrb[67].mxu1 }
0x19e2   : > { %8890 = vxpose.xlu1.b32.cont [10/16] (narrow) %v8789_v21, 16  ;;  %8914 = vxpose.xlu0.b32.cont [2/16] (narrow) %v8821_v1, 16 }
0x19e4   : > { %v11468_v42 = vpop.f32.mrb[68].mxu1 }
0x19e5   : > { %v8834_v35 = vpop.f32.mrb[69].mxu1 }
0x19e6   : > { %8891 = vxpose.xlu1.b32.cont [11/16] (narrow) %v11456_v16, 16  ;;  %8915 = vxpose.xlu0.b32.cont [3/16] (narrow) %v11464_v50, 16  ;;  %v11469_v20 = vpop.f32.mrb[70].mxu1  ;;  %v15363_v50 = vld [vmem:[#allocation23_spill] sm:$0xff] }
0x19e7   : > { %v8837_v18 = vpop.f32.mrb[71].mxu1 }
0x19ea   : > { %8892 = vxpose.xlu1.b32.cont [12/16] (narrow) %v11457_v57, 16  ;;  %8916 = vxpose.xlu0.b32.cont [4/16] (narrow) %v11465_v49, 16  ;;  %v15364_v49 = vld [vmem:[#allocation28_spill] sm:$0xff] }
0x19ec   : > { %v11472_v26 = vpop.f32.mrb[72].mxu1 }
0x19ed   : > { %v8850_v24 = vpop.f32.mrb[73].mxu1 }
0x19ee   : > { %8893 = vxpose.xlu1.b32.cont [13/16] (narrow) %v8802_v61, 16  ;;  %8917 = vxpose.xlu0.b32.cont [5/16] (narrow) %v8834_v35, 16  ;;  %v11473_v36 = vpop.f32.mrb[74].mxu1  ;;  %v15361_v61 = vld [vmem:[#allocation17_spill] sm:$0xff] }
0x19ef   : > { %v8853_v37 = vpop.f32.mrb[75].mxu1 }
0x19f2   : > { %8894 = vxpose.xlu1.b32.cont [14/16] (narrow) %v8805_v7, 16  ;;  %8918 = vxpose.xlu0.b32.cont [6/16] (narrow) %v8837_v18, 16 }
0x19f4   : > { %v11476_v63 = vpop.f32.mrb[76].mxu1 }
0x19f5   : > { %v8866_v14 = vpop.f32.mrb[77].mxu1 }
0x19f6   : > { %8895 = vxpose.xlu1.b32.cont [15/16] (narrow) %v11460_v51, 16  ;;  %8919 = vxpose.xlu0.b32.cont [7/16] (narrow) %v11468_v42, 16  ;;  %v11477_v59 = vpop.f32.mrb[78].mxu1 }
0x19f7   : > { %v8869_v38 = vpop.f32.mrb[79].mxu1 }
0x19fa   : > { %8896 = vxpose.xlu1.b32.end [16/16] (narrow) %v11461_v8, 16  ;;  %8920 = vxpose.xlu0.b32.cont [8/16] (narrow) %v11469_v20, 16  ;;  %v4965_v8 = vsub.s32 0, %v15361_v61 }
0x19fe   : > { %8921 = vxpose.xlu0.b32.cont [9/16] (narrow) %v8850_v24, 16 }
0x1a02   : > { %8922 = vxpose.xlu0.b32.cont [10/16] (narrow) %v8853_v37, 16 }
0x1a06   : > { %8923 = vxpose.xlu0.b32.cont [11/16] (narrow) %v11472_v26, 16 }
0x1a0a   : > { %8924 = vxpose.xlu0.b32.cont [12/16] (narrow) %v11473_v36, 16 }
0x1a0e   : > { %8925 = vxpose.xlu0.b32.cont [13/16] (narrow) %v8866_v14, 16 }
0x1a12   : > { %8926 = vxpose.xlu0.b32.cont [14/16] (narrow) %v8869_v38, 16 }
0x1a16   : > { %8927 = vxpose.xlu0.b32.cont [15/16] (narrow) %v11476_v63, 16 }
0x1a19   : > { %v10736_v22 = vpop.f32.mrb[80].mxu1 }
0x1a1a   : > { %8928 = vxpose.xlu0.b32.end [16/16] (narrow) %v11477_v59, 16  ;;  %v10737_v40 = vpop.f32.mrb[81].mxu1 }
0x1a1b   : > { %v10738_v25 = vadd.f32 %v10737_v40, %v10736_v22  ;;  %v10739_v11 = vpop.f32.mrb[82].mxu1 }
0x1a1c   : > { %v10740_v58 = vpop.f32.mrb[83].mxu1 }
0x1a1d   : > { %v9359_v19 = vadd.f32 %v10738_v25, %v15054_v3  ;;  %v10741_v15 = vadd.f32 %v10740_v58, %v10739_v11  ;;  %v15360_v3 = vld [vmem:[#allocation14_spill] sm:$0xff] }
0x1a1f   : > { %v9362_v29 = vadd.f32 %v10741_v15, %v15056_v28  ;;  %v11508_v30 = vadd.f32 %v9359_v19, %v15357_v0 }
0x1a21   : > { %v10742_v6 = vpop.f32.mrb[84].mxu1  ;;  %v11512_v12 = vadd.f32 %v9362_v29, %v15358_v27 }
0x1a22   : > { %v10743_v4 = vpop.f32.mrb[85].mxu1 }
0x1a23   : > { %v10744_v47 = vadd.f32 %v10743_v4, %v10742_v6  ;;  %v10745_v55 = vpop.f32.mrb[86].mxu1 }
0x1a24   : > { %v10746_v39 = vpop.f32.mrb[87].mxu1 }
0x1a25   : > { %v9367_v53 = vadd.f32 %v10744_v47, %v15058_v2  ;;  %v10747_v52 = vadd.f32 %v10746_v39, %v10745_v55  ;;  %v15366_v39 = vld [vmem:[#allocation11_spill] sm:$0xff] }
0x1a27   : > { %v9370_v43 = vadd.f32 %v10747_v52, %v15060_v60  ;;  %v11506_v23 = vadd.f32 %v9367_v53, %v15359_v44  ;;  %v15367_v44 = vld [vmem:[#allocation13_spill] sm:$0xff] }
0x1a29   : > { %v11510_v46 = vadd.f32 %v9370_v43, %v15360_v3 }
0x1a3e   : > { %v8897_v33 = vpop.trf.xlu1 }
0x1a3f   : > { %v8945_v28 = vmul.f32 2.0, %v8897_v33  ;;  %v15368_v33 = vld [vmem:[#allocation10_spill] sm:$0xff] }
0x1a41   : > { %v8949_v5 = vsub.f32 %v8945_v28, %v15353_v48  ;;  %v12653_v48 = vld [vmem:[%s15263_s6] sm:$0x7] }
0x1a42   : > { %v8898_v10 = vpop.trf.xlu1  ;;  %v4966_v7 = vrot.slane %v12653_v48, %v4965_v8  ;;  %v15374_v8 = vld [vmem:[#allocation22_spill] sm:$0xff] }
0x1a43   : > { %v8946_v31 = vmul.f32 2.0, %v8898_v10 }
0x1a44   : > { %v11498_v41 = vadd.f32 %v15363_v50, %v4966_v7  ;;  %v11504_v1 = vadd.f32 %v15364_v49, %v4966_v7  ;;  %v11500_v42 = vadd.f32 %v15365_v9, %v4966_v7  ;;  %v15375_v9 = vld [vmem:[#allocation21_spill] sm:$0xff] }
0x1a45   : > { %v8950_v16 = vsub.f32 %v8946_v31, %v15354_v34  ;;  %v15362_v34 = vld [vmem:[#allocation25_spill] sm:$0xff] }
0x1a46   : > { %v11502_v56 = vadd.f32 %v15362_v34, %v4966_v7  ;;  %v10107_v32 = vmul.f32 -1.442695, %v11498_v41  ;;  %v10109_v35 = vmul.f32 -1.442695, %v11500_v42 }
0x1a47   : > { %v8953_v17 = vpack.c.bf16 %v8950_v16, %v8949_v5  ;;  %v15369_v5 = vld [vmem:[#allocation12_spill] sm:$0xff] }
0x1a49   : > { %11494 = vmatprep.mubr.bf16.mxu0 %v8953_v17 }
0x1a5e   : > { %v8929_v57 = vpop.trf.xlu0 }
0x1a5f   : > { %v8947_v21 = vmul.f32 2.0, %v8929_v57 }
0x1a61   : > { %v8951_v60 = vsub.f32 %v8947_v21, %v15356_v54  ;;  %v10111_v54 = vmul.f32 -1.442695, %v11502_v56 }
0x1a62   : > { %v8930_v2 = vpop.trf.xlu0 }
0x1a63   : > { %v8948_v62 = vmul.f32 2.0, %v8930_v2  ;;  %12627 = vpow2.f32 %v10111_v54 }
0x1a64   : > { %12629 = vpow2.f32 %v10107_v32 }
0x1a65   : > { %v8952_v13 = vsub.f32 %v8948_v62, %v15355_v45  ;;  %v10113_v45 = vmul.f32 -1.442695, %v11504_v1  ;;  %v15378_v62 = vld [vmem:[#allocation19_spill] sm:$0xff] (%p61_p0) }
0x1a66   :  { %9465 = vst [vmem:[#allocation3] sm:$0xff] (%p61_p0), %v15378_v62 }
0x1a67   : > { %v8954_v51 = vpack.c.bf16 %v8952_v13, %v8951_v60  ;;  %12631 = vpow2.f32 %v10113_v45  ;;  %v15379_v60 = vld [vmem:[#allocation20_spill] sm:$0xff] (%p61_p0)  ;;  %v15380_v13 = vld [vmem:[#allocation21_spill] sm:$0xff] (%p61_p0) }
0x1a68   : > { %12633 = vpow2.f32 %v10109_v35  ;;  %9466 = vst [vmem:[#allocation3 + $0x8] sm:$0xff] (%p61_p0), %v15379_v60  ;;  %9467 = vst [vmem:[#allocation3 + $0x10] sm:$0xff] (%p61_p0), %v15380_v13 }
0x1a69   : > { %11495 = vmatmul.mubr.bf16.vlgmr.msra.gmra.mrb[196].mxu0 %v8954_v51  ;;  %v15381_v51 = vld [vmem:[#allocation22_spill] sm:$0xff] (%p61_p0) }
0x1a6a   :  { %9468 = vst [vmem:[#allocation3 + $0x18] sm:$0xff] (%p61_p0), %v15381_v51 }
0x1a6d   : > { %v12628_v20 = vpop.eup %12627 }
0x1a6e   : > { %v12630_v18 = vpop.eup %12629  ;;  %v7765_v36 = vadd.f32 1.0, %v12628_v20 }
0x1a6f   : > { %v7761_v37 = vadd.f32 1.0, %v12630_v18 }
0x1a70   : > { %12635 = vrcp.f32 %v7765_v36 }
0x1a71   : > { %v12632_v26 = vpop.eup %12631  ;;  %12637 = vrcp.f32 %v7761_v37 }
0x1a72   : > { %v12634_v24 = vpop.eup %12633  ;;  %v7767_v63 = vadd.f32 1.0, %v12632_v26 }
0x1a73   : > { %v7763_v14 = vadd.f32 1.0, %v12634_v24 }
0x1a74   : > { %12639 = vrcp.f32 %v7767_v63 }
0x1a75   : > { %12641 = vrcp.f32 %v7763_v14 }
0x1a7a   : > { %v12636_v15 = vpop.eup %12635 }
0x1a7b   : > { %v12638_v29 = vpop.eup %12637  ;;  %v9436_v27 = vsub.f32 1.0, %v12636_v15  ;;  %v9432_v53 = vmul.f32 %v15366_v39, %v12636_v15 }
0x1a7c   : > { %v9434_v47 = vsub.f32 1.0, %v12638_v29 }
0x1a7e   : > { %v12640_v0 = vpop.eup %12639 }
0x1a7f   : > { %v12642_v6 = vpop.eup %12641  ;;  %v9433_v28 = vmul.f32 %v15368_v33, %v12640_v0 }
0x1a80   : > { %v9431_v16 = vmul.f32 %v15369_v5, %v12642_v6 }
0x1b3c   : > { %v11496_v59 = vpop.f32.mrb[196].mxu0 }
0x1b3d   : > { %v11507_v38 = vadd.f32 %v11506_v23, %v11496_v59  ;;  %v9407_v22 = vpop.f32.mrb[197].mxu0  ;;  %v9430_v23 = vmul.f32 %v15367_v44, %v12638_v29 }
0x1b3e   : > { %v11509_v40 = vadd.f32 %v11508_v30, %v9407_v22  ;;  %v11497_v25 = vpop.f32.mrb[198].mxu0  ;;  %v9437_v30 = vsub.f32 1.0, %v12640_v0 }
0x1b3f   : > { %12643 = vtanh.f32 %v11507_v38  ;;  %v11511_v11 = vadd.f32 %v11510_v46, %v11497_v25  ;;  %v9410_v58 = vpop.f32.mrb[199].mxu0  ;;  %v9435_v46 = vsub.f32 1.0, %v12642_v6 }
0x1b40   : > { %12645 = vtanh.f32 %v11509_v40  ;;  %v11513_v19 = vadd.f32 %v11512_v12, %v9410_v58 }
0x1b41   : > { %12647 = vtanh.f32 %v11511_v11  ;;  %v15377_v11 = vld [vmem:[#allocation19_spill] sm:$0xff] }
0x1b42   : > { %12649 = vtanh.f32 %v11513_v19 }
0x1b49   : > { %v12644_v4 = vpop.eup %12643 }
0x1b4a   : > { %v12646_v55 = vpop.eup %12645  ;;  %v9440_v52 = vmul.f32 %v12644_v4, %v9436_v27 }
0x1b4b   : > { %v12648_v43 = vpop.eup %12647  ;;  %v9438_v3 = vmul.f32 %v12646_v55, %v9434_v47  ;;  %63 = sbr.rel (!%p61_p0) target bundleno = 4 (0x4), region = 73 }
0x1b4c   : > { %v12650_v12 = vpop.eup %12649  ;;  %v9444_v31 = vadd.f32 %v9440_v52, %v9432_v53   ;;  %v9441_v10 = vmul.f32 %v12648_v43, %v9437_v30 }
0x1b4d   : > { %v9442_v17 = vadd.f32 %v9438_v3, %v9430_v23   ;;  %v9439_v57 = vmul.f32 %v12650_v12, %v9435_v46 }
0x1b4e   : > { %v9445_v21 = vadd.f32 %v9441_v10, %v9433_v28   ;;  %v15371_v5 = vmov %v9444_v31  ;;  %v15376_v10 = vld [vmem:[#allocation20_spill] sm:$0xff]  ;;  %9471 = vst [vmem:[#allocation3 + $0x30] sm:$0xff] (%p61_p0), %v9444_v31 }
0x1b4f   : > { %v9443_v2 = vadd.f32 %v9439_v57, %v9431_v16   ;;  %v15373_v7 = vmov %v9442_v17  ;;  %9469 = vst [vmem:[#allocation3 + $0x20] sm:$0xff] (%p61_p0), %v9442_v17 }
0x1b50   : > { %v15370_v4 = vmov %v9445_v21  ;;  %9472 = vst [vmem:[#allocation3 + $0x38] sm:$0xff] (%p61_p0), %v9445_v21 }
0x1b51   : > { %v15372_v6 = vmov %v9443_v2  ;;  %9470 = vst [vmem:[#allocation3 + $0x28] sm:$0xff] (%p61_p0), %v9443_v2 }
0x1b52   :  { %12665 = shalt.err (!%p12662_p5)
}
0x1b53   :  { %s12666_s4 = scalar_lea.hbm %s15266_s9, 1024 }
0x1b54   :  { %p12667_p6 = scmp.ne.s32.totalorder %s15266_s9, %s12666_s4  ;;  %p12670_p7 = scmp.lt.u32.totalorder %s12666_s4, %s15266_s9 }
0x1b56   :  { %p12672_p8 = pnand %p12670_p7, %p12667_p6 }
0x1b58   :  { %12675 = shalt.err (!%p12672_p8)
}
0x1b59   :  { %s12752_s1 = smov 128   ;;  %s12753_s26 = smov 8  }
0x1b5a   :  { %9484 = dma.vmem_to_hbm [thread:$0]  %s9479_s23, 1024, %s15266_s9, [#allocation4], %s12752_s1, %s12752_s1, %s12753_s26  }
0x1b5b   :  { %12712 = dma.done.wait [#allocation4], 1024  }
0x1b5c   :  { %12713 = vsyncadd [#allocation4], 4294966272 }
0x1b5d   :  { %9488 = vsyncpa [#allocation4], 1 }

</bundles_post_ra>
